<compile_context>
chip_gen: v7x
topology: tpu7x:2x2x1
jax: 0.10.0
libtpu: 0.0.40
codegen_flags: <defaults>
</compile_context>

<pallas_src>
import math

import jax
import jax.numpy as jnp
from jax.experimental import pallas as pl
from jax.experimental.pallas import tpu as pltpu

DILS = (1, 3, 6, 9)
MH = 9            # H margin (leading dim, no alignment constraint): == max dilation
MW = 16           # W margin (sublane dim): >= max dilation, multiple of 16 so the
                  # bf16 interior store of pad_ref stays sublane-aligned
BN_EPS = 1e-8


def _make_kernel(H, W, C_in, HID, OUP, R):
    NC = H // R                       # number of row chunks
    Hp = H + 2 * MH
    RW = R * W

    def _aligned(v):                  # pl.ds start hint (only if actually true)
        return pl.multiple_of(v, 8) if RW % 8 == 0 else v

    def kernel(x_ref, w1_ref, b1_ref, w2_ref, b2_ref, w3_ref, b3_ref,
               out_ref, pad_ref, slab_ref, zcat_ref):
        c = pl.program_id(1)          # row-chunk index within this batch element

        # ------------------------------------------------------------------
        # Chunk step 0 of every batch element: zero only the 9-wide read
        # bands of pad_ref and fill its interior with the conv1 activation
        # (bf16), one row chunk at a time (bounds transients).
        # Gated on program_id(1), NOT program_id(0): safe under a
        # megacore-sharded "parallel" batch axis (per-core scratch).
        # ------------------------------------------------------------------
        @pl.when(c == 0)
        def _fill_pad():
            zero_b = jnp.zeros((MH, W + 2 * MH, HID), jnp.bfloat16)
            zero_s = jnp.zeros((H, MH, HID), jnp.bfloat16)
            # top / bottom 9-row bands over the read width [MW-9, MW+W+9)
            pad_ref[0:MH, MW - MH:MW + W + MH, :] = zero_b
            pad_ref[MH + H:Hp, MW - MH:MW + W + MH, :] = zero_b
            # left / right 9-column bands over the interior rows
            pad_ref[MH:MH + H, MW - MH:MW, :] = zero_s
            pad_ref[MH:MH + H, MW + W:MW + W + MH, :] = zero_s

            def fill_chunk(fc, carry):
                start = _aligned(fc * RW)
                xs = x_ref[0, pl.ds(start, RW), :]                # (RW, C_in) f32
                x0 = jnp.dot(xs.astype(jnp.bfloat16), w1_ref[...],
                             preferred_element_type=jnp.float32)  # (RW, HID) f32
                x0 = jnp.clip(x0 + b1_ref[...], 0.0, 6.0)
                pad_ref[pl.ds(MH + fc * R, R), MW:MW + W, :] = (
                    x0.astype(jnp.bfloat16).reshape(R, W, HID))
                return carry

            jax.lax.fori_loop(0, NC, fill_chunk, 0, unroll=NC <= 4)

        # ------------------------------------------------------------------
        # Process row chunk c: each dilated 3x3 branch is one fused
        # (RW, 9*HID) x (9*HID, HID) bf16 MXU matmul (taps written in place
        # into slab_ref -- no concatenate); branch outputs are written in
        # place into zcat_ref; then concat + 1x1 conv_out + folded BN_out is
        # one (RW, 4*HID) x (4*HID, OUP) matmul; bias + residual in f32.
        # ------------------------------------------------------------------
        r0 = c * R
        for di, d in enumerate(DILS):
            for kh in range(3):
                oh = (kh - 1) * d
                row = r0 + MH + oh            # dynamic leading-dim start (cheap)
                for kw in range(3):
                    ow = (kw - 1) * d
                    t = kh * 3 + kw
                    win = pad_ref[pl.ds(row, R), MW + ow:MW + ow + W, :]
                    slab_ref[:, :, t * HID:(t + 1) * HID] = win       # bf16
            stacked = slab_ref[...].reshape(RW, 9 * HID)              # bf16
            z = jnp.dot(stacked, w2_ref[di],
                        preferred_element_type=jnp.float32)          # (RW, HID)
            z = jnp.clip(z + b2_ref[di], 0.0, 6.0)
            zcat_ref[:, di * HID:(di + 1) * HID] = z.astype(jnp.bfloat16)

        y = jnp.dot(zcat_ref[...], w3_ref[...],
                    preferred_element_type=jnp.float32)               # (RW, OUP)
        xres = x_ref[0, pl.ds(_aligned(r0 * W), RW), :]               # (RW, C_in)
        out_ref[0] = (y + b3_ref[...] + xres).astype(out_ref.dtype)

    return kernel


def _pick_chunk_rows(H, W, chunk_positions):
    """Largest divisor R of H with R*W <= chunk_positions and (R*W) % 8 == 0."""
    for r in range(H, 0, -1):
        if H % r == 0 and r * W <= chunk_positions and (r * W) % 8 == 0:
            return r
    return H        # fallback: whole image (block dim == full array dim)


def multidilation_forward(x, w1t, b1, w2t, b2, w3t, b3, *, chunk_positions=512):
    N, C_in, H, W = x.shape
    HID = w1t.shape[1]
    OUP = w3t.shape[1]
    assert OUP == C_in, "down=False path requires oup == inp"
    HW = H * W
    R = _pick_chunk_rows(H, W, chunk_positions)
    NC = H // R
    RW = R * W

    # layout plumbing outside the kernel: NCHW -> (N, H*W, C) channels-last
    x_cl = jnp.transpose(x, (0, 2, 3, 1)).reshape(N, HW, C_in)
    # MXU operands in bf16 (halves weight DMA); biases stay f32
    w1b = w1t.astype(jnp.bfloat16)
    w2b = w2t.astype(jnp.bfloat16)
    w3b = w3t.astype(jnp.bfloat16)

    flops = 2 * N * HW * (C_in * HID + 36 * HID * HID + 4 * HID * OUP)
    bytes_accessed = (4 * N * HW * (C_in + OUP)
                      + 2 * (C_in * HID + 36 * HID * HID + 4 * HID * OUP)
                      + 4 * (HID + 4 * HID + OUP))

    # rough per-step VMEM budget: double-buffered x / out blocks + bf16
    # weights + pad/slab/zcat scratch + matmul transient slack
    vmem_est = (2 * HW * C_in * 4 + 2 * RW * OUP * 4
                + 4 * (C_in * HID + 36 * HID * HID + 4 * HID * OUP)
                + (H + 2 * MH) * (W + 2 * MW) * HID * 2
                + RW * (9 + 4) * HID * 2
                + 6 * RW * 9 * HID * 2)
    vmem_limit = int(min(max(2 * vmem_est, 16 * 2**20), 48 * 2**20))

    out_cl = pl.pallas_call(
        _make_kernel(H, W, C_in, HID, OUP, R),
        out_shape=jax.ShapeDtypeStruct((N, HW, OUP), jnp.float32),
        grid_spec=pltpu.PrefetchScalarGridSpec(
            num_scalar_prefetch=0,
            grid=(N, NC),
            in_specs=[
                pl.BlockSpec((1, HW, C_in), lambda n, c: (n, 0, 0)),
                pl.BlockSpec((C_in, HID), lambda n, c: (0, 0)),
                pl.BlockSpec((1, HID), lambda n, c: (0, 0)),
                pl.BlockSpec((4, 9 * HID, HID), lambda n, c: (0, 0, 0)),
                pl.BlockSpec((4, 1, HID), lambda n, c: (0, 0, 0)),
                pl.BlockSpec((4 * HID, OUP), lambda n, c: (0, 0)),
                pl.BlockSpec((1, OUP), lambda n, c: (0, 0)),
            ],
            out_specs=pl.BlockSpec((1, RW, OUP), lambda n, c: (n, c, 0)),
            scratch_shapes=[
                pltpu.VMEM((H + 2 * MH, W + 2 * MW, HID), jnp.bfloat16),  # pad
                pltpu.VMEM((R, W, 9 * HID), jnp.bfloat16),                # slab
                pltpu.VMEM((RW, 4 * HID), jnp.bfloat16),                  # zcat
            ],
        ),
        compiler_params=pltpu.CompilerParams(
            dimension_semantics=("parallel", "arbitrary"),
            vmem_limit_bytes=vmem_limit),
        cost_estimate=pl.CostEstimate(flops=flops, transcendentals=0,
                                      bytes_accessed=bytes_accessed),
    )(x_cl, w1b, b1, w2b, b2, w3b, b3)

    return jnp.transpose(out_cl.reshape(N, H, W, OUP), (0, 3, 1, 2))


# ---------------- parameter init (matches module __init__ shapes) -----------

def init_params(key, inp, oup, shrink_rate=2):
    hid = inp // shrink_rate
    ks = jax.random.split(key, 9)

    def kaiming(k, shape):               # kaiming_normal_, mode='fan_in'
        fan_in = shape[1] * shape[2] * shape[3]
        std = math.sqrt(2.0 / fan_in)
        return (std * jax.random.normal(k, shape)).astype(jnp.float32)

    def bn_gamma(k, c):                  # N(1.0, 0.02)
        return (1.0 + 0.02 * jax.random.normal(k, (c,))).astype(jnp.float32)

    p = {}
    p["w1"] = kaiming(ks[0], (hid, inp, 1, 1))
    p["b1"] = jnp.zeros((hid,), jnp.float32)
    p["g1"] = bn_gamma(ks[1], hid)
    p["beta1"] = jnp.zeros((hid,), jnp.float32)
    p["w2"] = jnp.stack([kaiming(ks[2 + i], (hid, hid, 3, 3)) for i in range(4)])
    p["b2"] = jnp.zeros((4, hid), jnp.float32)
    p["g_cat"] = bn_gamma(ks[6], 4 * hid)
    p["beta_cat"] = jnp.zeros((4 * hid,), jnp.float32)
    p["w3"] = kaiming(ks[7], (oup, 4 * hid, 1, 1))       # conv_out, bias=False
    p["g_out"] = bn_gamma(ks[8], oup)
    p["beta_out"] = jnp.zeros((oup,), jnp.float32)
    return p


def fold_params(p, inp, oup, hid):
    """Fold eval-mode BN (mean=0, var=1) into conv weights/biases.

    Weight layouts produced for the channels-last kernel:
      w1t : (inp, hid)          b1 : (1, hid)
      w2t : (4, 9*hid, hid)     b2 : (4, 1, hid)   (rows tap-major: t = kh*3+kw)
      w3t : (4*hid, oup)        b3 : (1, oup)
    """
    inv = 1.0 / jnp.sqrt(1.0 + BN_EPS)

    s1 = p["g1"] * inv
    w1t = (s1[:, None] * p["w1"].reshape(hid, inp)).T                # (inp, hid)
    b1 = (s1 * p["b1"] + p["beta1"]).reshape(1, hid)

    s_cat = p["g_cat"] * inv
    w2_list, b2_list = [], []
    for di in range(4):
        sd = s_cat[di * hid:(di + 1) * hid]
        w2d = sd[:, None, None, None] * p["w2"][di]                  # (out,in,3,3)
        # (out, in, kh, kw) -> (kh, kw, in, out) -> (9*in, out), tap-major rows
        w2_list.append(jnp.transpose(w2d, (2, 3, 1, 0)).reshape(9 * hid, hid))
        b2_list.append(sd * p["b2"][di] + p["beta_cat"][di * hid:(di + 1) * hid])
    w2t = jnp.stack(w2_list)                                         # (4,9h,h)
    b2 = jnp.stack(b2_list).reshape(4, 1, hid)

    s_out = p["g_out"] * inv
    w3t = (s_out[:, None] * p["w3"].reshape(oup, 4 * hid)).T         # (4*hid,oup)
    b3 = p["beta_out"].reshape(1, oup)
    return w1t, b1, w2t, b2, w3t, b3


# ---------------- pure-JAX reference (unfolded params) ----------------------

def reference_forward(x, p):
    def conv(t, w, b=None, d=1, pad=0):
        y = jax.lax.conv_general_dilated(
            t, w, window_strides=(1, 1),
            padding=((pad, pad), (pad, pad)),
            rhs_dilation=(d, d),
            dimension_numbers=("NCHW", "OIHW", "NCHW"),
            precision=jax.lax.Precision.HIGHEST)
        if b is not None:
            y = y + b[None, :, None, None]
        return y

    def bn(t, g, beta):                  # eval mode: mean=0, var=1
        return (g[None, :, None, None] * t / jnp.sqrt(1.0 + BN_EPS)
                + beta[None, :, None, None])

    relu6 = lambda t: jnp.clip(t, 0.0, 6.0)

    x0 = relu6(bn(conv(x, p["w1"], p["b1"]), p["g1"], p["beta1"]))
    branches = [conv(x0, p["w2"][i], p["b2"][i], d=DILS[i], pad=DILS[i])
                for i in range(4)]
    cat = jnp.concatenate(branches, axis=1)
    y = relu6(bn(cat, p["g_cat"], p["beta_cat"]))
    y = conv(y, p["w3"])
    y = bn(y, p["g_out"], p["beta_out"])
    return y + x


if __name__ == "__main__":
    N, INP, OUP, H, W = 2, 8, 8, 16, 16     # down=False requires oup == inp
    SHRINK = 2
    HID = INP // SHRINK

    key = jax.random.PRNGKey(0)
    k_params, k_x = jax.random.split(key)
    params = init_params(k_params, INP, OUP, SHRINK)
    x = jax.random.normal(k_x, (N, INP, H, W), jnp.float32)

    folded = fold_params(params, INP, OUP, HID)
    # chunk_positions=128 -> two 8-row chunks at H=W=16, so the multi-chunk
    # path (grid=(N, 2), per-batch pad fill at chunk 0) is exercised even at
    # this small test size.
    out = multidilation_forward(x, *folded, chunk_positions=128)
    out = jax.block_until_ready(out)

    ref = reference_forward(x, params)
    err = float(jnp.max(jnp.abs(out - ref)))
    scale = float(jnp.max(jnp.abs(ref))) + 1.0
    assert out.shape == (N, OUP, H, W)
    # bf16 MXU operands with f32 accumulation -> looser tolerance than pure f32
    assert err < 3e-2 * scale, f"mismatch: max abs err {err}"
    print("KERNEL_OK")
</pallas_src>

<mosaic_0001>
module attributes {stable_mosaic.version = 11 : i64} {
  func.func @kernel(%arg0: i32, %arg1: i32, %arg2: memref<1x256x8xf32, #tpu.memory_space<vmem>>, %arg3: memref<8x4xbf16, #tpu.memory_space<vmem>>, %arg4: memref<1x4xf32, #tpu.memory_space<vmem>>, %arg5: memref<4x36x4xbf16, #tpu.memory_space<vmem>>, %arg6: memref<4x1x4xf32, #tpu.memory_space<vmem>>, %arg7: memref<16x8xbf16, #tpu.memory_space<vmem>>, %arg8: memref<1x8xf32, #tpu.memory_space<vmem>>, %arg9: memref<1x128x8xf32, #tpu.memory_space<vmem>>, %arg10: memref<34x48x4xbf16, #tpu.memory_space<vmem>>, %arg11: memref<8x16x36xbf16, #tpu.memory_space<vmem>>, %arg12: memref<128x16xbf16, #tpu.memory_space<vmem>>) attributes {dimension_semantics = [#tpu.dimension_semantics<parallel>, #tpu.dimension_semantics<arbitrary>], iteration_bounds = array<i64: 2, 2>, scalar_prefetch = 0 : i64, scratch_operands = 3 : i64, tpu.core_type = #tpu.core_type<tc>, window_params = [{transform_indices = @transform_0, window_bounds = array<i64: 1, 256, 8>}, {pipeline_mode = #tpu.pipeline_mode<synchronous>, transform_indices = @transform_1, window_bounds = array<i64: 8, 4>}, {pipeline_mode = #tpu.pipeline_mode<synchronous>, transform_indices = @transform_2, window_bounds = array<i64: 1, 4>}, {pipeline_mode = #tpu.pipeline_mode<synchronous>, transform_indices = @transform_3, window_bounds = array<i64: 4, 36, 4>}, {pipeline_mode = #tpu.pipeline_mode<synchronous>, transform_indices = @transform_4, window_bounds = array<i64: 4, 1, 4>}, {pipeline_mode = #tpu.pipeline_mode<synchronous>, transform_indices = @transform_5, window_bounds = array<i64: 16, 8>}, {pipeline_mode = #tpu.pipeline_mode<synchronous>, transform_indices = @transform_6, window_bounds = array<i64: 1, 8>}, {transform_indices = @transform_7, window_bounds = array<i64: 1, 128, 8>}]} {
    %c0_i32 = arith.constant 0 : i32
    %0 = arith.cmpi eq, %arg1, %c0_i32 : i32
    %1 = arith.extui %0 : i1 to i32
    %c0_i32_0 = arith.constant 0 : i32
    %2 = arith.cmpi ne, %1, %c0_i32_0 : i32
    scf.if %2 {
      %cst_244 = arith.constant 0.000000e+00 : bf16
      %211 = vector.broadcast %cst_244 : bf16 to vector<9x34x4xbf16>
      %cst_245 = arith.constant 0.000000e+00 : bf16
      %212 = vector.broadcast %cst_245 : bf16 to vector<16x9x4xbf16>
      %c0_246 = arith.constant 0 : index
      %c7_247 = arith.constant 7 : index
      %c0_248 = arith.constant 0 : index
      %213 = vector.load %arg10[%c0_246, %c7_247, %c0_248] : memref<34x48x4xbf16, #tpu.memory_space<vmem>>, vector<9x34x4xbf16>
      tpu.vector_store %arg10[%c0_246, %c7_247, %c0_248], %211 {strides = array<i32>} : memref<34x48x4xbf16, #tpu.memory_space<vmem>>, vector<9x34x4xbf16>,
      %c25_249 = arith.constant 25 : index
      %c7_250 = arith.constant 7 : index
      %c0_251 = arith.constant 0 : index
      %214 = vector.load %arg10[%c25_249, %c7_250, %c0_251] : memref<34x48x4xbf16, #tpu.memory_space<vmem>>, vector<9x34x4xbf16>
      tpu.vector_store %arg10[%c25_249, %c7_250, %c0_251], %211 {strides = array<i32>} : memref<34x48x4xbf16, #tpu.memory_space<vmem>>, vector<9x34x4xbf16>,
      %c9 = arith.constant 9 : index
      %c7_252 = arith.constant 7 : index
      %c0_253 = arith.constant 0 : index
      %215 = vector.load %arg10[%c9, %c7_252, %c0_253] : memref<34x48x4xbf16, #tpu.memory_space<vmem>>, vector<16x9x4xbf16>
      tpu.vector_store %arg10[%c9, %c7_252, %c0_253], %212 {strides = array<i32>} : memref<34x48x4xbf16, #tpu.memory_space<vmem>>, vector<16x9x4xbf16>,
      %c9_254 = arith.constant 9 : index
      %c32_255 = arith.constant 32 : index
      %c0_256 = arith.constant 0 : index
      %216 = vector.load %arg10[%c9_254, %c32_255, %c0_256] : memref<34x48x4xbf16, #tpu.memory_space<vmem>>, vector<16x9x4xbf16>
      tpu.vector_store %arg10[%c9_254, %c32_255, %c0_256], %212 {strides = array<i32>} : memref<34x48x4xbf16, #tpu.memory_space<vmem>>, vector<16x9x4xbf16>,
      %c0_i32_257 = arith.constant 0 : i32
      %c128_i32 = arith.constant 128 : i32
      %217 = arith.muli %c0_i32_257, %c128_i32 : i32
      %218 = tpu.assume_multiple %217, 8 : i32
      %c0_258 = arith.constant 0 : index
      %219 = arith.index_cast %218 : i32 to index
      %c0_259 = arith.constant 0 : index
      %220 = vector.load %arg2[%c0_258, %219, %c0_259] : memref<1x256x8xf32, #tpu.memory_space<vmem>>, vector<1x128x8xf32>
      %221 = vector.shape_cast %220 : vector<1x128x8xf32> to vector<128x8xf32>
      %222 = arith.truncf %221 : vector<128x8xf32> to vector<128x8xbf16>
      %c0_260 = arith.constant 0 : index
      %c0_261 = arith.constant 0 : index
      %223 = vector.load %arg3[%c0_260, %c0_261] : memref<8x4xbf16, #tpu.memory_space<vmem>>, vector<8x4xbf16>
      %cst_262 = arith.constant dense<0.000000e+00> : vector<128x4xf32>
      %224 = tpu.matmul %222, %223, %cst_262 {dimension_numbers = #tpu.dot_dimension_numbers<[1], [0], [0], [1], [0, 0, 1, 1], [], []>} : vector<128x8xbf16>, vector<8x4xbf16>, vector<128x4xf32> -> vector<128x4xf32>
      %c0_263 = arith.constant 0 : index
      %c0_264 = arith.constant 0 : index
      %225 = vector.load %arg4[%c0_263, %c0_264] : memref<1x4xf32, #tpu.memory_space<vmem>>, vector<1x4xf32>
      %226 = vector.broadcast %225 : vector<1x4xf32> to vector<128x4xf32>
      %227 = arith.addf %224, %226 : vector<128x4xf32>
      %cst_265 = arith.constant 0.000000e+00 : f32
      %cst_266 = arith.constant 6.000000e+00 : f32
      %228 = vector.broadcast %cst_265 : f32 to vector<128x4xf32>
      %229 = arith.maximumf %228, %227 : vector<128x4xf32>
      %230 = vector.broadcast %cst_266 : f32 to vector<128x4xf32>
      %231 = arith.minimumf %230, %229 : vector<128x4xf32>
      %232 = arith.truncf %231 : vector<128x4xf32> to vector<128x4xbf16>
      %233 = vector.shape_cast %232 : vector<128x4xbf16> to vector<8x16x4xbf16>
      %c8_i32_267 = arith.constant 8 : i32
      %234 = arith.muli %c0_i32_257, %c8_i32_267 : i32
      %c9_i32_268 = arith.constant 9 : i32
      %235 = arith.addi %c9_i32_268, %234 : i32
      %236 = arith.index_cast %235 : i32 to index
      %c16_269 = arith.constant 16 : index
      %c0_270 = arith.constant 0 : index
      %237 = vector.load %arg10[%236, %c16_269, %c0_270] : memref<34x48x4xbf16, #tpu.memory_space<vmem>>, vector<8x16x4xbf16>
      tpu.vector_store %arg10[%236, %c16_269, %c0_270], %233 {strides = array<i32>} : memref<34x48x4xbf16, #tpu.memory_space<vmem>>, vector<8x16x4xbf16>,
      %c1_i32_271 = arith.constant 1 : i32
      %c128_i32_272 = arith.constant 128 : i32
      %238 = arith.muli %c1_i32_271, %c128_i32_272 : i32
      %239 = tpu.assume_multiple %238, 8 : i32
      %c0_273 = arith.constant 0 : index
      %240 = arith.index_cast %239 : i32 to index
      %c0_274 = arith.constant 0 : index
      %241 = vector.load %arg2[%c0_273, %240, %c0_274] : memref<1x256x8xf32, #tpu.memory_space<vmem>>, vector<1x128x8xf32>
      %242 = vector.shape_cast %241 : vector<1x128x8xf32> to vector<128x8xf32>
      %243 = arith.truncf %242 : vector<128x8xf32> to vector<128x8xbf16>
      %c0_275 = arith.constant 0 : index
      %c0_276 = arith.constant 0 : index
      %244 = vector.load %arg3[%c0_275, %c0_276] : memref<8x4xbf16, #tpu.memory_space<vmem>>, vector<8x4xbf16>
      %cst_277 = arith.constant dense<0.000000e+00> : vector<128x4xf32>
      %245 = tpu.matmul %243, %244, %cst_277 {dimension_numbers = #tpu.dot_dimension_numbers<[1], [0], [0], [1], [0, 0, 1, 1], [], []>} : vector<128x8xbf16>, vector<8x4xbf16>, vector<128x4xf32> -> vector<128x4xf32>
      %c0_278 = arith.constant 0 : index
      %c0_279 = arith.constant 0 : index
      %246 = vector.load %arg4[%c0_278, %c0_279] : memref<1x4xf32, #tpu.memory_space<vmem>>, vector<1x4xf32>
      %247 = vector.broadcast %246 : vector<1x4xf32> to vector<128x4xf32>
      %248 = arith.addf %245, %247 : vector<128x4xf32>
      %cst_280 = arith.constant 0.000000e+00 : f32
      %cst_281 = arith.constant 6.000000e+00 : f32
      %249 = vector.broadcast %cst_280 : f32 to vector<128x4xf32>
      %250 = arith.maximumf %249, %248 : vector<128x4xf32>
      %251 = vector.broadcast %cst_281 : f32 to vector<128x4xf32>
      %252 = arith.minimumf %251, %250 : vector<128x4xf32>
      %253 = arith.truncf %252 : vector<128x4xf32> to vector<128x4xbf16>
      %254 = vector.shape_cast %253 : vector<128x4xbf16> to vector<8x16x4xbf16>
      %c8_i32_282 = arith.constant 8 : i32
      %255 = arith.muli %c1_i32_271, %c8_i32_282 : i32
      %c9_i32_283 = arith.constant 9 : i32
      %256 = arith.addi %c9_i32_283, %255 : i32
      %257 = arith.index_cast %256 : i32 to index
      %c16_284 = arith.constant 16 : index
      %c0_285 = arith.constant 0 : index
      %258 = vector.load %arg10[%257, %c16_284, %c0_285] : memref<34x48x4xbf16, #tpu.memory_space<vmem>>, vector<8x16x4xbf16>
      tpu.vector_store %arg10[%257, %c16_284, %c0_285], %254 {strides = array<i32>} : memref<34x48x4xbf16, #tpu.memory_space<vmem>>, vector<8x16x4xbf16>,
      %c2_i32 = arith.constant 2 : i32
    } else {
    }
    %c8_i32 = arith.constant 8 : i32
    %3 = arith.muli %arg1, %c8_i32 : i32
    %c9_i32 = arith.constant 9 : i32
    %4 = arith.addi %3, %c9_i32 : i32
    %c-1_i32 = arith.constant -1 : i32
    %5 = arith.addi %4, %c-1_i32 : i32
    %6 = arith.index_cast %5 : i32 to index
    %c15 = arith.constant 15 : index
    %c0 = arith.constant 0 : index
    %7 = vector.load %arg10[%6, %c15, %c0] : memref<34x48x4xbf16, #tpu.memory_space<vmem>>, vector<8x16x4xbf16>
    %c0_1 = arith.constant 0 : index
    %c0_2 = arith.constant 0 : index
    %c0_3 = arith.constant 0 : index
    %8 = vector.load %arg11[%c0_1, %c0_2, %c0_3] : memref<8x16x36xbf16, #tpu.memory_space<vmem>>, vector<8x16x4xbf16>
    tpu.vector_store %arg11[%c0_1, %c0_2, %c0_3], %7 {strides = array<i32>} : memref<8x16x36xbf16, #tpu.memory_space<vmem>>, vector<8x16x4xbf16>,
    %9 = arith.index_cast %5 : i32 to index
    %c16 = arith.constant 16 : index
    %c0_4 = arith.constant 0 : index
    %10 = vector.load %arg10[%9, %c16, %c0_4] : memref<34x48x4xbf16, #tpu.memory_space<vmem>>, vector<8x16x4xbf16>
    %c0_5 = arith.constant 0 : index
    %c0_6 = arith.constant 0 : index
    %c4 = arith.constant 4 : index
    %11 = vector.load %arg11[%c0_5, %c0_6, %c4] : memref<8x16x36xbf16, #tpu.memory_space<vmem>>, vector<8x16x4xbf16>
    tpu.vector_store %arg11[%c0_5, %c0_6, %c4], %10 {strides = array<i32>} : memref<8x16x36xbf16, #tpu.memory_space<vmem>>, vector<8x16x4xbf16>,
    %12 = arith.index_cast %5 : i32 to index
    %c17 = arith.constant 17 : index
    %c0_7 = arith.constant 0 : index
    %13 = vector.load %arg10[%12, %c17, %c0_7] : memref<34x48x4xbf16, #tpu.memory_space<vmem>>, vector<8x16x4xbf16>
    %c0_8 = arith.constant 0 : index
    %c0_9 = arith.constant 0 : index
    %c8 = arith.constant 8 : index
    %14 = vector.load %arg11[%c0_8, %c0_9, %c8] : memref<8x16x36xbf16, #tpu.memory_space<vmem>>, vector<8x16x4xbf16>
    tpu.vector_store %arg11[%c0_8, %c0_9, %c8], %13 {strides = array<i32>} : memref<8x16x36xbf16, #tpu.memory_space<vmem>>, vector<8x16x4xbf16>,
    %c9_i32_10 = arith.constant 9 : i32
    %15 = arith.addi %3, %c9_i32_10 : i32
    %c0_i32_11 = arith.constant 0 : i32
    %16 = arith.addi %15, %c0_i32_11 : i32
    %17 = arith.index_cast %16 : i32 to index
    %c15_12 = arith.constant 15 : index
    %c0_13 = arith.constant 0 : index
    %18 = vector.load %arg10[%17, %c15_12, %c0_13] : memref<34x48x4xbf16, #tpu.memory_space<vmem>>, vector<8x16x4xbf16>
    %c0_14 = arith.constant 0 : index
    %c0_15 = arith.constant 0 : index
    %c12 = arith.constant 12 : index
    %19 = vector.load %arg11[%c0_14, %c0_15, %c12] : memref<8x16x36xbf16, #tpu.memory_space<vmem>>, vector<8x16x4xbf16>
    tpu.vector_store %arg11[%c0_14, %c0_15, %c12], %18 {strides = array<i32>} : memref<8x16x36xbf16, #tpu.memory_space<vmem>>, vector<8x16x4xbf16>,
    %20 = arith.index_cast %16 : i32 to index
    %c16_16 = arith.constant 16 : index
    %c0_17 = arith.constant 0 : index
    %21 = vector.load %arg10[%20, %c16_16, %c0_17] : memref<34x48x4xbf16, #tpu.memory_space<vmem>>, vector<8x16x4xbf16>
    %c0_18 = arith.constant 0 : index
    %c0_19 = arith.constant 0 : index
    %c16_20 = arith.constant 16 : index
    %22 = vector.load %arg11[%c0_18, %c0_19, %c16_20] : memref<8x16x36xbf16, #tpu.memory_space<vmem>>, vector<8x16x4xbf16>
    tpu.vector_store %arg11[%c0_18, %c0_19, %c16_20], %21 {strides = array<i32>} : memref<8x16x36xbf16, #tpu.memory_space<vmem>>, vector<8x16x4xbf16>,
    %23 = arith.index_cast %16 : i32 to index
    %c17_21 = arith.constant 17 : index
    %c0_22 = arith.constant 0 : index
    %24 = vector.load %arg10[%23, %c17_21, %c0_22] : memref<34x48x4xbf16, #tpu.memory_space<vmem>>, vector<8x16x4xbf16>
    %c0_23 = arith.constant 0 : index
    %c0_24 = arith.constant 0 : index
    %c20 = arith.constant 20 : index
    %25 = vector.load %arg11[%c0_23, %c0_24, %c20] : memref<8x16x36xbf16, #tpu.memory_space<vmem>>, vector<8x16x4xbf16>
    tpu.vector_store %arg11[%c0_23, %c0_24, %c20], %24 {strides = array<i32>} : memref<8x16x36xbf16, #tpu.memory_space<vmem>>, vector<8x16x4xbf16>,
    %c9_i32_25 = arith.constant 9 : i32
    %26 = arith.addi %3, %c9_i32_25 : i32
    %c1_i32 = arith.constant 1 : i32
    %27 = arith.addi %26, %c1_i32 : i32
    %28 = arith.index_cast %27 : i32 to index
    %c15_26 = arith.constant 15 : index
    %c0_27 = arith.constant 0 : index
    %29 = vector.load %arg10[%28, %c15_26, %c0_27] : memref<34x48x4xbf16, #tpu.memory_space<vmem>>, vector<8x16x4xbf16>
    %c0_28 = arith.constant 0 : index
    %c0_29 = arith.constant 0 : index
    %c24 = arith.constant 24 : index
    %30 = vector.load %arg11[%c0_28, %c0_29, %c24] : memref<8x16x36xbf16, #tpu.memory_space<vmem>>, vector<8x16x4xbf16>
    tpu.vector_store %arg11[%c0_28, %c0_29, %c24], %29 {strides = array<i32>} : memref<8x16x36xbf16, #tpu.memory_space<vmem>>, vector<8x16x4xbf16>,
    %31 = arith.index_cast %27 : i32 to index
    %c16_30 = arith.constant 16 : index
    %c0_31 = arith.constant 0 : index
    %32 = vector.load %arg10[%31, %c16_30, %c0_31] : memref<34x48x4xbf16, #tpu.memory_space<vmem>>, vector<8x16x4xbf16>
    %c0_32 = arith.constant 0 : index
    %c0_33 = arith.constant 0 : index
    %c28 = arith.constant 28 : index
    %33 = vector.load %arg11[%c0_32, %c0_33, %c28] : memref<8x16x36xbf16, #tpu.memory_space<vmem>>, vector<8x16x4xbf16>
    tpu.vector_store %arg11[%c0_32, %c0_33, %c28], %32 {strides = array<i32>} : memref<8x16x36xbf16, #tpu.memory_space<vmem>>, vector<8x16x4xbf16>,
    %34 = arith.index_cast %27 : i32 to index
    %c17_34 = arith.constant 17 : index
    %c0_35 = arith.constant 0 : index
    %35 = vector.load %arg10[%34, %c17_34, %c0_35] : memref<34x48x4xbf16, #tpu.memory_space<vmem>>, vector<8x16x4xbf16>
    %c0_36 = arith.constant 0 : index
    %c0_37 = arith.constant 0 : index
    %c32 = arith.constant 32 : index
    %36 = vector.load %arg11[%c0_36, %c0_37, %c32] : memref<8x16x36xbf16, #tpu.memory_space<vmem>>, vector<8x16x4xbf16>
    tpu.vector_store %arg11[%c0_36, %c0_37, %c32], %35 {strides = array<i32>} : memref<8x16x36xbf16, #tpu.memory_space<vmem>>, vector<8x16x4xbf16>,
    %c0_38 = arith.constant 0 : index
    %c0_39 = arith.constant 0 : index
    %c0_40 = arith.constant 0 : index
    %37 = vector.load %arg11[%c0_38, %c0_39, %c0_40] : memref<8x16x36xbf16, #tpu.memory_space<vmem>>, vector<8x16x36xbf16>
    %38 = vector.shape_cast %37 : vector<8x16x36xbf16> to vector<128x36xbf16>
    %c0_41 = arith.constant 0 : index
    %c0_42 = arith.constant 0 : index
    %c0_43 = arith.constant 0 : index
    %39 = vector.load %arg5[%c0_41, %c0_42, %c0_43] : memref<4x36x4xbf16, #tpu.memory_space<vmem>>, vector<1x36x4xbf16>
    %40 = vector.shape_cast %39 : vector<1x36x4xbf16> to vector<36x4xbf16>
    %cst = arith.constant dense<0.000000e+00> : vector<128x4xf32>
    %41 = tpu.matmul %38, %40, %cst {dimension_numbers = #tpu.dot_dimension_numbers<[1], [0], [0], [1], [0, 0, 1, 1], [], []>} : vector<128x36xbf16>, vector<36x4xbf16>, vector<128x4xf32> -> vector<128x4xf32>
    %c0_44 = arith.constant 0 : index
    %c0_45 = arith.constant 0 : index
    %c0_46 = arith.constant 0 : index
    %42 = vector.load %arg6[%c0_44, %c0_45, %c0_46] : memref<4x1x4xf32, #tpu.memory_space<vmem>>, vector<1x1x4xf32>
    %43 = vector.shape_cast %42 : vector<1x1x4xf32> to vector<1x4xf32>
    %44 = vector.broadcast %43 : vector<1x4xf32> to vector<128x4xf32>
    %45 = arith.addf %41, %44 : vector<128x4xf32>
    %cst_47 = arith.constant 0.000000e+00 : f32
    %cst_48 = arith.constant 6.000000e+00 : f32
    %46 = vector.broadcast %cst_47 : f32 to vector<128x4xf32>
    %47 = arith.maximumf %46, %45 : vector<128x4xf32>
    %48 = vector.broadcast %cst_48 : f32 to vector<128x4xf32>
    %49 = arith.minimumf %48, %47 : vector<128x4xf32>
    %50 = arith.truncf %49 : vector<128x4xf32> to vector<128x4xbf16>
    %c0_49 = arith.constant 0 : index
    %c0_50 = arith.constant 0 : index
    %51 = vector.load %arg12[%c0_49, %c0_50] : memref<128x16xbf16, #tpu.memory_space<vmem>>, vector<128x4xbf16>
    tpu.vector_store %arg12[%c0_49, %c0_50], %50 {strides = array<i32>} : memref<128x16xbf16, #tpu.memory_space<vmem>>, vector<128x4xbf16>,
    %c9_i32_51 = arith.constant 9 : i32
    %52 = arith.addi %3, %c9_i32_51 : i32
    %c-3_i32 = arith.constant -3 : i32
    %53 = arith.addi %52, %c-3_i32 : i32
    %54 = arith.index_cast %53 : i32 to index
    %c13 = arith.constant 13 : index
    %c0_52 = arith.constant 0 : index
    %55 = vector.load %arg10[%54, %c13, %c0_52] : memref<34x48x4xbf16, #tpu.memory_space<vmem>>, vector<8x16x4xbf16>
    %c0_53 = arith.constant 0 : index
    %c0_54 = arith.constant 0 : index
    %c0_55 = arith.constant 0 : index
    %56 = vector.load %arg11[%c0_53, %c0_54, %c0_55] : memref<8x16x36xbf16, #tpu.memory_space<vmem>>, vector<8x16x4xbf16>
    tpu.vector_store %arg11[%c0_53, %c0_54, %c0_55], %55 {strides = array<i32>} : memref<8x16x36xbf16, #tpu.memory_space<vmem>>, vector<8x16x4xbf16>,
    %57 = arith.index_cast %53 : i32 to index
    %c16_56 = arith.constant 16 : index
    %c0_57 = arith.constant 0 : index
    %58 = vector.load %arg10[%57, %c16_56, %c0_57] : memref<34x48x4xbf16, #tpu.memory_space<vmem>>, vector<8x16x4xbf16>
    %c0_58 = arith.constant 0 : index
    %c0_59 = arith.constant 0 : index
    %c4_60 = arith.constant 4 : index
    %59 = vector.load %arg11[%c0_58, %c0_59, %c4_60] : memref<8x16x36xbf16, #tpu.memory_space<vmem>>, vector<8x16x4xbf16>
    tpu.vector_store %arg11[%c0_58, %c0_59, %c4_60], %58 {strides = array<i32>} : memref<8x16x36xbf16, #tpu.memory_space<vmem>>, vector<8x16x4xbf16>,
    %60 = arith.index_cast %53 : i32 to index
    %c19 = arith.constant 19 : index
    %c0_61 = arith.constant 0 : index
    %61 = vector.load %arg10[%60, %c19, %c0_61] : memref<34x48x4xbf16, #tpu.memory_space<vmem>>, vector<8x16x4xbf16>
    %c0_62 = arith.constant 0 : index
    %c0_63 = arith.constant 0 : index
    %c8_64 = arith.constant 8 : index
    %62 = vector.load %arg11[%c0_62, %c0_63, %c8_64] : memref<8x16x36xbf16, #tpu.memory_space<vmem>>, vector<8x16x4xbf16>
    tpu.vector_store %arg11[%c0_62, %c0_63, %c8_64], %61 {strides = array<i32>} : memref<8x16x36xbf16, #tpu.memory_space<vmem>>, vector<8x16x4xbf16>,
    %c9_i32_65 = arith.constant 9 : i32
    %63 = arith.addi %3, %c9_i32_65 : i32
    %c0_i32_66 = arith.constant 0 : i32
    %64 = arith.addi %63, %c0_i32_66 : i32
    %65 = arith.index_cast %64 : i32 to index
    %c13_67 = arith.constant 13 : index
    %c0_68 = arith.constant 0 : index
    %66 = vector.load %arg10[%65, %c13_67, %c0_68] : memref<34x48x4xbf16, #tpu.memory_space<vmem>>, vector<8x16x4xbf16>
    %c0_69 = arith.constant 0 : index
    %c0_70 = arith.constant 0 : index
    %c12_71 = arith.constant 12 : index
    %67 = vector.load %arg11[%c0_69, %c0_70, %c12_71] : memref<8x16x36xbf16, #tpu.memory_space<vmem>>, vector<8x16x4xbf16>
    tpu.vector_store %arg11[%c0_69, %c0_70, %c12_71], %66 {strides = array<i32>} : memref<8x16x36xbf16, #tpu.memory_space<vmem>>, vector<8x16x4xbf16>,
    %68 = arith.index_cast %64 : i32 to index
    %c16_72 = arith.constant 16 : index
    %c0_73 = arith.constant 0 : index
    %69 = vector.load %arg10[%68, %c16_72, %c0_73] : memref<34x48x4xbf16, #tpu.memory_space<vmem>>, vector<8x16x4xbf16>
    %c0_74 = arith.constant 0 : index
    %c0_75 = arith.constant 0 : index
    %c16_76 = arith.constant 16 : index
    %70 = vector.load %arg11[%c0_74, %c0_75, %c16_76] : memref<8x16x36xbf16, #tpu.memory_space<vmem>>, vector<8x16x4xbf16>
    tpu.vector_store %arg11[%c0_74, %c0_75, %c16_76], %69 {strides = array<i32>} : memref<8x16x36xbf16, #tpu.memory_space<vmem>>, vector<8x16x4xbf16>,
    %71 = arith.index_cast %64 : i32 to index
    %c19_77 = arith.constant 19 : index
    %c0_78 = arith.constant 0 : index
    %72 = vector.load %arg10[%71, %c19_77, %c0_78] : memref<34x48x4xbf16, #tpu.memory_space<vmem>>, vector<8x16x4xbf16>
    %c0_79 = arith.constant 0 : index
    %c0_80 = arith.constant 0 : index
    %c20_81 = arith.constant 20 : index
    %73 = vector.load %arg11[%c0_79, %c0_80, %c20_81] : memref<8x16x36xbf16, #tpu.memory_space<vmem>>, vector<8x16x4xbf16>
    tpu.vector_store %arg11[%c0_79, %c0_80, %c20_81], %72 {strides = array<i32>} : memref<8x16x36xbf16, #tpu.memory_space<vmem>>, vector<8x16x4xbf16>,
    %c9_i32_82 = arith.constant 9 : i32
    %74 = arith.addi %3, %c9_i32_82 : i32
    %c3_i32 = arith.constant 3 : i32
    %75 = arith.addi %74, %c3_i32 : i32
    %76 = arith.index_cast %75 : i32 to index
    %c13_83 = arith.constant 13 : index
    %c0_84 = arith.constant 0 : index
    %77 = vector.load %arg10[%76, %c13_83, %c0_84] : memref<34x48x4xbf16, #tpu.memory_space<vmem>>, vector<8x16x4xbf16>
    %c0_85 = arith.constant 0 : index
    %c0_86 = arith.constant 0 : index
    %c24_87 = arith.constant 24 : index
    %78 = vector.load %arg11[%c0_85, %c0_86, %c24_87] : memref<8x16x36xbf16, #tpu.memory_space<vmem>>, vector<8x16x4xbf16>
    tpu.vector_store %arg11[%c0_85, %c0_86, %c24_87], %77 {strides = array<i32>} : memref<8x16x36xbf16, #tpu.memory_space<vmem>>, vector<8x16x4xbf16>,
    %79 = arith.index_cast %75 : i32 to index
    %c16_88 = arith.constant 16 : index
    %c0_89 = arith.constant 0 : index
    %80 = vector.load %arg10[%79, %c16_88, %c0_89] : memref<34x48x4xbf16, #tpu.memory_space<vmem>>, vector<8x16x4xbf16>
    %c0_90 = arith.constant 0 : index
    %c0_91 = arith.constant 0 : index
    %c28_92 = arith.constant 28 : index
    %81 = vector.load %arg11[%c0_90, %c0_91, %c28_92] : memref<8x16x36xbf16, #tpu.memory_space<vmem>>, vector<8x16x4xbf16>
    tpu.vector_store %arg11[%c0_90, %c0_91, %c28_92], %80 {strides = array<i32>} : memref<8x16x36xbf16, #tpu.memory_space<vmem>>, vector<8x16x4xbf16>,
    %82 = arith.index_cast %75 : i32 to index
    %c19_93 = arith.constant 19 : index
    %c0_94 = arith.constant 0 : index
    %83 = vector.load %arg10[%82, %c19_93, %c0_94] : memref<34x48x4xbf16, #tpu.memory_space<vmem>>, vector<8x16x4xbf16>
    %c0_95 = arith.constant 0 : index
    %c0_96 = arith.constant 0 : index
    %c32_97 = arith.constant 32 : index
    %84 = vector.load %arg11[%c0_95, %c0_96, %c32_97] : memref<8x16x36xbf16, #tpu.memory_space<vmem>>, vector<8x16x4xbf16>
    tpu.vector_store %arg11[%c0_95, %c0_96, %c32_97], %83 {strides = array<i32>} : memref<8x16x36xbf16, #tpu.memory_space<vmem>>, vector<8x16x4xbf16>,
    %c0_98 = arith.constant 0 : index
    %c0_99 = arith.constant 0 : index
    %c0_100 = arith.constant 0 : index
    %85 = vector.load %arg11[%c0_98, %c0_99, %c0_100] : memref<8x16x36xbf16, #tpu.memory_space<vmem>>, vector<8x16x36xbf16>
    %86 = vector.shape_cast %85 : vector<8x16x36xbf16> to vector<128x36xbf16>
    %c1 = arith.constant 1 : index
    %c0_101 = arith.constant 0 : index
    %c0_102 = arith.constant 0 : index
    %87 = vector.load %arg5[%c1, %c0_101, %c0_102] : memref<4x36x4xbf16, #tpu.memory_space<vmem>>, vector<1x36x4xbf16>
    %88 = vector.shape_cast %87 : vector<1x36x4xbf16> to vector<36x4xbf16>
    %cst_103 = arith.constant dense<0.000000e+00> : vector<128x4xf32>
    %89 = tpu.matmul %86, %88, %cst_103 {dimension_numbers = #tpu.dot_dimension_numbers<[1], [0], [0], [1], [0, 0, 1, 1], [], []>} : vector<128x36xbf16>, vector<36x4xbf16>, vector<128x4xf32> -> vector<128x4xf32>
    %c1_104 = arith.constant 1 : index
    %c0_105 = arith.constant 0 : index
    %c0_106 = arith.constant 0 : index
    %90 = vector.load %arg6[%c1_104, %c0_105, %c0_106] : memref<4x1x4xf32, #tpu.memory_space<vmem>>, vector<1x1x4xf32>
    %91 = vector.shape_cast %90 : vector<1x1x4xf32> to vector<1x4xf32>
    %92 = vector.broadcast %91 : vector<1x4xf32> to vector<128x4xf32>
    %93 = arith.addf %89, %92 : vector<128x4xf32>
    %cst_107 = arith.constant 0.000000e+00 : f32
    %cst_108 = arith.constant 6.000000e+00 : f32
    %94 = vector.broadcast %cst_107 : f32 to vector<128x4xf32>
    %95 = arith.maximumf %94, %93 : vector<128x4xf32>
    %96 = vector.broadcast %cst_108 : f32 to vector<128x4xf32>
    %97 = arith.minimumf %96, %95 : vector<128x4xf32>
    %98 = arith.truncf %97 : vector<128x4xf32> to vector<128x4xbf16>
    %c0_109 = arith.constant 0 : index
    %c4_110 = arith.constant 4 : index
    %99 = vector.load %arg12[%c0_109, %c4_110] : memref<128x16xbf16, #tpu.memory_space<vmem>>, vector<128x4xbf16>
    tpu.vector_store %arg12[%c0_109, %c4_110], %98 {strides = array<i32>} : memref<128x16xbf16, #tpu.memory_space<vmem>>, vector<128x4xbf16>,
    %c9_i32_111 = arith.constant 9 : i32
    %100 = arith.addi %3, %c9_i32_111 : i32
    %c-6_i32 = arith.constant -6 : i32
    %101 = arith.addi %100, %c-6_i32 : i32
    %102 = arith.index_cast %101 : i32 to index
    %c10 = arith.constant 10 : index
    %c0_112 = arith.constant 0 : index
    %103 = vector.load %arg10[%102, %c10, %c0_112] : memref<34x48x4xbf16, #tpu.memory_space<vmem>>, vector<8x16x4xbf16>
    %c0_113 = arith.constant 0 : index
    %c0_114 = arith.constant 0 : index
    %c0_115 = arith.constant 0 : index
    %104 = vector.load %arg11[%c0_113, %c0_114, %c0_115] : memref<8x16x36xbf16, #tpu.memory_space<vmem>>, vector<8x16x4xbf16>
    tpu.vector_store %arg11[%c0_113, %c0_114, %c0_115], %103 {strides = array<i32>} : memref<8x16x36xbf16, #tpu.memory_space<vmem>>, vector<8x16x4xbf16>,
    %105 = arith.index_cast %101 : i32 to index
    %c16_116 = arith.constant 16 : index
    %c0_117 = arith.constant 0 : index
    %106 = vector.load %arg10[%105, %c16_116, %c0_117] : memref<34x48x4xbf16, #tpu.memory_space<vmem>>, vector<8x16x4xbf16>
    %c0_118 = arith.constant 0 : index
    %c0_119 = arith.constant 0 : index
    %c4_120 = arith.constant 4 : index
    %107 = vector.load %arg11[%c0_118, %c0_119, %c4_120] : memref<8x16x36xbf16, #tpu.memory_space<vmem>>, vector<8x16x4xbf16>
    tpu.vector_store %arg11[%c0_118, %c0_119, %c4_120], %106 {strides = array<i32>} : memref<8x16x36xbf16, #tpu.memory_space<vmem>>, vector<8x16x4xbf16>,
    %108 = arith.index_cast %101 : i32 to index
    %c22 = arith.constant 22 : index
    %c0_121 = arith.constant 0 : index
    %109 = vector.load %arg10[%108, %c22, %c0_121] : memref<34x48x4xbf16, #tpu.memory_space<vmem>>, vector<8x16x4xbf16>
    %c0_122 = arith.constant 0 : index
    %c0_123 = arith.constant 0 : index
    %c8_124 = arith.constant 8 : index
    %110 = vector.load %arg11[%c0_122, %c0_123, %c8_124] : memref<8x16x36xbf16, #tpu.memory_space<vmem>>, vector<8x16x4xbf16>
    tpu.vector_store %arg11[%c0_122, %c0_123, %c8_124], %109 {strides = array<i32>} : memref<8x16x36xbf16, #tpu.memory_space<vmem>>, vector<8x16x4xbf16>,
    %c9_i32_125 = arith.constant 9 : i32
    %111 = arith.addi %3, %c9_i32_125 : i32
    %c0_i32_126 = arith.constant 0 : i32
    %112 = arith.addi %111, %c0_i32_126 : i32
    %113 = arith.index_cast %112 : i32 to index
    %c10_127 = arith.constant 10 : index
    %c0_128 = arith.constant 0 : index
    %114 = vector.load %arg10[%113, %c10_127, %c0_128] : memref<34x48x4xbf16, #tpu.memory_space<vmem>>, vector<8x16x4xbf16>
    %c0_129 = arith.constant 0 : index
    %c0_130 = arith.constant 0 : index
    %c12_131 = arith.constant 12 : index
    %115 = vector.load %arg11[%c0_129, %c0_130, %c12_131] : memref<8x16x36xbf16, #tpu.memory_space<vmem>>, vector<8x16x4xbf16>
    tpu.vector_store %arg11[%c0_129, %c0_130, %c12_131], %114 {strides = array<i32>} : memref<8x16x36xbf16, #tpu.memory_space<vmem>>, vector<8x16x4xbf16>,
    %116 = arith.index_cast %112 : i32 to index
    %c16_132 = arith.constant 16 : index
    %c0_133 = arith.constant 0 : index
    %117 = vector.load %arg10[%116, %c16_132, %c0_133] : memref<34x48x4xbf16, #tpu.memory_space<vmem>>, vector<8x16x4xbf16>
    %c0_134 = arith.constant 0 : index
    %c0_135 = arith.constant 0 : index
    %c16_136 = arith.constant 16 : index
    %118 = vector.load %arg11[%c0_134, %c0_135, %c16_136] : memref<8x16x36xbf16, #tpu.memory_space<vmem>>, vector<8x16x4xbf16>
    tpu.vector_store %arg11[%c0_134, %c0_135, %c16_136], %117 {strides = array<i32>} : memref<8x16x36xbf16, #tpu.memory_space<vmem>>, vector<8x16x4xbf16>,
    %119 = arith.index_cast %112 : i32 to index
    %c22_137 = arith.constant 22 : index
    %c0_138 = arith.constant 0 : index
    %120 = vector.load %arg10[%119, %c22_137, %c0_138] : memref<34x48x4xbf16, #tpu.memory_space<vmem>>, vector<8x16x4xbf16>
    %c0_139 = arith.constant 0 : index
    %c0_140 = arith.constant 0 : index
    %c20_141 = arith.constant 20 : index
    %121 = vector.load %arg11[%c0_139, %c0_140, %c20_141] : memref<8x16x36xbf16, #tpu.memory_space<vmem>>, vector<8x16x4xbf16>
    tpu.vector_store %arg11[%c0_139, %c0_140, %c20_141], %120 {strides = array<i32>} : memref<8x16x36xbf16, #tpu.memory_space<vmem>>, vector<8x16x4xbf16>,
    %c9_i32_142 = arith.constant 9 : i32
    %122 = arith.addi %3, %c9_i32_142 : i32
    %c6_i32 = arith.constant 6 : i32
    %123 = arith.addi %122, %c6_i32 : i32
    %124 = arith.index_cast %123 : i32 to index
    %c10_143 = arith.constant 10 : index
    %c0_144 = arith.constant 0 : index
    %125 = vector.load %arg10[%124, %c10_143, %c0_144] : memref<34x48x4xbf16, #tpu.memory_space<vmem>>, vector<8x16x4xbf16>
    %c0_145 = arith.constant 0 : index
    %c0_146 = arith.constant 0 : index
    %c24_147 = arith.constant 24 : index
    %126 = vector.load %arg11[%c0_145, %c0_146, %c24_147] : memref<8x16x36xbf16, #tpu.memory_space<vmem>>, vector<8x16x4xbf16>
    tpu.vector_store %arg11[%c0_145, %c0_146, %c24_147], %125 {strides = array<i32>} : memref<8x16x36xbf16, #tpu.memory_space<vmem>>, vector<8x16x4xbf16>,
    %127 = arith.index_cast %123 : i32 to index
    %c16_148 = arith.constant 16 : index
    %c0_149 = arith.constant 0 : index
    %128 = vector.load %arg10[%127, %c16_148, %c0_149] : memref<34x48x4xbf16, #tpu.memory_space<vmem>>, vector<8x16x4xbf16>
    %c0_150 = arith.constant 0 : index
    %c0_151 = arith.constant 0 : index
    %c28_152 = arith.constant 28 : index
    %129 = vector.load %arg11[%c0_150, %c0_151, %c28_152] : memref<8x16x36xbf16, #tpu.memory_space<vmem>>, vector<8x16x4xbf16>
    tpu.vector_store %arg11[%c0_150, %c0_151, %c28_152], %128 {strides = array<i32>} : memref<8x16x36xbf16, #tpu.memory_space<vmem>>, vector<8x16x4xbf16>,
    %130 = arith.index_cast %123 : i32 to index
    %c22_153 = arith.constant 22 : index
    %c0_154 = arith.constant 0 : index
    %131 = vector.load %arg10[%130, %c22_153, %c0_154] : memref<34x48x4xbf16, #tpu.memory_space<vmem>>, vector<8x16x4xbf16>
    %c0_155 = arith.constant 0 : index
    %c0_156 = arith.constant 0 : index
    %c32_157 = arith.constant 32 : index
    %132 = vector.load %arg11[%c0_155, %c0_156, %c32_157] : memref<8x16x36xbf16, #tpu.memory_space<vmem>>, vector<8x16x4xbf16>
    tpu.vector_store %arg11[%c0_155, %c0_156, %c32_157], %131 {strides = array<i32>} : memref<8x16x36xbf16, #tpu.memory_space<vmem>>, vector<8x16x4xbf16>,
    %c0_158 = arith.constant 0 : index
    %c0_159 = arith.constant 0 : index
    %c0_160 = arith.constant 0 : index
    %133 = vector.load %arg11[%c0_158, %c0_159, %c0_160] : memref<8x16x36xbf16, #tpu.memory_space<vmem>>, vector<8x16x36xbf16>
    %134 = vector.shape_cast %133 : vector<8x16x36xbf16> to vector<128x36xbf16>
    %c2 = arith.constant 2 : index
    %c0_161 = arith.constant 0 : index
    %c0_162 = arith.constant 0 : index
    %135 = vector.load %arg5[%c2, %c0_161, %c0_162] : memref<4x36x4xbf16, #tpu.memory_space<vmem>>, vector<1x36x4xbf16>
    %136 = vector.shape_cast %135 : vector<1x36x4xbf16> to vector<36x4xbf16>
    %cst_163 = arith.constant dense<0.000000e+00> : vector<128x4xf32>
    %137 = tpu.matmul %134, %136, %cst_163 {dimension_numbers = #tpu.dot_dimension_numbers<[1], [0], [0], [1], [0, 0, 1, 1], [], []>} : vector<128x36xbf16>, vector<36x4xbf16>, vector<128x4xf32> -> vector<128x4xf32>
    %c2_164 = arith.constant 2 : index
    %c0_165 = arith.constant 0 : index
    %c0_166 = arith.constant 0 : index
    %138 = vector.load %arg6[%c2_164, %c0_165, %c0_166] : memref<4x1x4xf32, #tpu.memory_space<vmem>>, vector<1x1x4xf32>
    %139 = vector.shape_cast %138 : vector<1x1x4xf32> to vector<1x4xf32>
    %140 = vector.broadcast %139 : vector<1x4xf32> to vector<128x4xf32>
    %141 = arith.addf %137, %140 : vector<128x4xf32>
    %cst_167 = arith.constant 0.000000e+00 : f32
    %cst_168 = arith.constant 6.000000e+00 : f32
    %142 = vector.broadcast %cst_167 : f32 to vector<128x4xf32>
    %143 = arith.maximumf %142, %141 : vector<128x4xf32>
    %144 = vector.broadcast %cst_168 : f32 to vector<128x4xf32>
    %145 = arith.minimumf %144, %143 : vector<128x4xf32>
    %146 = arith.truncf %145 : vector<128x4xf32> to vector<128x4xbf16>
    %c0_169 = arith.constant 0 : index
    %c8_170 = arith.constant 8 : index
    %147 = vector.load %arg12[%c0_169, %c8_170] : memref<128x16xbf16, #tpu.memory_space<vmem>>, vector<128x4xbf16>
    tpu.vector_store %arg12[%c0_169, %c8_170], %146 {strides = array<i32>} : memref<128x16xbf16, #tpu.memory_space<vmem>>, vector<128x4xbf16>,
    %c9_i32_171 = arith.constant 9 : i32
    %148 = arith.addi %3, %c9_i32_171 : i32
    %c-9_i32 = arith.constant -9 : i32
    %149 = arith.addi %148, %c-9_i32 : i32
    %150 = arith.index_cast %149 : i32 to index
    %c7 = arith.constant 7 : index
    %c0_172 = arith.constant 0 : index
    %151 = vector.load %arg10[%150, %c7, %c0_172] : memref<34x48x4xbf16, #tpu.memory_space<vmem>>, vector<8x16x4xbf16>
    %c0_173 = arith.constant 0 : index
    %c0_174 = arith.constant 0 : index
    %c0_175 = arith.constant 0 : index
    %152 = vector.load %arg11[%c0_173, %c0_174, %c0_175] : memref<8x16x36xbf16, #tpu.memory_space<vmem>>, vector<8x16x4xbf16>
    tpu.vector_store %arg11[%c0_173, %c0_174, %c0_175], %151 {strides = array<i32>} : memref<8x16x36xbf16, #tpu.memory_space<vmem>>, vector<8x16x4xbf16>,
    %153 = arith.index_cast %149 : i32 to index
    %c16_176 = arith.constant 16 : index
    %c0_177 = arith.constant 0 : index
    %154 = vector.load %arg10[%153, %c16_176, %c0_177] : memref<34x48x4xbf16, #tpu.memory_space<vmem>>, vector<8x16x4xbf16>
    %c0_178 = arith.constant 0 : index
    %c0_179 = arith.constant 0 : index
    %c4_180 = arith.constant 4 : index
    %155 = vector.load %arg11[%c0_178, %c0_179, %c4_180] : memref<8x16x36xbf16, #tpu.memory_space<vmem>>, vector<8x16x4xbf16>
    tpu.vector_store %arg11[%c0_178, %c0_179, %c4_180], %154 {strides = array<i32>} : memref<8x16x36xbf16, #tpu.memory_space<vmem>>, vector<8x16x4xbf16>,
    %156 = arith.index_cast %149 : i32 to index
    %c25 = arith.constant 25 : index
    %c0_181 = arith.constant 0 : index
    %157 = vector.load %arg10[%156, %c25, %c0_181] : memref<34x48x4xbf16, #tpu.memory_space<vmem>>, vector<8x16x4xbf16>
    %c0_182 = arith.constant 0 : index
    %c0_183 = arith.constant 0 : index
    %c8_184 = arith.constant 8 : index
    %158 = vector.load %arg11[%c0_182, %c0_183, %c8_184] : memref<8x16x36xbf16, #tpu.memory_space<vmem>>, vector<8x16x4xbf16>
    tpu.vector_store %arg11[%c0_182, %c0_183, %c8_184], %157 {strides = array<i32>} : memref<8x16x36xbf16, #tpu.memory_space<vmem>>, vector<8x16x4xbf16>,
    %c9_i32_185 = arith.constant 9 : i32
    %159 = arith.addi %3, %c9_i32_185 : i32
    %c0_i32_186 = arith.constant 0 : i32
    %160 = arith.addi %159, %c0_i32_186 : i32
    %161 = arith.index_cast %160 : i32 to index
    %c7_187 = arith.constant 7 : index
    %c0_188 = arith.constant 0 : index
    %162 = vector.load %arg10[%161, %c7_187, %c0_188] : memref<34x48x4xbf16, #tpu.memory_space<vmem>>, vector<8x16x4xbf16>
    %c0_189 = arith.constant 0 : index
    %c0_190 = arith.constant 0 : index
    %c12_191 = arith.constant 12 : index
    %163 = vector.load %arg11[%c0_189, %c0_190, %c12_191] : memref<8x16x36xbf16, #tpu.memory_space<vmem>>, vector<8x16x4xbf16>
    tpu.vector_store %arg11[%c0_189, %c0_190, %c12_191], %162 {strides = array<i32>} : memref<8x16x36xbf16, #tpu.memory_space<vmem>>, vector<8x16x4xbf16>,
    %164 = arith.index_cast %160 : i32 to index
    %c16_192 = arith.constant 16 : index
    %c0_193 = arith.constant 0 : index
    %165 = vector.load %arg10[%164, %c16_192, %c0_193] : memref<34x48x4xbf16, #tpu.memory_space<vmem>>, vector<8x16x4xbf16>
    %c0_194 = arith.constant 0 : index
    %c0_195 = arith.constant 0 : index
    %c16_196 = arith.constant 16 : index
    %166 = vector.load %arg11[%c0_194, %c0_195, %c16_196] : memref<8x16x36xbf16, #tpu.memory_space<vmem>>, vector<8x16x4xbf16>
    tpu.vector_store %arg11[%c0_194, %c0_195, %c16_196], %165 {strides = array<i32>} : memref<8x16x36xbf16, #tpu.memory_space<vmem>>, vector<8x16x4xbf16>,
    %167 = arith.index_cast %160 : i32 to index
    %c25_197 = arith.constant 25 : index
    %c0_198 = arith.constant 0 : index
    %168 = vector.load %arg10[%167, %c25_197, %c0_198] : memref<34x48x4xbf16, #tpu.memory_space<vmem>>, vector<8x16x4xbf16>
    %c0_199 = arith.constant 0 : index
    %c0_200 = arith.constant 0 : index
    %c20_201 = arith.constant 20 : index
    %169 = vector.load %arg11[%c0_199, %c0_200, %c20_201] : memref<8x16x36xbf16, #tpu.memory_space<vmem>>, vector<8x16x4xbf16>
    tpu.vector_store %arg11[%c0_199, %c0_200, %c20_201], %168 {strides = array<i32>} : memref<8x16x36xbf16, #tpu.memory_space<vmem>>, vector<8x16x4xbf16>,
    %c9_i32_202 = arith.constant 9 : i32
    %170 = arith.addi %3, %c9_i32_202 : i32
    %c9_i32_203 = arith.constant 9 : i32
    %171 = arith.addi %170, %c9_i32_203 : i32
    %172 = arith.index_cast %171 : i32 to index
    %c7_204 = arith.constant 7 : index
    %c0_205 = arith.constant 0 : index
    %173 = vector.load %arg10[%172, %c7_204, %c0_205] : memref<34x48x4xbf16, #tpu.memory_space<vmem>>, vector<8x16x4xbf16>
    %c0_206 = arith.constant 0 : index
    %c0_207 = arith.constant 0 : index
    %c24_208 = arith.constant 24 : index
    %174 = vector.load %arg11[%c0_206, %c0_207, %c24_208] : memref<8x16x36xbf16, #tpu.memory_space<vmem>>, vector<8x16x4xbf16>
    tpu.vector_store %arg11[%c0_206, %c0_207, %c24_208], %173 {strides = array<i32>} : memref<8x16x36xbf16, #tpu.memory_space<vmem>>, vector<8x16x4xbf16>,
    %175 = arith.index_cast %171 : i32 to index
    %c16_209 = arith.constant 16 : index
    %c0_210 = arith.constant 0 : index
    %176 = vector.load %arg10[%175, %c16_209, %c0_210] : memref<34x48x4xbf16, #tpu.memory_space<vmem>>, vector<8x16x4xbf16>
    %c0_211 = arith.constant 0 : index
    %c0_212 = arith.constant 0 : index
    %c28_213 = arith.constant 28 : index
    %177 = vector.load %arg11[%c0_211, %c0_212, %c28_213] : memref<8x16x36xbf16, #tpu.memory_space<vmem>>, vector<8x16x4xbf16>
    tpu.vector_store %arg11[%c0_211, %c0_212, %c28_213], %176 {strides = array<i32>} : memref<8x16x36xbf16, #tpu.memory_space<vmem>>, vector<8x16x4xbf16>,
    %178 = arith.index_cast %171 : i32 to index
    %c25_214 = arith.constant 25 : index
    %c0_215 = arith.constant 0 : index
    %179 = vector.load %arg10[%178, %c25_214, %c0_215] : memref<34x48x4xbf16, #tpu.memory_space<vmem>>, vector<8x16x4xbf16>
    %c0_216 = arith.constant 0 : index
    %c0_217 = arith.constant 0 : index
    %c32_218 = arith.constant 32 : index
    %180 = vector.load %arg11[%c0_216, %c0_217, %c32_218] : memref<8x16x36xbf16, #tpu.memory_space<vmem>>, vector<8x16x4xbf16>
    tpu.vector_store %arg11[%c0_216, %c0_217, %c32_218], %179 {strides = array<i32>} : memref<8x16x36xbf16, #tpu.memory_space<vmem>>, vector<8x16x4xbf16>,
    %c0_219 = arith.constant 0 : index
    %c0_220 = arith.constant 0 : index
    %c0_221 = arith.constant 0 : index
    %181 = vector.load %arg11[%c0_219, %c0_220, %c0_221] : memref<8x16x36xbf16, #tpu.memory_space<vmem>>, vector<8x16x36xbf16>
    %182 = vector.shape_cast %181 : vector<8x16x36xbf16> to vector<128x36xbf16>
    %c3 = arith.constant 3 : index
    %c0_222 = arith.constant 0 : index
    %c0_223 = arith.constant 0 : index
    %183 = vector.load %arg5[%c3, %c0_222, %c0_223] : memref<4x36x4xbf16, #tpu.memory_space<vmem>>, vector<1x36x4xbf16>
    %184 = vector.shape_cast %183 : vector<1x36x4xbf16> to vector<36x4xbf16>
    %cst_224 = arith.constant dense<0.000000e+00> : vector<128x4xf32>
    %185 = tpu.matmul %182, %184, %cst_224 {dimension_numbers = #tpu.dot_dimension_numbers<[1], [0], [0], [1], [0, 0, 1, 1], [], []>} : vector<128x36xbf16>, vector<36x4xbf16>, vector<128x4xf32> -> vector<128x4xf32>
    %c3_225 = arith.constant 3 : index
    %c0_226 = arith.constant 0 : index
    %c0_227 = arith.constant 0 : index
    %186 = vector.load %arg6[%c3_225, %c0_226, %c0_227] : memref<4x1x4xf32, #tpu.memory_space<vmem>>, vector<1x1x4xf32>
    %187 = vector.shape_cast %186 : vector<1x1x4xf32> to vector<1x4xf32>
    %188 = vector.broadcast %187 : vector<1x4xf32> to vector<128x4xf32>
    %189 = arith.addf %185, %188 : vector<128x4xf32>
    %cst_228 = arith.constant 0.000000e+00 : f32
    %cst_229 = arith.constant 6.000000e+00 : f32
    %190 = vector.broadcast %cst_228 : f32 to vector<128x4xf32>
    %191 = arith.maximumf %190, %189 : vector<128x4xf32>
    %192 = vector.broadcast %cst_229 : f32 to vector<128x4xf32>
    %193 = arith.minimumf %192, %191 : vector<128x4xf32>
    %194 = arith.truncf %193 : vector<128x4xf32> to vector<128x4xbf16>
    %c0_230 = arith.constant 0 : index
    %c12_231 = arith.constant 12 : index
    %195 = vector.load %arg12[%c0_230, %c12_231] : memref<128x16xbf16, #tpu.memory_space<vmem>>, vector<128x4xbf16>
    tpu.vector_store %arg12[%c0_230, %c12_231], %194 {strides = array<i32>} : memref<128x16xbf16, #tpu.memory_space<vmem>>, vector<128x4xbf16>,
    %c0_232 = arith.constant 0 : index
    %c0_233 = arith.constant 0 : index
    %196 = vector.load %arg12[%c0_232, %c0_233] : memref<128x16xbf16, #tpu.memory_space<vmem>>, vector<128x16xbf16>
    %c0_234 = arith.constant 0 : index
    %c0_235 = arith.constant 0 : index
    %197 = vector.load %arg7[%c0_234, %c0_235] : memref<16x8xbf16, #tpu.memory_space<vmem>>, vector<16x8xbf16>
    %cst_236 = arith.constant dense<0.000000e+00> : vector<128x8xf32>
    %198 = tpu.matmul %196, %197, %cst_236 {dimension_numbers = #tpu.dot_dimension_numbers<[1], [0], [0], [1], [0, 0, 1, 1], [], []>} : vector<128x16xbf16>, vector<16x8xbf16>, vector<128x8xf32> -> vector<128x8xf32>
    %c16_i32 = arith.constant 16 : i32
    %199 = arith.muli %3, %c16_i32 : i32
    %200 = tpu.assume_multiple %199, 8 : i32
    %c0_237 = arith.constant 0 : index
    %201 = arith.index_cast %200 : i32 to index
    %c0_238 = arith.constant 0 : index
    %202 = vector.load %arg2[%c0_237, %201, %c0_238] : memref<1x256x8xf32, #tpu.memory_space<vmem>>, vector<1x128x8xf32>
    %203 = vector.shape_cast %202 : vector<1x128x8xf32> to vector<128x8xf32>
    %c0_239 = arith.constant 0 : index
    %c0_240 = arith.constant 0 : index
    %204 = vector.load %arg8[%c0_239, %c0_240] : memref<1x8xf32, #tpu.memory_space<vmem>>, vector<1x8xf32>
    %205 = vector.broadcast %204 : vector<1x8xf32> to vector<128x8xf32>
    %206 = arith.addf %198, %205 : vector<128x8xf32>
    %207 = arith.addf %206, %203 : vector<128x8xf32>
    %c0_241 = arith.constant 0 : index
    %c0_242 = arith.constant 0 : index
    %c0_243 = arith.constant 0 : index
    %208 = vector.load %arg9[%c0_241, %c0_242, %c0_243] : memref<1x128x8xf32, #tpu.memory_space<vmem>>, vector<1x128x8xf32>
    %209 = vector.shape_cast %208 : vector<1x128x8xf32> to vector<128x8xf32>
    %210 = vector.shape_cast %207 : vector<128x8xf32> to vector<1x128x8xf32>
    tpu.vector_store %arg9[%c0_241, %c0_242, %c0_243], %210 {strides = array<i32>} : memref<1x128x8xf32, #tpu.memory_space<vmem>>, vector<1x128x8xf32>,
    return
  }
  func.func @transform_0(%arg0: i32, %arg1: i32) -> (i32, i32, i32) {
    %c0_i32 = arith.constant 0 : i32
    %c0_i32_0 = arith.constant 0 : i32
    %c0_i32_1 = arith.constant 0 : i32
    return %arg0, %c0_i32, %c0_i32_0 : i32, i32, i32
  }
  func.func @transform_1(%arg0: i32, %arg1: i32) -> (i32, i32) {
    %c0_i32 = arith.constant 0 : i32
    %c0_i32_0 = arith.constant 0 : i32
    %c0_i32_1 = arith.constant 0 : i32
    return %c0_i32, %c0_i32_0 : i32, i32
  }
  func.func @transform_2(%arg0: i32, %arg1: i32) -> (i32, i32) {
    %c0_i32 = arith.constant 0 : i32
    %c0_i32_0 = arith.constant 0 : i32
    %c0_i32_1 = arith.constant 0 : i32
    return %c0_i32, %c0_i32_0 : i32, i32
  }
  func.func @transform_3(%arg0: i32, %arg1: i32) -> (i32, i32, i32) {
    %c0_i32 = arith.constant 0 : i32
    %c0_i32_0 = arith.constant 0 : i32
    %c0_i32_1 = arith.constant 0 : i32
    %c0_i32_2 = arith.constant 0 : i32
    return %c0_i32, %c0_i32_0, %c0_i32_1 : i32, i32, i32
  }
  func.func @transform_4(%arg0: i32, %arg1: i32) -> (i32, i32, i32) {
    %c0_i32 = arith.constant 0 : i32
    %c0_i32_0 = arith.constant 0 : i32
    %c0_i32_1 = arith.constant 0 : i32
    %c0_i32_2 = arith.constant 0 : i32
    return %c0_i32, %c0_i32_0, %c0_i32_1 : i32, i32, i32
  }
  func.func @transform_5(%arg0: i32, %arg1: i32) -> (i32, i32) {
    %c0_i32 = arith.constant 0 : i32
    %c0_i32_0 = arith.constant 0 : i32
    %c0_i32_1 = arith.constant 0 : i32
    return %c0_i32, %c0_i32_0 : i32, i32
  }
  func.func @transform_6(%arg0: i32, %arg1: i32) -> (i32, i32) {
    %c0_i32 = arith.constant 0 : i32
    %c0_i32_0 = arith.constant 0 : i32
    %c0_i32_1 = arith.constant 0 : i32
    return %c0_i32, %c0_i32_0 : i32, i32
  }
  func.func @transform_7(%arg0: i32, %arg1: i32) -> (i32, i32, i32) {
    %c0_i32 = arith.constant 0 : i32
    %c0_i32_0 = arith.constant 0 : i32
    return %arg0, %arg1, %c0_i32 : i32, i32, i32
  }
}

</mosaic_0001>

<bundles_post_ra>
// kernel: tpu_custom_call.1
= control target key start
LH: loop header
LB: loop body
LE: loop exit
PB: predicated region body
PF: predicated region fallthrough
CT: control target
= control target key end

     0   :  { %s7331_s24 = smov 0   ;;  %s7333_s25 = smov 0   ;;  %s9832_s0 = inlined_call_operand.vmem [shape: f32[2,256,8], index: 0, kind: input, shape index: {}]   ;;  %s9833_s1 = inlined_call_operand.vmem [shape: bf16[8,4], index: 1, kind: input, shape index: {}]   ;;  %s9834_s2 = inlined_call_operand.vmem [shape: f32[1,4], index: 2, kind: input, shape index: {}]   ;;  %s9835_s3 = inlined_call_operand.vmem [shape: bf16[4,36,4], index: 3, kind: input, shape index: {}]   ;;  %s9836_s4 = inlined_call_operand.vmem [shape: f32[4,1,4], index: 4, kind: input, shape index: {}]   ;;  %s9837_s5 = inlined_call_operand.vmem [shape: bf16[16,8], index: 5, kind: input, shape index: {}]   ;;  %s9838_s6 = inlined_call_operand.vmem [shape: f32[1,8], index: 6, kind: input, shape index: {}]   ;;  %s9839_s7 = inlined_call_operand.vmem [shape: f32[2,256,8], index: 7, kind: output, shape index: {}]  }
   0x1   :  { %s7335_s26 = smov 0   ;;  %s7337_s27 = smov 0  }
   0x2   :  { %s7339_s28 = smov 0  }
   0x3 LB: > { %s26_s29 = sadd.s32 1, %s7272_s26  ;;  %s29_s30 = sadd.s32 1, %s7276_s27  ;;  %s7280_s28 = sphi %s7339_s28, %s17_s28   ;;  %s7276_s27 = sphi %s7337_s27, %s9847_s27   ;;  %s7272_s26 = sphi %s7335_s26, %s9846_s26   ;;  %s7268_s25 = sphi %s7333_s25, %s9845_s25   ;;  %s7264_s24 = sphi %s7331_s24, %s9844_s24  }
   0x4   : > { %p27_p0 = scmp.ge.s32.totalorder %s26_s29, 2  ;;  %p6367_p1 = scmp.ge.s32.totalorder %s7280_s28, 1 }
   0x5   : > { %p251_p2 = scmp.lt.s32.totalorder %s7280_s28, 5 }
   0x6   : > { %s9849_s29 = smov (%p27_p0, %s26_s29), 0  ;;  %s9851_s30 = smov (!%p27_p0, %s29_s30), %s7276_s27 }
   0x7   : > { %p252_p3 = pnand %p6367_p1, %p251_p2  ;;  %p31_p4 = scmp.ge.s32.totalorder %s9851_s30, 2 }
   0x8   : > { %p287_p5 = scmp.lt.s32.totalorder (!%p252_p3), %s7268_s25, 1  ;;  %s6370_s8 = sshll.u32 (!%p252_p3), %s7264_s24, 4 }
   0x9   : > { %s9853_s30 = smov (%p31_p4, %s9851_s30), 0  ;;  %255 = sbr.rel (%p252_p3) target bundleno = 1538 (0x602), region = 48 }
   0xa   : > { %p295_p6 = scmp.lt.s32.totalorder (!%p252_p3), %s6370_s8, 31  ;;  %p6373_p7 = scmp.ne.s32.totalorder (!%p252_p3), %s7264_s24, 0 }
  0x10   : > { %s9855_s25 = smov (!%p287_p5, %s7268_s25), 1  ;;  %s9857_s8 = smov (!%p295_p6, %s6370_s8), 31 }
  0x11   : > { %s6946_s9 = sshll.u32 %s9855_s25, 8  ;;  %s6371_s10 = sshll.u32 %s9855_s25, 5  ;;  %vm307_vm0 = vcmask (!%p6373_p7), 31747   ;;  %vm308_vm1 = vsmask.f32 (!%p6373_p7), 7950  ;;  %vm315_vm2 = vcmask (!%p6373_p7), 28672  }
  0x12   : > { %s7367_s13 = scalar_lea.vmem %s9832_s0, %s6946_s9  ;;  %s298_s14 = sadd.s32 %s6371_s10, %s9857_s8  ;;  %v310_v0 = vld [vmem:[#allocation2] sm:$0xf8] (!%p6373_p7)  ;;  %vm7375_vm3 = vmand (!%p6373_p7), %vm307_vm0, %vm308_vm1  ;;  %vm316_vm4 = vsmask.f32 (!%p6373_p7), 4352  ;;  %v318_v2 = vld [vmem:[#allocation2 + $0x10] sm:$0x1f] (!%p6373_p7) }
  0x13   : > { %s6372_s15 = sshll.u32 %s298_s14, 3  ;;  %306 = sbr.rel (%p6373_p7) target bundleno = 330 (0x14a), region = 52  ;;  %v321_v3 = vld [vmem:[#allocation2 + $0x18] sm:$0xf8] (!%p6373_p7)  ;;  %v311_v4 = vsel (!%p6373_p7), %vm7375_vm3, 0, %v310_v0  ;;  %vm7381_vm5 = vmand (!%p6373_p7), %vm315_vm2, %vm316_vm4  ;;  %vm595_vm6 = vcmask (!%p6373_p7), 1043456  }
  0x14   : > { %s7372_s18 = scalar_lea.vmem %s9839_s7, %s6372_s15  ;;  %v322_v6 = vsel (!%p6373_p7), %vm7375_vm3, 0, %v321_v3  ;;  %v325_v7 = vld [vmem:[#allocation2 + $0x28] sm:$0x1f] (!%p6373_p7)  ;;  %v328_v8 = vld [vmem:[#allocation2 + $0x30] sm:$0xf8] (!%p6373_p7)  ;;  %v319_v9 = vsel (!%p6373_p7), %vm7381_vm5, 0, %v318_v2 }
  0x15   : > { %312 = vst [vmem:[#allocation2] sm:$0xf8] (!%p6373_p7), %v311_v4  ;;  %323 = vst [vmem:[#allocation2 + $0x18] sm:$0xf8] (!%p6373_p7), %v322_v6  ;;  %v326_v10 = vsel (!%p6373_p7), %vm7381_vm5, 0, %v325_v7  ;;  %v329_v11 = vsel (!%p6373_p7), %vm7375_vm3, 0, %v328_v8 }
  0x16   : > { %v332_v12 = vld [vmem:[#allocation2 + $0x40] sm:$0x1f] (!%p6373_p7)  ;;  %320 = vst [vmem:[#allocation2 + $0x10] sm:$0x1f] (!%p6373_p7), %v319_v9  ;;  %327 = vst [vmem:[#allocation2 + $0x28] sm:$0x1f] (!%p6373_p7), %v326_v10 }
  0x17   : > { %330 = vst [vmem:[#allocation2 + $0x30] sm:$0xf8] (!%p6373_p7), %v329_v11  ;;  %v333_v13 = vsel (!%p6373_p7), %vm7381_vm5, 0, %v332_v12  ;;  %v335_v14 = vld [vmem:[#allocation2 + $0x48] sm:$0xf8] (!%p6373_p7)  ;;  %vm570_vm7 = vcmask (!%p6373_p7), 64512  }
  0x18   : > { %v339_v15 = vld [vmem:[#allocation2 + $0x58] sm:$0x1f] (!%p6373_p7)  ;;  %334 = vst [vmem:[#allocation2 + $0x40] sm:$0x1f] (!%p6373_p7), %v333_v13  ;;  %v336_v16 = vsel (!%p6373_p7), %vm7375_vm3, 0, %v335_v14  ;;  %vm313_vm8 = vcmask (!%p6373_p7), 31744  }
  0x19   : > { %v340_v17 = vsel (!%p6373_p7), %vm7381_vm5, 0, %v339_v15  ;;  %v342_v18 = vld [vmem:[#allocation2 + $0x60] sm:$0xf8] (!%p6373_p7)  ;;  %v346_v19 = vld [vmem:[#allocation2 + $0x70] sm:$0x1f] (!%p6373_p7) }
  0x1a   : > { %337 = vst [vmem:[#allocation2 + $0x48] sm:$0xf8] %v336_v16  ;;  %341 = vst [vmem:[#allocation2 + $0x58] sm:$0x1f] %v340_v17  ;;  %v343_v20 = vsel %vm7375_vm3, 0, %v342_v18  ;;  %v347_v21 = vsel %vm7381_vm5, 0, %v346_v19 }
  0x1b   : > { %v349_v22 = vld [vmem:[#allocation2 + $0x78] sm:$0xf8]  ;;  %v353_v23 = vld [vmem:[#allocation2 + $0x88] sm:$0x1f]  ;;  %344 = vst [vmem:[#allocation2 + $0x60] sm:$0xf8] %v343_v20 }
  0x1c   : > { %348 = vst [vmem:[#allocation2 + $0x70] sm:$0x1f] %v347_v21  ;;  %v350_v24 = vsel %vm7375_vm3, 0, %v349_v22  ;;  %v354_v25 = vsel %vm7381_vm5, 0, %v353_v23  ;;  %v356_v26 = vld [vmem:[#allocation2 + $0x90] sm:$0xf8] }
  0x1d   : > { %v360_v27 = vld [vmem:[#allocation2 + $0xa0] sm:$0x1f]  ;;  %351 = vst [vmem:[#allocation2 + $0x78] sm:$0xf8] %v350_v24  ;;  %355 = vst [vmem:[#allocation2 + $0x88] sm:$0x1f] %v354_v25 }
  0x1e   : > { %v357_v28 = vsel %vm7375_vm3, 0, %v356_v26  ;;  %v361_v29 = vsel %vm7381_vm5, 0, %v360_v27  ;;  %v363_v30 = vld [vmem:[#allocation2 + $0xa8] sm:$0xf8]  ;;  %v367_v31 = vld [vmem:[#allocation2 + $0xb8] sm:$0x1f] }
  0x1f   : > { %358 = vst [vmem:[#allocation2 + $0x90] sm:$0xf8] %v357_v28  ;;  %362 = vst [vmem:[#allocation2 + $0xa0] sm:$0x1f] %v361_v29  ;;  %v364_v32 = vsel %vm7375_vm3, 0, %v363_v30  ;;  %v368_v33 = vsel %vm7381_vm5, 0, %v367_v31 }
  0x20   : > { %v370_v34 = vld [vmem:[#allocation2 + $0xc0] sm:$0xf8]  ;;  %v374_v35 = vld [vmem:[#allocation2 + $0xd0] sm:$0x1f]  ;;  %365 = vst [vmem:[#allocation2 + $0xa8] sm:$0xf8] %v364_v32 }
  0x21   : > { %369 = vst [vmem:[#allocation2 + $0xb8] sm:$0x1f] %v368_v33  ;;  %v371_v36 = vsel %vm7375_vm3, 0, %v370_v34  ;;  %v375_v37 = vsel %vm7381_vm5, 0, %v374_v35  ;;  %v378_v38 = vld [vmem:[#allocation2 + $0x258] sm:$0xf8] }
  0x22   : > { %v382_v39 = vld [vmem:[#allocation2 + $0x268] sm:$0x1f]  ;;  %372 = vst [vmem:[#allocation2 + $0xc0] sm:$0xf8] %v371_v36  ;;  %376 = vst [vmem:[#allocation2 + $0xd0] sm:$0x1f] %v375_v37 }
  0x23   : > { %v379_v40 = vsel %vm7375_vm3, 0, %v378_v38  ;;  %v383_v41 = vsel %vm7381_vm5, 0, %v382_v39  ;;  %v385_v42 = vld [vmem:[#allocation2 + $0x270] sm:$0xf8]  ;;  %v389_v43 = vld [vmem:[#allocation2 + $0x280] sm:$0x1f] }
  0x24   : > { %380 = vst [vmem:[#allocation2 + $0x258] sm:$0xf8] %v379_v40  ;;  %384 = vst [vmem:[#allocation2 + $0x268] sm:$0x1f] %v383_v41  ;;  %v386_v44 = vsel %vm7375_vm3, 0, %v385_v42  ;;  %v390_v45 = vsel %vm7381_vm5, 0, %v389_v43 }
  0x25   : > { %v392_v46 = vld [vmem:[#allocation2 + $0x288] sm:$0xf8]  ;;  %v396_v47 = vld [vmem:[#allocation2 + $0x298] sm:$0x1f]  ;;  %387 = vst [vmem:[#allocation2 + $0x270] sm:$0xf8] %v386_v44 }
  0x26   : > { %391 = vst [vmem:[#allocation2 + $0x280] sm:$0x1f] %v390_v45  ;;  %v393_v48 = vsel %vm7375_vm3, 0, %v392_v46  ;;  %v397_v49 = vsel %vm7381_vm5, 0, %v396_v47  ;;  %v399_v50 = vld [vmem:[#allocation2 + $0x2a0] sm:$0xf8] }
  0x27   : > { %v403_v51 = vld [vmem:[#allocation2 + $0x2b0] sm:$0x1f]  ;;  %394 = vst [vmem:[#allocation2 + $0x288] sm:$0xf8] %v393_v48  ;;  %398 = vst [vmem:[#allocation2 + $0x298] sm:$0x1f] %v397_v49 }
  0x28   : > { %v400_v52 = vsel %vm7375_vm3, 0, %v399_v50  ;;  %v404_v53 = vsel %vm7381_vm5, 0, %v403_v51  ;;  %v406_v54 = vld [vmem:[#allocation2 + $0x2b8] sm:$0xf8]  ;;  %v410_v55 = vld [vmem:[#allocation2 + $0x2c8] sm:$0x1f] }
  0x29   : > { %401 = vst [vmem:[#allocation2 + $0x2a0] sm:$0xf8] %v400_v52  ;;  %405 = vst [vmem:[#allocation2 + $0x2b0] sm:$0x1f] %v404_v53  ;;  %v407_v56 = vsel %vm7375_vm3, 0, %v406_v54  ;;  %v411_v57 = vsel %vm7381_vm5, 0, %v410_v55 }
  0x2a   : > { %v413_v58 = vld [vmem:[#allocation2 + $0x2d0] sm:$0xf8]  ;;  %v417_v59 = vld [vmem:[#allocation2 + $0x2e0] sm:$0x1f]  ;;  %408 = vst [vmem:[#allocation2 + $0x2b8] sm:$0xf8] %v407_v56 }
  0x2b   : > { %412 = vst [vmem:[#allocation2 + $0x2c8] sm:$0x1f] %v411_v57  ;;  %v414_v60 = vsel %vm7375_vm3, 0, %v413_v58  ;;  %v418_v61 = vsel %vm7381_vm5, 0, %v417_v59  ;;  %v420_v62 = vld [vmem:[#allocation2 + $0x2e8] sm:$0xf8] }
  0x2c   : > { %v424_v63 = vld [vmem:[#allocation2 + $0x2f8] sm:$0x1f]  ;;  %415 = vst [vmem:[#allocation2 + $0x2d0] sm:$0xf8] %v414_v60  ;;  %419 = vst [vmem:[#allocation2 + $0x2e0] sm:$0x1f] %v418_v61 }
  0x2d   : > { %v421_v0 = vsel %vm7375_vm3, 0, %v420_v62  ;;  %v425_v2 = vsel %vm7381_vm5, 0, %v424_v63  ;;  %v427_v3 = vld [vmem:[#allocation2 + $0x300] sm:$0xf8]  ;;  %v431_v4 = vld [vmem:[#allocation2 + $0x310] sm:$0x1f] }
  0x2e   : > { %422 = vst [vmem:[#allocation2 + $0x2e8] sm:$0xf8] %v421_v0  ;;  %426 = vst [vmem:[#allocation2 + $0x2f8] sm:$0x1f] %v425_v2  ;;  %v428_v6 = vsel %vm7375_vm3, 0, %v427_v3  ;;  %v432_v7 = vsel %vm7381_vm5, 0, %v431_v4 }
  0x2f   : > { %v434_v8 = vld [vmem:[#allocation2 + $0x318] sm:$0xf8]  ;;  %v438_v9 = vld [vmem:[#allocation2 + $0x328] sm:$0x1f]  ;;  %429 = vst [vmem:[#allocation2 + $0x300] sm:$0xf8] %v428_v6 }
  0x30   : > { %433 = vst [vmem:[#allocation2 + $0x310] sm:$0x1f] %v432_v7  ;;  %v435_v10 = vsel %vm7375_vm3, 0, %v434_v8  ;;  %v439_v11 = vsel %vm7381_vm5, 0, %v438_v9  ;;  %v442_v12 = vld [vmem:[#allocation2 + $0xd8] sm:$0xf8] }
  0x31   : > { %v445_v13 = vld [vmem:[#allocation2 + $0xf0] sm:$0xf8]  ;;  %436 = vst [vmem:[#allocation2 + $0x318] sm:$0xf8] %v435_v10  ;;  %440 = vst [vmem:[#allocation2 + $0x328] sm:$0x1f] %v439_v11 }
  0x32   : > { %v443_v14 = vsel %vm7375_vm3, 0, %v442_v12  ;;  %v446_v15 = vsel %vm7375_vm3, 0, %v445_v13  ;;  %v448_v16 = vld [vmem:[#allocation2 + $0x108] sm:$0xf8]  ;;  %v451_v17 = vld [vmem:[#allocation2 + $0x120] sm:$0xf8] }
  0x33   : > { %444 = vst [vmem:[#allocation2 + $0xd8] sm:$0xf8] %v443_v14  ;;  %447 = vst [vmem:[#allocation2 + $0xf0] sm:$0xf8] %v446_v15  ;;  %v449_v18 = vsel %vm7375_vm3, 0, %v448_v16  ;;  %v452_v19 = vsel %vm7375_vm3, 0, %v451_v17 }
  0x34   : > { %v454_v20 = vld [vmem:[#allocation2 + $0x138] sm:$0xf8]  ;;  %v457_v21 = vld [vmem:[#allocation2 + $0x150] sm:$0xf8]  ;;  %450 = vst [vmem:[#allocation2 + $0x108] sm:$0xf8] %v449_v18 }
  0x35   : > { %453 = vst [vmem:[#allocation2 + $0x120] sm:$0xf8] %v452_v19  ;;  %v455_v22 = vsel %vm7375_vm3, 0, %v454_v20  ;;  %v458_v23 = vsel %vm7375_vm3, 0, %v457_v21  ;;  %v460_v24 = vld [vmem:[#allocation2 + $0x168] sm:$0xf8] }
  0x36   : > { %v463_v25 = vld [vmem:[#allocation2 + $0x180] sm:$0xf8]  ;;  %456 = vst [vmem:[#allocation2 + $0x138] sm:$0xf8] %v455_v22  ;;  %459 = vst [vmem:[#allocation2 + $0x150] sm:$0xf8] %v458_v23 }
  0x37   : > { %v461_v26 = vsel %vm7375_vm3, 0, %v460_v24  ;;  %v464_v27 = vsel %vm7375_vm3, 0, %v463_v25  ;;  %v466_v28 = vld [vmem:[#allocation2 + $0x198] sm:$0xf8]  ;;  %v469_v29 = vld [vmem:[#allocation2 + $0x1b0] sm:$0xf8] }
  0x38   : > { %462 = vst [vmem:[#allocation2 + $0x168] sm:$0xf8] %v461_v26  ;;  %465 = vst [vmem:[#allocation2 + $0x180] sm:$0xf8] %v464_v27  ;;  %v467_v30 = vsel %vm7375_vm3, 0, %v466_v28  ;;  %v470_v31 = vsel %vm7375_vm3, 0, %v469_v29 }
  0x39   : > { %v472_v32 = vld [vmem:[#allocation2 + $0x1c8] sm:$0xf8]  ;;  %v475_v33 = vld [vmem:[#allocation2 + $0x1e0] sm:$0xf8]  ;;  %468 = vst [vmem:[#allocation2 + $0x198] sm:$0xf8] %v467_v30 }
  0x3a   : > { %471 = vst [vmem:[#allocation2 + $0x1b0] sm:$0xf8] %v470_v31  ;;  %v473_v34 = vsel %vm7375_vm3, 0, %v472_v32  ;;  %v476_v35 = vsel %vm7375_vm3, 0, %v475_v33  ;;  %v478_v36 = vld [vmem:[#allocation2 + $0x1f8] sm:$0xf8] }
  0x3b   : > { %v481_v37 = vld [vmem:[#allocation2 + $0x210] sm:$0xf8]  ;;  %474 = vst [vmem:[#allocation2 + $0x1c8] sm:$0xf8] %v473_v34  ;;  %477 = vst [vmem:[#allocation2 + $0x1e0] sm:$0xf8] %v476_v35 }
  0x3c   : > { %v479_v38 = vsel %vm7375_vm3, 0, %v478_v36  ;;  %v482_v39 = vsel %vm7375_vm3, 0, %v481_v37  ;;  %v484_v40 = vld [vmem:[#allocation2 + $0x228] sm:$0xf8]  ;;  %v487_v41 = vld [vmem:[#allocation2 + $0x240] sm:$0xf8] }
  0x3d   : > { %480 = vst [vmem:[#allocation2 + $0x1f8] sm:$0xf8] %v479_v38  ;;  %483 = vst [vmem:[#allocation2 + $0x210] sm:$0xf8] %v482_v39  ;;  %v485_v42 = vsel %vm7375_vm3, 0, %v484_v40  ;;  %v488_v43 = vsel %vm7375_vm3, 0, %v487_v41 }
  0x3e   : > { %v490_v44 = vld [vmem:[#allocation2 + $0xe8] sm:$0x1f]  ;;  %v493_v45 = vld [vmem:[#allocation2 + $0x100] sm:$0x1f]  ;;  %486 = vst [vmem:[#allocation2 + $0x228] sm:$0xf8] %v485_v42 }
  0x3f   : > { %489 = vst [vmem:[#allocation2 + $0x240] sm:$0xf8] %v488_v43  ;;  %v491_v46 = vsel %vm7381_vm5, 0, %v490_v44  ;;  %v494_v47 = vsel %vm7381_vm5, 0, %v493_v45  ;;  %v496_v48 = vld [vmem:[#allocation2 + $0x118] sm:$0x1f] }
  0x40   : > { %v499_v49 = vld [vmem:[#allocation2 + $0x130] sm:$0x1f]  ;;  %492 = vst [vmem:[#allocation2 + $0xe8] sm:$0x1f] %v491_v46  ;;  %495 = vst [vmem:[#allocation2 + $0x100] sm:$0x1f] %v494_v47 }
  0x41   : > { %v497_v50 = vsel %vm7381_vm5, 0, %v496_v48  ;;  %v500_v1 = vsel %vm7381_vm5, 0, %v499_v49  ;;  %v502_v51 = vld [vmem:[#allocation2 + $0x148] sm:$0x1f]  ;;  %v505_v52 = vld [vmem:[#allocation2 + $0x160] sm:$0x1f] }
  0x42   : > { %498 = vst [vmem:[#allocation2 + $0x118] sm:$0x1f] %v497_v50  ;;  %501 = vst [vmem:[#allocation2 + $0x130] sm:$0x1f] %v500_v1  ;;  %v503_v53 = vsel %vm7381_vm5, 0, %v502_v51  ;;  %v506_v54 = vsel %vm7381_vm5, 0, %v505_v52 }
  0x43   : > { %v508_v55 = vld [vmem:[#allocation2 + $0x178] sm:$0x1f]  ;;  %v511_v56 = vld [vmem:[#allocation2 + $0x190] sm:$0x1f]  ;;  %504 = vst [vmem:[#allocation2 + $0x148] sm:$0x1f] %v503_v53 }
  0x44   : > { %507 = vst [vmem:[#allocation2 + $0x160] sm:$0x1f] %v506_v54  ;;  %v509_v57 = vsel %vm7381_vm5, 0, %v508_v55  ;;  %v512_v58 = vsel %vm7381_vm5, 0, %v511_v56  ;;  %v514_v59 = vld [vmem:[#allocation2 + $0x1a8] sm:$0x1f] }
  0x45   : > { %v517_v60 = vld [vmem:[#allocation2 + $0x1c0] sm:$0x1f]  ;;  %510 = vst [vmem:[#allocation2 + $0x178] sm:$0x1f] %v509_v57  ;;  %513 = vst [vmem:[#allocation2 + $0x190] sm:$0x1f] %v512_v58 }
  0x46   : > { %v515_v61 = vsel %vm7381_vm5, 0, %v514_v59  ;;  %v518_v62 = vsel %vm7381_vm5, 0, %v517_v60  ;;  %v520_v63 = vld [vmem:[#allocation2 + $0x1d8] sm:$0x1f]  ;;  %v523_v0 = vld [vmem:[#allocation2 + $0x1f0] sm:$0x1f] }
  0x47   : > { %v538_v2 = vld [vmem:[%s7367_s13] sm:$0xff]  ;;  %516 = vst [vmem:[#allocation2 + $0x1a8] sm:$0x1f] %v515_v61  ;;  %519 = vst [vmem:[#allocation2 + $0x1c0] sm:$0x1f] %v518_v62  ;;  %v521_v3 = vsel %vm7381_vm5, 0, %v520_v63 }
  0x48   : > { %v524_v4 = vsel %vm7381_vm5, 0, %v523_v0  ;;  %v526_v6 = vld [vmem:[#allocation2 + $0x208] sm:$0x1f]  ;;  %v529_v7 = vld [vmem:[#allocation2 + $0x220] sm:$0x1f]  ;;  %v540_v22 = vld [vmem:[%s7367_s13 + $0x10] sm:$0xff] }
  0x49   : > { %522 = vst [vmem:[#allocation2 + $0x1d8] sm:$0x1f] %v521_v3  ;;  %525 = vst [vmem:[#allocation2 + $0x1f0] sm:$0x1f] %v524_v4  ;;  %v527_v8 = vsel %vm7381_vm5, 0, %v526_v6  ;;  %v530_v9 = vsel %vm7381_vm5, 0, %v529_v7 }
  0x4a   : > { %v532_v10 = vld [vmem:[#allocation2 + $0x238] sm:$0x1f]  ;;  %v535_v11 = vld [vmem:[#allocation2 + $0x250] sm:$0x1f]  ;;  %528 = vst [vmem:[#allocation2 + $0x208] sm:$0x1f] %v527_v8 }
  0x4b   : > { %531 = vst [vmem:[#allocation2 + $0x220] sm:$0x1f] %v530_v9  ;;  %v533_v12 = vsel %vm7381_vm5, 0, %v532_v10  ;;  %v536_v13 = vsel %vm7381_vm5, 0, %v535_v11  ;;  %v562_v14 = vld [vmem:[%s9833_s1] sm:$0xf] }
  0x4c   : > { %v769_v15 = vld [vmem:[%s9833_s1] sm:$0xf]  ;;  %534 = vst [vmem:[#allocation2 + $0x238] sm:$0x1f] %v533_v12  ;;  %537 = vst [vmem:[#allocation2 + $0x250] sm:$0x1f] %v536_v13  ;;  %7167 = vmatprep.subr.msk.bf16.mxu0 %vm595_vm6, %v562_v14 }
  0x4d   : > { %7168 = vmatprep.subr.msk.bf16.mxu1 %vm595_vm6, %v769_v15  ;;  %v597_v5 = vsel %vm595_vm6, %v562_v14, 0  ;;  %v802_v16 = vsel %vm595_vm6, %v769_v15, 0  ;;  %v539_v17 = vld [vmem:[%s7367_s13 + $0x8] sm:$0xff]  ;;  %v6383_v18 = vld [vmem:[%s7367_s13 + $0x80] sm:$0xff]  ;;  %v541_v23 = vld [vmem:[%s7367_s13 + $0x18] sm:$0xff]  ;;  %v7282_v63 = vmov 0  }
  0x4e   : > { %v6384_v19 = vld [vmem:[%s7367_s13 + $0x88] sm:$0xff]  ;;  %7020 = vmatpush3.bf16.msra.mxu0 %v597_v5  ;;  %7038 = vmatpush3.bf16.msra.mxu1 %v802_v16  ;;  %v554_v20 = vpack.c.bf16 %v539_v17, %v538_v2  ;;  %v6385_v24 = vld [vmem:[%s7367_s13 + $0x90] sm:$0xff]  ;;  %v555_v25 = vpack.c.bf16 %v541_v23, %v540_v22  ;;  %v6386_v26 = vld [vmem:[%s7367_s13 + $0x98] sm:$0xff]  ;;  %314 = vst.msk [vmem:[#allocation2 + $0x8] sm:$0xff] %vm313_vm8, %v7282_v63 }
  0x4f   : > { %v761_v21 = vpack.c.bf16 %v6384_v19, %v6383_v18  ;;  %v542_v27 = vld [vmem:[%s7367_s13 + $0x20] sm:$0xff]  ;;  %v543_v28 = vld [vmem:[%s7367_s13 + $0x28] sm:$0xff]  ;;  %v762_v29 = vpack.c.bf16 %v6386_v26, %v6385_v24  ;;  %v544_v34 = vld [vmem:[%s7367_s13 + $0x30] sm:$0xff]  ;;  %324 = vst.msk [vmem:[#allocation2 + $0x20] sm:$0xff] %vm313_vm8, %v7282_v63 }
  0x50   : > { %7021 = vmatprep.mubr.msk.bf16.mxu0 %vm570_vm7, %v554_v20  ;;  %v556_v30 = vpack.c.bf16 %v543_v28, %v542_v27  ;;  %v6387_v31 = vld [vmem:[%s7367_s13 + $0xa0] sm:$0xff]  ;;  %v6388_v32 = vld [vmem:[%s7367_s13 + $0xa8] sm:$0xff]  ;;  %v545_v35 = vld [vmem:[%s7367_s13 + $0x38] sm:$0xff]  ;;  %331 = vst.msk [vmem:[#allocation2 + $0x38] sm:$0xff] %vm313_vm8, %v7282_v63 }
  0x51   : > { %7039 = vmatprep.mubr.msk.bf16.mxu1 %vm570_vm7, %v761_v21  ;;  %7022 = vmatmul.mubr.msk.bf16.vlgmr.msra.gmra.mrb[0].mxu0 %vm570_vm7, %v555_v25  ;;  %v763_v33 = vpack.c.bf16 %v6388_v32, %v6387_v31  ;;  %v6389_v36 = vld [vmem:[%s7367_s13 + $0xb0] sm:$0xff]  ;;  %v6390_v37 = vld [vmem:[%s7367_s13 + $0xb8] sm:$0xff]  ;;  %v546_v38 = vld [vmem:[%s7367_s13 + $0x40] sm:$0xff]  ;;  %v557_v42 = vpack.c.bf16 %v545_v35, %v544_v34  ;;  %338 = vst.msk [vmem:[#allocation2 + $0x50] sm:$0xff] %vm313_vm8, %v7282_v63 }
  0x52   : > { %7040 = vmatmul.mubr.msk.bf16.vlgmr.msra.gmra.mrb[0].mxu1 %vm570_vm7, %v762_v29  ;;  %7025 = vmatprep.mubr.msk.bf16.mxu0 %vm570_vm7, %v556_v30  ;;  %v547_v39 = vld [vmem:[%s7367_s13 + $0x48] sm:$0xff]  ;;  %v6391_v40 = vld [vmem:[%s7367_s13 + $0xc0] sm:$0xff]  ;;  %v764_v43 = vpack.c.bf16 %v6390_v37, %v6389_v36  ;;  %v548_v46 = vld [vmem:[%s7367_s13 + $0x50] sm:$0xff]  ;;  %345 = vst.msk [vmem:[#allocation2 + $0x68] sm:$0xff] %vm313_vm8, %v7282_v63 }
  0x53   : > { %7043 = vmatprep.mubr.msk.bf16.mxu1 %vm570_vm7, %v763_v33  ;;  %v6392_v41 = vld [vmem:[%s7367_s13 + $0xc8] sm:$0xff]  ;;  %v558_v44 = vpack.c.bf16 %v547_v39, %v546_v38  ;;  %v549_v47 = vld [vmem:[%s7367_s13 + $0x58] sm:$0xff]  ;;  %v6393_v48 = vld [vmem:[%s7367_s13 + $0xd0] sm:$0xff]  ;;  %352 = vst.msk [vmem:[#allocation2 + $0x80] sm:$0xff] %vm313_vm8, %v7282_v63 }
  0x54   : > { %v765_v45 = vpack.c.bf16 %v6392_v41, %v6391_v40  ;;  %v6394_v49 = vld [vmem:[%s7367_s13 + $0xd8] sm:$0xff]  ;;  %v550_v50 = vld [vmem:[%s7367_s13 + $0x60] sm:$0xff]  ;;  %v551_v1 = vld [vmem:[%s7367_s13 + $0x68] sm:$0xff]  ;;  %v559_v53 = vpack.c.bf16 %v549_v47, %v548_v46  ;;  %359 = vst.msk [vmem:[#allocation2 + $0x98] sm:$0xff] %vm313_vm8, %v7282_v63 }
  0x55   : > { %v6395_v51 = vld [vmem:[%s7367_s13 + $0xe0] sm:$0xff]  ;;  %v6396_v52 = vld [vmem:[%s7367_s13 + $0xe8] sm:$0xff]  ;;  %v766_v54 = vpack.c.bf16 %v6394_v49, %v6393_v48  ;;  %v560_v55 = vpack.c.bf16 %v551_v1, %v550_v50  ;;  %v552_v57 = vld [vmem:[%s7367_s13 + $0x70] sm:$0xff]  ;;  %366 = vst.msk [vmem:[#allocation2 + $0xb0] sm:$0xff] %vm313_vm8, %v7282_v63 }
  0x56   : > { %v767_v56 = vpack.c.bf16 %v6396_v52, %v6395_v51  ;;  %v553_v58 = vld [vmem:[%s7367_s13 + $0x78] sm:$0xff]  ;;  %v6397_v59 = vld [vmem:[%s7367_s13 + $0xf0] sm:$0xff]  ;;  %373 = vst.msk [vmem:[#allocation2 + $0xc8] sm:$0xff] %vm313_vm8, %v7282_v63  ;;  %381 = vst.msk [vmem:[#allocation2 + $0x260] sm:$0xff] %vm313_vm8, %v7282_v63 }
  0x57   : > { %v6398_v60 = vld [vmem:[%s7367_s13 + $0xf8] sm:$0xff]  ;;  %v561_v61 = vpack.c.bf16 %v553_v58, %v552_v57  ;;  %388 = vst.msk [vmem:[#allocation2 + $0x278] sm:$0xff] %vm313_vm8, %v7282_v63  ;;  %395 = vst.msk [vmem:[#allocation2 + $0x290] sm:$0xff] %vm313_vm8, %v7282_v63  ;;  %v7598_v0 = vld [vmem:[%s9834_s2] ss:$0 sm:$0xff] }
  0x58   : > { %v768_v62 = vpack.c.bf16 %v6398_v60, %v6397_v59  ;;  %402 = vst.msk [vmem:[#allocation2 + $0x2a8] sm:$0xff] %vm313_vm8, %v7282_v63  ;;  %409 = vst.msk [vmem:[#allocation2 + $0x2c0] sm:$0xff] %vm313_vm8, %v7282_v63 }
  0x59   : > { %7026 = vmatmul.mubr.msk.bf16.gmra.mrb[4].mxu0 %vm570_vm7, %v557_v42  ;;  %416 = vst.msk [vmem:[#allocation2 + $0x2d8] sm:$0xff] %vm313_vm8, %v7282_v63  ;;  %423 = vst.msk [vmem:[#allocation2 + $0x2f0] sm:$0xff] %vm313_vm8, %v7282_v63 }
  0x5a   : > { %7044 = vmatmul.mubr.msk.bf16.gmra.mrb[4].mxu1 %vm570_vm7, %v764_v43  ;;  %7029 = vmatprep.mubr.msk.bf16.mxu0 %vm570_vm7, %v558_v44  ;;  %430 = vst.msk [vmem:[#allocation2 + $0x308] sm:$0xff] %vm313_vm8, %v7282_v63  ;;  %437 = vst.msk [vmem:[#allocation2 + $0x320] sm:$0xff] %vm313_vm8, %v7282_v63 }
  0x5b   : > { %7047 = vmatprep.mubr.msk.bf16.mxu1 %vm570_vm7, %v765_v45 }
  0x61   : > { %7030 = vmatmul.mubr.msk.bf16.gmra.mrb[8].mxu0 %vm570_vm7, %v559_v53 }
  0x62   : > { %7048 = vmatmul.mubr.msk.bf16.gmra.mrb[8].mxu1 %vm570_vm7, %v766_v54  ;;  %7033 = vmatprep.mubr.msk.bf16.mxu0 %vm570_vm7, %v560_v55 }
  0x63   : > { %7051 = vmatprep.mubr.msk.bf16.mxu1 %vm570_vm7, %v767_v56 }
  0x69   : > { %7034 = vmatmul.mubr.msk.bf16.gmra.mrb[12].mxu0 %vm570_vm7, %v561_v61 }
  0x6a   : > { %7052 = vmatmul.mubr.msk.bf16.gmra.mrb[12].mxu1 %vm570_vm7, %v768_v62 }
 0x124   : > { %v7023_v2 = vpop.f32.mrb[0].mxu0 }
 0x125   : > { %v642_v3 = vadd.f32 %v7023_v2, %v7598_v0  ;;  %v7041_v4 = vpop.f32.mrb[0].mxu1  ;;  %v633_v6 = vpop.f32.mrb[1].mxu0 }
 0x126   : > { %v847_v7 = vadd.f32 %v7041_v4, %v7598_v0  ;;  %v634_v8 = vadd.f32 %v7598_v0, %v633_v6  ;;  %v838_v9 = vpop.f32.mrb[1].mxu1  ;;  %v7024_v10 = vpop.f32.mrb[2].mxu0 }
 0x127   : > { %v698_v11 = vmax.f32 %v642_v3, 0.0  ;;  %v839_v12 = vadd.f32 %v7598_v0, %v838_v9  ;;  %v645_v13 = vadd.f32 %v7024_v10, %v7598_v0  ;;  %v7042_v14 = vpop.f32.mrb[2].mxu1  ;;  %v636_v15 = vpop.f32.mrb[3].mxu0 }
 0x128   : > { %v903_v5 = vmax.f32 %v847_v7, 0.0  ;;  %v696_v16 = vmax.f32 %v634_v8, 0.0  ;;  %v850_v17 = vadd.f32 %v7042_v14, %v7598_v0  ;;  %v637_v18 = vadd.f32 %v7598_v0, %v636_v15  ;;  %v841_v19 = vpop.f32.mrb[3].mxu1 }
 0x129   : > { %v901_v20 = vmax.f32 %v839_v12, 0.0  ;;  %v699_v21 = vmax.f32 %v645_v13, 0.0  ;;  %v842_v22 = vadd.f32 %v7598_v0, %v841_v19  ;;  %v714_v25 = vmin.f32 %v698_v11, 6.0 }
 0x12a   : > { %v904_v23 = vmax.f32 %v850_v17, 0.0  ;;  %v697_v24 = vmax.f32 %v637_v18, 0.0  ;;  %v919_v28 = vmin.f32 %v903_v5, 6.0  ;;  %v712_v29 = vmin.f32 %v696_v16, 6.0 }
 0x12b   : > { %v715_v26 = vmin.f32 %v699_v21, 6.0  ;;  %v902_v27 = vmax.f32 %v842_v22, 0.0  ;;  %v917_v33 = vmin.f32 %v901_v20, 6.0 }
 0x12c   : > { %v920_v30 = vmin.f32 %v904_v23, 6.0  ;;  %v713_v31 = vmin.f32 %v697_v24, 6.0  ;;  %v7027_v32 = vpop.f32.mrb[4].mxu0 }
 0x12d   : > { %v729_v34 = vpack.c.bf16 %v715_v26, %v714_v25  ;;  %v918_v35 = vmin.f32 %v902_v27, 6.0  ;;  %v658_v36 = vadd.f32 %v7027_v32, %v7598_v0  ;;  %v7045_v37 = vpop.f32.mrb[4].mxu1  ;;  %v649_v38 = vpop.f32.mrb[5].mxu0 }
 0x12e   : > { %v934_v39 = vpack.c.bf16 %v920_v30, %v919_v28  ;;  %v728_v40 = vpack.c.bf16 %v713_v31, %v712_v29  ;;  %v863_v41 = vadd.f32 %v7045_v37, %v7598_v0  ;;  %v650_v42 = vadd.f32 %v7598_v0, %v649_v38  ;;  %v854_v43 = vpop.f32.mrb[5].mxu1  ;;  %v7028_v44 = vpop.f32.mrb[6].mxu0 }
 0x12f   : > { %737 = vst.msk [vmem:[#allocation2 + $0xf8] sm:$0xff] %vm313_vm8, %v729_v34  ;;  %v933_v45 = vpack.c.bf16 %v918_v35, %v917_v33  ;;  %v702_v46 = vmax.f32 %v658_v36, 0.0  ;;  %v855_v47 = vadd.f32 %v7598_v0, %v854_v43  ;;  %v661_v48 = vadd.f32 %v7028_v44, %v7598_v0  ;;  %v7046_v49 = vpop.f32.mrb[6].mxu1  ;;  %v652_v50 = vpop.f32.mrb[7].mxu0 }
 0x130   : > { %943 = vst.msk [vmem:[#allocation2 + $0x1b8] sm:$0xff] %vm313_vm8, %v934_v39  ;;  %736 = vst.msk [vmem:[#allocation2 + $0xe0] sm:$0xff] %vm313_vm8, %v728_v40  ;;  %v907_v1 = vmax.f32 %v863_v41, 0.0  ;;  %v700_v51 = vmax.f32 %v650_v42, 0.0  ;;  %v866_v52 = vadd.f32 %v7046_v49, %v7598_v0  ;;  %v653_v53 = vadd.f32 %v7598_v0, %v652_v50  ;;  %v857_v54 = vpop.f32.mrb[7].mxu1 }
 0x131   : > { %942 = vst.msk [vmem:[#allocation2 + $0x1a0] sm:$0xff] %vm313_vm8, %v933_v45  ;;  %v905_v55 = vmax.f32 %v855_v47, 0.0  ;;  %v703_v56 = vmax.f32 %v661_v48, 0.0  ;;  %v858_v57 = vadd.f32 %v7598_v0, %v857_v54  ;;  %v718_v60 = vmin.f32 %v702_v46, 6.0 }
 0x132   : > { %v908_v58 = vmax.f32 %v866_v52, 0.0  ;;  %v701_v59 = vmax.f32 %v653_v53, 0.0  ;;  %v923_v63 = vmin.f32 %v907_v1, 6.0  ;;  %v716_v2 = vmin.f32 %v700_v51, 6.0 }
 0x133   : > { %v719_v61 = vmin.f32 %v703_v56, 6.0  ;;  %v906_v62 = vmax.f32 %v858_v57, 0.0  ;;  %v921_v7 = vmin.f32 %v905_v55, 6.0 }
 0x134   : > { %v924_v3 = vmin.f32 %v908_v58, 6.0  ;;  %v717_v4 = vmin.f32 %v701_v59, 6.0  ;;  %v7031_v6 = vpop.f32.mrb[8].mxu0 }
 0x135   : > { %v731_v8 = vpack.c.bf16 %v719_v61, %v718_v60  ;;  %v922_v9 = vmin.f32 %v906_v62, 6.0  ;;  %v674_v10 = vadd.f32 %v7031_v6, %v7598_v0  ;;  %v7049_v11 = vpop.f32.mrb[8].mxu1  ;;  %v665_v12 = vpop.f32.mrb[9].mxu0 }
 0x136   : > { %v936_v13 = vpack.c.bf16 %v924_v3, %v923_v63  ;;  %v730_v14 = vpack.c.bf16 %v717_v4, %v716_v2  ;;  %v879_v15 = vadd.f32 %v7049_v11, %v7598_v0  ;;  %v666_v5 = vadd.f32 %v7598_v0, %v665_v12  ;;  %v870_v16 = vpop.f32.mrb[9].mxu1  ;;  %v7032_v17 = vpop.f32.mrb[10].mxu0 }
 0x137   : > { %739 = vst.msk [vmem:[#allocation2 + $0x128] sm:$0xff] %vm313_vm8, %v731_v8  ;;  %v935_v18 = vpack.c.bf16 %v922_v9, %v921_v7  ;;  %v706_v19 = vmax.f32 %v674_v10, 0.0  ;;  %v871_v20 = vadd.f32 %v7598_v0, %v870_v16  ;;  %v677_v21 = vadd.f32 %v7032_v17, %v7598_v0  ;;  %v7050_v22 = vpop.f32.mrb[10].mxu1  ;;  %v668_v23 = vpop.f32.mrb[11].mxu0 }
 0x138   : > { %945 = vst.msk [vmem:[#allocation2 + $0x1e8] sm:$0xff] %vm313_vm8, %v936_v13  ;;  %738 = vst.msk [vmem:[#allocation2 + $0x110] sm:$0xff] %vm313_vm8, %v730_v14  ;;  %v911_v24 = vmax.f32 %v879_v15, 0.0  ;;  %v704_v25 = vmax.f32 %v666_v5, 0.0  ;;  %v882_v26 = vadd.f32 %v7050_v22, %v7598_v0  ;;  %v669_v27 = vadd.f32 %v7598_v0, %v668_v23  ;;  %v873_v28 = vpop.f32.mrb[11].mxu1 }
 0x139   : > { %944 = vst.msk [vmem:[#allocation2 + $0x1d0] sm:$0xff] %vm313_vm8, %v935_v18  ;;  %v909_v29 = vmax.f32 %v871_v20, 0.0  ;;  %v707_v30 = vmax.f32 %v677_v21, 0.0  ;;  %v874_v31 = vadd.f32 %v7598_v0, %v873_v28  ;;  %v722_v34 = vmin.f32 %v706_v19, 6.0 }
 0x13a   : > { %v912_v32 = vmax.f32 %v882_v26, 0.0  ;;  %v705_v33 = vmax.f32 %v669_v27, 0.0  ;;  %v927_v37 = vmin.f32 %v911_v24, 6.0  ;;  %v720_v38 = vmin.f32 %v704_v25, 6.0 }
 0x13b   : > { %v723_v35 = vmin.f32 %v707_v30, 6.0  ;;  %v910_v36 = vmax.f32 %v874_v31, 0.0  ;;  %v925_v42 = vmin.f32 %v909_v29, 6.0 }
 0x13c   : > { %v928_v39 = vmin.f32 %v912_v32, 6.0  ;;  %v721_v40 = vmin.f32 %v705_v33, 6.0  ;;  %v7035_v41 = vpop.f32.mrb[12].mxu0 }
 0x13d   : > { %v733_v43 = vpack.c.bf16 %v723_v35, %v722_v34  ;;  %v926_v44 = vmin.f32 %v910_v36, 6.0  ;;  %v690_v45 = vadd.f32 %v7035_v41, %v7598_v0  ;;  %v7053_v46 = vpop.f32.mrb[12].mxu1  ;;  %v681_v47 = vpop.f32.mrb[13].mxu0 }
 0x13e   : > { %v938_v48 = vpack.c.bf16 %v928_v39, %v927_v37  ;;  %v732_v49 = vpack.c.bf16 %v721_v40, %v720_v38  ;;  %v895_v50 = vadd.f32 %v7053_v46, %v7598_v0  ;;  %v682_v1 = vadd.f32 %v7598_v0, %v681_v47  ;;  %v886_v51 = vpop.f32.mrb[13].mxu1  ;;  %v7036_v52 = vpop.f32.mrb[14].mxu0 }
 0x13f   : > { %741 = vst.msk [vmem:[#allocation2 + $0x158] sm:$0xff] %vm313_vm8, %v733_v43  ;;  %v937_v53 = vpack.c.bf16 %v926_v44, %v925_v42  ;;  %v710_v54 = vmax.f32 %v690_v45, 0.0  ;;  %v887_v55 = vadd.f32 %v7598_v0, %v886_v51  ;;  %v693_v56 = vadd.f32 %v7036_v52, %v7598_v0  ;;  %v7054_v57 = vpop.f32.mrb[14].mxu1  ;;  %v684_v58 = vpop.f32.mrb[15].mxu0 }
 0x140   : > { %947 = vst.msk [vmem:[#allocation2 + $0x218] sm:$0xff] %vm313_vm8, %v938_v48  ;;  %740 = vst.msk [vmem:[#allocation2 + $0x140] sm:$0xff] %vm313_vm8, %v732_v49  ;;  %v915_v59 = vmax.f32 %v895_v50, 0.0  ;;  %v708_v60 = vmax.f32 %v682_v1, 0.0  ;;  %v898_v61 = vadd.f32 %v7054_v57, %v7598_v0  ;;  %v685_v62 = vadd.f32 %v7598_v0, %v684_v58  ;;  %v889_v63 = vpop.f32.mrb[15].mxu1 }
 0x141   : > { %946 = vst.msk [vmem:[#allocation2 + $0x200] sm:$0xff] %vm313_vm8, %v937_v53  ;;  %v913_v2 = vmax.f32 %v887_v55, 0.0  ;;  %v711_v3 = vmax.f32 %v693_v56, 0.0  ;;  %v890_v4 = vadd.f32 %v7598_v0, %v889_v63  ;;  %v726_v8 = vmin.f32 %v710_v54, 6.0 }
 0x142   : > { %v916_v6 = vmax.f32 %v898_v61, 0.0  ;;  %v709_v7 = vmax.f32 %v685_v62, 0.0  ;;  %v931_v11 = vmin.f32 %v915_v59, 6.0  ;;  %v724_v12 = vmin.f32 %v708_v60, 6.0 }
 0x143   : > { %v727_v9 = vmin.f32 %v711_v3, 6.0  ;;  %v914_v10 = vmax.f32 %v890_v4, 0.0  ;;  %v929_v15 = vmin.f32 %v913_v2, 6.0 }
 0x144   : > { %v932_v13 = vmin.f32 %v916_v6, 6.0  ;;  %v725_v14 = vmin.f32 %v709_v7, 6.0 }
 0x145   : > { %v735_v5 = vpack.c.bf16 %v727_v9, %v726_v8  ;;  %v930_v16 = vmin.f32 %v914_v10, 6.0 }
 0x146   : > { %v940_v17 = vpack.c.bf16 %v932_v13, %v931_v11  ;;  %v734_v18 = vpack.c.bf16 %v725_v14, %v724_v12 }
 0x147   : > { %743 = vst.msk [vmem:[#allocation2 + $0x188] sm:$0xff] %vm313_vm8, %v735_v5  ;;  %v939_v19 = vpack.c.bf16 %v930_v16, %v929_v15 }
 0x148   : > { %949 = vst.msk [vmem:[#allocation2 + $0x248] sm:$0xff] %vm313_vm8, %v940_v17  ;;  %742 = vst.msk [vmem:[#allocation2 + $0x170] sm:$0xff] %vm313_vm8, %v734_v18 }
 0x149   : > { %948 = vst.msk [vmem:[#allocation2 + $0x230] sm:$0xff] %vm313_vm8, %v939_v19 }
 0x14a PF: > { %s6410_s8 = smul.u32 192, %s7264_s24  ;;  %vm1150_vm9 = vsmask.f32 7424  ;;  %s7283_s10 = smov 4   ;;  %vm971_vm10 = vsmask.f32 256 }
 0x14b   : > { %s7284_s11 = smov 8   ;;  %s7285_s12 = smov 12   ;;  %vm1076_vm11 = vcmask 31744   ;;  %vm1125_vm12 = vcmask 64544   ;;  %vm2026_vm13 = vcmask 1041408   ;;  %vm1271_vm14 = vcmask 97344  }
 0x14c   : > { %s7649_s9 = scalar_lea.vmem [#allocation2], %s6410_s8  ;;  %s7286_s14 = smov 16   ;;  %vm2412_vm15 = vsmask.f32 6400  ;;  %vm1420_vm0 = vcmask 130144   ;;  %vm1469_vm2 = vcmask 162944  }
 0x14d   : > { %s7287_s15 = smov 20   ;;  %s7288_s16 = smov 24   ;;  %vm2195_vm1 = vsmask.f32 1280  ;;  %vm1614_vm3 = vcmask 195744   ;;  %vm1763_vm4 = vcmask 228544  }
 0x14e   : > { %s7289_s20 = smov 28   ;;  %s7290_s23 = smov 32   ;;  %vm1812_vm5 = vcmask 261344   ;;  %vm1957_vm6 = vcmask 294144   ;;  %vm2001_vm7 = vcmask 293888   ;;  %vm3815_vm8 = vcmask 1044480  }
 0x150   : > { %v7652_v0 = vld [vmem:[%s7649_s9 + $0xe0] sm:$0xff]  ;;  %v7655_v20 = vld [vmem:[%s7649_s9 + $0xc8] sm:$0xff]  ;;  %v6444_v23 = vld [vmem:[%s7649_s9 + $0x130] sm:$0x1] }
 0x151   : > { %v7658_v21 = vld [vmem:[%s7649_s9 + $0x140] sm:$0xff]  ;;  %1103 = vrot.lane.b32.xlu1 %v7652_v0, %s7283_s10  ;;  %1101 = vrot.lane.b32.xlu0 %v7655_v20, %s7283_s10  ;;  %v7665_v22 = vld [vmem:[%s7649_s9 + $0x128] sm:$0xff]  ;;  %v1152_v24 = vshrl.u32 %v7655_v20, 16  ;;  %v1154_v25 = vshll.u32 %v7655_v20, 16  ;;  %v1207_v29 = vshll.u32 %v6444_v23, 16  ;;  %v1164_v43 = vshrl.u32 %v7652_v0, 16 }
 0x152   : > { %v1212_v26 = vshrl.u32 %v7658_v21, 16  ;;  %v1200_v27 = vshrl.u32 %v7665_v22, 16  ;;  %v1202_v28 = vshll.u32 %v7665_v22, 16  ;;  %v6436_v30 = vld [vmem:[%s7649_s9 + $0xd0] sm:$0x1]  ;;  %v1214_v31 = vshll.u32 %v7658_v21, 16 }
 0x153   : > { %v1156_v32 = vrot.slane %v1154_v25, 1  ;;  %v1159_v33 = vshll.u32 %v6436_v30, 16  ;;  %v6446_v34 = vld [vmem:[%s7649_s9 + $0x148] sm:$0x1]  ;;  %v1209_v37 = vrot.slane %v1207_v29, 1  ;;  %v1166_v44 = vshll.u32 %v7652_v0, 16 }
 0x154   : > { %v6438_v35 = vld [vmem:[%s7649_s9 + $0xe8] sm:$0x1]  ;;  %v1204_v36 = vrot.slane %v1202_v28, 1  ;;  %v1216_v38 = vrot.slane %v1214_v31, 1  ;;  %v1219_v39 = vshll.u32 %v6446_v34, 16  ;;  %v1355_v52 = vrot.slane %v1212_v26, 7 }
 0x155   : > { %v6461_v40 = vld [vmem:[%s7649_s9 + $0x138] sm:$0x80]  ;;  %1111 = vrot.lane.b32.xlu1 %v7658_v21, %s7283_s10  ;;  %1109 = vrot.lane.b32.xlu0 %v7665_v22, %s7283_s10  ;;  %v1157_v41 = vor.u32 %v1156_v32, %v1152_v24  ;;  %v1161_v42 = vrot.slane %v1159_v33, 1  ;;  %v1171_v49 = vshll.u32 %v6438_v35, 16  ;;  %v1168_v1 = vrot.slane %v1166_v44, 1 }
 0x156   : > { %v6453_v45 = vld [vmem:[%s7649_s9 + $0xd8] sm:$0x80]  ;;  %v7693_v46 = vor.u32 %v1204_v36, %v1200_v27  ;;  %v7695_v47 = vor.u32 %v1216_v38, %v1212_v26  ;;  %v1221_v48 = vrot.slane %v1219_v39, 1  ;;  %v1349_v51 = vshrl.u32 %v6461_v40, 16  ;;  %v6463_v53 = vld [vmem:[%s7649_s9 + $0x150] sm:$0x80] }
 0x157   : > { %v1162_v50 = vsel %vm1150_vm9, %v1157_v41, %v1161_v42  ;;  %v7700_v54 = vld [vmem:[%s7649_s9 + $0x158] sm:$0xff]  ;;  %v1173_v57 = vrot.slane %v1171_v49, 1  ;;  %v1301_v58 = vshrl.u32 %v6453_v45, 16  ;;  %v6455_v59 = vld [vmem:[%s7649_s9 + $0xf0] sm:$0x80]  ;;  %v1169_v60 = vor.u32 %v1168_v1, %v1164_v43 }
 0x158   : > { %v1210_v55 = vsel %vm1150_vm9, %v7693_v46, %v1209_v37  ;;  %v1222_v56 = vsel %vm1150_vm9, %v7695_v47, %v1221_v48  ;;  %v1351_v61 = vrot.slane %v1349_v51, 7  ;;  %v7709_v62 = vor.u32 %v1355_v52, %v1214_v31  ;;  %v7712_v2 = vld [vmem:[%s7649_s9 + $0xf8] sm:$0xff]  ;;  %v6486_v29 = vld [vmem:[%s7649_s9 + $0x148] sm:$0x1]  ;;  %v6488_v31 = vld [vmem:[%s7649_s9 + $0x160] sm:$0x1] }
 0x159   : > { %1255 = vrot.lane.b32.xlu1 %v1210_v55, %s7284_s11  ;;  %1247 = vrot.lane.b32.xlu0 %v1162_v50, %s7284_s11  ;;  %v1307_v63 = vrot.slane %v1164_v43, 7  ;;  %v1303_v3 = vrot.slane %v1301_v58, 7  ;;  %v1361_v4 = vshrl.u32 %v6463_v53, 16  ;;  %v1365_v6 = vshrl.u32 %v7700_v54, 16  ;;  %v6478_v30 = vld [vmem:[%s7649_s9 + $0xe8] sm:$0x1] }
 0x15a   : > { %v1368_v7 = vshll.u32 %v7700_v54, 16  ;;  %v1174_v8 = vsel %vm1150_vm9, %v1169_v60, %v1173_v57  ;;  %v1313_v10 = vshrl.u32 %v6455_v59, 16  ;;  %v1317_v12 = vshrl.u32 %v7712_v2, 16  ;;  %v6480_v32 = vld [vmem:[%s7649_s9 + $0x100] sm:$0x1]  ;;  %v7744_v43 = vld [vmem:[%s7649_s9 + $0x170] sm:$0xff] }
 0x15b   : > { %v7717_v9 = vor.u32 %v1307_v63, %v1166_v44  ;;  %v1367_v11 = vrot.slane %v1365_v6, 7  ;;  %v1320_v13 = vshll.u32 %v7712_v2, 16  ;;  %v1359_v14 = vsel %vm971_vm10, %v1351_v61, %v7709_v62  ;;  %v6503_v41 = vld [vmem:[%s7649_s9 + $0x150] sm:$0x80]  ;;  %v6505_v53 = vld [vmem:[%s7649_s9 + $0x168] sm:$0x80] }
 0x15c   : > { %v1363_v15 = vrot.slane %v1361_v4, 7  ;;  %v1315_v17 = vrot.slane %v1313_v10, 7  ;;  %v1319_v18 = vrot.slane %v1317_v12, 7  ;;  %v1550_v33 = vshll.u32 %v6486_v29, 16  ;;  %v6495_v42 = vld [vmem:[%s7649_s9 + $0xf0] sm:$0x80] }
 0x15d   : > { %1257 = vrot.lane.b32.xlu1 %v1222_v56, %s7284_s11  ;;  %1249 = vrot.lane.b32.xlu0 %v1174_v8, %s7284_s11  ;;  %v1311_v5 = vsel %vm971_vm10, %v1303_v3, %v7717_v9  ;;  %v1370_v16 = vor.u32 %v1368_v7, %v1367_v11  ;;  %v1502_v34 = vshll.u32 %v6478_v30, 16  ;;  %v1559_v35 = vrot.slane %v1368_v7, 1  ;;  %v7747_v44 = vld [vmem:[%s7649_s9 + $0x110] sm:$0xff]  ;;  %v6497_v57 = vld [vmem:[%s7649_s9 + $0x108] sm:$0x80] }
 0x15e   : > { %v1322_v19 = vor.u32 %v1320_v13, %v1319_v18  ;;  %v1562_v36 = vshll.u32 %v6488_v31, 16  ;;  %v1511_v37 = vrot.slane %v1320_v13, 1  ;;  %v1514_v38 = vshll.u32 %v6480_v32, 16  ;;  %v6528_v18 = vld [vmem:[%s7649_s9 + $0x160] sm:$0x1] }
 0x15f   : > { %v1371_v23 = vsel %vm971_vm10, %v1363_v15, %v1370_v16  ;;  %v1552_v39 = vrot.slane %v1550_v33, 1  ;;  %v1504_v40 = vrot.slane %v1502_v34, 1  ;;  %v7749_v45 = vor.u32 %v1559_v35, %v1365_v6  ;;  %v6520_v30 = vld [vmem:[%s7649_s9 + $0x100] sm:$0x1]  ;;  %v6411_v32 = vld [vmem:[%s7649_s9 + $0xc0] sm:$0x80] }
 0x160   : > { %v1323_v26 = vsel %vm971_vm10, %v1315_v17, %v1322_v19  ;;  %v1564_v48 = vrot.slane %v1562_v36, 1  ;;  %v7751_v49 = vor.u32 %v1511_v37, %v1317_v12  ;;  %v1516_v50 = vrot.slane %v1514_v38, 1  ;;  %v6421_v33 = vld [vmem:[%s7649_s9 + $0x138] sm:$0x80]  ;;  %v7223_v36 = vld [vmem:[%s9835_s3] sm:$0xff]  }
 0x161   : > { %1404 = vrot.lane.b32.xlu1 %v1359_v14, %s7285_s12  ;;  %1396 = vrot.lane.b32.xlu0 %v1311_v5, %s7285_s12  ;;  %v1644_v1 = vshrl.u32 %v6495_v42, 16  ;;  %v1553_v51 = vsel %vm1150_vm9, %v7695_v47, %v1552_v39  ;;  %v1505_v52 = vsel %vm1150_vm9, %v1169_v60, %v1504_v40  ;;  %v1708_v55 = vshrl.u32 %v7744_v43, 16  ;;  %v6484_v14 = vld [vmem:[%s7649_s9 + $0x130] sm:$0x1]  ;;  %v6419_v40 = vld [vmem:[%s7649_s9 + $0x120] sm:$0x80] }
 0x162   : > { %v1660_v56 = vshrl.u32 %v7747_v44, 16  ;;  %v1565_v58 = vsel %vm1150_vm9, %v7749_v45, %v1564_v48  ;;  %v1517_v59 = vsel %vm1150_vm9, %v7751_v49, %v1516_v50  ;;  %v1704_v63 = vshrl.u32 %v6505_v53, 16  ;;  %7055 = vmatprep.subr.bf16.mxu0 %v7223_v36  ;;  %7161 = vmatprep.subr.bf16.mxu1 %v7223_v36  ;;  %v6530_v48 = vld [vmem:[%s7649_s9 + $0x178] sm:$0x1] }
 0x163   : > { %v1646_v60 = vrot.slane %v1644_v1, 7  ;;  %v1711_v3 = vshll.u32 %v7744_v43, 16  ;;  %v1710_v4 = vrot.slane %v1708_v55, 7  ;;  %v1656_v6 = vshrl.u32 %v6497_v57, 16  ;;  %7056 = vmatpush3.bf16.msra.mxu0 %v7223_v36  ;;  %7164 = vmatpush3.bf16.msra.mxu1 %v7223_v36  ;;  %v6522_v57 = vld [vmem:[%s7649_s9 + $0x118] sm:$0x1] }
 0x164   : > { %v1662_v7 = vrot.slane %v1660_v56, 7  ;;  %v1663_v8 = vshll.u32 %v7747_v44, 16  ;;  %v1343_v10 = vrot.slane %v1200_v27, 7  ;;  %v1706_v13 = vrot.slane %v1704_v63, 7 }
 0x165   : > { %1406 = vrot.lane.b32.xlu1 %v1371_v23, %s7285_s12  ;;  %1398 = vrot.lane.b32.xlu0 %v1323_v26, %s7285_s12  ;;  %v1654_v12 = vsel %vm971_vm10, %v1646_v60, %v1322_v19  ;;  %v7783_v15 = vor.u32 %v1711_v3, %v1710_v4  ;;  %v1658_v5 = vrot.slane %v1656_v6, 7  ;;  %v1893_v29 = vshll.u32 %v6528_v18, 16 }
 0x166   : > { %v7787_v17 = vor.u32 %v1663_v8, %v1662_v7  ;;  %v7791_v27 = vor.u32 %v1343_v10, %v1202_v28  ;;  %v6413_v28 = vld [vmem:[%s7649_s9 + $0xd8] sm:$0x80]  ;;  %v1845_v34 = vshll.u32 %v6520_v30, 16  ;;  %v973_v38 = vshrl.u32 %v6411_v32, 16  ;;  %v6442_v30 = vld [vmem:[%s7649_s9 + $0x118] sm:$0x1] }
 0x167   : > { %v1714_v19 = vsel %vm971_vm10, %v1706_v13, %v7783_v15  ;;  %v985_v35 = vshrl.u32 %v6413_v28, 16  ;;  %v1895_v37 = vrot.slane %v1893_v29, 1  ;;  %v979_v39 = vrot.slane %v1152_v24, 7  ;;  %v6524_v24 = vld [vmem:[%s7649_s9 + $0x130] sm:$0x1] }
 0x168   : > { %v1666_v23 = vsel %vm971_vm10, %v1658_v5, %v7787_v17  ;;  %v1033_v42 = vshrl.u32 %v6421_v33, 16  ;;  %v975_v50 = vrot.slane %v973_v38, 7  ;;  %v1847_v1 = vrot.slane %v1845_v34, 1  ;;  %v6450_v29 = vld [vmem:[%s7649_s9 + $0x178] sm:$0x1] }
 0x169   : > { %1453 = vrot.lane.b32.xlu1 %v7658_v21, %s7286_s14  ;;  %1445 = vrot.lane.b32.xlu0 %v7652_v0, %s7286_s14  ;;  %v1692_v0 = vshrl.u32 %v6503_v41, 16  ;;  %v987_v41 = vrot.slane %v985_v35, 7  ;;  %v1021_v53 = vshrl.u32 %v6419_v40, 16  ;;  %v1905_v60 = vshll.u32 %v6530_v48, 16  ;;  %v6465_v32 = vld [vmem:[%s7649_s9 + $0x168] sm:$0x80] }
 0x16a   : > { %v1854_v63 = vrot.slane %v1663_v8, 1  ;;  %v1848_v4 = vsel %vm1150_vm9, %v7751_v49, %v1847_v1  ;;  %v1857_v6 = vshll.u32 %v6522_v57, 16  ;;  %v1243_v28 = vshll.u32 %v6450_v29, 16  ;;  %v6457_v34 = vld [vmem:[%s7649_s9 + $0x108] sm:$0x80] }
 0x16b   : > { %v1694_v61 = vrot.slane %v1692_v0, 7  ;;  %v982_v0 = vor.u32 %v1154_v25, %v979_v39  ;;  %v1023_v20 = vrot.slane %v1021_v53, 7  ;;  %v1869_v25 = vshll.u32 %v6524_v24, 16  ;;  %v7885_v35 = vld [vmem:[%s7649_s9 + $0x188] sm:$0xff]  ;;  %v6415_v29 = vld [vmem:[%s7649_s9 + $0xf0] sm:$0x80] }
 0x16c   : > { %v1907_v5 = vrot.slane %v1905_v60, 1  ;;  %v7862_v18 = vor.u32 %v1854_v63, %v1660_v56  ;;  %v1195_v33 = vshll.u32 %v6442_v30, 16  ;;  %v1373_v38 = vshrl.u32 %v6465_v32, 16  ;;  %v6482_v63 = vld [vmem:[%s7649_s9 + $0x118] sm:$0x1] }
 0x16d   : > { %1455 = vrot.lane.b32.xlu1 %v7700_v54, %s7286_s14  ;;  %1447 = vrot.lane.b32.xlu0 %v7712_v2, %s7286_s14  ;;  %v1702_v11 = vsel %vm971_vm10, %v1694_v61, %v1370_v16  ;;  %v1538_v16 = vshll.u32 %v6484_v14, 16  ;;  %v1902_v61 = vrot.slane %v1711_v3, 1  ;;  %v1871_v7 = vrot.slane %v1869_v25, 1  ;;  %v6416_v30 = vld [vmem:[%s7649_s9 + $0xf8] sm:$0xff] }
 0x16e   : > { %v1325_v39 = vshrl.u32 %v6457_v34, 16  ;;  %v1389_v48 = vshrl.u32 %v7885_v35, 16 }
 0x16f   : > { %v1540_v26 = vrot.slane %v1538_v16, 1  ;;  %v7852_v8 = vsel %vm1150_vm9, %v7693_v46, %v1871_v7  ;;  %v7858_v14 = vor.u32 %v1902_v61, %v1708_v55  ;;  %v6448_v16 = vld [vmem:[%s7649_s9 + $0x160] sm:$0x1]  ;;  %v6507_v7 = vld [vmem:[%s7649_s9 + $0x180] sm:$0x80] }
 0x170   : > { %v1231_v55 = vshll.u32 %v6448_v16, 16  ;;  %v1327_v24 = vrot.slane %v1325_v39, 7  ;;  %v1716_v16 = vshrl.u32 %v6507_v7, 16  ;;  %v1001_v39 = vshrl.u32 %v6416_v30, 16 }
 0x171   : > { %1598 = vrot.lane.b32.xlu1 %v1553_v51, %s7287_s15  ;;  %1590 = vrot.lane.b32.xlu0 %v1505_v52, %s7287_s15  ;;  %v7804_v31 = vsel %vm1150_vm9, %v7693_v46, %v1540_v26  ;;  %v995_v51 = vsel %vm971_vm10, %v987_v41, %v7717_v9  ;;  %v1035_v52 = vrot.slane %v1033_v42, 7  ;;  %v1896_v9 = vsel %vm1150_vm9, %v7749_v45, %v1895_v37  ;;  %v6467_v42 = vld [vmem:[%s7649_s9 + $0x180] sm:$0x80] }
 0x172   : > { %1078 = vst.msk [vmem:[#allocation3 + $0x8] sm:$0xff] %vm1076_vm11, %v995_v51  ;;  %v1859_v46 = vrot.slane %v1857_v6, 1  ;;  %v1908_v56 = vsel %vm1150_vm9, %v7858_v14, %v1907_v5  ;;  %v1245_v37 = vrot.slane %v1243_v28, 1  ;;  %v1197_v41 = vrot.slane %v1195_v33, 1 }
 0x173   : > { %v1043_v3 = vsel %vm971_vm10, %v1035_v52, %v7709_v62  ;;  %v1385_v1 = vshrl.u32 %v6467_v42, 16  ;;  %v1391_v52 = vrot.slane %v1389_v48, 7  ;;  %v1718_v28 = vrot.slane %v1716_v16, 7 }
 0x174   : > { %1082 = vst.msk [vmem:[#allocation3 + $0x28] sm:$0xff] %vm1076_vm11, %v1043_v3  ;;  %v1246_v51 = vsel %vm1150_vm9, %v7858_v14, %v1245_v37  ;;  %v1526_v3 = vshll.u32 %v6482_v63, 16  ;;  %v6576_v63 = vld [vmem:[%s7649_s9 + $0xb8] sm:$0x3] }
 0x175   : > { %1600 = vrot.lane.b32.xlu1 %v1565_v58, %s7287_s15  ;;  %1592 = vrot.lane.b32.xlu0 %v1517_v59, %s7287_s15  ;;  %v983_v58 = vsel %vm971_vm10, %v975_v50, %v982_v0  ;;  %v6526_v59 = vld [vmem:[%s7649_s9 + $0x148] sm:$0x1]  ;;  %v6459_v50 = vld [vmem:[%s7649_s9 + $0x120] sm:$0x80]  ;;  %v1375_v0 = vrot.slane %v1373_v38, 7  ;;  %v1387_v57 = vrot.slane %v1385_v1, 7 }
 0x176   : > { %1077 = vst.msk [vmem:[#allocation3] sm:$0xff] %vm1076_vm11, %v983_v58  ;;  %v1881_v10 = vshll.u32 %v6526_v59, 16  ;;  %v1337_v53 = vshrl.u32 %v6459_v50, 16  ;;  %v1335_v59 = vsel %vm971_vm10, %v1327_v24, %v7787_v17  ;;  %v997_v38 = vshrl.u32 %v6415_v29, 16 }
 0x177   : > { %v1383_v58 = vsel %vm971_vm10, %v1375_v0, %v7783_v15  ;;  %v6492_v15 = vld [vmem:[%s7649_s9 + $0x190] sm:$0x1]  ;;  %v1003_v0 = vrot.slane %v1001_v39, 7 }
 0x178   : > { %v1883_v13 = vrot.slane %v1881_v10, 1  ;;  %v1339_v60 = vrot.slane %v1337_v53, 7  ;;  %v1586_v6 = vshll.u32 %v6492_v15, 16  ;;  %v6499_v10 = vld [vmem:[%s7649_s9 + $0x120] sm:$0x80]  ;;  %v999_v50 = vrot.slane %v997_v38, 7 }
 0x179   : > { %1747 = vrot.lane.b32.xlu1 %v1702_v11, %s7288_s16  ;;  %1739 = vrot.lane.b32.xlu0 %v1654_v12, %s7288_s16  ;;  %v7224_v11 = vld [vmem:[%s9835_s3 + $0x8] sm:$0xff]   ;;  %v1031_v12 = vsel %vm971_vm10, %v1023_v20, %v7791_v27 }
 0x17a   : > { %1081 = vst.msk [vmem:[#allocation3 + $0x20] sm:$0xff] %vm1076_vm11, %v1031_v12  ;;  %7057 = vmatprep.subr.bf16.mxu0 %v7224_v11  ;;  %7162 = vmatprep.subr.bf16.mxu1 %v7224_v11  ;;  %v1347_v25 = vsel %vm971_vm10, %v1339_v60, %v7791_v27  ;;  %v1528_v12 = vrot.slane %v1526_v3, 1 }
 0x17b   : > { %7058 = vmatpush3.bf16.msra.mxu0 %v7224_v11  ;;  %7165 = vmatpush3.bf16.msra.mxu1 %v7224_v11 }
 0x17d   : > { %1749 = vrot.lane.b32.xlu1 %v1714_v19, %s7288_s16  ;;  %1741 = vrot.lane.b32.xlu0 %v1666_v23, %s7288_s16  ;;  %v7867_v19 = vsel %vm1150_vm9, %v7695_v47, %v1883_v13  ;;  %v6440_v23 = vld [vmem:[%s7649_s9 + $0x100] sm:$0x1]  ;;  %v1860_v47 = vsel %vm1150_vm9, %v7862_v18, %v1859_v46  ;;  %v1588_v46 = vrot.slane %v1586_v6, 1  ;;  %v6573_v6 = vld [vmem:[%s7649_s9 + $0x98] sm:$0xfe] }
 0x17e   : > { %v1183_v26 = vshll.u32 %v6440_v23, 16  ;;  %v7928_v13 = vld [vmem:[%s7649_s9 + $0x1a0] sm:$0xff]  ;;  %v6509_v23 = vld [vmem:[%s7649_s9 + $0x198] sm:$0x80] }
 0x17f   : > { %v1728_v32 = vshrl.u32 %v6509_v23, 16  ;;  %v2439_v23 = vshrl.u32 %v6576_v63, 16 }
 0x181   : > { %1796 = vrot.lane.b32.xlu1 %v7700_v54, %s7289_s20  ;;  %1788 = vrot.lane.b32.xlu0 %v7712_v2, %s7289_s20 }
 0x185   : > { %1798 = vrot.lane.b32.xlu1 %v7744_v43, %s7289_s20  ;;  %1790 = vrot.lane.b32.xlu0 %v7747_v44, %s7289_s20 }
 0x189   : > { %1941 = vrot.lane.b32.xlu1 %v1896_v9, %s7290_s23  ;;  %1933 = vrot.lane.b32.xlu0 %v1848_v4, %s7290_s23  ;;  %v6490_v9 = vld [vmem:[%s7649_s9 + $0x178] sm:$0x1] }
 0x18a   : > { %v1574_v17 = vshll.u32 %v6490_v9, 16  ;;  %v7974_v9 = vld [vmem:[%s7649_s9 + $0x170] sm:$0xff] }
 0x18c   : > { %v1576_v11 = vrot.slane %v1574_v17, 1  ;;  %v6417_v17 = vld [vmem:[%s7649_s9 + $0x108] sm:$0x80] }
 0x18d   : > { %1113 = vrot.lane.b32.xlu1 %v7700_v54, %s7283_s10  ;;  %1105 = vrot.lane.b32.xlu0 %v7712_v2, %s7283_s10  ;;  %v1233_v54 = vrot.slane %v1231_v55, 1  ;;  %v1185_v2 = vrot.slane %v1183_v26, 1  ;;  %v1668_v55 = vshrl.u32 %v6499_v10, 16  ;;  %v1529_v26 = vsel %vm1150_vm9, %v7862_v18, %v1528_v12 }
 0x18e   : > { %v1061_v12 = vshrl.u32 %v7974_v9, 16 }
 0x18f   : > { %v1234_v36 = vsel %vm1150_vm9, %v7749_v45, %v1233_v54  ;;  %v1186_v40 = vsel %vm1150_vm9, %v7751_v49, %v1185_v2  ;;  %v1392_v45 = vshll.u32 %v7885_v35, 16  ;;  %v1198_v49 = vsel %vm1150_vm9, %v7862_v18, %v1197_v41  ;;  %v6501_v2 = vld [vmem:[%s7649_s9 + $0x138] sm:$0x80] }
 0x190   : > { %v1670_v33 = vrot.slane %v1668_v55, 7  ;;  %v1735_v18 = vshll.u32 %v7928_v13, 16  ;;  %v6574_v55 = vld [vmem:[%s7649_s9 + $0xa0] sm:$0x3] }
 0x191   : > { %1943 = vrot.lane.b32.xlu1 %v1908_v56, %s7290_s23  ;;  %1935 = vrot.lane.b32.xlu0 %v1860_v47, %s7290_s23  ;;  %v1394_v61 = vor.u32 %v1392_v45, %v1391_v52  ;;  %v1583_v4 = vrot.slane %v1392_v45, 1  ;;  %v6424_v56 = vld [vmem:[%s7649_s9 + $0x158] sm:$0xff]  ;;  %v1577_v47 = vsel %vm1150_vm9, %v7858_v14, %v1576_v11  ;;  %v1730_v45 = vrot.slane %v1728_v32, 7  ;;  %v7985_v11 = vld [vmem:[%s7649_s9 + $0x110] sm:$0xff] }
 0x192   : > { %v1052_v37 = vshll.u32 %v6424_v56, 16  ;;  %v1926_v3 = vrot.slane %v1735_v18, 1  ;;  %v1016_v29 = vshll.u32 %v7985_v11, 16 }
 0x193   : > { %v1395_v20 = vsel %vm971_vm10, %v1387_v57, %v1394_v61  ;;  %v7930_v5 = vor.u32 %v1583_v4, %v1389_v48  ;;  %v1004_v48 = vshll.u32 %v6416_v30, 16  ;;  %v1726_v1 = vsel %vm971_vm10, %v1718_v28, %v1394_v61  ;;  %v6425_v61 = vld [vmem:[%s7649_s9 + $0x168] sm:$0x80] }
 0x194   : > { %v1057_v15 = vshrl.u32 %v6425_v61, 16  ;;  %v2442_v30 = vshll.u32 %v6576_v63, 16 }
 0x195   : > { %1115 = vrot.lane.b32.xlu1 %v7744_v43, %s7283_s10  ;;  %1107 = vrot.lane.b32.xlu0 %v7747_v44, %s7283_s10  ;;  %v1589_v54 = vsel %vm1150_vm9, %v7930_v5, %v1588_v46  ;;  %v1064_v46 = vshll.u32 %v7974_v9, 16 }
 0x199   : > { %1259 = vrot.lane.b32.xlu1 %v1234_v36, %s7284_s11  ;;  %1251 = vrot.lane.b32.xlu0 %v1186_v40, %s7284_s11  ;;  %v1049_v36 = vshrl.u32 %v6424_v56, 16  ;;  %v1680_v40 = vshrl.u32 %v6501_v2, 16  ;;  %v1013_v56 = vshrl.u32 %v7985_v11, 16 }
 0x19b   : > { %v1051_v42 = vrot.slane %v1049_v36, 7  ;;  %v1682_v53 = vrot.slane %v1680_v40, 7  ;;  %v1015_v28 = vrot.slane %v1013_v56, 7 }
 0x19d   : > { %1261 = vrot.lane.b32.xlu1 %v1246_v51, %s7284_s11  ;;  %1253 = vrot.lane.b32.xlu0 %v1198_v49, %s7284_s11  ;;  %v1054_v24 = vor.u32 %v1052_v37, %v1051_v42  ;;  %v1006_v51 = vor.u32 %v1004_v48, %v1003_v0  ;;  %v1678_v49 = vsel %vm971_vm10, %v1670_v33, %v7791_v27  ;;  %v2414_v33 = vshrl.u32 %v6573_v6, 16  ;;  %v6592_v42 = vld [vmem:[%s7649_s9 + $0xf8] sm:$0x7f] }
 0x19e   : > { %v1018_v38 = vor.u32 %v1016_v29, %v1015_v28  ;;  %v6589_v48 = vld [vmem:[%s7649_s9 + $0xd8] sm:$0xc0]  ;;  %v8017_v0 = vrot.slane %v2439_v23, 1 }
 0x1a1   : > { %1408 = vrot.lane.b32.xlu1 %v1383_v58, %s7285_s12  ;;  %1400 = vrot.lane.b32.xlu0 %v1335_v59, %s7285_s12  ;;  %v6532_v58 = vld [vmem:[%s7649_s9 + $0x190] sm:$0x1]  ;;  %v1690_v59 = vsel %vm971_vm10, %v1682_v53, %v7709_v62 }
 0x1a2   : > { %v1917_v60 = vshll.u32 %v6532_v58, 16  ;;  %v7225_v62 = vld [vmem:[%s9835_s3 + $0x10] ss:$0 sps:$4 sm:$0x33]   ;;  %v2626_v58 = vshll.u32 %v6592_v42, 16 }
 0x1a3   : > { %7169 = vmatprep.subr.msk.bf16.mxu0 %vm2026_vm13, %v7225_v62  ;;  %7170 = vmatprep.subr.msk.bf16.mxu1 %vm2026_vm13, %v7225_v62  ;;  %v2028_v32 = vsel %vm2026_vm13, %v7225_v62, 0  ;;  %v6613_v62 = vld [vmem:[%s7649_s9 + $0xe0] sm:$0xfe] }
 0x1a4   : > { %v1919_v7 = vrot.slane %v1917_v60, 1  ;;  %7060 = vmatpush3.bf16.msra.mxu0 %v2028_v32  ;;  %7166 = vmatpush3.bf16.msra.mxu1 %v2028_v32 }
 0x1a5   : > { %1410 = vrot.lane.b32.xlu1 %v1395_v20, %s7285_s12  ;;  %1402 = vrot.lane.b32.xlu0 %v1347_v25, %s7285_s12  ;;  %v6534_v20 = vld [vmem:[%s7649_s9 + $0x1a8] sm:$0x1]  ;;  %v6575_v25 = vld [vmem:[%s7649_s9 + $0xb0] sm:$0xfe] }
 0x1a6   : > { %v1929_v4 = vshll.u32 %v6534_v20, 16  ;;  %v2431_v10 = vshrl.u32 %v6575_v25, 16  ;;  %v2434_v16 = vshll.u32 %v6575_v25, 16  ;;  %v1920_v39 = vsel %vm1150_vm9, %v7930_v5, %v1919_v7  ;;  %v6615_v25 = vld [vmem:[%s7649_s9 + $0xf8] sm:$0xfe] }
 0x1a7   : > { %v2847_v29 = vshrl.u32 %v6615_v25, 16 }
 0x1a8   : > { %v1931_v40 = vrot.slane %v1929_v4, 1 }
 0x1a9   : > { %1457 = vrot.lane.b32.xlu1 %v7744_v43, %s7286_s14  ;;  %1449 = vrot.lane.b32.xlu0 %v7747_v44, %s7286_s14  ;;  %v1732_v43 = vshrl.u32 %v7928_v13, 16  ;;  %v6423_v44 = vld [vmem:[%s7649_s9 + $0x150] sm:$0x80] }
 0x1aa   : > { %v1045_v34 = vshrl.u32 %v6423_v44, 16  ;;  %v1009_v44 = vshrl.u32 %v6417_v17, 16 }
 0x1ab   : > { %v1734_v14 = vrot.slane %v1732_v43, 7  ;;  %v1927_v37 = vor.u32 %v1926_v3, %v1732_v43  ;;  %v8015_v43 = vrot.slane %v2434_v16, 2  ;;  %v6614_v16 = vld [vmem:[%s7649_s9 + $0xe8] sm:$0x3] }
 0x1ac   : > { %v1047_v41 = vrot.slane %v1045_v34, 7  ;;  %v2417_v34 = vshll.u32 %v6573_v6, 16 }
 0x1ad   : > { %1459 = vrot.lane.b32.xlu1 %v7885_v35, %s7286_s14  ;;  %1451 = vrot.lane.b32.xlu0 %v7665_v22, %s7286_s14  ;;  %v1737_v52 = vor.u32 %v1735_v18, %v1734_v14  ;;  %v2425_v14 = vshll.u32 %v6574_v55, 16  ;;  %v6591_v18 = vld [vmem:[%s7649_s9 + $0xf0] sm:$0xc0]  ;;  %v1932_v20 = vsel %vm1150_vm9, %v1927_v37, %v1931_v40  ;;  %v6634_v40 = vld [vmem:[%s7649_s9 + $0x140] sm:$0x7f]  ;;  %vm3694_vm9 = vcmask 1042432  }
 0x1ae   : > { %v1055_v57 = vsel %vm971_vm10, %v1047_v41, %v1054_v24  ;;  %v8010_v41 = vrot.slane %v2431_v10, 1  ;;  %v8019_v24 = vrot.slane %v2442_v30, 2  ;;  %v2850_v30 = vshll.u32 %v6615_v25, 16 }
 0x1af   : > { %1083 = vst.msk [vmem:[#allocation3 + $0x30] sm:$0xff] %vm1076_vm11, %v1055_v57  ;;  %v1738_v27 = vsel %vm971_vm10, %v1730_v45, %v1737_v52  ;;  %v2416_v45 = vrot.slane %v2414_v33, 1  ;;  %v2615_v52 = vshrl.u32 %v6591_v18, 16  ;;  %v2427_v53 = vrot.slane %v2425_v14, 2  ;;  %v6633_v14 = vld [vmem:[%s7649_s9 + $0x138] sm:$0xc0] }
 0x1b0   : > { %v2618_v57 = vshll.u32 %v6591_v18, 16  ;;  %v2437_v17 = vor.u32 %v8015_v43, %v8010_v41  ;;  %v2445_v3 = vor.u32 %v8019_v24, %v8017_v0  ;;  %v2833_v33 = vshll.u32 %v6613_v62, 16  ;;  %v6631_v41 = vld [vmem:[%s7649_s9 + $0x120] sm:$0xc0]  ;;  %v6632_v0 = vld [vmem:[%s7649_s9 + $0x128] sm:$0x7f] }
 0x1b1   : > { %1602 = vrot.lane.b32.xlu1 %v1577_v47, %s7287_s15  ;;  %1594 = vrot.lane.b32.xlu0 %v1529_v26, %s7287_s15  ;;  %v1059_v47 = vrot.slane %v1057_v15, 7  ;;  %v1063_v26 = vrot.slane %v1061_v12, 7  ;;  %v8036_v6 = vrot.slane %v2615_v52, 6  ;;  %v3043_v52 = vshrl.u32 %v6634_v40, 16 }
 0x1b2   : > { %v2620_v10 = vrot.slane %v2618_v57, 7  ;;  %v3018_v57 = vshrl.u32 %v6631_v41, 16 }
 0x1b3   : > { %v1066_v36 = vor.u32 %v1064_v46, %v1063_v26  ;;  %v2628_v46 = vrot.slane %v2626_v58, 7  ;;  %v6565_v26 = vld [vmem:[%s7649_s9 + $0x98] sm:$0xff]  ;;  %v3026_v58 = vshrl.u32 %v6632_v0, 16 }
 0x1b4   : > { %v2621_v37 = vor.u32 %v2620_v10, %v8036_v6  ;;  %v6657_v10 = vld [vmem:[%s7649_s9 + $0x140] sm:$0xfe] }
 0x1b5   : > { %1604 = vrot.lane.b32.xlu1 %v1589_v54, %s7287_s15  ;;  %1596 = vrot.lane.b32.xlu0 %v7804_v31, %s7287_s15  ;;  %v1007_v31 = vsel %vm971_vm10, %v999_v50, %v1006_v51  ;;  %v1011_v54 = vrot.slane %v1009_v44, 7  ;;  %v1067_v50 = vsel %vm971_vm10, %v1059_v47, %v1066_v36  ;;  %v2419_v51 = vrot.slane %v2417_v34, 2  ;;  %v6566_v47 = vld [vmem:[%s7649_s9 + $0xb0] sm:$0xff] }
 0x1b6   : > { %1079 = vst.msk [vmem:[#allocation3 + $0x10] sm:$0xff] %vm1076_vm11, %v1007_v31  ;;  %1084 = vst.msk [vmem:[#allocation3 + $0x38] sm:$0xff] %vm1076_vm11, %v1067_v50  ;;  %v2623_v31 = vshrl.u32 %v6592_v42, 16  ;;  %v2838_v34 = vshrl.u32 %v6614_v16, 16  ;;  %v2849_v42 = vrot.slane %v2847_v29, 1 }
 0x1b7   : > { %v2420_v4 = vor.u32 %v2419_v51, %v2416_v45  ;;  %v3035_v51 = vshrl.u32 %v6633_v14, 16  ;;  %v6658_v29 = vld [vmem:[%s7649_s9 + $0x148] sm:$0x3] }
 0x1b8   : > { %v2625_v12 = vrot.slane %v2623_v31, 6  ;;  %v3021_v31 = vshll.u32 %v6631_v41, 16 }
 0x1b9   : > { %1751 = vrot.lane.b32.xlu1 %v1726_v1, %s7288_s16  ;;  %1743 = vrot.lane.b32.xlu0 %v1678_v49, %s7288_s16  ;;  %v3037_v6 = vrot.slane %v3035_v51, 6 }
 0x1ba   : > { %v2629_v18 = vor.u32 %v2628_v46, %v2625_v12  ;;  %v8073_v12 = vld [vmem:[%s7649_s9 + $0xe0] sm:$0xff]  ;;  %v3020_v46 = vrot.slane %v3018_v57, 6 }
 0x1bd   : > { %1753 = vrot.lane.b32.xlu1 %v1738_v27, %s7288_s16  ;;  %1745 = vrot.lane.b32.xlu0 %v1690_v59, %s7288_s16  ;;  %v2598_v27 = vshrl.u32 %v6589_v48, 16  ;;  %v2601_v59 = vshll.u32 %v6589_v48, 16  ;;  %v2852_v48 = vrot.slane %v2850_v30, 2 }
 0x1bf   : > { %v2600_v23 = vrot.slane %v2598_v27, 6  ;;  %v3029_v27 = vshll.u32 %v6632_v0, 16  ;;  %v2853_v25 = vor.u32 %v2852_v48, %v2849_v42  ;;  %v8096_v42 = vld [vmem:[%s9835_s3 + $0x14] sm:$0xff]  }
 0x1c0   : > { %7077 = vmatprep.subr.bf16.mxu1 %v8096_v42 }
 0x1c1   : > { %1800 = vrot.lane.b32.xlu1 %v7885_v35, %s7289_s20  ;;  %1792 = vrot.lane.b32.xlu0 %v7665_v22, %s7289_s20  ;;  %v2422_v22 = vshrl.u32 %v6574_v55, 16  ;;  %v2603_v55 = vrot.slane %v2601_v59, 7  ;;  %v2630_v59 = vsel %vm2195_vm1, %v2621_v37, %v2629_v18  ;;  %v3278_v18 = vshll.u32 %v6658_v29, 16 }
 0x1c3   : > { %v1104_v2 = vpop.permute.xlu1 %1103  ;;  %v1102_v35 = vpop.permute.xlu0 %1101  ;;  %v2424_v49 = vrot.slane %v2422_v22, 1  ;;  %v2841_v22 = vshll.u32 %v6614_v16, 16  ;;  %v3023_v16 = vrot.slane %v3021_v31, 7 }
 0x1c4   : > { %1127 = vst.msk [vmem:[#allocation3 + $0x8] sm:$0xff] %vm1125_vm12, %v1104_v2  ;;  %1126 = vst.msk [vmem:[#allocation3] sm:$0xff] %vm1125_vm12, %v1102_v35  ;;  %v2830_v35 = vshrl.u32 %v6613_v62, 16  ;;  %v3045_v62 = vrot.slane %v3043_v52, 6 }
 0x1c5   : > { %1802 = vrot.lane.b32.xlu1 %v7928_v13, %s7289_s20  ;;  %1794 = vrot.lane.b32.xlu0 %v7658_v21, %s7289_s20  ;;  %v6590_v13 = vld [vmem:[%s7649_s9 + $0xe0] sm:$0x7f]  ;;  %v1019_v21 = vsel %vm971_vm10, %v1011_v54, %v1018_v38  ;;  %v2428_v7 = vor.u32 %v2427_v53, %v2424_v49  ;;  %v2604_v38 = vor.u32 %v2603_v55, %v2600_v23  ;;  %v2843_v45 = vrot.slane %v2841_v22, 2 }
 0x1c6   : > { %1080 = vst.msk [vmem:[#allocation3 + $0x18] sm:$0xff] %vm1076_vm11, %v1019_v21  ;;  %v2606_v61 = vshrl.u32 %v6590_v13, 16  ;;  %v2609_v60 = vshll.u32 %v6590_v13, 16  ;;  %v2832_v21 = vrot.slane %v2830_v35, 1  ;;  %v3038_v49 = vshll.u32 %v6633_v14, 16 }
 0x1c7   : > { %v1112_v1 = vpop.permute.xlu1 %1111  ;;  %v1110_v5 = vpop.permute.xlu0 %1109  ;;  %v2429_v36 = vsel %vm2412_vm15, %v2420_v4, %v2428_v7  ;;  %v3046_v53 = vshll.u32 %v6634_v40, 16  ;;  %v6656_v4 = vld [vmem:[%s7649_s9 + $0x130] sm:$0x3]  ;;  %v3028_v23 = vrot.slane %v3026_v58, 6  ;;  %v3031_v55 = vrot.slane %v3029_v27, 7 }
 0x1c8   : > { %1131 = vst.msk [vmem:[#allocation3 + $0x28] sm:$0xff] %vm1125_vm12, %v1112_v1  ;;  %1130 = vst.msk [vmem:[#allocation3 + $0x20] sm:$0xff] %vm1125_vm12, %v1110_v5  ;;  %v2608_v44 = vrot.slane %v2606_v61, 6  ;;  %v2611_v56 = vrot.slane %v2609_v60, 7  ;;  %v2835_v1 = vrot.slane %v2833_v33, 2  ;;  %v2840_v5 = vrot.slane %v2838_v34, 1 }
 0x1c9   : > { %1945 = vrot.lane.b32.xlu1 %v1920_v39, %s7290_s23  ;;  %1937 = vrot.lane.b32.xlu0 %v7852_v8, %s7290_s23  ;;  %v6616_v8 = vld [vmem:[%s7649_s9 + $0x100] sm:$0x3]  ;;  %v3048_v7 = vrot.slane %v3046_v53, 7  ;;  %v3032_v37 = vor.u32 %v3031_v55, %v3028_v23  ;;  %v3275_v14 = vshrl.u32 %v6658_v29, 16  ;;  %v6595_v53 = vld [vmem:[%s7649_s9 + $0x120] sm:$0xc0] }
 0x1ca   : > { %v2855_v54 = vshrl.u32 %v6616_v8, 16  ;;  %v2858_v28 = vshll.u32 %v6616_v8, 16  ;;  %v2612_v39 = vor.u32 %v2611_v56, %v2608_v44  ;;  %v3040_v8 = vrot.slane %v3038_v49, 7  ;;  %v6579_v22 = vld [vmem:[%s7649_s9 + $0xe0] sm:$0xfe]  ;;  %v8140_v55 = vld [vmem:[%s7649_s9 + $0x128] sm:$0xff] }
 0x1cb   : > { %v1256_v63 = vpop.permute.xlu1 %1255  ;;  %v1248_v15 = vpop.permute.xlu0 %1247  ;;  %v3049_v34 = vor.u32 %v3048_v7, %v3045_v62  ;;  %v8112_v51 = vrot.slane %v3275_v14, 1  ;;  %v8114_v49 = vrot.slane %v3278_v18, 2  ;;  %v2468_v52 = vshll.u32 %v6579_v22, 16  ;;  %v8137_v23 = vld [vmem:[%s7649_s9 + $0x140] sm:$0xff]  ;;  %v6619_v18 = vld [vmem:[%s7649_s9 + $0x128] sm:$0xfe] }
 0x1cc   : > { %1276 = vst.msk [vmem:[#allocation3 + $0x20] sm:$0xff] %vm1271_vm14, %v1256_v63  ;;  %1272 = vst.msk [vmem:[#allocation3] sm:$0xff] %vm1271_vm14, %v1248_v15  ;;  %v2857_v50 = vrot.slane %v2855_v54, 1  ;;  %v2860_v43 = vrot.slane %v2858_v28, 2  ;;  %v2613_v61 = vsel %vm2195_vm1, %v2604_v38, %v2612_v39  ;;  %v2836_v15 = vor.u32 %v2835_v1, %v2832_v21  ;;  %v6577_v1 = vld [vmem:[%s7649_s9 + $0xc8] sm:$0xfe] }
 0x1cd   : > { %1947 = vrot.lane.b32.xlu1 %v1932_v20, %s7290_s23  ;;  %1939 = vrot.lane.b32.xlu0 %v7867_v19, %s7290_s23  ;;  %v2446_v19 = vsel %vm2412_vm15, %v2437_v17, %v2445_v3  ;;  %v2844_v17 = vor.u32 %v2843_v45, %v2840_v5  ;;  %v6655_v3 = vld [vmem:[%s7649_s9 + $0x128] sm:$0xfe]  ;;  %v3267_v28 = vshrl.u32 %v6657_v10, 16  ;;  %v3041_v33 = vor.u32 %v3040_v8, %v3037_v6  ;;  %v6578_v5 = vld [vmem:[%s7649_s9 + $0xd0] sm:$0x3] }
 0x1ce   : > { %v2861_v63 = vor.u32 %v2860_v43, %v2857_v50  ;;  %v3250_v44 = vshrl.u32 %v6655_v3, 16  ;;  %v3253_v56 = vshll.u32 %v6655_v3, 16  ;;  %v6594_v3 = vld [vmem:[%s7649_s9 + $0x110] sm:$0x7f]  ;;  %v2459_v6 = vshll.u32 %v6578_v5, 16 }
 0x1cf   : > { %v1258_v32 = vpop.permute.xlu1 %1257  ;;  %v1250_v2 = vpop.permute.xlu0 %1249  ;;  %v2845_v35 = vsel %vm2412_vm15, %v2836_v15, %v2844_v17  ;;  %v8098_v43 = vrot.slane %v3267_v28, 1  ;;  %v3050_v21 = vsel %vm2195_vm1, %v3041_v33, %v3049_v34  ;;  %v2448_v15 = vshrl.u32 %v6577_v1, 16 }
 0x1d0   : > { %1277 = vst.msk [vmem:[#allocation3 + $0x28] sm:$0xff] %vm1271_vm14, %v1258_v32  ;;  %1273 = vst.msk [vmem:[#allocation3 + $0x8] sm:$0xff] %vm1271_vm14, %v1250_v2  ;;  %v3270_v32 = vshll.u32 %v6657_v10, 16  ;;  %v2862_v2 = vsel %vm2412_vm15, %v2853_v25, %v2861_v63  ;;  %v8085_v38 = vrot.slane %v3250_v44, 1  ;;  %v8087_v39 = vrot.slane %v3253_v56, 2 }
 0x1d1   : > { %2366 = vrot.lane.b32.xlu1 %v6566_v47, %s7283_s10  ;;  %2364 = vrot.lane.b32.xlu0 %v6565_v26, %s7283_s10  ;;  %v3258_v47 = vshrl.u32 %v6656_v4, 16  ;;  %v3261_v26 = vshll.u32 %v6656_v4, 16  ;;  %v2451_v17 = vshll.u32 %v6577_v1, 16  ;;  %v2456_v4 = vshrl.u32 %v6578_v5, 16 }
 0x1d2   : > { %v8100_v0 = vrot.slane %v3270_v32, 2  ;;  %v3256_v57 = vor.u32 %v8087_v39, %v8085_v38  ;;  %v2649_v8 = vshrl.u32 %v6595_v53, 16  ;;  %v2652_v62 = vshll.u32 %v6595_v53, 16 }
 0x1d3   : > { %v1405_v24 = vpop.permute.xlu1 %1404  ;;  %v1397_v13 = vpop.permute.xlu0 %1396  ;;  %v8089_v40 = vrot.slane %v3258_v47, 1  ;;  %v8091_v41 = vrot.slane %v3261_v26, 2  ;;  %v3281_v7 = vor.u32 %v8114_v49, %v8112_v51  ;;  %v8134_v10 = vrot.slane %v2468_v52, 2  ;;  %v6618_v51 = vld [vmem:[%s7649_s9 + $0x118] sm:$0x3] }
 0x1d4   : > { %1425 = vst.msk [vmem:[#allocation3 + $0x20] sm:$0xff] %vm1420_vm0, %v1405_v24  ;;  %1421 = vst.msk [vmem:[#allocation3] sm:$0xff] %vm1420_vm0, %v1397_v13  ;;  %v6580_v24 = vld [vmem:[%s7649_s9 + $0xe8] sm:$0x3]  ;;  %v2465_v13 = vshrl.u32 %v6579_v22, 16  ;;  %v3273_v25 = vor.u32 %v8100_v0, %v8098_v43  ;;  %v2640_v47 = vshrl.u32 %v6594_v3, 16 }
 0x1d5   : > { %2551 = vrot.lane.b32.xlu1 %v2446_v19, %s7284_s11  ;;  %2549 = vrot.lane.b32.xlu0 %v2429_v36, %s7284_s11  ;;  %v7236_v19 = vld [vmem:[%s7649_s9 + $0xf8] sm:$0xff]  ;;  %v3024_v36 = vor.u32 %v3023_v16, %v3020_v46  ;;  %v3264_v31 = vor.u32 %v8091_v41, %v8089_v40  ;;  %v2473_v58 = vshrl.u32 %v6580_v24, 16  ;;  %v2476_v27 = vshll.u32 %v6580_v24, 16 }
 0x1d6   : > { %v8125_v63 = vrot.slane %v2465_v13, 1  ;;  %v2643_v26 = vshll.u32 %v6594_v3, 16  ;;  %v2450_v32 = vrot.slane %v2448_v15, 1  ;;  %v2461_v33 = vrot.slane %v2459_v6, 2  ;;  %v6617_v13 = vld [vmem:[%s7649_s9 + $0x110] sm:$0xfe] }
 0x1d7   : > { %v1407_v60 = vpop.permute.xlu1 %1406  ;;  %v1399_v20 = vpop.permute.xlu0 %1398  ;;  %v3033_v45 = vsel %vm2195_vm1, %v3024_v36, %v3032_v37  ;;  %v2478_v28 = vrot.slane %v2476_v27, 2  ;;  %v2651_v34 = vrot.slane %v2649_v8, 6  ;;  %v2654_v22 = vrot.slane %v2652_v62, 7  ;;  %v6637_v3 = vld [vmem:[%s7649_s9 + $0x168] sm:$0xc0] }
 0x1d8   : > { %1426 = vst.msk [vmem:[#allocation3 + $0x28] sm:$0xff] %vm1420_vm0, %v1407_v60  ;;  %1422 = vst.msk [vmem:[#allocation3 + $0x8] sm:$0xff] %vm1420_vm0, %v1399_v20  ;;  %v3265_v36 = vsel %vm2412_vm15, %v3256_v57, %v3264_v31  ;;  %v2642_v40 = vrot.slane %v2640_v47, 6  ;;  %v2645_v41 = vrot.slane %v2643_v26, 7  ;;  %v3282_v0 = vsel %vm2412_vm15, %v3273_v25, %v3281_v7  ;;  %v6635_v7 = vld [vmem:[%s7649_s9 + $0x150] sm:$0xc0] }
 0x1d9   : > { %2735 = vrot.lane.b32.xlu1 %v2630_v59, %s7285_s12  ;;  %2733 = vrot.lane.b32.xlu0 %v2613_v61, %s7285_s12  ;;  %v6596_v59 = vld [vmem:[%s7649_s9 + $0x128] sm:$0x7f]  ;;  %v2471_v24 = vor.u32 %v8134_v10, %v8125_v63  ;;  %v2881_v52 = vshrl.u32 %v6619_v18, 16  ;;  %v2884_v53 = vshll.u32 %v6619_v18, 16  ;;  %v2872_v25 = vshrl.u32 %v6618_v51, 16 }
 0x1da   : > { %v6593_v61 = vld [vmem:[%s7649_s9 + $0x108] sm:$0xc0]  ;;  %v2657_v46 = vshrl.u32 %v6596_v59, 16  ;;  %v2660_v16 = vshll.u32 %v6596_v59, 16  ;;  %v2864_v59 = vshrl.u32 %v6617_v13, 16 }
 0x1db   : > { %v1454_v30 = vpop.permute.xlu1 %1453  ;;  %v1446_v54 = vpop.permute.xlu0 %1445  ;;  %v2632_v44 = vshrl.u32 %v6593_v61, 16  ;;  %v2635_v56 = vshll.u32 %v6593_v61, 16  ;;  %v8170_v6 = vrot.slane %v2881_v52, 1  ;;  %v8172_v8 = vrot.slane %v2884_v53, 2  ;;  %v6550_v47 = vld [vmem:[%s7649_s9 + $0x98] sm:$0x7f] }
 0x1dc   : > { %1474 = vst.msk [vmem:[#allocation3 + $0x20] sm:$0xff] %vm1469_vm2, %v1454_v30  ;;  %1470 = vst.msk [vmem:[#allocation3] sm:$0xff] %vm1469_vm2, %v1446_v54  ;;  %v2475_v54 = vrot.slane %v2473_v58, 1  ;;  %v2659_v37 = vrot.slane %v2657_v46, 6  ;;  %v2662_v14 = vrot.slane %v2660_v16, 7  ;;  %v2646_v58 = vor.u32 %v2645_v41, %v2642_v40 }
 0x1dd   : > { %2783 = vrot.lane.b32.xlu1 %v7236_v19, %s7286_s14  ;;  %2781 = vrot.lane.b32.xlu0 %v8073_v12, %s7286_s14  ;;  %v6567_v19 = vld [vmem:[%s7649_s9 + $0xc8] sm:$0xff]  ;;  %v2634_v38 = vrot.slane %v2632_v44, 6  ;;  %v2637_v39 = vrot.slane %v2635_v56, 7  ;;  %v8177_v44 = vrot.slane %v2864_v59, 1  ;;  %v6549_v56 = vld [vmem:[%s7649_s9 + $0x90] sm:$0xc0]  ;;  %v2887_v18 = vor.u32 %v8172_v8, %v8170_v6 }
 0x1de   : > { %v2663_v49 = vor.u32 %v2662_v14, %v2659_v37  ;;  %v2205_v37 = vshrl.u32 %v6550_v47, 16  ;;  %v2208_v14 = vshll.u32 %v6550_v47, 16  ;;  %v6661_v8 = vld [vmem:[%s7649_s9 + $0x170] sm:$0xfe]  ;;  %vm4801_vm10 = vsmask.f32 3328 }
 0x1df   : > { %v1456_v48 = vpop.permute.xlu1 %1455  ;;  %v1448_v50 = vpop.permute.xlu0 %1447  ;;  %v2638_v31 = vor.u32 %v2637_v39, %v2634_v38  ;;  %v3055_v38 = vshll.u32 %v6635_v7, 16 }
 0x1e0   : > { %1475 = vst.msk [vmem:[#allocation3 + $0x28] sm:$0xff] %vm1469_vm2, %v1456_v48  ;;  %1471 = vst.msk [vmem:[#allocation3 + $0x8] sm:$0xff] %vm1469_vm2, %v1448_v50  ;;  %v6620_v48 = vld [vmem:[%s7649_s9 + $0x130] sm:$0x3] }
 0x1e1   : > { %2967 = vrot.lane.b32.xlu1 %v2862_v2, %s7287_s15  ;;  %2965 = vrot.lane.b32.xlu0 %v2845_v35, %s7287_s15  ;;  %v2453_v2 = vrot.slane %v2451_v17, 2  ;;  %v2458_v35 = vrot.slane %v2456_v4, 1  ;;  %v2889_v57 = vshrl.u32 %v6620_v48, 16  ;;  %v2892_v27 = vshll.u32 %v6620_v48, 16  ;;  %v6638_v4 = vld [vmem:[%s7649_s9 + $0x170] sm:$0x7f] }
 0x1e2   : > { %v2875_v17 = vshll.u32 %v6618_v51, 16  ;;  %v2647_v46 = vsel %vm2195_vm1, %v2638_v31, %v2646_v58  ;;  %v6660_v51 = vld [vmem:[%s7649_s9 + $0x160] sm:$0x3]  ;;  %v2210_v31 = vrot.slane %v2208_v14, 7  ;;  %v3057_v58 = vrot.slane %v3055_v38, 7 }
 0x1e3   : > { %v1599_v60 = vpop.permute.xlu1 %1598  ;;  %v1591_v20 = vpop.permute.xlu0 %1590  ;;  %v2454_v1 = vor.u32 %v2453_v2, %v2450_v32  ;;  %v2462_v5 = vor.u32 %v2461_v33, %v2458_v35  ;;  %v2891_v62 = vrot.slane %v2889_v57, 1  ;;  %v2894_v16 = vrot.slane %v2892_v27, 2  ;;  %v6636_v2 = vld [vmem:[%s7649_s9 + $0x158] sm:$0x7f] }
 0x1e4   : > { %1619 = vst.msk [vmem:[#allocation3 + $0x20] sm:$0xff] %vm1614_vm3, %v1599_v60  ;;  %1615 = vst.msk [vmem:[#allocation3] sm:$0xff] %vm1614_vm3, %v1591_v20  ;;  %v2867_v20 = vshll.u32 %v6617_v13, 16  ;;  %v3072_v32 = vshll.u32 %v6637_v3, 16  ;;  %v2877_v35 = vrot.slane %v2875_v17, 2  ;;  %v3077_v33 = vshrl.u32 %v6638_v4, 16 }
 0x1e5   : > { %3155 = vrot.lane.b32.xlu1 %v3050_v21, %s7288_s16  ;;  %3153 = vrot.lane.b32.xlu0 %v3033_v45, %s7288_s16  ;;  %v2479_v21 = vor.u32 %v2478_v28, %v2475_v54  ;;  %v2655_v45 = vor.u32 %v2654_v22, %v2651_v34  ;;  %v2463_v15 = vsel %vm2412_vm15, %v2454_v1, %v2462_v5  ;;  %v2874_v54 = vrot.slane %v2872_v25, 1  ;;  %v6659_v13 = vld [vmem:[%s7649_s9 + $0x158] sm:$0xfe] }
 0x1e6   : > { %v3069_v28 = vshrl.u32 %v6637_v3, 16  ;;  %v3080_v34 = vshll.u32 %v6638_v4, 16  ;;  %v3052_v22 = vshrl.u32 %v6635_v7, 16  ;;  %v3060_v39 = vshrl.u32 %v6636_v2, 16 }
 0x1e7   : > { %v1601_v29 = vpop.permute.xlu1 %1600  ;;  %v1593_v30 = vpop.permute.xlu0 %1592  ;;  %v2480_v63 = vsel %vm2412_vm15, %v2471_v24, %v2479_v21  ;;  %v2664_v10 = vsel %vm2195_vm1, %v2655_v45, %v2663_v49  ;;  %v3063_v40 = vshll.u32 %v6636_v2, 16  ;;  %v8191_v24 = vrot.slane %v3072_v32, 7  ;;  %v6551_v49 = vld [vmem:[%s7649_s9 + $0xa8] sm:$0xc0] }
 0x1e8   : > { %1620 = vst.msk [vmem:[#allocation3 + $0x28] sm:$0xff] %vm1614_vm3, %v1601_v29  ;;  %1616 = vst.msk [vmem:[#allocation3 + $0x8] sm:$0xff] %vm1614_vm3, %v1593_v30  ;;  %v2869_v30 = vrot.slane %v2867_v20, 2  ;;  %v2878_v21 = vor.u32 %v2877_v35, %v2874_v54  ;;  %v3079_v1 = vrot.slane %v3077_v33, 6  ;;  %v3082_v5 = vrot.slane %v3080_v34, 7 }
 0x1e9   : > { %3203 = vrot.lane.b32.xlu1 %v8137_v23, %s7289_s20  ;;  %3201 = vrot.lane.b32.xlu0 %v8140_v55, %s7289_s20  ;;  %v3054_v45 = vrot.slane %v3052_v22, 6  ;;  %v2207_v57 = vrot.slane %v2205_v37, 6  ;;  %v3062_v27 = vrot.slane %v3060_v39, 6  ;;  %v3065_v59 = vrot.slane %v3063_v40, 7  ;;  %v6581_v22 = vld [vmem:[%s7649_s9 + $0xf8] sm:$0xfe] }
 0x1ea   : > { %v3287_v17 = vshll.u32 %v6659_v13, 16  ;;  %v3292_v3 = vshrl.u32 %v6660_v51, 16  ;;  %v3295_v6 = vshll.u32 %v6660_v51, 16  ;;  %v2217_v7 = vshll.u32 %v6551_v49, 16  ;;  %v6582_v40 = vld [vmem:[%s7649_s9 + $0x100] sm:$0x3] }
 0x1eb   : > { %v1748_v50 = vpop.permute.xlu1 %1747  ;;  %v1740_v43 = vpop.permute.xlu0 %1739  ;;  %v3083_v47 = vor.u32 %v3082_v5, %v3079_v1  ;;  %v3301_v35 = vshrl.u32 %v6661_v8, 16  ;;  %v3304_v33 = vshll.u32 %v6661_v8, 16  ;;  %v2485_v51 = vshll.u32 %v6581_v22, 16  ;;  %v6716_v8 = vld [vmem:[%s7649_s9 + $0x58] sm:$0x7] }
 0x1ec   : > { %1768 = vst.msk [vmem:[#allocation3 + $0x20] sm:$0xff] %vm1763_vm4, %v1748_v50  ;;  %1764 = vst.msk [vmem:[#allocation3] sm:$0xff] %vm1763_vm4, %v1740_v43  ;;  %v2895_v50 = vor.u32 %v2894_v16, %v2891_v62  ;;  %v2870_v43 = vor.u32 %v2869_v30, %v8177_v44  ;;  %v2214_v62 = vshrl.u32 %v6551_v49, 16  ;;  %v3289_v32 = vrot.slane %v3287_v17, 2  ;;  %v6715_v17 = vld [vmem:[%s7649_s9 + $0x50] sm:$0xf8] }
 0x1ed   : > { %2368 = vrot.lane.b32.xlu1 %v6567_v19, %s7283_s10  ;;  %3385 = vrot.lane.b32.xlu0 %v3265_v36, %s7290_s23  ;;  %v2197_v19 = vshrl.u32 %v6549_v56, 16  ;;  %v2200_v36 = vshll.u32 %v6549_v56, 16  ;;  %v2211_v56 = vor.u32 %v2210_v31, %v2207_v57  ;;  %v3294_v2 = vrot.slane %v3292_v3, 1  ;;  %v6597_v31 = vld [vmem:[%s7649_s9 + $0x138] sm:$0xc0] }
 0x1ee   : > { %v2879_v4 = vsel %vm2412_vm15, %v2870_v43, %v2878_v21  ;;  %v2482_v21 = vshrl.u32 %v6581_v22, 16  ;;  %v2490_v49 = vshrl.u32 %v6582_v40, 16  ;;  %v8239_v3 = vld [vmem:[%s7649_s9 + $0x158] sm:$0xff] }
 0x1ef   : > { %v1750_v61 = vpop.permute.xlu1 %1749  ;;  %v1742_v60 = vpop.permute.xlu0 %1741  ;;  %v2199_v52 = vrot.slane %v2197_v19, 6  ;;  %v2202_v53 = vrot.slane %v2200_v36, 7  ;;  %v2216_v19 = vrot.slane %v2214_v62, 6  ;;  %v2219_v36 = vrot.slane %v2217_v7, 7 }
 0x1f0   : > { %1769 = vst.msk [vmem:[#allocation3 + $0x28] sm:$0xff] %vm1763_vm4, %v1750_v61  ;;  %1765 = vst.msk [vmem:[#allocation3 + $0x8] sm:$0xff] %vm1763_vm4, %v1742_v60  ;;  %v3284_v61 = vshrl.u32 %v6659_v13, 16  ;;  %v6552_v60 = vld [vmem:[%s7649_s9 + $0xb0] sm:$0x7f]  ;;  %v3306_v13 = vrot.slane %v3304_v33, 2 }
 0x1f1   : > { %2370 = vrot.lane.b32.xlu1 %v8073_v12, %s7283_s10  ;;  %3387 = vrot.lane.b32.xlu0 %v3282_v0, %s7290_s23  ;;  %v8189_v0 = vrot.slane %v3069_v28, 6  ;;  %v2225_v16 = vshll.u32 %v6552_v60, 16  ;;  %v2203_v44 = vor.u32 %v2202_v53, %v2199_v52  ;;  %v2493_v52 = vshll.u32 %v6582_v40, 16  ;;  %v8256_v33 = vld [vmem:[%s7649_s9 + $0xf8] sm:$0xff] }
 0x1f2   : > { %v3286_v30 = vrot.slane %v3284_v61, 1  ;;  %v2220_v53 = vor.u32 %v2219_v36, %v2216_v19  ;;  %v6598_v61 = vld [vmem:[%s7649_s9 + $0x140] sm:$0x7f]  ;;  %v2666_v62 = vshrl.u32 %v6597_v31, 16  ;;  %v6707_v19 = vld [vmem:[%s7649_s9 + $0x50] sm:$0xff] }
 0x1f3   : > { %v1797_v26 = vpop.permute.xlu1 %1796  ;;  %v1789_v29 = vpop.permute.xlu0 %1788  ;;  %v2227_v14 = vrot.slane %v2225_v16, 7  ;;  %v2677_v16 = vshll.u32 %v6598_v61, 16 }
 0x1f4   : > { %1817 = vst.msk [vmem:[#allocation3 + $0x20] sm:$0xff] %vm1812_vm5, %v1797_v26  ;;  %1813 = vst.msk [vmem:[#allocation3] sm:$0xff] %vm1812_vm5, %v1789_v29  ;;  %v3058_v26 = vor.u32 %v3057_v58, %v3054_v45  ;;  %v3066_v29 = vor.u32 %v3065_v59, %v3062_v27 }
 0x1f5   : > { %2555 = vrot.lane.b32.xlu1 %v2480_v63, %s7284_s11  ;;  %2553 = vrot.lane.b32.xlu0 %v2463_v15, %s7284_s11  ;;  %v2896_v63 = vsel %vm2412_vm15, %v2887_v18, %v2895_v50  ;;  %v3075_v15 = vor.u32 %v8191_v24, %v8189_v0  ;;  %v2212_v18 = vsel %vm2195_vm1, %v2203_v44, %v2211_v56  ;;  %v3303_v24 = vrot.slane %v3301_v35, 1  ;;  %v6584_v44 = vld [vmem:[%s7649_s9 + $0x118] sm:$0x3] }
 0x1f6   : > { %v3067_v39 = vsel %vm2195_vm1, %v3058_v26, %v3066_v29  ;;  %v3290_v0 = vor.u32 %v3289_v32, %v3286_v30  ;;  %v3817_v35 = vrot.slane %v6716_v8, 3  ;;  %v2510_v22 = vshll.u32 %v6584_v44, 16 }
 0x1f7   : > { %v1799_v41 = vpop.permute.xlu1 %1798  ;;  %v1791_v48 = vpop.permute.xlu0 %1790  ;;  %v3084_v38 = vsel %vm2195_vm1, %v3075_v15, %v3083_v47  ;;  %v3307_v59 = vor.u32 %v3306_v13, %v3303_v24  ;;  %v2487_v15 = vrot.slane %v2485_v51, 2  ;;  %v8287_v13 = vld [vmem:[%s7649_s9 + $0xd8] sm:$0xe0] }
 0x1f8   : > { %1818 = vst.msk [vmem:[#allocation3 + $0x28] sm:$0xff] %vm1812_vm5, %v1799_v41  ;;  %1814 = vst.msk [vmem:[#allocation3 + $0x8] sm:$0xff] %vm1812_vm5, %v1791_v48  ;;  %v2512_v24 = vrot.slane %v2510_v22, 2  ;;  %v6600_v51 = vld [vmem:[%s7649_s9 + $0x158] sm:$0x7f] }
 0x1f9   : > { %2739 = vrot.lane.b32.xlu1 %v2664_v10, %s7285_s12  ;;  %2737 = vrot.lane.b32.xlu0 %v2647_v46, %s7285_s12  ;;  %v6662_v10 = vld [vmem:[%s7649_s9 + $0x178] sm:$0x3]  ;;  %v2222_v46 = vshrl.u32 %v6552_v60, 16  ;;  %v6583_v60 = vld [vmem:[%s7649_s9 + $0x110] sm:$0xfe] }
 0x1fa   : > { %v3312_v34 = vshll.u32 %v6662_v10, 16  ;;  %v2499_v56 = vshrl.u32 %v6583_v60, 16  ;;  %v2502_v30 = vshll.u32 %v6583_v60, 16  ;;  %v8308_v60 = vld [vmem:[%s7649_s9 + $0x70] sm:$0x7] }
 0x1fb   : > { %v1942_v20 = vpop.permute.xlu1 %1941  ;;  %v1934_v25 = vpop.permute.xlu0 %1933  ;;  %v2224_v37 = vrot.slane %v2222_v46, 6  ;;  %v2674_v46 = vshrl.u32 %v6598_v61, 16 }
 0x1fc   : > { %1962 = vst.msk [vmem:[#allocation3 + $0x20] sm:$0xff] %vm1957_vm6, %v1942_v20  ;;  %1958 = vst.msk [vmem:[#allocation3] sm:$0xff] %vm1957_vm6, %v1934_v25  ;;  %v3314_v45 = vrot.slane %v3312_v34, 2  ;;  %v2507_v34 = vshrl.u32 %v6584_v44, 16  ;;  %v8273_v40 = vrot.slane %v2502_v30, 2 }
 0x1fd   : > { %2787 = vrot.lane.b32.xlu1 %v8140_v55, %s7286_s14  ;;  %2785 = vrot.lane.b32.xlu0 %v7985_v11, %s7286_s14  ;;  %v3297_v11 = vrot.slane %v3295_v6, 2  ;;  %v3309_v55 = vshrl.u32 %v6662_v10, 16  ;;  %v2228_v57 = vor.u32 %v2227_v14, %v2224_v37  ;;  %v2495_v6 = vrot.slane %v2493_v52, 2 }
 0x1fe   : > { %v2669_v10 = vshll.u32 %v6597_v31, 16  ;;  %v8266_v37 = vrot.slane %v2674_v46, 6  ;;  %v8268_v14 = vrot.slane %v2677_v16, 7  ;;  %v3904_v46 = vrot.slane %v8287_v13, 5 }
 0x1ff   : > { %v1114_v54 = vpop.permute.xlu1 %1113  ;;  %v1106_v28 = vpop.permute.xlu0 %1105  ;;  %v3298_v1 = vor.u32 %v3297_v11, %v3294_v2  ;;  %v3311_v5 = vrot.slane %v3309_v55, 1  ;;  %v2229_v7 = vsel %vm2195_vm1, %v2220_v53, %v2228_v57  ;;  %v3816_v2 = vrot.slane %v6715_v17, 3  ;;  %v7239_v17 = vld [vmem:[%s7649_s9 + $0x110] sm:$0xff] }
 0x200   : > { %1132 = vst.msk [vmem:[#allocation3 + $0x30] sm:$0xff] %vm1125_vm12, %v1114_v54  ;;  %1128 = vst.msk [vmem:[#allocation3 + $0x10] sm:$0xff] %vm1125_vm12, %v1106_v28  ;;  %v7227_v54 = vld [vmem:[%s9835_s3 + $0x1c] sm:$0xff]   ;;  %v8261_v55 = vrot.slane %v2666_v62, 6  ;;  %v8264_v36 = vrot.slane %v2669_v10, 7  ;;  %v6708_v10 = vld [vmem:[%s7649_s9 + $0x68] sm:$0xff] }
 0x201   : > { %2971 = vrot.lane.b32.xlu1 %v2896_v63, %s7287_s15  ;;  %2969 = vrot.lane.b32.xlu0 %v2879_v4, %s7287_s15  ;;  %v3299_v20 = vsel %vm2412_vm15, %v3290_v0, %v3298_v1  ;;  %v3315_v25 = vor.u32 %v3314_v45, %v3311_v5  ;;  %v2484_v63 = vrot.slane %v2482_v21, 1  ;;  %v2492_v4 = vrot.slane %v2490_v49, 1  ;;  %v6599_v21 = vld [vmem:[%s7649_s9 + $0x150] sm:$0xc0]  ;;  %v8295_v45 = vld [vmem:[%s7649_s9 + $0xe0] sm:$0x1f] }
 0x202   : > { %v2509_v0 = vrot.slane %v2507_v34, 1  ;;  %v2672_v1 = vor.u32 %v8264_v36, %v8261_v55  ;;  %v2680_v5 = vor.u32 %v8268_v14, %v8266_v37  ;;  %v2694_v16 = vshll.u32 %v6600_v51, 16  ;;  %v6621_v34 = vld [vmem:[%s7649_s9 + $0x140] sm:$0xfe]  ;;  %v6622_v37 = vld [vmem:[%s7649_s9 + $0x148] sm:$0x3] }
 0x203   : > { %v1944_v41 = vpop.permute.xlu1 %1943  ;;  %v1936_v48 = vpop.permute.xlu0 %1935  ;;  %v1966_v50 = vld [vmem:[#allocation3] sm:$0xff]  ;;  %v3316_v28 = vsel %vm2412_vm15, %v3307_v59, %v3315_v25  ;;  %v2488_v32 = vor.u32 %v2487_v15, %v2484_v63  ;;  %v2496_v11 = vor.u32 %v2495_v6, %v2492_v4  ;;  %v2686_v25 = vshll.u32 %v6599_v21, 16 }
 0x204   : > { %v1970_v43 = vld [vmem:[#allocation3 + $0x20] sm:$0xff]  ;;  %1963 = vst.msk [vmem:[#allocation3 + $0x28] sm:$0xff] %vm1957_vm6, %v1944_v41  ;;  %1959 = vst.msk [vmem:[#allocation3 + $0x8] sm:$0xff] %vm1957_vm6, %v1936_v48  ;;  %7061 = vmatprep.mubr.msk.bf16.mxu0 %vm2001_vm7, %v1966_v50  ;;  %v7228_v41 = vld [vmem:[%s9835_s3 + $0x24] ss:$0 sps:$4 sm:$0x33]   ;;  %v2513_v4 = vor.u32 %v2512_v24, %v2509_v0 }
 0x205   : > { %7069 = vmatprep.mubr.msk.bf16.mxu1 %vm2001_vm7, %v1970_v43  ;;  %2340 = vst.msk [vmem:[#allocation3] sm:$0xff] %vm1076_vm11, %v2212_v18  ;;  %3159 = vrot.lane.b32.xlu1 %v3084_v38, %s7288_s16  ;;  %v8270_v18 = vrot.slane %v2499_v56, 1  ;;  %v6557_v48 = vld [vmem:[%s7649_s9 + $0xf0] sm:$0xc0]  ;;  %v6558_v50 = vld [vmem:[%s7649_s9 + $0xf8] sm:$0x7f]  ;;  %v3818_v43 = vsel %vm3815_vm8, %v3816_v2, %v3817_v35 }
 0x206   : > { %3157 = vrot.lane.b32.xlu0 %v3067_v39, %s7288_s16  ;;  %v2265_v49 = vshrl.u32 %v6557_v48, 16  ;;  %v2268_v52 = vshll.u32 %v6557_v48, 16  ;;  %v2273_v59 = vshrl.u32 %v6558_v50, 16  ;;  %v2276_v61 = vshll.u32 %v6558_v50, 16  ;;  %v6733_v50 = vld [vmem:[%s7649_s9 + $0xf0] sm:$0xe0] }
 0x207   : > { %v1116_v58 = vpop.permute.xlu1 %1115  ;;  %v1108_v27 = vpop.permute.xlu0 %1107  ;;  %v2505_v31 = vor.u32 %v8273_v40, %v8270_v18  ;;  %v2691_v6 = vshrl.u32 %v6600_v51, 16  ;;  %v2688_v2 = vrot.slane %v2686_v25, 7  ;;  %v2696_v36 = vrot.slane %v2694_v16, 7  ;;  %v6734_v24 = vld [vmem:[%s7649_s9 + $0xf8] sm:$0x1f] }
 0x208   : > { %1133 = vst.msk [vmem:[#allocation3 + $0x38] sm:$0xff] %vm1125_vm12, %v1116_v58  ;;  %1129 = vst.msk [vmem:[#allocation3 + $0x18] sm:$0xff] %vm1125_vm12, %v1108_v27  ;;  %v8301_v58 = vld [vmem:[%s7649_s9 + $0x68] sm:$0xf8]  ;;  %v3479_v27 = vsel %vm2026_vm13, %v7228_v41, 0  ;;  %v2267_v63 = vrot.slane %v2265_v49, 6 }
 0x209   : > { %3207 = vrot.lane.b32.xlu1 %v7974_v9, %s7289_s20  ;;  %v2270_v15 = vrot.slane %v2268_v52, 7  ;;  %v2275_v8 = vrot.slane %v2273_v59, 6  ;;  %v2278_v62 = vrot.slane %v2276_v61, 7  ;;  %v2693_v55 = vrot.slane %v2691_v6, 6  ;;  %v6639_v25 = vld [vmem:[%s7649_s9 + $0x180] sm:$0xc0] }
 0x20a   : > { %3205 = vrot.lane.b32.xlu0 %v8239_v3, %s7289_s20  ;;  %v2901_v13 = vshll.u32 %v6621_v34, 16  ;;  %v6623_v6 = vld [vmem:[%s7649_s9 + $0x158] sm:$0xfe] }
 0x20b   : > { %v1260_v47 = vpop.permute.xlu1 %1259  ;;  %v1252_v26 = vpop.permute.xlu0 %1251  ;;  %v1967_v9 = vld [vmem:[#allocation3 + $0x8] sm:$0xff]  ;;  %v2271_v44 = vor.u32 %v2270_v15, %v2267_v63  ;;  %v2279_v30 = vor.u32 %v2278_v62, %v2275_v8  ;;  %v2697_v49 = vor.u32 %v2696_v36, %v2693_v55  ;;  %v6640_v15 = vld [vmem:[%s7649_s9 + $0x188] sm:$0x7f]  ;;  %v6624_v8 = vld [vmem:[%s7649_s9 + $0x160] sm:$0x3] }
 0x20c   : > { %v1971_v29 = vld [vmem:[#allocation3 + $0x28] sm:$0xff]  ;;  %1278 = vst.msk [vmem:[#allocation3 + $0x30] sm:$0xff] %vm1271_vm14, %v1260_v47  ;;  %1274 = vst.msk [vmem:[#allocation3 + $0x10] sm:$0xff] %vm1271_vm14, %v1252_v26  ;;  %7062 = vmatmul.mubr.msk.bf16.vlgmr.msra.gmra.mrb[0].mxu0 %vm2001_vm7, %v1967_v9  ;;  %v3905_v26 = vrot.slane %v8295_v45, 5  ;;  %v3819_v9 = vrot.slane %v8301_v58, 3  ;;  %v3908_v58 = vrot.slane %v6734_v24, 5 }
 0x20d   : > { %7070 = vmatmul.mubr.msk.bf16.vlgmr.msra.gmra.mrb[0].mxu1 %vm2001_vm7, %v1971_v29  ;;  %2341 = vst.msk [vmem:[#allocation3 + $0x8] sm:$0xff] %vm1076_vm11, %v2229_v7  ;;  %2372 = vrot.lane.b32.xlu1 %v8256_v33, %s7283_s10  ;;  %v6559_v7 = vld [vmem:[%s7649_s9 + $0x108] sm:$0xc0]  ;;  %v3820_v29 = vrot.slane %v8308_v60, 3  ;;  %v2280_v22 = vsel %vm2195_vm1, %v2271_v44, %v2279_v30  ;;  %v2903_v61 = vrot.slane %v2901_v13, 2  ;;  %v2923_v30 = vshrl.u32 %v6624_v8, 16 }
 0x20e   : > { %3389 = vrot.lane.b32.xlu0 %v3299_v20, %s7290_s23  ;;  %7078 = vmatpush3.bf16.msra.mxu1 %v8096_v42  ;;  %v2497_v42 = vsel %vm2412_vm15, %v2488_v32, %v2496_v11  ;;  %v2683_v20 = vshrl.u32 %v6599_v21, 16  ;;  %v2282_v35 = vshrl.u32 %v6559_v7, 16  ;;  %v2514_v11 = vsel %vm2412_vm15, %v2505_v31, %v2513_v4  ;;  %2344 = vst.msk [vmem:[#allocation3 + $0x20] sm:$0xff] %vm1076_vm11, %v2280_v22  ;;  %v6755_v44 = vld [vmem:[%s7649_s9 + $0xe0] sm:$0xf8] }
 0x20f   : > { %v1262_v38 = vpop.permute.xlu1 %1261  ;;  %v1254_v39 = vpop.permute.xlu0 %1253  ;;  %7079 = vmatprep.subr.bf16.mxu1 %v7227_v54  ;;  %v3906_v48 = vsel %vm3694_vm9, %v3904_v46, %v3905_v26  ;;  %v2906_v21 = vshrl.u32 %v6622_v37, 16  ;;  %v3821_v45 = vsel %vm3815_vm8, %v3819_v9, %v3820_v29  ;;  %v3907_v31 = vrot.slane %v6733_v50, 5  ;;  %v6642_v36 = vld [vmem:[%s7649_s9 + $0x1a0] sm:$0x7f] }
 0x210   : > { %1279 = vst.msk [vmem:[#allocation3 + $0x38] sm:$0xff] %vm1271_vm14, %v1262_v38  ;;  %1275 = vst.msk [vmem:[#allocation3 + $0x18] sm:$0xff] %vm1271_vm14, %v1254_v39  ;;  %v2685_v32 = vrot.slane %v2683_v20, 6  ;;  %v2284_v14 = vrot.slane %v2282_v35, 6  ;;  %v3097_v26 = vshll.u32 %v6640_v15, 16  ;;  %v2915_v9 = vshrl.u32 %v6623_v6, 16 }
 0x211   : > { %3751 = vrot.lane.b32.xlu1 %v6707_v19, %s7283_s10  ;;  %v2285_v19 = vshll.u32 %v6559_v7, 16  ;;  %v2908_v60 = vrot.slane %v2906_v21, 1  ;;  %v3909_v62 = vsel %vm3694_vm9, %v3907_v31, %v3908_v58  ;;  %v3086_v7 = vshrl.u32 %v6639_v25, 16 }
 0x212   : > { %3391 = vrot.lane.b32.xlu0 %v3316_v28, %s7290_s23  ;;  %7080 = vmatpush3.bf16.msra.mxu1 %v7227_v54  ;;  %v6560_v54 = vld [vmem:[%s7649_s9 + $0x110] sm:$0x7f]  ;;  %v2681_v28 = vsel %vm2195_vm1, %v2672_v1, %v2680_v5  ;;  %v2909_v1 = vshll.u32 %v6622_v37, 16  ;;  %v2689_v51 = vor.u32 %v2688_v2, %v2685_v32  ;;  %v2918_v29 = vshll.u32 %v6623_v6, 16 }
 0x213   : > { %v1409_v53 = vpop.permute.xlu1 %1408  ;;  %v1401_v57 = vpop.permute.xlu0 %1400  ;;  %7171 = vmatprep.subr.msk.bf16.mxu1 %vm2026_vm13, %v7228_v41  ;;  %v2290_v18 = vshrl.u32 %v6560_v54, 16  ;;  %v2293_v38 = vshll.u32 %v6560_v54, 16  ;;  %v2287_v41 = vrot.slane %v2285_v19, 7  ;;  %v2926_v54 = vshll.u32 %v6624_v8, 16 }
 0x214   : > { %1427 = vst.msk [vmem:[#allocation3 + $0x30] sm:$0xff] %vm1420_vm0, %v1409_v53  ;;  %1423 = vst.msk [vmem:[#allocation3 + $0x10] sm:$0xff] %vm1420_vm0, %v1401_v57  ;;  %v2911_v20 = vrot.slane %v2909_v1, 2  ;;  %v2698_v63 = vsel %vm2195_vm1, %v2689_v51, %v2697_v49  ;;  %v3088_v35 = vrot.slane %v3086_v7, 6  ;;  %v3099_v19 = vrot.slane %v3097_v26, 7 }
 0x215   : > { %2557 = vrot.lane.b32.xlu1 %v2497_v42, %s7284_s11  ;;  %v2898_v42 = vshrl.u32 %v6621_v34, 16  ;;  %v2295_v0 = vrot.slane %v2293_v38, 7  ;;  %v2288_v5 = vor.u32 %v2287_v41, %v2284_v14  ;;  %v2917_v37 = vrot.slane %v2915_v9, 1  ;;  %v6774_v1 = vld [vmem:[%s7649_s9 + $0x170] sm:$0x1f] }
 0x216   : > { %2374 = vrot.lane.b32.xlu0 %v7239_v17, %s7283_s10  ;;  %7082 = vmatpush3.bf16.msra.mxu1 %v3479_v27  ;;  %v2912_v16 = vor.u32 %v2911_v20, %v2908_v60  ;;  %v2920_v14 = vrot.slane %v2918_v29, 2  ;;  %v2928_v38 = vrot.slane %v2926_v54, 2  ;;  %v3114_v50 = vshll.u32 %v6642_v36, 16 }
 0x217   : > { %v1411_v56 = vpop.permute.xlu1 %1410  ;;  %v1403_v47 = vpop.permute.xlu0 %1402  ;;  %v2900_v59 = vrot.slane %v2898_v42, 1  ;;  %v4133_v60 = vrot.slane %v6774_v1, 5 }
 0x218   : > { %1428 = vst.msk [vmem:[#allocation3 + $0x38] sm:$0xff] %vm1420_vm0, %v1411_v56  ;;  %1424 = vst.msk [vmem:[#allocation3 + $0x18] sm:$0xff] %vm1420_vm0, %v1403_v47  ;;  %v6756_v56 = vld [vmem:[%s7649_s9 + $0xe8] sm:$0x7]  ;;  %v3094_v47 = vshrl.u32 %v6640_v15, 16  ;;  %v2921_v13 = vor.u32 %v2920_v14, %v2917_v37 }
 0x219   : > { %3840 = vrot.lane.b32.xlu1 %v3818_v43, %s7284_s11  ;;  %v2292_v43 = vrot.slane %v2290_v18, 6  ;;  %v2904_v46 = vor.u32 %v2903_v61, %v2900_v59  ;;  %v4041_v2 = vrot.slane %v6756_v56, 3  ;;  %v2925_v18 = vrot.slane %v2923_v30, 1  ;;  %v6554_v59 = vld [vmem:[%s7649_s9 + $0xc8] sm:$0x7f] }
 0x21a   : > { %3753 = vrot.lane.b32.xlu0 %v6708_v10, %s7283_s10  ;;  %v3089_v10 = vshll.u32 %v6639_v25, 16  ;;  %v3096_v22 = vrot.slane %v3094_v47, 6  ;;  %v6555_v30 = vld [vmem:[%s7649_s9 + $0xd8] sm:$0xc0] }
 0x21b   : > { %v1458_v39 = vpop.permute.xlu1 %1457  ;;  %v1450_v40 = vpop.permute.xlu0 %1449  ;;  %v2296_v52 = vor.u32 %v2295_v0, %v2292_v43  ;;  %v2913_v55 = vsel %vm2412_vm15, %v2904_v46, %v2912_v16  ;;  %v6773_v43 = vld [vmem:[%s7649_s9 + $0x168] sm:$0xe0]  ;;  %v2929_v21 = vor.u32 %v2928_v38, %v2925_v18  ;;  %v2239_v16 = vshrl.u32 %v6554_v59, 16 }
 0x21c   : > { %1476 = vst.msk [vmem:[#allocation3 + $0x30] sm:$0xff] %vm1469_vm2, %v1458_v39  ;;  %1472 = vst.msk [vmem:[#allocation3 + $0x10] sm:$0xff] %vm1469_vm2, %v1450_v40  ;;  %v3091_v34 = vrot.slane %v3089_v10, 7  ;;  %v3100_v24 = vor.u32 %v3099_v19, %v3096_v22  ;;  %v4132_v61 = vrot.slane %v6773_v43, 5  ;;  %v2248_v38 = vshrl.u32 %v6555_v30, 16  ;;  %v8421_v43 = vld [vmem:[%s7649_s9 + $0x188] sm:$0xff] }
 0x21d   : > { %2741 = vrot.lane.b32.xlu1 %v2681_v28, %s7285_s12  ;;  %v2297_v27 = vsel %vm2195_vm1, %v2288_v5, %v2296_v52  ;;  %v6757_v5 = vld [vmem:[%s7649_s9 + $0xf8] sm:$0xf8]  ;;  %v6775_v52 = vld [vmem:[%s7649_s9 + $0x180] sm:$0xe0] }
 0x21e   : > { %2559 = vrot.lane.b32.xlu0 %v2514_v11, %s7284_s11  ;;  %2345 = vst.msk [vmem:[#allocation3 + $0x28] sm:$0xff] %vm1076_vm11, %v2297_v27  ;;  %v6641_v11 = vld [vmem:[%s7649_s9 + $0x198] sm:$0xc0]  ;;  %v3092_v0 = vor.u32 %v3091_v34, %v3088_v35  ;;  %v3116_v27 = vrot.slane %v3114_v50, 7  ;;  %v4043_v20 = vrot.slane %v6757_v5, 3  ;;  %v4135_v47 = vrot.slane %v6775_v52, 5 }
 0x21f   : > { %v1460_v53 = vpop.permute.xlu1 %1459  ;;  %v1452_v57 = vpop.permute.xlu0 %1451  ;;  %v3106_v41 = vshll.u32 %v6641_v11, 16  ;;  %v4134_v54 = vsel %vm3694_vm9, %v4132_v61, %v4133_v60  ;;  %v6556_v35 = vld [vmem:[%s7649_s9 + $0xe0] sm:$0x7f]  ;;  %v8402_v34 = vld [vmem:[%s7649_s9 + $0x1a8] sm:$0x3] }
 0x220   : > { %1477 = vst.msk [vmem:[#allocation3 + $0x38] sm:$0xff] %vm1469_vm2, %v1460_v53  ;;  %1473 = vst.msk [vmem:[#allocation3 + $0x18] sm:$0xff] %vm1469_vm2, %v1452_v57  ;;  %v6663_v53 = vld [vmem:[%s7649_s9 + $0x188] sm:$0xfe]  ;;  %v6553_v57 = vld [vmem:[%s7649_s9 + $0xc0] sm:$0xc0]  ;;  %v3101_v15 = vsel %vm2195_vm1, %v3092_v0, %v3100_v24 }
 0x221   : > { %3928 = vrot.lane.b32.xlu1 %v3906_v48, %s7285_s12  ;;  %v3111_v48 = vshrl.u32 %v6642_v36, 16  ;;  %v3108_v31 = vrot.slane %v3106_v41, 7  ;;  %v3318_v6 = vshrl.u32 %v6663_v53, 16  ;;  %v3321_v8 = vshll.u32 %v6663_v53, 16 }
 0x222   : > { %3842 = vrot.lane.b32.xlu0 %v3821_v45, %s7284_s11  ;;  %v6758_v45 = vld [vmem:[%s7649_s9 + $0x100] sm:$0x7]  ;;  %v2231_v10 = vshrl.u32 %v6553_v57, 16  ;;  %v2234_v46 = vshll.u32 %v6553_v57, 16  ;;  %v8408_v36 = vrot.slane %v2239_v16, 6  ;;  %v2259_v50 = vshll.u32 %v6556_v35, 16 }
 0x223   : > { %v1603_v17 = vpop.permute.xlu1 %1602  ;;  %v1595_v4 = vpop.permute.xlu0 %1594  ;;  %v3113_v58 = vrot.slane %v3111_v48, 6  ;;  %v4044_v25 = vrot.slane %v6758_v45, 3  ;;  %v2256_v48 = vshrl.u32 %v6556_v35, 16  ;;  %v6797_v45 = vld [vmem:[%s7649_s9 + $0x170] sm:$0xf8] }
 0x224   : > { %1621 = vst.msk [vmem:[#allocation3 + $0x30] sm:$0xff] %vm1614_vm3, %v1603_v17  ;;  %1617 = vst.msk [vmem:[#allocation3 + $0x10] sm:$0xff] %vm1614_vm3, %v1595_v4  ;;  %v2930_v17 = vsel %vm2412_vm15, %v2921_v13, %v2929_v21  ;;  %v6664_v4 = vld [vmem:[%s7649_s9 + $0x190] sm:$0x3]  ;;  %v8404_v22 = vrot.slane %v2231_v10, 6  ;;  %v8406_v19 = vrot.slane %v2234_v46, 7 }
 0x225   : > { %2789 = vrot.lane.b32.xlu1 %v8137_v23, %s7286_s14  ;;  %v4040_v23 = vrot.slane %v6755_v44, 3  ;;  %v2242_v44 = vshll.u32 %v6554_v59, 16  ;;  %v3117_v56 = vor.u32 %v3116_v27, %v3113_v58  ;;  %v3326_v9 = vshrl.u32 %v6664_v4, 16  ;;  %v6798_v57 = vld [vmem:[%s7649_s9 + $0x178] sm:$0x7]  ;;  %v7230_v35 = vld [vmem:[%s9835_s3 + $0x30] sm:$0xff]  }
 0x226   : > { %2743 = vrot.lane.b32.xlu0 %v2698_v63, %s7285_s12  ;;  %v6776_v63 = vld [vmem:[%s7649_s9 + $0x188] sm:$0x1f]  ;;  %v3329_v29 = vshll.u32 %v6664_v4, 16  ;;  %v3343_v21 = vshrl.u32 %v8402_v34, 16  ;;  %v2258_v59 = vrot.slane %v2256_v48, 6  ;;  %v2261_v61 = vrot.slane %v2259_v50, 7 }
 0x227   : > { %v1605_v28 = vpop.permute.xlu1 %1604  ;;  %v1597_v32 = vpop.permute.xlu0 %1596  ;;  %v4042_v42 = vsel %vm3815_vm8, %v4040_v23, %v4041_v2  ;;  %v4136_v26 = vrot.slane %v6776_v63, 5  ;;  %v8397_v23 = vrot.slane %v3321_v8, 2  ;;  %v6665_v2 = vld [vmem:[%s7649_s9 + $0x1a0] sm:$0xfe]  ;;  %v8410_v37 = vrot.slane %v2242_v44, 7  ;;  %v7229_v4 = vld [vmem:[%s9835_s3 + $0x28] sm:$0xff]  }
 0x228   : > { %1622 = vst.msk [vmem:[#allocation3 + $0x38] sm:$0xff] %vm1614_vm3, %v1605_v28  ;;  %1618 = vst.msk [vmem:[#allocation3 + $0x18] sm:$0xff] %vm1614_vm3, %v1597_v32  ;;  %v4045_v28 = vsel %vm3815_vm8, %v4043_v20, %v4044_v25  ;;  %v8395_v32 = vrot.slane %v3318_v6, 1  ;;  %v3331_v41 = vrot.slane %v3329_v29, 2  ;;  %v3335_v24 = vshrl.u32 %v6665_v2, 16  ;;  %7099 = vmatprep.subr.bf16.mxu0 %v7229_v4 }
 0x229   : > { %3976 = vrot.lane.b32.xlu1 %v8073_v12, %s7286_s14  ;;  %v3103_v12 = vshrl.u32 %v6641_v11, 16  ;;  %v4137_v18 = vsel %vm3694_vm9, %v4135_v47, %v4136_v26  ;;  %v3338_v13 = vshll.u32 %v6665_v2, 16  ;;  %v3346_v63 = vshll.u32 %v8402_v34, 16  ;;  %v8452_v44 = vld [vmem:[%s7649_s9 + $0x128] sm:$0xfe]  ;;  %v7240_v47 = vld [vmem:[%s7649_s9 + $0x170] sm:$0xff]  ;;  %7100 = vmatpush3.bf16.msra.mxu0 %v7229_v4 }
 0x22a   : > { %3930 = vrot.lane.b32.xlu0 %v3909_v62, %s7285_s12  ;;  %v3324_v0 = vor.u32 %v8397_v23, %v8395_v32  ;;  %v8447_v46 = vrot.slane %v3335_v24, 1  ;;  %v8459_v26 = vld [vmem:[%s7649_s9 + $0x130] sm:$0x3]  ;;  %v3345_v32 = vrot.slane %v3343_v21, 1  ;;  %7101 = vmatprep.subr.bf16.mxu0 %v7230_v35  ;;  %v6587_v4 = vld [vmem:[%s7649_s9 + $0x140] sm:$0xfe] }
 0x22b   : > { %v1752_v39 = vpop.permute.xlu1 %1751  ;;  %v1744_v40 = vpop.permute.xlu0 %1743  ;;  %v8449_v16 = vrot.slane %v3338_v13, 2  ;;  %v3348_v23 = vrot.slane %v3346_v63, 2  ;;  %v6800_v48 = vld [vmem:[%s7649_s9 + $0x190] sm:$0x7]  ;;  %v2524_v50 = vshrl.u32 %v8459_v26, 16  ;;  %v2527_v21 = vshll.u32 %v8459_v26, 16 }
 0x22c   : > { %1770 = vst.msk [vmem:[#allocation3 + $0x30] sm:$0xff] %vm1763_vm4, %v1752_v39  ;;  %1766 = vst.msk [vmem:[#allocation3 + $0x10] sm:$0xff] %vm1763_vm4, %v1744_v40  ;;  %v2251_v39 = vshll.u32 %v6555_v30, 16  ;;  %v6561_v40 = vld [vmem:[%s7649_s9 + $0x120] sm:$0xc0]  ;;  %v2262_v30 = vor.u32 %v2261_v61, %v2258_v59  ;;  %v4272_v61 = vrot.slane %v6800_v48, 3 }
 0x22d   : > { %2973 = vrot.lane.b32.xlu1 %v2913_v55, %s7287_s15  ;;  %v2299_v52 = vshrl.u32 %v6561_v40, 16  ;;  %v2302_v53 = vshll.u32 %v6561_v40, 16  ;;  %v2519_v40 = vshll.u32 %v8452_v44, 16  ;;  %v3349_v13 = vor.u32 %v3348_v23, %v3345_v32  ;;  %7102 = vmatpush3.bf16.msra.mxu0 %v7230_v35  ;;  %v6603_v48 = vld [vmem:[%s7649_s9 + $0x180] sm:$0xc0] }
 0x22e   : > { %2791 = vrot.lane.b32.xlu0 %v8239_v3, %s7286_s14  ;;  %v3105_v3 = vrot.slane %v3103_v12, 6  ;;  %v3328_v12 = vrot.slane %v3326_v9, 1  ;;  %v2536_v26 = vshll.u32 %v6587_v4, 16 }
 0x22f   : > { %v1754_v51 = vpop.permute.xlu1 %1753  ;;  %v1746_v49 = vpop.permute.xlu0 %1745  ;;  %v2301_v60 = vrot.slane %v2299_v52, 6  ;;  %v2304_v20 = vrot.slane %v2302_v53, 7 }
 0x230   : > { %1771 = vst.msk [vmem:[#allocation3 + $0x38] sm:$0xff] %vm1763_vm4, %v1754_v51  ;;  %1767 = vst.msk [vmem:[#allocation3 + $0x18] sm:$0xff] %vm1763_vm4, %v1746_v49  ;;  %v2237_v51 = vor.u32 %v8406_v19, %v8404_v22  ;;  %v2245_v49 = vor.u32 %v8410_v37, %v8408_v36  ;;  %v3332_v25 = vor.u32 %v3331_v41, %v3328_v12  ;;  %v2516_v37 = vshrl.u32 %v8452_v44, 16 }
 0x231   : > { %4064 = vrot.lane.b32.xlu1 %v4042_v42, %s7287_s15  ;;  %v6562_v42 = vld [vmem:[%s7649_s9 + $0x128] sm:$0x7f]  ;;  %v2305_v10 = vor.u32 %v2304_v20, %v2301_v60  ;;  %v2521_v20 = vrot.slane %v2519_v40, 2  ;;  %v8533_v40 = vld [vmem:[%s7649_s9 + $0x140] sm:$0xff] }
 0x232   : > { %3978 = vrot.lane.b32.xlu0 %v8256_v33, %s7286_s14  ;;  %v3109_v33 = vor.u32 %v3108_v31, %v3105_v3  ;;  %v8434_v3 = vrot.slane %v2248_v38, 6  ;;  %v8436_v31 = vrot.slane %v2251_v39, 7  ;;  %v2307_v58 = vshrl.u32 %v6562_v42, 16  ;;  %v8482_v39 = vld [vmem:[%s7649_s9 + $0x188] sm:$0xf8] }
 0x233   : > { %v1801_v62 = vpop.permute.xlu1 %1800  ;;  %v1793_v7 = vpop.permute.xlu0 %1792  ;;  %v2310_v27 = vshll.u32 %v6562_v42, 16  ;;  %v2246_v9 = vsel %vm2195_vm1, %v2237_v51, %v2245_v49  ;;  %v3341_v38 = vor.u32 %v8449_v16, %v8447_v46  ;;  %v4271_v59 = vrot.slane %v8482_v39, 3  ;;  %v6720_v46 = vld [vmem:[%s7649_s9 + $0x88] sm:$0x7] }
 0x234   : > { %1819 = vst.msk [vmem:[#allocation3 + $0x30] sm:$0xff] %vm1812_vm5, %v1801_v62  ;;  %1815 = vst.msk [vmem:[#allocation3 + $0x10] sm:$0xff] %vm1812_vm5, %v1793_v7  ;;  %v3118_v14 = vsel %vm2195_vm1, %v3109_v33, %v3117_v56  ;;  %v4268_v62 = vrot.slane %v6797_v45, 3  ;;  %v4269_v7 = vrot.slane %v6798_v57, 3  ;;  %v6563_v56 = vld [vmem:[%s7649_s9 + $0x138] sm:$0xc0]  ;;  %v2254_v29 = vor.u32 %v8436_v31, %v8434_v3 }
 0x235   : > { %3161 = vrot.lane.b32.xlu1 %v3101_v15, %s7288_s16  ;;  %v2309_v15 = vrot.slane %v2307_v58, 6  ;;  %v7231_v45 = vld [vmem:[%s9835_s3 + $0x38] ss:$0 sps:$4 sm:$0x33]   ;;  %v8502_v3 = vld [vmem:[%s7649_s9 + $0x128] sm:$0xff]  ;;  %v2518_v60 = vrot.slane %v2516_v37, 1  ;;  %v3350_v63 = vsel %vm2412_vm15, %v3341_v38, %v3349_v13 }
 0x236   : > { %2975 = vrot.lane.b32.xlu0 %v2930_v17, %s7287_s15  ;;  %v2312_v17 = vrot.slane %v2310_v27, 7  ;;  %v4270_v36 = vsel %vm3815_vm8, %v4268_v62, %v4269_v7  ;;  %v2263_v42 = vsel %vm2195_vm1, %v2254_v29, %v2262_v30  ;;  %v6601_v31 = vld [vmem:[%s7649_s9 + $0x168] sm:$0xc0]  ;;  %v4386_v27 = vsel %vm2026_vm13, %v7231_v45, 0  ;;  %7172 = vmatprep.subr.msk.bf16.mxu0 %vm2026_vm13, %v7231_v45  ;;  %v6736_v45 = vld [vmem:[%s7649_s9 + $0x110] sm:$0x1f] }
 0x237   : > { %v1803_v11 = vpop.permute.xlu1 %1802  ;;  %v1795_v55 = vpop.permute.xlu0 %1794  ;;  %7104 = vmatpush3.bf16.msra.mxu0 %v4386_v27  ;;  %v2700_v16 = vshrl.u32 %v6601_v31, 16  ;;  %v2703_v44 = vshll.u32 %v6601_v31, 16  ;;  %v4273_v30 = vsel %vm3815_vm8, %v4271_v59, %v4272_v61  ;;  %v2522_v32 = vor.u32 %v2521_v20, %v2518_v60  ;;  %v6735_v13 = vld [vmem:[%s7649_s9 + $0x108] sm:$0xe0]  ;;  %v6625_v60 = vld [vmem:[%s7649_s9 + $0x170] sm:$0xfe] }
 0x238   : > { %1820 = vst.msk [vmem:[#allocation3 + $0x38] sm:$0xff] %vm1812_vm5, %v1803_v11  ;;  %1816 = vst.msk [vmem:[#allocation3 + $0x18] sm:$0xff] %vm1812_vm5, %v1795_v55  ;;  %v2313_v33 = vor.u32 %v2312_v17, %v2309_v15  ;;  %v6564_v11 = vld [vmem:[%s7649_s9 + $0x140] sm:$0x7f]  ;;  %v2526_v15 = vrot.slane %v2524_v50, 1  ;;  %v2529_v17 = vrot.slane %v2527_v21, 2 }
 0x239   : > { %4156 = vrot.lane.b32.xlu1 %v4134_v54, %s7288_s16  ;;  %v3333_v54 = vsel %vm2412_vm15, %v3324_v0, %v3332_v25  ;;  %v2324_v12 = vshrl.u32 %v6564_v11, 16  ;;  %v2327_v41 = vshll.u32 %v6564_v11, 16  ;;  %v6602_v25 = vld [vmem:[%s7649_s9 + $0x170] sm:$0x7f]  ;;  %v6604_v50 = vld [vmem:[%s7649_s9 + $0x188] sm:$0x7f] }
 0x23a   : > { %4066 = vrot.lane.b32.xlu0 %v4045_v28, %s7287_s15  ;;  %v8466_v28 = vld [vmem:[%s7649_s9 + $0x1a0] sm:$0xff]  ;;  %v2314_v2 = vsel %vm2195_vm1, %v2305_v10, %v2313_v33  ;;  %v2708_v33 = vshrl.u32 %v6602_v25, 16  ;;  %v2530_v23 = vor.u32 %v2529_v17, %v2526_v15  ;;  %v2728_v31 = vshll.u32 %v6604_v50, 16  ;;  %v6626_v17 = vld [vmem:[%s7649_s9 + $0x178] sm:$0x3] }
 0x23b   : > { %v1946_v1 = vpop.permute.xlu1 %1945  ;;  %v1938_v5 = vpop.permute.xlu0 %1937  ;;  %v6719_v10 = vld [vmem:[%s7649_s9 + $0x80] sm:$0xf8]  ;;  %v3910_v61 = vrot.slane %v6735_v13, 5  ;;  %v6628_v13 = vld [vmem:[%s7649_s9 + $0x190] sm:$0x3] }
 0x23c   : > { %1964 = vst.msk [vmem:[#allocation3 + $0x30] sm:$0xff] %vm1957_vm6, %v1946_v1  ;;  %1960 = vst.msk [vmem:[#allocation3 + $0x10] sm:$0xff] %vm1957_vm6, %v1938_v5  ;;  %v2326_v1 = vrot.slane %v2324_v12, 6  ;;  %v2329_v5 = vrot.slane %v2327_v41, 7  ;;  %v3822_v11 = vrot.slane %v6719_v10, 3  ;;  %v2531_v39 = vsel %vm2412_vm15, %v2522_v32, %v2530_v23 }
 0x23d   : > { %3209 = vrot.lane.b32.xlu1 %v8421_v43, %s7289_s20  ;;  %v6692_v32 = vld [vmem:[%s7649_s9 + $0x50] sm:$0x1f] }
 0x23e   : > { %3163 = vrot.lane.b32.xlu0 %v3118_v14, %s7288_s16  ;;  %v2316_v14 = vshrl.u32 %v6563_v56, 16  ;;  %v2330_v58 = vor.u32 %v2329_v5, %v2326_v1 }
 0x23f   : > { %v1948_v6 = vpop.permute.xlu1 %1947  ;;  %v1940_v8 = vpop.permute.xlu0 %1939 }
 0x240   : > { %1965 = vst.msk [vmem:[#allocation3 + $0x38] sm:$0xff] %vm1957_vm6, %v1948_v6  ;;  %1961 = vst.msk [vmem:[#allocation3 + $0x18] sm:$0xff] %vm1957_vm6, %v1940_v8  ;;  %v2318_v0 = vrot.slane %v2316_v14, 6  ;;  %v6588_v6 = vld [vmem:[%s7649_s9 + $0x148] sm:$0x3]  ;;  %v2538_v14 = vrot.slane %v2536_v26, 2 }
 0x241   : > { %4204 = vrot.lane.b32.xlu1 %v7240_v47, %s7289_s20  ;;  %v2533_v47 = vshrl.u32 %v6587_v4, 16  ;;  %v2544_v29 = vshll.u32 %v6588_v6, 16 }
 0x242   : > { %4158 = vrot.lane.b32.xlu0 %v4137_v18, %s7288_s16  ;;  %v2319_v18 = vshll.u32 %v6563_v56, 16  ;;  %v2711_v56 = vshll.u32 %v6602_v25, 16  ;;  %v3911_v25 = vrot.slane %v6736_v45, 5 }
 0x243   : > { %v2367_v55 = vpop.permute.xlu1 %2366  ;;  %v2365_v34 = vpop.permute.xlu0 %2364  ;;  %v1968_v22 = vld [vmem:[#allocation3 + $0x10] sm:$0xff]  ;;  %v2535_v37 = vrot.slane %v2533_v47, 1  ;;  %v2546_v38 = vrot.slane %v2544_v29, 2  ;;  %v2943_v47 = vshll.u32 %v6626_v17, 16 }
 0x244   : > { %v1972_v19 = vld [vmem:[#allocation3 + $0x30] sm:$0xff]  ;;  %2389 = vst.msk [vmem:[#allocation3 + $0x8] sm:$0xff] %vm1125_vm12, %v2367_v55  ;;  %2388 = vst.msk [vmem:[#allocation3] sm:$0xff] %vm1125_vm12, %v2365_v34  ;;  %7065 = vmatprep.mubr.msk.bf16.mxu0 %vm2001_vm7, %v1968_v22  ;;  %v2321_v24 = vrot.slane %v2319_v18, 7  ;;  %v3823_v55 = vrot.slane %v6720_v46, 3  ;;  %v2702_v34 = vrot.slane %v2700_v16, 6  ;;  %v3912_v26 = vsel %vm3694_vm9, %v3910_v61, %v3911_v25 }
 0x245   : > { %7073 = vmatprep.mubr.msk.bf16.mxu1 %vm2001_vm7, %v1972_v19  ;;  %2342 = vst.msk [vmem:[#allocation3 + $0x10] sm:$0xff] %vm1076_vm11, %v2246_v9  ;;  %2346 = vst.msk [vmem:[#allocation3 + $0x30] sm:$0xff] %vm1076_vm11, %v2314_v2  ;;  %3393 = vrot.lane.b32.xlu1 %v3333_v54, %s7290_s23  ;;  %v2541_v9 = vshrl.u32 %v6588_v6, 16  ;;  %v6709_v54 = vld [vmem:[%s7649_s9 + $0x80] sm:$0xff]  ;;  %v2705_v22 = vrot.slane %v2703_v44, 7  ;;  %v2710_v19 = vrot.slane %v2708_v33, 6  ;;  %v2539_v1 = vor.u32 %v2538_v14, %v2535_v37 }
 0x246   : > { %3211 = vrot.lane.b32.xlu0 %v8466_v28, %s7289_s20  ;;  %v2322_v57 = vor.u32 %v2321_v24, %v2318_v0  ;;  %v3824_v21 = vsel %vm3815_vm8, %v3822_v11, %v3823_v55  ;;  %v6737_v46 = vld [vmem:[%s7649_s9 + $0x120] sm:$0xe0]  ;;  %v6738_v16 = vld [vmem:[%s7649_s9 + $0x128] sm:$0x1f]  ;;  %v2932_v44 = vshrl.u32 %v6625_v60, 16  ;;  %v2935_v33 = vshll.u32 %v6625_v60, 16 }
 0x247   : > { %v2552_v51 = vpop.permute.xlu1 %2551  ;;  %v2550_v49 = vpop.permute.xlu0 %2549  ;;  %v1969_v52 = vld [vmem:[#allocation3 + $0x18] sm:$0xff]  ;;  %v2543_v18 = vrot.slane %v2541_v9, 1  ;;  %v2706_v0 = vor.u32 %v2705_v22, %v2702_v34  ;;  %v3914_v11 = vrot.slane %v6738_v16, 5  ;;  %v6644_v37 = vld [vmem:[%s7649_s9 + $0x1b8] sm:$0x7f]  ;;  %v2957_v61 = vshrl.u32 %v6628_v13, 16 }
 0x248   : > { %v1973_v53 = vld [vmem:[#allocation3 + $0x38] sm:$0xff]  ;;  %2574 = vst.msk [vmem:[#allocation3 + $0x8] sm:$0xff] %vm1271_vm14, %v2552_v51  ;;  %2573 = vst.msk [vmem:[#allocation3] sm:$0xff] %vm1271_vm14, %v2550_v49  ;;  %7066 = vmatmul.mubr.msk.bf16.gmra.mrb[4].mxu0 %vm2001_vm7, %v1969_v52  ;;  %v2331_v8 = vsel %vm2195_vm1, %v2322_v57, %v2330_v58  ;;  %v6721_v51 = vld [vmem:[%s7649_s9 + $0x98] sm:$0xf8]  ;;  %v2717_v52 = vshrl.u32 %v6603_v48, 16 }
 0x249   : > { %7074 = vmatmul.mubr.msk.bf16.gmra.mrb[4].mxu1 %vm2001_vm7, %v1973_v53  ;;  %2343 = vst.msk [vmem:[#allocation3 + $0x18] sm:$0xff] %vm1076_vm11, %v2263_v42  ;;  %4292 = vrot.lane.b32.xlu1 %v4270_v36, %s7290_s23  ;;  %2347 = vst.msk [vmem:[#allocation3 + $0x38] sm:$0xff] %vm1076_vm11, %v2331_v8  ;;  %v2713_v36 = vrot.slane %v2711_v56, 7  ;;  %v6710_v42 = vld [vmem:[%s7649_s9 + $0x98] sm:$0xff]  ;;  %v2547_v5 = vor.u32 %v2546_v38, %v2543_v18  ;;  %v6722_v49 = vld [vmem:[%s7649_s9 + $0xa0] sm:$0x7] }
 0x24a   : > { %4206 = vrot.lane.b32.xlu0 %v8421_v43, %s7289_s20  ;;  %v2720_v53 = vshll.u32 %v6603_v48, 16  ;;  %v2725_v57 = vshrl.u32 %v6604_v50, 16  ;;  %v3826_v15 = vrot.slane %v6722_v49, 3  ;;  %v2719_v4 = vrot.slane %v2717_v52, 6  ;;  %v6611_v38 = vld [vmem:[%s7649_s9 + $0x170] sm:$0xff] }
 0x24b   : > { %v2736_v62 = vpop.permute.xlu1 %2735  ;;  %v2734_v7 = vpop.permute.xlu0 %2733  ;;  %v2714_v24 = vor.u32 %v2713_v36, %v2710_v19  ;;  %v2548_v20 = vsel %vm2412_vm15, %v2539_v1, %v2547_v5  ;;  %v2940_v56 = vshrl.u32 %v6626_v17, 16  ;;  %v2934_v55 = vrot.slane %v2932_v44, 1  ;;  %v6643_v36 = vld [vmem:[%s7649_s9 + $0x1b0] sm:$0xc0]  ;;  %v6760_v49 = vld [vmem:[%s7649_s9 + $0x118] sm:$0x7] }
 0x24c   : > { %2758 = vst.msk [vmem:[#allocation3 + $0x8] sm:$0xff] %vm1420_vm0, %v2736_v62  ;;  %2757 = vst.msk [vmem:[#allocation3] sm:$0xff] %vm1420_vm0, %v2734_v7  ;;  %v2722_v6 = vrot.slane %v2720_v53, 7  ;;  %v2727_v8 = vrot.slane %v2725_v57, 6  ;;  %v2730_v62 = vrot.slane %v2728_v31, 7  ;;  %v2937_v34 = vrot.slane %v2935_v33, 2 }
 0x24d   : > { %3395 = vrot.lane.b32.xlu1 %v3350_v63, %s7290_s23  ;;  %v2715_v59 = vsel %vm2195_vm1, %v2706_v0, %v2714_v24  ;;  %v3825_v63 = vrot.slane %v6721_v51, 3  ;;  %v2942_v22 = vrot.slane %v2940_v56, 1  ;;  %v2945_v19 = vrot.slane %v2943_v47, 2  ;;  %v6627_v24 = vld [vmem:[%s7649_s9 + $0x188] sm:$0xfe] }
 0x24e   : > { %2376 = vrot.lane.b32.xlu0 %v8502_v3, %s7283_s10  ;;  %v2723_v29 = vor.u32 %v2722_v6, %v2719_v4  ;;  %v3696_v18 = vrot.slane %v6692_v32, 5  ;;  %v3120_v0 = vshrl.u32 %v6643_v36, 16  ;;  %v6759_v5 = vld [vmem:[%s7649_s9 + $0x110] sm:$0xf8]  ;;  %v3123_v45 = vshll.u32 %v6643_v36, 16 }
 0x24f   : > { %v2784_v2 = vpop.permute.xlu1 %2783  ;;  %v2782_v35 = vpop.permute.xlu0 %2781  ;;  %v3827_v9 = vsel %vm3815_vm8, %v3825_v63, %v3826_v15  ;;  %v2946_v1 = vor.u32 %v2945_v19, %v2942_v22  ;;  %v3128_v51 = vshrl.u32 %v6644_v37, 16  ;;  %v3131_v52 = vshll.u32 %v6644_v37, 16  ;;  %v6646_v47 = vld [vmem:[%s7649_s9 + $0x1d0] sm:$0x7f]  ;;  %v6778_v32 = vld [vmem:[%s7649_s9 + $0x1a0] sm:$0x1f] }
 0x250   : > { %2806 = vst.msk [vmem:[#allocation3 + $0x8] sm:$0xff] %vm1469_vm2, %v2784_v2  ;;  %2805 = vst.msk [vmem:[#allocation3] sm:$0xff] %vm1469_vm2, %v2782_v35  ;;  %v3913_v35 = vrot.slane %v6737_v46, 5  ;;  %v2960_v60 = vshll.u32 %v6628_v13, 16  ;;  %v4046_v15 = vrot.slane %v6759_v5, 3  ;;  %v4047_v17 = vrot.slane %v6760_v49, 3 }
 0x251   : > { %4294 = vrot.lane.b32.xlu1 %v4273_v30, %s7290_s23  ;;  %v2731_v30 = vor.u32 %v2730_v62, %v2727_v8  ;;  %v3122_v4 = vrot.slane %v3120_v0, 6  ;;  %v3125_v6 = vrot.slane %v3123_v45, 7  ;;  %v3130_v62 = vrot.slane %v3128_v51, 6  ;;  %v6668_v5 = vld [vmem:[%s7649_s9 + $0x1c0] sm:$0x3] }
 0x252   : > { %3755 = vrot.lane.b32.xlu0 %v6709_v54, %s7283_s10  ;;  %v6691_v54 = vld [vmem:[%s7649_s9 + $0x48] sm:$0xe0]  ;;  %v2959_v33 = vrot.slane %v2957_v61, 1  ;;  %v2962_v56 = vrot.slane %v2960_v60, 2  ;;  %v8631_v60 = vld [vmem:[%s7649_s9 + $0x1b8] sm:$0xff] }
 0x253   : > { %v2968_v12 = vpop.permute.xlu1 %2967  ;;  %v2966_v41 = vpop.permute.xlu0 %2965  ;;  %v3695_v14 = vrot.slane %v6691_v54, 5  ;;  %v6777_v54 = vld [vmem:[%s7649_s9 + $0x198] sm:$0xe0]  ;;  %v3126_v22 = vor.u32 %v3125_v6, %v3122_v4 }
 0x254   : > { %2990 = vst.msk [vmem:[#allocation3 + $0x8] sm:$0xff] %vm1614_vm3, %v2968_v12  ;;  %2989 = vst.msk [vmem:[#allocation3] sm:$0xff] %vm1614_vm3, %v2966_v41  ;;  %v6693_v12 = vld [vmem:[%s7649_s9 + $0x60] sm:$0xe0]  ;;  %v6694_v41 = vld [vmem:[%s7649_s9 + $0x68] sm:$0x1f]  ;;  %v2963_v37 = vor.u32 %v2962_v56, %v2959_v33 }
 0x255   : > { %2561 = vrot.lane.b32.xlu1 %v2531_v39, %s7284_s11  ;;  %v2732_v39 = vsel %vm2195_vm1, %v2723_v29, %v2731_v30  ;;  %v3697_v53 = vsel %vm3694_vm9, %v3695_v14, %v3696_v18  ;;  %v3698_v57 = vrot.slane %v6693_v12, 5  ;;  %v3699_v31 = vrot.slane %v6694_v41, 5 }
 0x256   : > { %2378 = vrot.lane.b32.xlu0 %v8533_v40, %s7283_s10  ;;  %v4048_v30 = vsel %vm3815_vm8, %v4046_v15, %v4047_v17 }
 0x257   : > { %v3156_v58 = vpop.permute.xlu1 %3155  ;;  %v3154_v27 = vpop.permute.xlu0 %3153  ;;  %v3700_v46 = vsel %vm3694_vm9, %v3698_v57, %v3699_v31 }
 0x258   : > { %3178 = vst.msk [vmem:[#allocation3 + $0x8] sm:$0xff] %vm1763_vm4, %v3156_v58  ;;  %3177 = vst.msk [vmem:[#allocation3] sm:$0xff] %vm1763_vm4, %v3154_v27  ;;  %v6749_v58 = vld [vmem:[%s7649_s9 + $0x110] sm:$0xff]  ;;  %v2949_v27 = vshrl.u32 %v6627_v24, 16 }
 0x259   : > { %3844 = vrot.lane.b32.xlu1 %v3824_v21, %s7284_s11  ;;  %v2938_v21 = vor.u32 %v2937_v34, %v2934_v55  ;;  %v3145_v55 = vshrl.u32 %v6646_v47, 16  ;;  %v3148_v34 = vshll.u32 %v6646_v47, 16 }
 0x25a   : > { %3757 = vrot.lane.b32.xlu0 %v6710_v42, %s7283_s10  ;;  %v3915_v42 = vsel %vm3694_vm9, %v3913_v35, %v3914_v11  ;;  %v2951_v16 = vrot.slane %v2949_v27, 1  ;;  %v3363_v27 = vshll.u32 %v6668_v5, 16 }
 0x25b   : > { %v3204_v7 = vpop.permute.xlu1 %3203  ;;  %v3202_v10 = vpop.permute.xlu0 %3201  ;;  %v2947_v8 = vsel %vm2412_vm15, %v2938_v21, %v2946_v1  ;;  %v6667_v1 = vld [vmem:[%s7649_s9 + $0x1b8] sm:$0xfe] }
 0x25c   : > { %3226 = vst.msk [vmem:[#allocation3 + $0x8] sm:$0xff] %vm1812_vm5, %v3204_v7  ;;  %3225 = vst.msk [vmem:[#allocation3] sm:$0xff] %vm1812_vm5, %v3202_v10  ;;  %v3133_v7 = vrot.slane %v3131_v52, 7  ;;  %v6645_v10 = vld [vmem:[%s7649_s9 + $0x1c8] sm:$0xc0]  ;;  %v3352_v57 = vshrl.u32 %v6667_v1, 16 }
 0x25d   : > { %2745 = vrot.lane.b32.xlu1 %v2715_v59, %s7285_s12  ;;  %v2952_v59 = vshll.u32 %v6627_v24, 16  ;;  %v3137_v35 = vshrl.u32 %v6645_v10, 16  ;;  %v3140_v11 = vshll.u32 %v6645_v10, 16  ;;  %v6779_v52 = vld [vmem:[%s7649_s9 + $0x1b0] sm:$0xe0]  ;;  %v3355_v31 = vshll.u32 %v6667_v1, 16 }
 0x25e   : > { %2563 = vrot.lane.b32.xlu0 %v2548_v20, %s7284_s11  ;;  %v3134_v19 = vor.u32 %v3133_v7, %v3130_v62  ;;  %v3354_v15 = vrot.slane %v3352_v57, 1  ;;  %v3365_v6 = vrot.slane %v3363_v27, 2  ;;  %v6670_v10 = vld [vmem:[%s7649_s9 + $0x1d8] sm:$0x3] }
 0x25f   : > { %v2369_v23 = vpop.permute.xlu1 %2368  ;;  %v3386_v2 = vpop.permute.xlu0 %3385  ;;  %v2954_v44 = vrot.slane %v2952_v59, 2  ;;  %v3139_v41 = vrot.slane %v3137_v35, 6  ;;  %v3357_v17 = vrot.slane %v3355_v31, 2  ;;  %v6711_v31 = vld [vmem:[%s7649_s9 + $0xb0] sm:$0xff] }
 0x260   : > { %2390 = vst.msk [vmem:[#allocation3 + $0x10] sm:$0xff] %vm1125_vm12, %v2369_v23  ;;  %v6761_v23 = vld [vmem:[%s7649_s9 + $0x128] sm:$0xf8]  ;;  %v3135_v0 = vsel %vm2195_vm1, %v3126_v22, %v3134_v19 }
 0x261   : > { %3409 = vst.msk [vmem:[#allocation3] sm:$0xff] %vm1957_vm6, %v3386_v2  ;;  %3932 = vrot.lane.b32.xlu1 %v3912_v26, %s7285_s12  ;;  %v6762_v2 = vld [vmem:[%s7649_s9 + $0x130] sm:$0x7]  ;;  %v2955_v36 = vor.u32 %v2954_v44, %v2951_v16  ;;  %v6801_v16 = vld [vmem:[%s7649_s9 + $0x1a0] sm:$0xf8]  ;;  %v3358_v47 = vor.u32 %v3357_v17, %v3354_v15  ;;  %v4737_v15 = vld [vmem:[%s7649_s9 + $0x8] sm:$0xff] }
 0x262   : > { %3846 = vrot.lane.b32.xlu0 %v3827_v9, %s7284_s11  ;;  %v4050_v12 = vrot.slane %v6762_v2, 3  ;;  %v6802_v44 = vld [vmem:[%s7649_s9 + $0x1a8] sm:$0x7]  ;;  %v4274_v2 = vrot.slane %v6801_v16, 3 }
 0x263   : > { %v2371_v48 = vpop.permute.xlu1 %2370  ;;  %v3388_v50 = vpop.permute.xlu0 %3387  ;;  %v2964_v24 = vsel %vm2412_vm15, %v2955_v36, %v2963_v37  ;;  %v4275_v35 = vrot.slane %v6802_v44, 3  ;;  %v4787_v44 = vld [vmem:[%s7649_s9 + $0x20] sm:$0xf0] }
 0x264   : > { %2391 = vst.msk [vmem:[#allocation3 + $0x18] sm:$0xff] %vm1125_vm12, %v2371_v48  ;;  %v3142_v48 = vrot.slane %v3140_v11, 7  ;;  %v8652_v11 = vld [vmem:[%s7649_s9 + $0x1d0] sm:$0xff] }
 0x265   : > { %3410 = vst.msk [vmem:[#allocation3 + $0x8] sm:$0xff] %vm1957_vm6, %v3388_v50  ;;  %2793 = vrot.lane.b32.xlu1 %v6611_v38, %s7286_s14  ;;  %v4138_v38 = vrot.slane %v6777_v54, 5  ;;  %v3147_v50 = vrot.slane %v3145_v55, 6  ;;  %v6696_v54 = vld [vmem:[%s7649_s9 + $0x80] sm:$0x1f] }
 0x266   : > { %2747 = vrot.lane.b32.xlu0 %v2732_v39, %s7285_s12  ;;  %v4139_v39 = vrot.slane %v6778_v32, 5  ;;  %v3143_v51 = vor.u32 %v3142_v48, %v3139_v41  ;;  %v3702_v19 = vrot.slane %v6696_v54, 5  ;;  %v4276_v48 = vsel %vm3815_vm8, %v4274_v2, %v4275_v35 }
 0x267   : > { %v2556_v20 = vpop.permute.xlu1 %2555  ;;  %v2554_v25 = vpop.permute.xlu0 %2553 }
 0x268   : > { %v3417_v63 = vld [vmem:[#allocation3] sm:$0xff]  ;;  %2576 = vst.msk [vmem:[#allocation3 + $0x18] sm:$0xff] %vm1271_vm14, %v2556_v20  ;;  %2575 = vst.msk [vmem:[#allocation3 + $0x10] sm:$0xff] %vm1271_vm14, %v2554_v25  ;;  %v4141_v25 = vrot.slane %v6779_v52, 5  ;;  %v6724_v52 = vld [vmem:[%s7649_s9 + $0xb8] sm:$0x7] }
 0x269   : > { %7083 = vmatprep.mubr.msk.bf16.mxu1 %vm2001_vm7, %v3417_v63  ;;  %3727 = vst.msk [vmem:[#allocation3] sm:$0xff] %vm1076_vm11, %v3697_v53  ;;  %3980 = vrot.lane.b32.xlu1 %v6749_v58, %s7286_s14  ;;  %v6780_v53 = vld [vmem:[%s7649_s9 + $0x1b8] sm:$0x1f]  ;;  %v3360_v58 = vshrl.u32 %v6668_v5, 16 }
 0x26a   : > { %3934 = vrot.lane.b32.xlu0 %v3915_v42, %s7285_s12  ;;  %v3150_v42 = vrot.slane %v3148_v34, 7  ;;  %v4142_v63 = vrot.slane %v6780_v53, 5 }
 0x26b   : > { %v2740_v26 = vpop.permute.xlu1 %2739  ;;  %v2738_v9 = vpop.permute.xlu0 %2737  ;;  %v3362_v4 = vrot.slane %v3360_v58, 1 }
 0x26c   : > { %v3418_v29 = vld [vmem:[#allocation3 + $0x8] sm:$0xff]  ;;  %2760 = vst.msk [vmem:[#allocation3 + $0x18] sm:$0xff] %vm1420_vm0, %v2740_v26  ;;  %2759 = vst.msk [vmem:[#allocation3 + $0x10] sm:$0xff] %vm1420_vm0, %v2738_v9  ;;  %v3151_v49 = vor.u32 %v3150_v42, %v3147_v50  ;;  %v3377_v9 = vshrl.u32 %v6670_v10, 16 }
 0x26d   : > { %7084 = vmatmul.mubr.msk.bf16.vlgmr.msra.gmra.mrb[8].mxu1 %vm2001_vm7, %v3418_v29  ;;  %3728 = vst.msk [vmem:[#allocation3 + $0x8] sm:$0xff] %vm1076_vm11, %v3700_v46  ;;  %2977 = vrot.lane.b32.xlu1 %v2947_v8, %s7287_s15  ;;  %v6669_v8 = vld [vmem:[%s7649_s9 + $0x1d0] sm:$0xfe]  ;;  %v4143_v46 = vsel %vm3694_vm9, %v4141_v25, %v4142_v63  ;;  %v3366_v26 = vor.u32 %v3365_v6, %v3362_v4  ;;  %v3380_v29 = vshll.u32 %v6670_v10, 16  ;;  %v3829_v4 = vrot.slane %v6724_v52, 3 }
 0x26e   : > { %2795 = vrot.lane.b32.xlu0 %v8421_v43, %s7286_s14  ;;  %v4049_v43 = vrot.slane %v6761_v23, 3  ;;  %v3152_v20 = vsel %vm2195_vm1, %v3143_v51, %v3151_v49  ;;  %v3369_v33 = vshrl.u32 %v6669_v8, 16  ;;  %v3372_v56 = vshll.u32 %v6669_v8, 16  ;;  %v6833_v8 = vld [vmem:[%s7649_s9 + $0xd8] sm:$0xf8] }
 0x26f   : > { %v2788_v14 = vpop.permute.xlu1 %2787  ;;  %v2786_v18 = vpop.permute.xlu0 %2785  ;;  %v3367_v36 = vsel %vm2412_vm15, %v3358_v47, %v3366_v26  ;;  %v3379_v37 = vrot.slane %v3377_v9, 1  ;;  %v6739_v47 = vld [vmem:[%s7649_s9 + $0x138] sm:$0xe0]  ;;  %v4788_v26 = vld [vmem:[%s7649_s9 + $0x28] sm:$0x1f]  ;;  %v4987_v54 = vshrl.u32 %v6833_v8, 16 }
 0x270   : > { %2808 = vst.msk [vmem:[#allocation3 + $0x18] sm:$0xff] %vm1469_vm2, %v2788_v14  ;;  %2807 = vst.msk [vmem:[#allocation3 + $0x10] sm:$0xff] %vm1469_vm2, %v2786_v18  ;;  %v4051_v45 = vsel %vm3815_vm8, %v4049_v43, %v4050_v12  ;;  %v3371_v55 = vrot.slane %v3369_v33, 1  ;;  %v3374_v34 = vrot.slane %v3372_v56, 2  ;;  %v3382_v14 = vrot.slane %v3380_v29, 2 }
 0x271   : > { %4068 = vrot.lane.b32.xlu1 %v4048_v30, %s7287_s15  ;;  %v6695_v30 = vld [vmem:[%s7649_s9 + $0x78] sm:$0xe0]  ;;  %v6697_v18 = vld [vmem:[%s7649_s9 + $0x90] sm:$0xe0]  ;;  %v6740_v29 = vld [vmem:[%s7649_s9 + $0x140] sm:$0x1f] }
 0x272   : > { %3982 = vrot.lane.b32.xlu0 %v8502_v3, %s7286_s14  ;;  %v4140_v3 = vsel %vm3694_vm9, %v4138_v38, %v4139_v39  ;;  %v3701_v22 = vrot.slane %v6695_v30, 5  ;;  %v6698_v38 = vld [vmem:[%s7649_s9 + $0x98] sm:$0x1f]  ;;  %v3704_v12 = vrot.slane %v6697_v18, 5  ;;  %v3375_v50 = vor.u32 %v3374_v34, %v3371_v55  ;;  %v6725_v30 = vld [vmem:[%s7649_s9 + $0xc8] sm:$0xf8] }
 0x273   : > { %v2972_v13 = vpop.permute.xlu1 %2971  ;;  %v2970_v21 = vpop.permute.xlu0 %2969  ;;  %v3705_v41 = vrot.slane %v6698_v38, 5  ;;  %v3383_v42 = vor.u32 %v3382_v14, %v3379_v37  ;;  %v4820_v55 = vshrl.u32 %v4787_v44, 16  ;;  %v4823_v34 = vshll.u32 %v4787_v44, 16 }
 0x274   : > { %2992 = vst.msk [vmem:[#allocation3 + $0x18] sm:$0xff] %vm1614_vm3, %v2972_v13  ;;  %2991 = vst.msk [vmem:[#allocation3 + $0x10] sm:$0xff] %vm1614_vm3, %v2970_v21  ;;  %v4785_v13 = vld [vmem:[%s7649_s9 + $0x8] sm:$0xf0]  ;;  %v4828_v37 = vshrl.u32 %v4788_v26, 16  ;;  %v4831_v14 = vshll.u32 %v4788_v26, 16 }
 0x275   : > { %3165 = vrot.lane.b32.xlu1 %v3135_v0, %s7288_s16  ;;  %v6803_v0 = vld [vmem:[%s7649_s9 + $0x1b8] sm:$0xf8]  ;;  %v4803_v53 = vshrl.u32 %v4785_v13, 16  ;;  %v3706_v57 = vsel %vm3694_vm9, %v3704_v12, %v3705_v41  ;;  %v3384_v58 = vsel %vm2412_vm15, %v3375_v50, %v3383_v42  ;;  %v4806_v27 = vshll.u32 %v4785_v13, 16  ;;  %v6858_v26 = vld [vmem:[%s7649_s9 + $0xe8] sm:$0x1f] }
 0x276   : > { %2979 = vrot.lane.b32.xlu0 %v2964_v24, %s7287_s15  ;;  %v6804_v24 = vld [vmem:[%s7649_s9 + $0x1c0] sm:$0x7]  ;;  %v4277_v51 = vrot.slane %v6803_v0, 3  ;;  %v4989_v41 = vrot.slane %v4987_v54, 3  ;;  %v4822_v0 = vrot.slane %v4820_v55, 4  ;;  %v5230_v55 = vshll.u32 %v6858_v26, 16 }
 0x277   : > { %v3160_v59 = vpop.permute.xlu1 %3159  ;;  %v4278_v49 = vrot.slane %v6804_v24, 3  ;;  %v4808_v10 = vrot.slane %v4806_v27, 5  ;;  %v4825_v24 = vrot.slane %v4823_v34, 5  ;;  %vm4584_vm15 = vsmask.f32 4352 }
 0x278   : > { %v3158_v61 = vpop.permute.xlu0 %3157  ;;  %3180 = vst.msk [vmem:[#allocation3 + $0x18] sm:$0xff] %vm1763_vm4, %v3160_v59  ;;  %v6741_v27 = vld [vmem:[%s7649_s9 + $0x150] sm:$0xe0] }
 0x279   : > { %3179 = vst.msk [vmem:[#allocation3 + $0x10] sm:$0xff] %vm1763_vm4, %v3158_v61  ;;  %4160 = vrot.lane.b32.xlu1 %v4140_v3, %s7288_s16  ;;  %v4786_v3 = vld [vmem:[%s7649_s9 + $0x10] sm:$0x1f]  ;;  %v4279_v6 = vsel %vm3815_vm8, %v4277_v51, %v4278_v49  ;;  %v6836_v49 = vld [vmem:[%s7649_s9 + $0xf8] sm:$0xf] }
 0x27a   : > { %4070 = vrot.lane.b32.xlu0 %v4051_v45, %s7287_s15  ;;  %v6723_v45 = vld [vmem:[%s7649_s9 + $0xb0] sm:$0xf8]  ;;  %v4811_v59 = vshrl.u32 %v4786_v3, 16  ;;  %v4814_v61 = vshll.u32 %v4786_v3, 16 }
 0x27b   : > { %v3208_v62 = vpop.permute.xlu1 %3207  ;;  %v3828_v17 = vrot.slane %v6723_v45, 3  ;;  %v6835_v3 = vld [vmem:[%s7649_s9 + $0xf0] sm:$0xf8] }
 0x27c   : > { %v3206_v7 = vpop.permute.xlu0 %3205  ;;  %3228 = vst.msk [vmem:[#allocation3 + $0x18] sm:$0xff] %vm1812_vm5, %v3208_v62  ;;  %v6834_v62 = vld [vmem:[%s7649_s9 + $0xe0] sm:$0xf]  ;;  %v4816_v16 = vrot.slane %v4814_v61, 5 }
 0x27d   : > { %3227 = vst.msk [vmem:[#allocation3 + $0x10] sm:$0xff] %vm1812_vm5, %v3206_v7  ;;  %3213 = vrot.lane.b32.xlu1 %v8631_v60, %s7289_s20  ;;  %v4805_v7 = vrot.slane %v4803_v53, 4  ;;  %v3830_v9 = vsel %vm3815_vm8, %v3828_v17, %v3829_v4  ;;  %v4995_v2 = vshrl.u32 %v6834_v62, 16  ;;  %v4998_v35 = vshll.u32 %v6834_v62, 16 }
 0x27e   : > { %3167 = vrot.lane.b32.xlu0 %v3152_v20, %s7288_s16 }
 0x27f   : > { %v2373_v32 = vpop.permute.xlu1 %2372  ;;  %v4997_v50 = vrot.slane %v4995_v2, 3  ;;  %v5000_v42 = vrot.slane %v4998_v35, 4  ;;  %v5227_v35 = vshrl.u32 %v6858_v26, 16  ;;  %v6784_v26 = vld [vmem:[%s7649_s9 + $0x1e8] sm:$0x1f] }
 0x280   : > { %v3390_v23 = vpop.permute.xlu0 %3389  ;;  %2392 = vst.msk [vmem:[#allocation3 + $0x20] sm:$0xff] %vm1125_vm12, %v2373_v32  ;;  %v4990_v32 = vshll.u32 %v6833_v8, 16  ;;  %v3919_v8 = vrot.slane %v6741_v27, 5 }
 0x281   : > { %3411 = vst.msk [vmem:[#allocation3 + $0x10] sm:$0xff] %vm1957_vm6, %v3390_v23  ;;  %4208 = vrot.lane.b32.xlu1 %v8466_v28, %s7289_s20  ;;  %v3703_v28 = vsel %vm3694_vm9, %v3701_v22, %v3702_v19  ;;  %v6726_v23 = vld [vmem:[%s7649_s9 + $0xd0] sm:$0x7]  ;;  %v6712_v22 = vld [vmem:[%s7649_s9 + $0xc8] sm:$0xff]  ;;  %v4809_v19 = vor.u32 %v4808_v10, %v4805_v7 }
 0x282   : > { %4162 = vrot.lane.b32.xlu0 %v4143_v46, %s7288_s16  ;;  %v4813_v46 = vrot.slane %v4811_v59, 4  ;;  %v3832_v12 = vrot.slane %v6726_v23, 3  ;;  %v5004_v59 = vshrl.u32 %v6835_v3, 16 }
 0x283   : > { %v3752_v39 = vpop.permute.xlu1 %3751 }
 0x284   : > { %v3392_v43 = vpop.permute.xlu0 %3391  ;;  %3775 = vst.msk [vmem:[#allocation3] sm:$0xff] %vm1125_vm12, %v3752_v39  ;;  %v3916_v39 = vrot.slane %v6739_v47, 5  ;;  %v5006_v7 = vrot.slane %v5004_v59, 3 }
 0x285   : > { %3412 = vst.msk [vmem:[#allocation3 + $0x18] sm:$0xff] %vm1957_vm6, %v3392_v43  ;;  %3397 = vrot.lane.b32.xlu1 %v3367_v36, %s7290_s23  ;;  %v4817_v36 = vor.u32 %v4816_v16, %v4813_v46  ;;  %v3917_v43 = vrot.slane %v6740_v29, 5  ;;  %v6763_v29 = vld [vmem:[%s7649_s9 + $0x140] sm:$0xf8] }
 0x286   : > { %3215 = vrot.lane.b32.xlu0 %v8652_v11, %s7289_s20 }
 0x287   : > { %v2558_v21 = vpop.permute.xlu1 %2557  ;;  %v4818_v13 = vsel %vm4801_vm10, %v4809_v19, %v4817_v36  ;;  %v3918_v52 = vsel %vm3694_vm9, %v3916_v39, %v3917_v43  ;;  %v8736_v19 = vld [vmem:[%s7649_s9 + $0xe0] sm:$0xff]  ;;  %v4052_v36 = vrot.slane %v6763_v29, 3  ;;  %v6876_v39 = vld [vmem:[%s7649_s9 + $0x1b8] sm:$0xf] }
 0x288   : > { %v2375_v1 = vpop.permute.xlu0 %2374  ;;  %v3419_v5 = vld [vmem:[#allocation3 + $0x10] sm:$0xff]  ;;  %2577 = vst.msk [vmem:[#allocation3 + $0x20] sm:$0xff] %vm1271_vm14, %v2558_v21 }
 0x289   : > { %2393 = vst.msk [vmem:[#allocation3 + $0x28] sm:$0xff] %vm1125_vm12, %v2375_v1  ;;  %7087 = vmatprep.mubr.msk.bf16.mxu1 %vm2001_vm7, %v3419_v5  ;;  %4296 = vrot.lane.b32.xlu1 %v4276_v48, %s7290_s23  ;;  %v4992_v48 = vrot.slane %v4990_v32, 4  ;;  %v4738_v21 = vld [vmem:[%s7649_s9 + $0x20] sm:$0xff]  ;;  %v4830_v1 = vrot.slane %v4828_v37, 4  ;;  %v4833_v5 = vrot.slane %v4831_v14, 5 }
 0x28a   : > { %3729 = vst.msk [vmem:[#allocation3 + $0x10] sm:$0xff] %vm1076_vm11, %v3703_v28  ;;  %4210 = vrot.lane.b32.xlu0 %v8631_v60, %s7289_s20  ;;  %v3831_v28 = vrot.slane %v6725_v30, 3  ;;  %v6764_v30 = vld [vmem:[%s7649_s9 + $0x148] sm:$0x7] }
 0x28b   : > { %v3841_v20 = vpop.permute.xlu1 %3840  ;;  %v4834_v61 = vor.u32 %v4833_v5, %v4830_v1  ;;  %v4053_v37 = vrot.slane %v6764_v30, 3  ;;  %v5415_v5 = vshrl.u32 %v6876_v39, 16 }
 0x28c   : > { %v3754_v25 = vpop.permute.xlu0 %3753  ;;  %v3420_v63 = vld [vmem:[#allocation3 + $0x18] sm:$0xff]  ;;  %3864 = vst.msk [vmem:[#allocation3] sm:$0xff] %vm1271_vm14, %v3841_v20  ;;  %v3833_v53 = vsel %vm3815_vm8, %v3831_v28, %v3832_v12  ;;  %v6742_v20 = vld [vmem:[%s7649_s9 + $0x158] sm:$0x1f]  ;;  %v5229_v28 = vrot.slane %v5227_v35, 4  ;;  %v5232_v12 = vrot.slane %v5230_v55, 5 }
 0x28d   : > { %3776 = vst.msk [vmem:[#allocation3 + $0x8] sm:$0xff] %vm1125_vm12, %v3754_v25  ;;  %7088 = vmatmul.mubr.msk.bf16.gmra.mrb[12].mxu1 %vm2001_vm7, %v3420_v63  ;;  %3759 = vrot.lane.b32.xlu1 %v6711_v31, %s7283_s10  ;;  %v5001_v31 = vor.u32 %v5000_v42, %v4997_v50  ;;  %v5007_v25 = vshll.u32 %v6835_v3, 16  ;;  %v5012_v63 = vshrl.u32 %v6836_v49, 16  ;;  %v3920_v62 = vrot.slane %v6742_v20, 5 }
 0x28e   : > { %3730 = vst.msk [vmem:[#allocation3 + $0x18] sm:$0xff] %vm1076_vm11, %v3706_v57  ;;  %3399 = vrot.lane.b32.xlu0 %v3384_v58, %s7290_s23  ;;  %v4993_v57 = vor.u32 %v4992_v48, %v4989_v41  ;;  %v4826_v58 = vor.u32 %v4825_v24, %v4822_v0  ;;  %v6859_v41 = vld [vmem:[%s7649_s9 + $0xf8] sm:$0xf0]  ;;  %v6860_v48 = vld [vmem:[%s7649_s9 + $0x100] sm:$0x1f]  ;;  %v5418_v3 = vshll.u32 %v6876_v39, 16 }
 0x28f   : > { %v2742_v33 = vpop.permute.xlu1 %2741  ;;  %v5009_v46 = vrot.slane %v5007_v25, 4  ;;  %v5014_v16 = vrot.slane %v5012_v63, 3  ;;  %v6781_v0 = vld [vmem:[%s7649_s9 + $0x1c8] sm:$0xe0]  ;;  %v6782_v24 = vld [vmem:[%s7649_s9 + $0x1d0] sm:$0x1f] }
 0x290   : > { %v2560_v56 = vpop.permute.xlu0 %2559  ;;  %2761 = vst.msk [vmem:[#allocation3 + $0x20] sm:$0xff] %vm1420_vm0, %v2742_v33  ;;  %v4835_v10 = vsel %vm4801_vm10, %v4826_v58, %v4834_v61  ;;  %v6857_v33 = vld [vmem:[%s7649_s9 + $0xe0] sm:$0xf0]  ;;  %v5233_v58 = vor.u32 %v5232_v12, %v5229_v28  ;;  %v4144_v61 = vrot.slane %v6781_v0, 5  ;;  %v4145_v20 = vrot.slane %v6782_v24, 5 }
 0x291   : > { %2578 = vst.msk [vmem:[#allocation3 + $0x28] sm:$0xff] %vm1271_vm14, %v2560_v56  ;;  %4753 = vrot.lane.b32.xlu1 %v4737_v15, %s7283_s10  ;;  %v5015_v15 = vshll.u32 %v6836_v49, 16  ;;  %v5219_v54 = vshrl.u32 %v6857_v33, 16  ;;  %v5222_v32 = vshll.u32 %v6857_v33, 16  ;;  %v5010_v23 = vor.u32 %v5009_v46, %v5006_v7  ;;  %v6900_v28 = vld [vmem:[%s7649_s9 + $0x1c0] sm:$0x1f] }
 0x292   : > { %4298 = vrot.lane.b32.xlu0 %v4279_v6, %s7290_s23  ;;  %v5002_v6 = vsel %vm4584_vm15, %v4993_v57, %v5001_v31  ;;  %v5244_v49 = vshrl.u32 %v6860_v48, 16  ;;  %v6752_v57 = vld [vmem:[%s7649_s9 + $0x158] sm:$0xff]  ;;  %v4146_v29 = vsel %vm3694_vm9, %v4144_v61, %v4145_v20  ;;  %v6699_v12 = vld [vmem:[%s7649_s9 + $0xa8] sm:$0xe0] }
 0x293   : > { %v3929_v18 = vpop.permute.xlu1 %3928  ;;  %v5017_v44 = vrot.slane %v5015_v15, 4  ;;  %v5221_v14 = vrot.slane %v5219_v54, 4 }
 0x294   : > { %v3843_v38 = vpop.permute.xlu0 %3842  ;;  %3952 = vst.msk [vmem:[#allocation3] sm:$0xff] %vm1420_vm0, %v3929_v18  ;;  %v5224_v18 = vrot.slane %v5222_v32, 5  ;;  %v5246_v7 = vrot.slane %v5244_v49, 4 }
 0x295   : > { %3865 = vst.msk [vmem:[#allocation3 + $0x8] sm:$0xff] %vm1271_vm14, %v3843_v38  ;;  %3848 = vrot.lane.b32.xlu1 %v3830_v9, %s7284_s11  ;;  %v3921_v9 = vsel %vm3694_vm9, %v3919_v8, %v3920_v62  ;;  %v5018_v2 = vor.u32 %v5017_v44, %v5014_v16  ;;  %v6875_v38 = vld [vmem:[%s7649_s9 + $0x1b0] sm:$0xf8]  ;;  %v8763_v16 = vld [vmem:[%s7649_s9 + $0xf8] sm:$0xff]  ;;  %v6877_v44 = vld [vmem:[%s7649_s9 + $0x1c8] sm:$0xf8] }
 0x296   : > { %3761 = vrot.lane.b32.xlu0 %v6712_v22, %s7283_s10  ;;  %v5410_v1 = vshll.u32 %v6875_v38, 16  ;;  %v5225_v31 = vor.u32 %v5224_v18, %v5221_v14  ;;  %v5424_v35 = vshrl.u32 %v6877_v44, 16  ;;  %v5427_v55 = vshll.u32 %v6877_v44, 16 }
 0x297   : > { %v2790_v45 = vpop.permute.xlu1 %2789  ;;  %v5019_v43 = vsel %vm4584_vm15, %v5010_v23, %v5018_v2 }
 0x298   : > { %v2744_v51 = vpop.permute.xlu0 %2743  ;;  %2809 = vst.msk [vmem:[#allocation3 + $0x20] sm:$0xff] %vm1469_vm2, %v2790_v45  ;;  %v5236_v45 = vshrl.u32 %v6859_v41, 16  ;;  %v5234_v46 = vsel %vm4801_vm10, %v5225_v31, %v5233_v58  ;;  %v3707_v31 = vrot.slane %v6699_v12, 5 }
 0x299   : > { %2762 = vst.msk [vmem:[#allocation3 + $0x28] sm:$0xff] %vm1420_vm0, %v2744_v51  ;;  %4938 = vrot.lane.b32.xlu1 %v4818_v13, %s7284_s11  ;;  %v6765_v13 = vld [vmem:[%s7649_s9 + $0x158] sm:$0xf8]  ;;  %v5239_v51 = vshll.u32 %v6859_v41, 16  ;;  %v6700_v41 = vld [vmem:[%s7649_s9 + $0xb0] sm:$0x1f] }
 0x29a   : > { %4755 = vrot.lane.b32.xlu0 %v4738_v21, %s7283_s10  ;;  %v5407_v21 = vshrl.u32 %v6875_v38, 16  ;;  %v4055_v25 = vrot.slane %v6765_v13, 3  ;;  %v5238_v8 = vrot.slane %v5236_v45, 4  ;;  %v3708_v58 = vrot.slane %v6700_v41, 5 }
 0x29b   : > { %v3977_v17 = vpop.permute.xlu1 %3976  ;;  %v5241_v62 = vrot.slane %v5239_v51, 5 }
 0x29c   : > { %v3931_v4 = vpop.permute.xlu0 %3930  ;;  %4000 = vst.msk [vmem:[#allocation3] sm:$0xff] %vm1469_vm2, %v3977_v17  ;;  %v5409_v15 = vrot.slane %v5407_v21, 3  ;;  %v5412_v17 = vrot.slane %v5410_v1, 4  ;;  %v5429_v21 = vrot.slane %v5427_v55, 4  ;;  %v8807_v55 = vld [vmem:[%s7649_s9 + $0x1e8] sm:$0xf8] }
 0x29d   : > { %3953 = vst.msk [vmem:[#allocation3 + $0x8] sm:$0xff] %vm1420_vm0, %v3931_v4  ;;  %3936 = vrot.lane.b32.xlu1 %v3918_v52, %s7285_s12  ;;  %v5247_v52 = vshll.u32 %v6860_v48, 16  ;;  %v5417_v4 = vrot.slane %v5415_v5, 3  ;;  %v5242_v23 = vor.u32 %v5241_v62, %v5238_v8  ;;  %v4571_v8 = vld [vmem:[%s7649_s9 + $0x20] sm:$0xf] }
 0x29e   : > { %3850 = vrot.lane.b32.xlu0 %v3833_v53, %s7284_s11  ;;  %v4054_v53 = vsel %vm3815_vm8, %v4052_v36, %v4053_v37  ;;  %v5413_v54 = vor.u32 %v5412_v17, %v5409_v15  ;;  %v4148_v37 = vrot.slane %v6784_v26, 5 }
 0x29f   : > { %v2974_v56 = vpop.permute.xlu1 %2973 }
 0x2a0   : > { %v2792_v47 = vpop.permute.xlu0 %2791  ;;  %2993 = vst.msk [vmem:[#allocation3 + $0x20] sm:$0xff] %vm1614_vm3, %v2974_v56 }
 0x2a1   : > { %2810 = vst.msk [vmem:[#allocation3 + $0x28] sm:$0xff] %vm1469_vm2, %v2792_v47  ;;  %5122 = vrot.lane.b32.xlu1 %v5002_v6, %s7285_s12  ;;  %v5420_v6 = vrot.slane %v5418_v3, 4  ;;  %v6783_v47 = vld [vmem:[%s7649_s9 + $0x1e0] sm:$0xe0] }
 0x2a2   : > { %4940 = vrot.lane.b32.xlu0 %v4835_v10, %s7284_s11  ;;  %v5249_v10 = vrot.slane %v5247_v52, 5  ;;  %v4147_v36 = vrot.slane %v6783_v47, 5  ;;  %v6805_v52 = vld [vmem:[%s7649_s9 + $0x1d0] sm:$0xf8]  ;;  %v3709_v47 = vsel %vm3694_vm9, %v3707_v31, %v3708_v58 }
 0x2a3   : > { %v4065_v34 = vpop.permute.xlu1 %4064  ;;  %v5421_v32 = vor.u32 %v5420_v6, %v5417_v4  ;;  %v4280_v4 = vrot.slane %v6805_v52, 3  ;;  %v4570_v6 = vld [vmem:[%s7649_s9 + $0x18] sm:$0xf8] }
 0x2a4   : > { %v3979_v22 = vpop.permute.xlu0 %3978  ;;  %4088 = vst.msk [vmem:[#allocation3] sm:$0xff] %vm1614_vm3, %v4065_v34  ;;  %v5250_v2 = vor.u32 %v5249_v10, %v5246_v7  ;;  %v4568_v34 = vld [vmem:[%s7649_s9] sm:$0xf8] }
 0x2a5   : > { %4001 = vst.msk [vmem:[#allocation3 + $0x8] sm:$0xff] %vm1469_vm2, %v3979_v22  ;;  %3984 = vrot.lane.b32.xlu1 %v8533_v40, %s7286_s14  ;;  %v6766_v40 = vld [vmem:[%s7649_s9 + $0x160] sm:$0x7]  ;;  %v4569_v22 = vld [vmem:[%s7649_s9 + $0x8] sm:$0xf]  ;;  %v4586_v48 = vshrl.u32 %v4568_v34, 16  ;;  %v5422_v24 = vsel %vm4584_vm15, %v5413_v54, %v5421_v32 }
 0x2a6   : > { %3938 = vrot.lane.b32.xlu0 %v3921_v9, %s7285_s12  ;;  %v4056_v63 = vrot.slane %v6766_v40, 3  ;;  %v6878_v9 = vld [vmem:[%s7649_s9 + $0x1d0] sm:$0xf]  ;;  %v4597_v0 = vshll.u32 %v4569_v22, 16  ;;  %v5251_v13 = vsel %vm4801_vm10, %v5242_v23, %v5250_v2  ;;  %v5426_v40 = vrot.slane %v5424_v35, 3 }
 0x2a7   : > { %v3162_v50 = vpop.permute.xlu1 %3161  ;;  %v5432_v14 = vshrl.u32 %v6878_v9, 16  ;;  %v5435_v18 = vshll.u32 %v6878_v9, 16  ;;  %v4603_v54 = vshrl.u32 %v4570_v6, 16  ;;  %v4606_v32 = vshll.u32 %v4570_v6, 16 }
 0x2a8   : > { %v2976_v42 = vpop.permute.xlu0 %2975  ;;  %3181 = vst.msk [vmem:[#allocation3 + $0x20] sm:$0xff] %vm1763_vm4, %v3162_v50  ;;  %v4057_v30 = vsel %vm3815_vm8, %v4055_v25, %v4056_v63  ;;  %v4589_v50 = vshll.u32 %v4568_v34, 16  ;;  %v4599_v25 = vrot.slane %v4597_v0, 4  ;;  %v4149_v63 = vsel %vm3694_vm9, %v4147_v36, %v4148_v37 }
 0x2a9   : > { %2994 = vst.msk [vmem:[#allocation3 + $0x28] sm:$0xff] %vm1614_vm3, %v2976_v42  ;;  %5170 = vrot.lane.b32.xlu1 %v8736_v19, %s7286_s14  ;;  %v4594_v42 = vshrl.u32 %v4569_v22, 16  ;;  %v5434_v1 = vrot.slane %v5432_v14, 3  ;;  %v5437_v5 = vrot.slane %v5435_v18, 4  ;;  %v5430_v15 = vor.u32 %v5429_v21, %v5426_v40  ;;  %v6901_v18 = vld [vmem:[%s7649_s9 + $0x1d0] sm:$0xf0] }
 0x2aa   : > { %5124 = vrot.lane.b32.xlu0 %v5019_v43, %s7285_s12  ;;  %v6899_v43 = vld [vmem:[%s7649_s9 + $0x1b8] sm:$0xf0]  ;;  %v4591_v61 = vrot.slane %v4589_v50, 4  ;;  %v4611_v23 = vshrl.u32 %v4571_v8, 16  ;;  %v4614_v2 = vshll.u32 %v4571_v8, 16  ;;  %v4605_v0 = vrot.slane %v4603_v54, 3 }
 0x2ab   : > { %v4157_v27 = vpop.permute.xlu1 %4156  ;;  %v5639_v3 = vshrl.u32 %v6899_v43, 16  ;;  %v5642_v45 = vshll.u32 %v6899_v43, 16  ;;  %v4596_v20 = vrot.slane %v4594_v42, 3  ;;  %v5438_v17 = vor.u32 %v5437_v5, %v5434_v1  ;;  %v7232_v50 = vld [vmem:[%s9835_s3 + $0x3c] sm:$0xff]   ;;  %v6808_v21 = vld [vmem:[%s7649_s9 + $0x1f0] sm:$0x7] }
 0x2ac   : > { %v4067_v59 = vpop.permute.xlu0 %4066  ;;  %4180 = vst.msk [vmem:[#allocation3] sm:$0xff] %vm1763_vm4, %v4157_v27  ;;  %v6806_v27 = vld [vmem:[%s7649_s9 + $0x1d8] sm:$0x7]  ;;  %v4790_v42 = vld [vmem:[%s7649_s9 + $0x40] sm:$0x1f]  ;;  %v4616_v40 = vrot.slane %v4614_v2, 4  ;;  %7121 = vmatprep.subr.bf16.mxu1 %v7232_v50 }
 0x2ad   : > { %4089 = vst.msk [vmem:[#allocation3 + $0x8] sm:$0xff] %vm1614_vm3, %v4067_v59  ;;  %4072 = vrot.lane.b32.xlu1 %v4054_v53, %s7287_s15  ;;  %v5647_v53 = vshrl.u32 %v6900_v28, 16  ;;  %v4588_v59 = vrot.slane %v4586_v48, 3  ;;  %v4281_v10 = vrot.slane %v6806_v27, 3  ;;  %v5644_v44 = vrot.slane %v5642_v45, 5  ;;  %7122 = vmatpush3.bf16.msra.mxu1 %v7232_v50 }
 0x2ae   : > { %3986 = vrot.lane.b32.xlu0 %v6752_v57, %s7286_s14  ;;  %v5650_v57 = vshll.u32 %v6900_v28, 16  ;;  %v4600_v9 = vor.u32 %v4599_v25, %v4596_v20  ;;  %v5439_v35 = vsel %vm4584_vm15, %v5430_v15, %v5438_v17  ;;  %v4789_v28 = vld [vmem:[%s7649_s9 + $0x38] sm:$0xf0]  ;;  %v5656_v1 = vshrl.u32 %v6901_v18, 16 }
 0x2af   : > { %v3210_v33 = vpop.permute.xlu1 %3209  ;;  %v4592_v26 = vor.u32 %v4591_v61, %v4588_v59  ;;  %v4282_v37 = vsel %vm3815_vm8, %v4280_v4, %v4281_v10  ;;  %v5659_v5 = vshll.u32 %v6901_v18, 16  ;;  %v4840_v31 = vshll.u32 %v4789_v28, 16  ;;  %v7233_v59 = vld [vmem:[%s9835_s3 + $0x44] sm:$0xff]  }
 0x2b0   : > { %v3164_v56 = vpop.permute.xlu0 %3163  ;;  %3229 = vst.msk [vmem:[#allocation3 + $0x20] sm:$0xff] %vm1812_vm5, %v3210_v33  ;;  %v5649_v33 = vrot.slane %v5647_v53, 4  ;;  %v4283_v53 = vrot.slane %v8807_v55, 3  ;;  %v4845_v58 = vshrl.u32 %v4790_v42, 16  ;;  %v4848_v27 = vshll.u32 %v4790_v42, 16  ;;  %7123 = vmatprep.subr.bf16.mxu1 %v7233_v59 }
 0x2b1   : > { %3182 = vst.msk [vmem:[#allocation3 + $0x28] sm:$0xff] %vm1763_vm4, %v3164_v56  ;;  %5354 = vrot.lane.b32.xlu1 %v5234_v46, %s7287_s15  ;;  %v5641_v46 = vrot.slane %v5639_v3, 4  ;;  %v5652_v56 = vrot.slane %v5650_v57, 5  ;;  %v4601_v12 = vsel %vm4584_vm15, %v4592_v26, %v4600_v9  ;;  %v4837_v57 = vshrl.u32 %v4789_v28, 16  ;;  %7124 = vmatpush3.bf16.msra.mxu1 %v7233_v59  ;;  %v6728_v26 = vld [vmem:[%s7649_s9 + $0xe8] sm:$0x7] }
 0x2b2   : > { %5172 = vrot.lane.b32.xlu0 %v8763_v16, %s7286_s14  ;;  %v4284_v61 = vrot.slane %v6808_v21, 3  ;;  %v5658_v15 = vrot.slane %v5656_v1, 4  ;;  %v5661_v17 = vrot.slane %v5659_v5, 5  ;;  %v6839_v1 = vld [vmem:[%s7649_s9 + $0x120] sm:$0xf8] }
 0x2b3   : > { %v4205_v38 = vpop.permute.xlu1 %4204  ;;  %v5645_v14 = vor.u32 %v5644_v44, %v5641_v46  ;;  %v5653_v43 = vor.u32 %v5652_v56, %v5649_v33  ;;  %v4839_v10 = vrot.slane %v4837_v57, 4  ;;  %v4842_v46 = vrot.slane %v4840_v31, 5  ;;  %v7234_v56 = vld [vmem:[%s9835_s3 + $0x4c] ss:$0 sps:$4 sm:$0x33]  }
 0x2b4   : > { %v4159_v39 = vpop.permute.xlu0 %4158  ;;  %4228 = vst.msk [vmem:[#allocation3] sm:$0xff] %vm1812_vm5, %v4205_v38  ;;  %v6902_v38 = vld [vmem:[%s7649_s9 + $0x1d8] sm:$0x1f]  ;;  %v4847_v44 = vrot.slane %v4845_v58, 4  ;;  %v4850_v33 = vrot.slane %v4848_v27, 5  ;;  %7173 = vmatprep.subr.msk.bf16.mxu1 %vm2026_vm13, %v7234_v56  ;;  %v5868_v2 = vsel %vm2026_vm13, %v7234_v56, 0 }
 0x2b5   : > { %4181 = vst.msk [vmem:[#allocation3 + $0x8] sm:$0xff] %vm1763_vm4, %v4159_v39  ;;  %4164 = vrot.lane.b32.xlu1 %v4146_v29, %s7288_s16  ;;  %v6701_v29 = vld [vmem:[%s7649_s9 + $0xc0] sm:$0xe0]  ;;  %v8816_v39 = vld [vmem:[%s7649_s9 + $0x1e8] sm:$0xff]  ;;  %v5664_v3 = vshrl.u32 %v6902_v38, 16  ;;  %v5667_v45 = vshll.u32 %v6902_v38, 16  ;;  %7126 = vmatpush3.bf16.msra.mxu1 %v5868_v2 }
 0x2b6   : > { %4074 = vrot.lane.b32.xlu0 %v4057_v30, %s7287_s15  ;;  %v6702_v30 = vld [vmem:[%s7649_s9 + $0xc8] sm:$0x1f]  ;;  %v3710_v41 = vrot.slane %v6701_v29, 5  ;;  %v4285_v29 = vsel %vm3815_vm8, %v4283_v53, %v4284_v61  ;;  %v4851_v18 = vor.u32 %v4850_v33, %v4847_v44  ;;  %v6862_v53 = vld [vmem:[%s7649_s9 + $0x118] sm:$0x1f]  ;;  %v5038_v27 = vshrl.u32 %v6839_v1, 16 }
 0x2b7   : > { %v3394_v51 = vpop.permute.xlu1 %3393  ;;  %v3711_v48 = vrot.slane %v6702_v30, 5  ;;  %v5666_v4 = vrot.slane %v5664_v3, 4  ;;  %v5669_v6 = vrot.slane %v5667_v45, 5  ;;  %v5662_v30 = vor.u32 %v5661_v17, %v5658_v15  ;;  %v6837_v38 = vld [vmem:[%s7649_s9 + $0x108] sm:$0xf8] }
 0x2b8   : > { %v3212_v49 = vpop.permute.xlu0 %3211  ;;  %3413 = vst.msk [vmem:[#allocation3 + $0x20] sm:$0xff] %vm1957_vm6, %v3394_v51  ;;  %v5021_v21 = vshrl.u32 %v6837_v38, 16  ;;  %v6840_v5 = vld [vmem:[%s7649_s9 + $0x128] sm:$0xf]  ;;  %v5041_v59 = vshll.u32 %v6839_v1, 16 }
 0x2b9   : > { %3230 = vst.msk [vmem:[#allocation3 + $0x28] sm:$0xff] %vm1812_vm5, %v3212_v49  ;;  %5542 = vrot.lane.b32.xlu1 %v5422_v24, %s7288_s16  ;;  %v4608_v24 = vrot.slane %v4606_v32, 4  ;;  %v3712_v20 = vsel %vm3694_vm9, %v3710_v41, %v3711_v48  ;;  %v5670_v54 = vor.u32 %v5669_v6, %v5666_v4  ;;  %v8857_v32 = vld [vmem:[%s7649_s9 + $0x168] sm:$0xe0]  ;;  %v6838_v41 = vld [vmem:[%s7649_s9 + $0x110] sm:$0xf] }
 0x2ba   : > { %5356 = vrot.lane.b32.xlu0 %v5251_v13, %s7287_s15  ;;  %v4613_v13 = vrot.slane %v4611_v23, 3  ;;  %v8860_v23 = vld [vmem:[%s7649_s9 + $0x170] sm:$0x1f]  ;;  %v3922_v28 = vrot.slane %v8857_v32, 5  ;;  %v5046_v61 = vshrl.u32 %v6840_v5, 16  ;;  %v5261_v4 = vshrl.u32 %v6862_v53, 16 }
 0x2bb   : > { %v4293_v62 = vpop.permute.xlu1 %4292  ;;  %v4609_v25 = vor.u32 %v4608_v24, %v4605_v0  ;;  %v5671_v48 = vsel %vm4801_vm10, %v5662_v30, %v5670_v54  ;;  %v4791_v0 = vld [vmem:[%s7649_s9 + $0x50] sm:$0xf0]  ;;  %v4792_v24 = vld [vmem:[%s7649_s9 + $0x58] sm:$0x1f]  ;;  %v5264_v6 = vshll.u32 %v6862_v53, 16 }
 0x2bc   : > { %v4207_v7 = vpop.permute.xlu0 %4206  ;;  %4316 = vst.msk [vmem:[#allocation3] sm:$0xff] %vm1957_vm6, %v4293_v62  ;;  %v4854_v57 = vshrl.u32 %v4791_v0, 16  ;;  %v4862_v31 = vshrl.u32 %v4792_v24, 16  ;;  %v4865_v58 = vshll.u32 %v4792_v24, 16  ;;  %v5048_v30 = vrot.slane %v5046_v61, 3 }
 0x2bd   : > { %4229 = vst.msk [vmem:[#allocation3 + $0x8] sm:$0xff] %vm1812_vm5, %v4207_v7  ;;  %4212 = vrot.lane.b32.xlu1 %v8652_v11, %s7289_s20  ;;  %v8928_v1 = vld [vmem:[%s7649_s9 + $0x200] sm:$0x1f]  ;;  %v8941_v53 = vld [vmem:[%s7649_s9 + $0x128] sm:$0xf0] }
 0x2be   : > { %4166 = vrot.lane.b32.xlu0 %v4149_v63, %s7288_s16  ;;  %v4617_v63 = vor.u32 %v4616_v40, %v4613_v13  ;;  %v4856_v44 = vrot.slane %v4854_v57, 4  ;;  %v4864_v56 = vrot.slane %v4862_v31, 4 }
 0x2bf   : > { %v3396_v34 = vpop.permute.xlu1 %3395  ;;  %v3421_v36 = vld [vmem:[#allocation3 + $0x20] sm:$0xff] }
 0x2c0   : > { %v2377_v22 = vpop.permute.xlu0 %2376  ;;  %3414 = vst.msk [vmem:[#allocation3 + $0x28] sm:$0xff] %vm1957_vm6, %v3396_v34  ;;  %7091 = vmatprep.mubr.msk.bf16.mxu1 %vm2001_vm7, %v3421_v36  ;;  %v4618_v9 = vsel %vm4584_vm15, %v4609_v25, %v4617_v63  ;;  %v8865_v34 = vld [vmem:[%s7649_s9 + $0xf8] sm:$0xf8] }
 0x2c1   : > { %2394 = vst.msk [vmem:[#allocation3 + $0x30] sm:$0xff] %vm1125_vm12, %v2377_v22  ;;  %5590 = vrot.lane.b32.xlu1 %v8631_v60, %s7289_s20  ;;  %v5654_v60 = vsel %vm4801_vm10, %v5645_v14, %v5653_v43  ;;  %v8868_v22 = vld [vmem:[%s7649_s9 + $0x100] sm:$0x7]  ;;  %v4843_v14 = vor.u32 %v4842_v46, %v4839_v10  ;;  %v4739_v43 = vld [vmem:[%s7649_s9 + $0x38] sm:$0xff]  ;;  %v3837_v50 = vrot.slane %v8865_v34, 3  ;;  %v4740_v46 = vld [vmem:[%s7649_s9 + $0x50] sm:$0xff] }
 0x2c2   : > { %3731 = vst.msk [vmem:[#allocation3 + $0x20] sm:$0xff] %vm1076_vm11, %v3709_v47  ;;  %5544 = vrot.lane.b32.xlu0 %v5439_v35, %s7288_s16  ;;  %v6727_v47 = vld [vmem:[%s7649_s9 + $0xe0] sm:$0xf8]  ;;  %v3838_v42 = vrot.slane %v8868_v22, 3 }
 0x2c3   : > { %v4295_v51 = vpop.permute.xlu1 %4294  ;;  %v4324_v52 = vld [vmem:[#allocation3] sm:$0xff]  ;;  %v3834_v36 = vrot.slane %v6727_v47, 3  ;;  %v4852_v45 = vsel %vm4801_vm10, %v4843_v14, %v4851_v18  ;;  %v4867_v47 = vrot.slane %v4865_v58, 5 }
 0x2c4   : > { %v3756_v49 = vpop.permute.xlu0 %3755  ;;  %4317 = vst.msk [vmem:[#allocation3 + $0x8] sm:$0xff] %vm1957_vm6, %v4295_v51  ;;  %7105 = vmatprep.mubr.msk.bf16.mxu0 %vm2001_vm7, %v4324_v52  ;;  %v5029_v51 = vshrl.u32 %v6838_v41, 16  ;;  %v6861_v52 = vld [vmem:[%s7649_s9 + $0x110] sm:$0xf0]  ;;  %v3839_v14 = vsel %vm3815_vm8, %v3837_v50, %v3838_v42 }
 0x2c5   : > { %3777 = vst.msk [vmem:[#allocation3 + $0x10] sm:$0xff] %vm1125_vm12, %v3756_v49  ;;  %4300 = vrot.lane.b32.xlu1 %v4282_v37, %s7290_s23  ;;  %v3835_v37 = vrot.slane %v6728_v26, 3  ;;  %v5032_v49 = vshll.u32 %v6838_v41, 16  ;;  %v5253_v15 = vshrl.u32 %v6861_v52, 16  ;;  %v5256_v17 = vshll.u32 %v6861_v52, 16 }
 0x2c6   : > { %4729 = vst.msk [vmem:[#allocation3] sm:$0xff] %vm1076_vm11, %v4601_v12  ;;  %4214 = vrot.lane.b32.xlu0 %v8816_v39, %s7289_s20  ;;  %v3923_v12 = vrot.slane %v8860_v23, 5  ;;  %v6745_v26 = vld [vmem:[%s7649_s9 + $0x180] sm:$0xe0]  ;;  %v4868_v23 = vor.u32 %v4867_v47, %v4864_v56  ;;  %v6753_v47 = vld [vmem:[%s7649_s9 + $0x170] sm:$0xff] }
 0x2c7   : > { %v2562_v8 = vpop.permute.xlu1 %2561  ;;  %v3422_v7 = vld [vmem:[#allocation3 + $0x28] sm:$0xff]  ;;  %v3836_v3 = vsel %vm3815_vm8, %v3834_v36, %v3835_v37  ;;  %v5034_v10 = vrot.slane %v5032_v49, 4  ;;  %v5258_v22 = vrot.slane %v5256_v17, 5  ;;  %v5263_v36 = vrot.slane %v5261_v4, 4 }
 0x2c8   : > { %v2379_v62 = vpop.permute.xlu0 %2378  ;;  %2579 = vst.msk [vmem:[#allocation3 + $0x30] sm:$0xff] %vm1271_vm14, %v2562_v8  ;;  %7092 = vmatmul.mubr.msk.bf16.gmra.mrb[16].mxu1 %vm2001_vm7, %v3422_v7  ;;  %v5023_v8 = vrot.slane %v5021_v21, 3  ;;  %v5031_v7 = vrot.slane %v5029_v51, 3  ;;  %v5266_v37 = vrot.slane %v5264_v6, 5  ;;  %v6879_v21 = vld [vmem:[%s7649_s9 + $0x1e0] sm:$0xf8] }
 0x2c9   : > { %2395 = vst.msk [vmem:[#allocation3 + $0x38] sm:$0xff] %vm1125_vm12, %v2379_v62  ;;  %5774 = vrot.lane.b32.xlu1 %v5654_v60, %s7290_s23  ;;  %v4857_v60 = vshll.u32 %v4791_v0, 16  ;;  %v3925_v0 = vrot.slane %v6745_v26, 5  ;;  %v5441_v49 = vshrl.u32 %v6879_v21, 16  ;;  %v5444_v52 = vshll.u32 %v6879_v21, 16 }
 0x2ca   : > { %3732 = vst.msk [vmem:[#allocation3 + $0x28] sm:$0xff] %vm1076_vm11, %v3712_v20  ;;  %5592 = vrot.lane.b32.xlu0 %v8652_v11, %s7289_s20  ;;  %v5049_v20 = vshll.u32 %v6840_v5, 16  ;;  %v5035_v41 = vor.u32 %v5034_v10, %v5031_v7  ;;  %v8931_v5 = vld [vmem:[%s7649_s9 + $0x1e8] sm:$0xf]  ;;  %v5270_v7 = vshrl.u32 %v8941_v53, 16  ;;  %v5273_v10 = vshll.u32 %v8941_v53, 16 }
 0x2cb   : > { %v3845_v35 = vpop.permute.xlu1 %3844  ;;  %v4325_v11 = vld [vmem:[#allocation3 + $0x8] sm:$0xff]  ;;  %v4859_v33 = vrot.slane %v4857_v60, 5  ;;  %v5452_v17 = vshll.u32 %v8931_v5, 16  ;;  %v8968_v26 = vrot.slane %v5441_v49, 3  ;;  %v8989_v53 = vld [vmem:[%s7649_s9 + $0x188] sm:$0xf8] }
 0x2cc   : > { %v3758_v55 = vpop.permute.xlu0 %3757  ;;  %3866 = vst.msk [vmem:[#allocation3 + $0x10] sm:$0xff] %vm1271_vm14, %v3845_v35  ;;  %7106 = vmatmul.mubr.msk.bf16.vlgmr.msra.gmra.mrb[8].mxu0 %vm2001_vm7, %v4325_v11  ;;  %v5051_v54 = vrot.slane %v5049_v20, 4  ;;  %v5255_v11 = vrot.slane %v5253_v15, 4  ;;  %v5449_v15 = vshrl.u32 %v8931_v5, 16 }
 0x2cd   : > { %3778 = vst.msk [vmem:[#allocation3 + $0x18] sm:$0xff] %vm1125_vm12, %v3758_v55  ;;  %4302 = vrot.lane.b32.xlu1 %v4285_v29, %s7290_s23  ;;  %v5043_v29 = vrot.slane %v5041_v59, 4  ;;  %v6746_v55 = vld [vmem:[%s7649_s9 + $0x188] sm:$0x1f] }
 0x2ce   : > { %4730 = vst.msk [vmem:[#allocation3 + $0x8] sm:$0xff] %vm1076_vm11, %v4618_v9  ;;  %3763 = vrot.lane.b32.xlu0 %v8736_v19, %s7283_s10  ;;  %v5024_v19 = vshll.u32 %v6837_v38, 16  ;;  %v5040_v9 = vrot.slane %v5038_v27, 3  ;;  %v6767_v38 = vld [vmem:[%s7649_s9 + $0x170] sm:$0xf8]  ;;  %v3926_v32 = vrot.slane %v6746_v55, 5  ;;  %v5052_v34 = vor.u32 %v5051_v54, %v5048_v30 }
 0x2cf   : > { %v2746_v13 = vpop.permute.xlu1 %2745  ;;  %v4058_v42 = vrot.slane %v6767_v38, 3 }
 0x2d0   : > { %v2564_v40 = vpop.permute.xlu0 %2563  ;;  %2763 = vst.msk [vmem:[#allocation3 + $0x30] sm:$0xff] %vm1420_vm0, %v2746_v13  ;;  %v5026_v62 = vrot.slane %v5024_v19, 4  ;;  %v5259_v13 = vor.u32 %v5258_v22, %v5255_v11  ;;  %v8923_v19 = vld [vmem:[%s7649_s9 + $0x1f8] sm:$0xe0]  ;;  %v3927_v31 = vsel %vm3694_vm9, %v3925_v0, %v3926_v32  ;;  %v6864_v11 = vld [vmem:[%s7649_s9 + $0x130] sm:$0x1f] }
 0x2d1   : > { %2580 = vst.msk [vmem:[#allocation3 + $0x38] sm:$0xff] %vm1271_vm14, %v2564_v40  ;;  %5776 = vrot.lane.b32.xlu1 %v5671_v48, %s7290_s23  ;;  %v4860_v48 = vor.u32 %v4859_v33, %v4856_v44  ;;  %v5267_v40 = vor.u32 %v5266_v37, %v5263_v36  ;;  %v6851_v32 = vld [vmem:[%s7649_s9 + $0x110] sm:$0xff] }
 0x2d2   : > { %4757 = vrot.lane.b32.xlu0 %v4739_v43, %s7283_s10  ;;  %v5027_v18 = vor.u32 %v5026_v62, %v5023_v8  ;;  %v6768_v43 = vld [vmem:[%s7649_s9 + $0x178] sm:$0x7] }
 0x2d3   : > { %v3933_v25 = vpop.permute.xlu1 %3932  ;;  %v4059_v24 = vrot.slane %v6768_v43, 3  ;;  %v4869_v51 = vsel %vm4801_vm10, %v4860_v48, %v4868_v23  ;;  %v8951_v59 = vsel %vm4801_vm10, %v5259_v13, %v5267_v40  ;;  %v8981_v48 = vrot.slane %v5449_v15, 3  ;;  %v6881_v13 = vld [vmem:[%s7649_s9 + $0x1f8] sm:$0xf8]  ;;  %v6903_v15 = vld [vmem:[%s7649_s9 + $0x1e8] sm:$0xf0] }
 0x2d4   : > { %v3847_v63 = vpop.permute.xlu0 %3846  ;;  %3954 = vst.msk [vmem:[#allocation3 + $0x10] sm:$0xff] %vm1420_vm0, %v3933_v25  ;;  %v4150_v25 = vrot.slane %v8923_v19, 5 }
 0x2d5   : > { %3867 = vst.msk [vmem:[#allocation3 + $0x18] sm:$0xff] %vm1271_vm14, %v3847_v63  ;;  %3852 = vrot.lane.b32.xlu1 %v3836_v3, %s7284_s11  ;;  %v8936_v3 = vld [vmem:[%s9836_s4] ss:$0 sm:$0xff]  ;;  %v8948_v27 = vsel %vm3815_vm8, %v4058_v42, %v4059_v24  ;;  %v4151_v63 = vrot.slane %v8928_v1, 5  ;;  %v8984_v24 = vrot.slane %v5452_v17, 4 }
 0x2d6   : > { %3765 = vrot.lane.b32.xlu0 %v8763_v16, %s7283_s10  ;;  %v3924_v16 = vsel %vm3694_vm9, %v3922_v28, %v3923_v12  ;;  %v5044_v28 = vor.u32 %v5043_v29, %v5040_v9  ;;  %v8970_v9 = vrot.slane %v5444_v52, 4  ;;  %v6754_v52 = vld [vmem:[%s7649_s9 + $0x188] sm:$0xff]  ;;  %v6904_v17 = vld [vmem:[%s7649_s9 + $0x1f0] sm:$0x1f] }
 0x2d7   : > { %v2794_v2 = vpop.permute.xlu1 %2793 }
 0x2d8   : > { %v2748_v35 = vpop.permute.xlu0 %2747  ;;  %2811 = vst.msk [vmem:[#allocation3 + $0x30] sm:$0xff] %vm1469_vm2, %v2794_v2  ;;  %v8945_v58 = vsel %vm4584_vm15, %v5044_v28, %v5052_v34  ;;  %v5278_v28 = vshrl.u32 %v6864_v11, 16  ;;  %v5281_v34 = vshll.u32 %v6864_v11, 16  ;;  %v4061_v11 = vrot.slane %v8989_v53, 3 }
 0x2d9   : > { %2764 = vst.msk [vmem:[#allocation3 + $0x38] sm:$0xff] %vm1420_vm0, %v2748_v35  ;;  %4942 = vrot.lane.b32.xlu1 %v4852_v45, %s7284_s11  ;;  %v5036_v45 = vsel %vm4584_vm15, %v5027_v18, %v5035_v41 }
 0x2da   : > { %4759 = vrot.lane.b32.xlu0 %v4740_v46, %s7283_s10 }
 0x2db   : > { %v3981_v12 = vpop.permute.xlu1 %3980 }
 0x2dc   : > { %v3935_v50 = vpop.permute.xlu0 %3934  ;;  %4002 = vst.msk [vmem:[#allocation3 + $0x10] sm:$0xff] %vm1469_vm2, %v3981_v12 }
 0x2dd   : > { %3955 = vst.msk [vmem:[#allocation3 + $0x18] sm:$0xff] %vm1420_vm0, %v3935_v50  ;;  %3940 = vrot.lane.b32.xlu1 %v3924_v16, %s7285_s12 }
 0x2de   : > { %3854 = vrot.lane.b32.xlu0 %v3839_v14, %s7284_s11 }
 0x2df   : > { %v2978_v57 = vpop.permute.xlu1 %2977  ;;  %v7063_v61 = vpop.f32.mrb[0].mxu0 }
 0x2e0   : > { %v2796_v60 = vpop.permute.xlu0 %2795  ;;  %2995 = vst.msk [vmem:[#allocation3 + $0x30] sm:$0xff] %vm1614_vm3, %v2978_v57  ;;  %v7071_v20 = vpop.f32.mrb[0].mxu1  ;;  %v2073_v4 = vadd.f32 %v7063_v61, %v8936_v3  ;;  %v6882_v57 = vld [vmem:[%s7649_s9 + $0x200] sm:$0xf]  ;;  %v8997_v61 = vrot.slane %v5270_v7, 4 }
 0x2e1   : > { %2812 = vst.msk [vmem:[#allocation3 + $0x38] sm:$0xff] %vm1469_vm2, %v2796_v60  ;;  %v2105_v6 = vadd.f32 %v7071_v20, %v8936_v3  ;;  %v2064_v8 = vpop.f32.mrb[1].mxu0  ;;  %v2096_v62 = vpop.f32.mrb[1].mxu1  ;;  %5126 = vrot.lane.b32.xlu1 %v5036_v45, %s7285_s12  ;;  %v8999_v20 = vrot.slane %v5273_v10, 5  ;;  %v5466_v7 = vshrl.u32 %v6882_v57, 16 }
 0x2e2   : > { %4944 = vrot.lane.b32.xlu0 %v4869_v51, %s7284_s11  ;;  %v2065_v46 = vadd.f32 %v8936_v3, %v2064_v8  ;;  %v2097_v44 = vadd.f32 %v8936_v3, %v2096_v62  ;;  %v7064_v33 = vpop.f32.mrb[2].mxu0  ;;  %v7072_v56 = vpop.f32.mrb[2].mxu1  ;;  %v2129_v29 = vmax.f32 %v2073_v4, 0.0  ;;  %v6770_v8 = vld [vmem:[%s7649_s9 + $0x190] sm:$0x7]  ;;  %v5280_v62 = vrot.slane %v5278_v28, 4 }
 0x2e3   : > { %v2137_v30 = vmax.f32 %v2105_v6, 0.0  ;;  %v2076_v54 = vadd.f32 %v7064_v33, %v8936_v3  ;;  %v2108_v2 = vadd.f32 %v7072_v56, %v8936_v3  ;;  %v2067_v35 = vpop.f32.mrb[3].mxu0  ;;  %v2099_v55 = vpop.f32.mrb[3].mxu1  ;;  %v6788_v33 = vld [vmem:[%s7649_s9 + $0x218] sm:$0x1f]  ;;  %v5458_v56 = vshrl.u32 %v6881_v13, 16 }
 0x2e4   : > { %v2127_v22 = vmax.f32 %v2065_v46, 0.0  ;;  %v2135_v36 = vmax.f32 %v2097_v44, 0.0  ;;  %v2068_v37 = vadd.f32 %v8936_v3, %v2067_v35  ;;  %v2100_v16 = vadd.f32 %v8936_v3, %v2099_v55  ;;  %v4069_v14 = vpop.permute.xlu1 %4068  ;;  %v3983_v18 = vpop.permute.xlu0 %3982  ;;  %v6787_v44 = vld [vmem:[%s7649_s9 + $0x210] sm:$0xe0]  ;;  %v6852_v55 = vld [vmem:[%s7649_s9 + $0x128] sm:$0xff] }
 0x2e5   : > { %v2153_v38 = vmin.f32 %v2137_v30, 6.0  ;;  %v2130_v43 = vmax.f32 %v2076_v54, 0.0  ;;  %v2138_v41 = vmax.f32 %v2108_v2, 0.0  ;;  %4090 = vst.msk [vmem:[#allocation3 + $0x10] sm:$0xff] %vm1614_vm3, %v4069_v14  ;;  %3988 = vrot.lane.b32.xlu1 %v6753_v47, %s7286_s14  ;;  %v2145_v12 = vmin.f32 %v2129_v29, 6.0 }
 0x2e6   : > { %4003 = vst.msk [vmem:[#allocation3 + $0x18] sm:$0xff] %vm1469_vm2, %v3983_v18  ;;  %3942 = vrot.lane.b32.xlu0 %v3927_v31, %s7285_s12  ;;  %v2128_v23 = vmax.f32 %v2068_v37, 0.0  ;;  %v2136_v0 = vmax.f32 %v2100_v16, 0.0  ;;  %v2143_v40 = vmin.f32 %v2127_v22, 6.0  ;;  %v2151_v21 = vmin.f32 %v2135_v36, 6.0 }
 0x2e7   : > { %v2146_v50 = vmin.f32 %v2130_v43, 6.0  ;;  %v2154_v42 = vmin.f32 %v2138_v41, 6.0  ;;  %v5283_v46 = vrot.slane %v5281_v34, 5  ;;  %v5469_v47 = vshll.u32 %v6882_v57, 16  ;;  %v9027_v43 = vld [vmem:[%s7649_s9 + $0x208] sm:$0x7] }
 0x2e8   : > { %v2144_v5 = vmin.f32 %v2128_v23, 6.0  ;;  %v2152_v45 = vmin.f32 %v2136_v0, 6.0  ;;  %v3166_v51 = vpop.permute.xlu1 %3165  ;;  %v2980_v49 = vpop.permute.xlu0 %2979  ;;  %v5673_v30 = vshrl.u32 %v6903_v15, 16  ;;  %v5676_v54 = vshll.u32 %v6903_v15, 16 }
 0x2e9   : > { %v2160_v60 = vpack.c.bf16 %v2146_v50, %v2145_v12  ;;  %v2164_v31 = vpack.c.bf16 %v2154_v42, %v2153_v38  ;;  %3183 = vst.msk [vmem:[#allocation3 + $0x30] sm:$0xff] %vm1763_vm4, %v3166_v51  ;;  %5174 = vrot.lane.b32.xlu1 %v6851_v32, %s7286_s14  ;;  %v5681_v2 = vshrl.u32 %v6904_v17, 16  ;;  %v5684_v35 = vshll.u32 %v6904_v17, 16  ;;  %v9024_v38 = vld [vmem:[%s7649_s9 + $0x200] sm:$0xf8] }
 0x2ea   : > { %2996 = vst.msk [vmem:[#allocation3 + $0x38] sm:$0xff] %vm1614_vm3, %v2980_v49  ;;  %5128 = vrot.lane.b32.xlu0 %v8945_v58, %s7285_s12  ;;  %v2159_v4 = vpack.c.bf16 %v2144_v5, %v2143_v40  ;;  %v2163_v6 = vpack.c.bf16 %v2152_v45, %v2151_v21  ;;  %v5461_v58 = vshll.u32 %v6881_v13, 16  ;;  %v4062_v22 = vrot.slane %v6770_v8, 3  ;;  %v6906_v42 = vld [vmem:[%s7649_s9 + $0x208] sm:$0x1f] }
 0x2eb   : > { %2168 = vst.msk [vmem:[#allocation4 + $0x8] sm:$0xff] %vm1076_vm11, %v2160_v60  ;;  %2172 = vst.msk [vmem:[#allocation4 + $0x28] sm:$0xff] %vm1076_vm11, %v2164_v31  ;;  %v5447_v36 = vor.u32 %v8970_v9, %v8968_v26  ;;  %v5455_v37 = vor.u32 %v8984_v24, %v8981_v48  ;;  %v5276_v16 = vor.u32 %v8999_v20, %v8997_v61  ;;  %v4153_v18 = vrot.slane %v6787_v44, 5  ;;  %v6905_v9 = vld [vmem:[%s7649_s9 + $0x200] sm:$0xf0] }
 0x2ec   : > { %2167 = vst.msk [vmem:[#allocation4] sm:$0xff] %vm1076_vm11, %v2159_v4  ;;  %2171 = vst.msk [vmem:[#allocation4 + $0x20] sm:$0xff] %vm1076_vm11, %v2163_v6  ;;  %v4161_v10 = vpop.permute.xlu1 %4160  ;;  %v4071_v29 = vpop.permute.xlu0 %4070  ;;  %v5284_v14 = vor.u32 %v5283_v46, %v5280_v62  ;;  %v9029_v41 = vrot.slane %v5458_v56, 3  ;;  %v9031_v23 = vrot.slane %v5461_v58, 4  ;;  %v9033_v0 = vrot.slane %v5466_v7, 3 }
 0x2ed   : > { %4182 = vst.msk [vmem:[#allocation3 + $0x10] sm:$0xff] %vm1763_vm4, %v4161_v10  ;;  %4076 = vrot.lane.b32.xlu1 %v8948_v27, %s7287_s15  ;;  %v4154_v27 = vrot.slane %v6788_v33, 5  ;;  %v9035_v26 = vrot.slane %v5469_v47, 4  ;;  %v9038_v28 = vrot.slane %v5673_v30, 4  ;;  %v9040_v34 = vrot.slane %v5676_v54, 5 }
 0x2ee   : > { %4091 = vst.msk [vmem:[#allocation3 + $0x18] sm:$0xff] %vm1614_vm3, %v4071_v29  ;;  %3990 = vrot.lane.b32.xlu0 %v6754_v52, %s7286_s14  ;;  %v9042_v12 = vrot.slane %v5681_v2, 4  ;;  %v9044_v50 = vrot.slane %v5684_v35, 5  ;;  %v4152_v24 = vsel %vm3694_vm9, %v4150_v25, %v4151_v63  ;;  %v4286_v13 = vrot.slane %v9024_v38, 3  ;;  %v4573_v49 = vld [vmem:[%s7649_s9 + $0x38] sm:$0xf] }
 0x2ef   : > { %v4287_v40 = vrot.slane %v9027_v43, 3  ;;  %v4063_v21 = vsel %vm3815_vm8, %v4061_v11, %v4062_v22  ;;  %v5456_v5 = vsel %vm4584_vm15, %v5447_v36, %v5455_v37  ;;  %v5690_v45 = vshrl.u32 %v6905_v9, 16  ;;  %v6811_v25 = vld [vmem:[%s7649_s9 + $0x218] sm:$0xf8]  ;;  %v6812_v63 = vld [vmem:[%s7649_s9 + $0x220] sm:$0x7] }
 0x2f0   : > { %v3214_v48 = vpop.permute.xlu1 %3213  ;;  %v3168_v32 = vpop.permute.xlu0 %3167  ;;  %v5693_v51 = vshll.u32 %v6905_v9, 16  ;;  %v5285_v1 = vsel %vm4801_vm10, %v5276_v16, %v5284_v14  ;;  %v9065_v19 = vsel %vm3694_vm9, %v4153_v18, %v4154_v27  ;;  %v5698_v52 = vshrl.u32 %v6906_v42, 16  ;;  %v4795_v17 = vld [vmem:[%s7649_s9 + $0x80] sm:$0xf0]  ;;  %v4796_v4 = vld [vmem:[%s7649_s9 + $0x88] sm:$0x1f] }
 0x2f1   : > { %3231 = vst.msk [vmem:[#allocation3 + $0x30] sm:$0xff] %vm1812_vm5, %v3214_v48  ;;  %5358 = vrot.lane.b32.xlu1 %v8951_v59, %s7287_s15  ;;  %v4572_v59 = vld [vmem:[%s7649_s9 + $0x30] sm:$0xf8]  ;;  %v5701_v53 = vshll.u32 %v6906_v42, 16  ;;  %v5464_v31 = vor.u32 %v9031_v23, %v9029_v41  ;;  %v5472_v61 = vor.u32 %v9035_v26, %v9033_v0  ;;  %v5679_v20 = vor.u32 %v9040_v34, %v9038_v28  ;;  %v6703_v6 = vld [vmem:[%s7649_s9 + $0xd8] sm:$0xe0] }
 0x2f2   : > { %3184 = vst.msk [vmem:[#allocation3 + $0x38] sm:$0xff] %vm1763_vm4, %v3168_v32  ;;  %5176 = vrot.lane.b32.xlu0 %v6852_v55, %s7286_s14  ;;  %v5687_v15 = vor.u32 %v9044_v50, %v9042_v12  ;;  %v6704_v8 = vld [vmem:[%s7649_s9 + $0xe0] sm:$0x1f]  ;;  %v4620_v62 = vshrl.u32 %v4572_v59, 16  ;;  %v4623_v46 = vshll.u32 %v4572_v59, 16  ;;  %v4628_v44 = vshrl.u32 %v4573_v49, 16 }
 0x2f3   : > { %v4631_v33 = vshll.u32 %v4573_v49, 16  ;;  %v4289_v56 = vrot.slane %v6811_v25, 3  ;;  %v4290_v58 = vrot.slane %v6812_v63, 3  ;;  %v5692_v7 = vrot.slane %v5690_v45, 4  ;;  %v4793_v22 = vld [vmem:[%s7649_s9 + $0x68] sm:$0xf0] }
 0x2f4   : > { %v4209_v57 = vpop.permute.xlu1 %4208  ;;  %v4163_v60 = vpop.permute.xlu0 %4162  ;;  %v5695_v47 = vrot.slane %v5693_v51, 5  ;;  %v5700_v10 = vrot.slane %v5698_v52, 4  ;;  %v5703_v29 = vrot.slane %v5701_v53, 5  ;;  %v4888_v30 = vshrl.u32 %v4795_v17, 16  ;;  %v9091_v38 = vld [vmem:[%s7649_s9 + $0x200] sm:$0xff] }
 0x2f5   : > { %4230 = vst.msk [vmem:[#allocation3 + $0x10] sm:$0xff] %vm1812_vm5, %v4209_v57  ;;  %4168 = vrot.lane.b32.xlu1 %v4152_v24, %s7288_s16  ;;  %v4891_v54 = vshll.u32 %v4795_v17, 16  ;;  %v4896_v55 = vshrl.u32 %v4796_v4, 16  ;;  %v4899_v11 = vshll.u32 %v4796_v4, 16  ;;  %v3713_v36 = vrot.slane %v6703_v6, 5 }
 0x2f6   : > { %4183 = vst.msk [vmem:[#allocation3 + $0x18] sm:$0xff] %vm1763_vm4, %v4163_v60  ;;  %4078 = vrot.lane.b32.xlu0 %v4063_v21, %s7287_s15  ;;  %v3714_v37 = vrot.slane %v6704_v8, 5  ;;  %v4622_v16 = vrot.slane %v4620_v62, 3  ;;  %v4625_v14 = vrot.slane %v4623_v46, 4  ;;  %v4630_v18 = vrot.slane %v4628_v44, 3 }
 0x2f7   : > { %v4633_v27 = vrot.slane %v4631_v33, 4  ;;  %v5473_v43 = vsel %vm4584_vm15, %v5464_v31, %v5472_v61  ;;  %v9095_v41 = vsel %vm3815_vm8, %v4286_v13, %v4287_v40  ;;  %v9098_v23 = vsel %vm4801_vm10, %v5679_v20, %v5687_v15  ;;  %v4794_v26 = vld [vmem:[%s7649_s9 + $0x70] sm:$0x1f]  ;;  %v4574_v34 = vld [vmem:[%s7649_s9 + $0x48] sm:$0xf8]  ;;  %v9141_v33 = vld [vmem:[%s7649_s9 + $0x218] sm:$0xff] }
 0x2f8   : > { %v3398_v2 = vpop.permute.xlu1 %3397  ;;  %v3216_v35 = vpop.permute.xlu0 %3215  ;;  %v9101_v0 = vsel %vm3815_vm8, %v4289_v56, %v4290_v58  ;;  %v5696_v9 = vor.u32 %v5695_v47, %v5692_v7  ;;  %v5704_v48 = vor.u32 %v5703_v29, %v5700_v10  ;;  %v4871_v32 = vshrl.u32 %v4793_v22, 16  ;;  %v4575_v12 = vld [vmem:[%s7649_s9 + $0x50] sm:$0xf]  ;;  %v6844_v51 = vld [vmem:[%s7649_s9 + $0x158] sm:$0xf] }
 0x2f9   : > { %3415 = vst.msk [vmem:[#allocation3 + $0x30] sm:$0xff] %vm1957_vm6, %v3398_v2  ;;  %5546 = vrot.lane.b32.xlu1 %v5456_v5, %s7288_s16  ;;  %v4874_v28 = vshll.u32 %v4793_v22, 16  ;;  %v9106_v24 = vrot.slane %v4888_v30, 4  ;;  %v9108_v13 = vrot.slane %v4891_v54, 5  ;;  %v9110_v40 = vrot.slane %v4896_v55, 4 }
 0x2fa   : > { %3232 = vst.msk [vmem:[#allocation3 + $0x38] sm:$0xff] %vm1812_vm5, %v3216_v35  ;;  %5360 = vrot.lane.b32.xlu0 %v5285_v1, %s7287_s15  ;;  %v9112_v21 = vrot.slane %v4899_v11, 5  ;;  %v6843_v5 = vld [vmem:[%s7649_s9 + $0x150] sm:$0xf8]  ;;  %v4879_v45 = vshrl.u32 %v4794_v26, 16  ;;  %v3715_v59 = vsel %vm3694_vm9, %v3713_v36, %v3714_v37  ;;  %v4626_v49 = vor.u32 %v4625_v14, %v4622_v16 }
 0x2fb   : > { %v4634_v1 = vor.u32 %v4633_v27, %v4630_v18  ;;  %v6705_v25 = vld [vmem:[%s7649_s9 + $0xf0] sm:$0xe0]  ;;  %v6706_v63 = vld [vmem:[%s7649_s9 + $0xf8] sm:$0x1f]  ;;  %v4637_v52 = vshrl.u32 %v4574_v34, 16  ;;  %v4640_v53 = vshll.u32 %v4574_v34, 16  ;;  %v9126_v31 = vsel %vm4801_vm10, %v5696_v9, %v5704_v48 }
 0x2fc   : > { %v4297_v50 = vpop.permute.xlu1 %4296  ;;  %v4211_v42 = vpop.permute.xlu0 %4210  ;;  %v4645_v57 = vshrl.u32 %v4575_v12, 16  ;;  %v4648_v60 = vshll.u32 %v4575_v12, 16  ;;  %v9128_v61 = vrot.slane %v4871_v32, 4  ;;  %v4882_v20 = vshll.u32 %v4794_v26, 16  ;;  %v6841_v44 = vld [vmem:[%s7649_s9 + $0x138] sm:$0xf8] }
 0x2fd   : > { %4318 = vst.msk [vmem:[#allocation3 + $0x10] sm:$0xff] %vm1957_vm6, %v4297_v50  ;;  %4216 = vrot.lane.b32.xlu1 %v9091_v38, %s7289_s20  ;;  %v4894_v6 = vor.u32 %v9108_v13, %v9106_v24  ;;  %v5072_v8 = vshrl.u32 %v6843_v5, 16  ;;  %v5075_v62 = vshll.u32 %v6843_v5, 16  ;;  %v5080_v46 = vshrl.u32 %v6844_v51, 16  ;;  %v6842_v58 = vld [vmem:[%s7649_s9 + $0x140] sm:$0xf] }
 0x2fe   : > { %4231 = vst.msk [vmem:[#allocation3 + $0x18] sm:$0xff] %vm1812_vm5, %v4211_v42  ;;  %4170 = vrot.lane.b32.xlu0 %v9065_v19, %s7288_s16  ;;  %v9130_v19 = vrot.slane %v4874_v28, 5  ;;  %v5083_v56 = vshll.u32 %v6844_v51, 16  ;;  %v4635_v7 = vsel %vm4584_vm15, %v4626_v49, %v4634_v1  ;;  %v3716_v47 = vrot.slane %v6705_v25, 5  ;;  %v6867_v29 = vld [vmem:[%s7649_s9 + $0x158] sm:$0xf0] }
 0x2ff   : > { %v3717_v10 = vrot.slane %v6706_v63, 5  ;;  %v4639_v30 = vrot.slane %v4637_v52, 3  ;;  %v4642_v54 = vrot.slane %v4640_v53, 4  ;;  %v4647_v2 = vrot.slane %v4645_v57, 3  ;;  %v6868_v26 = vld [vmem:[%s7649_s9 + $0x160] sm:$0x1f] }
 0x300   : > { %v3760_v15 = vpop.permute.xlu1 %3759  ;;  %v3400_v17 = vpop.permute.xlu0 %3399  ;;  %v3423_v4 = vld [vmem:[#allocation3 + $0x30] sm:$0xff]  ;;  %v9148_v35 = vrot.slane %v4879_v45, 4  ;;  %v9150_v55 = vrot.slane %v4882_v20, 5  ;;  %v5055_v11 = vshrl.u32 %v6841_v44, 16  ;;  %v5058_v22 = vshll.u32 %v6841_v44, 16  ;;  %v4741_v52 = vld [vmem:[%s7649_s9 + $0x68] sm:$0xff] }
 0x301   : > { %3779 = vst.msk [vmem:[#allocation3 + $0x20] sm:$0xff] %vm1125_vm12, %v3760_v15  ;;  %5594 = vrot.lane.b32.xlu1 %v8816_v39, %s7289_s20  ;;  %7095 = vmatprep.mubr.msk.bf16.mxu1 %vm2001_vm7, %v3423_v4  ;;  %v4650_v39 = vrot.slane %v4648_v60, 4  ;;  %v4902_v14 = vor.u32 %v9112_v21, %v9110_v40  ;;  %v9154_v18 = vrot.slane %v5072_v8, 3  ;;  %v5063_v27 = vshrl.u32 %v6842_v58, 16  ;;  %v9172_v12 = vld [vmem:[%s7649_s9 + $0x140] sm:$0xf0] }
 0x302   : > { %3416 = vst.msk [vmem:[#allocation3 + $0x38] sm:$0xff] %vm1957_vm6, %v3400_v17  ;;  %5548 = vrot.lane.b32.xlu0 %v5473_v43, %s7288_s16  ;;  %v5066_v43 = vshll.u32 %v6842_v58, 16  ;;  %v9163_v9 = vrot.slane %v5075_v62, 4  ;;  %v9165_v48 = vrot.slane %v5080_v46, 3  ;;  %v9167_v32 = vrot.slane %v5083_v56, 4 }
 0x303   : > { %3733 = vst.msk [vmem:[#allocation3 + $0x30] sm:$0xff] %vm1076_vm11, %v3715_v59  ;;  %v5304_v28 = vshrl.u32 %v6867_v29, 16  ;;  %v5307_v34 = vshll.u32 %v6867_v29, 16  ;;  %v4643_v50 = vor.u32 %v4642_v54, %v4639_v30  ;;  %v4651_v42 = vor.u32 %v4650_v39, %v4647_v2  ;;  %v6866_v5 = vld [vmem:[%s7649_s9 + $0x148] sm:$0x1f] }
 0x304   : > { %v4754_v36 = vpop.permute.xlu1 %4753  ;;  %v4299_v37 = vpop.permute.xlu0 %4298  ;;  %v4326_v16 = vld [vmem:[#allocation3 + $0x10] sm:$0xff]  ;;  %v9175_v24 = vrot.slane %v5055_v11, 3  ;;  %v9177_v13 = vrot.slane %v5058_v22, 4  ;;  %v5312_v40 = vshrl.u32 %v6868_v26, 16  ;;  %v5315_v21 = vshll.u32 %v6868_v26, 16 }
 0x305   : > { %4777 = vst.msk [vmem:[#allocation3] sm:$0xff] %vm1125_vm12, %v4754_v36  ;;  %4304 = vrot.lane.b32.xlu1 %v9095_v41, %s7290_s23  ;;  %7109 = vmatprep.mubr.msk.bf16.mxu0 %vm2001_vm7, %v4326_v16  ;;  %v3718_v41 = vsel %vm3694_vm9, %v3716_v47, %v3717_v10  ;;  %v9181_v49 = vsel %vm4801_vm10, %v4894_v6, %v4902_v14  ;;  %v9185_v25 = vrot.slane %v5063_v27, 3  ;;  %v9187_v63 = vrot.slane %v5066_v43, 4  ;;  %v6885_v15 = vld [vmem:[%s7649_s9 + $0x228] sm:$0xf8]  ;;  %v4742_v14 = vld [vmem:[%s7649_s9 + $0x80] sm:$0xff] }
 0x306   : > { %4319 = vst.msk [vmem:[#allocation3 + $0x18] sm:$0xff] %vm1957_vm6, %v4299_v37  ;;  %4218 = vrot.lane.b32.xlu0 %v9141_v33, %s7289_s20  ;;  %v4877_v1 = vor.u32 %v9130_v19, %v9128_v61  ;;  %v4885_v53 = vor.u32 %v9150_v55, %v9148_v35  ;;  %v9197_v57 = vrot.slane %v5304_v28, 4  ;;  %v5287_v60 = vshrl.u32 %v9172_v12, 16  ;;  %v6886_v6 = vld [vmem:[%s7649_s9 + $0x230] sm:$0xf] }
 0x307   : > { %4731 = vst.msk [vmem:[#allocation3 + $0x10] sm:$0xff] %vm1076_vm11, %v4635_v7  ;;  %v5290_v20 = vshll.u32 %v9172_v12, 16  ;;  %v9207_v17 = vrot.slane %v5307_v34, 5  ;;  %v5295_v4 = vshrl.u32 %v6866_v5, 16  ;;  %v6883_v8 = vld [vmem:[%s7649_s9 + $0x210] sm:$0xf8]  ;;  %v4652_v62 = vsel %vm4584_vm15, %v4643_v50, %v4651_v42 }
 0x308   : > { %v3849_v45 = vpop.permute.xlu1 %3848  ;;  %v3762_v51 = vpop.permute.xlu0 %3761  ;;  %v5086_v46 = vor.u32 %v9167_v32, %v9165_v48  ;;  %v5061_v44 = vor.u32 %v9177_v13, %v9175_v24  ;;  %v9216_v56 = vrot.slane %v5312_v40, 4  ;;  %v6884_v58 = vld [vmem:[%s7649_s9 + $0x218] sm:$0xf]  ;;  %v6907_v7 = vld [vmem:[%s7649_s9 + $0x218] sm:$0xf0]  ;;  %v5069_v30 = vor.u32 %v9187_v63, %v9185_v25 }
 0x309   : > { %v3424_v59 = vld [vmem:[#allocation3 + $0x38] sm:$0xff]  ;;  %3868 = vst.msk [vmem:[#allocation3 + $0x20] sm:$0xff] %vm1271_vm14, %v3849_v45  ;;  %5778 = vrot.lane.b32.xlu1 %v9098_v23, %s7290_s23  ;;  %v5078_v23 = vor.u32 %v9163_v9, %v9154_v18  ;;  %v5298_v54 = vshll.u32 %v6866_v5, 16  ;;  %v5492_v2 = vshrl.u32 %v6885_v15, 16  ;;  %v5495_v39 = vshll.u32 %v6885_v15, 16 }
 0x30a   : > { %3780 = vst.msk [vmem:[#allocation3 + $0x28] sm:$0xff] %vm1125_vm12, %v3762_v51  ;;  %7096 = vmatmul.mubr.msk.bf16.gmra.mrb[20].mxu1 %vm2001_vm7, %v3424_v59  ;;  %5596 = vrot.lane.b32.xlu0 %v9091_v38, %s7289_s20  ;;  %v9218_v38 = vrot.slane %v5315_v21, 5  ;;  %v6908_v11 = vld [vmem:[%s7649_s9 + $0x220] sm:$0x1f]  ;;  %v5500_v22 = vshrl.u32 %v6886_v6, 16  ;;  %v5503_v36 = vshll.u32 %v6886_v6, 16 }
 0x30b   : > { %3734 = vst.msk [vmem:[#allocation3 + $0x38] sm:$0xff] %vm1076_vm11, %v3718_v41  ;;  %v5475_v37 = vshrl.u32 %v6883_v8, 16  ;;  %v5478_v16 = vshll.u32 %v6883_v8, 16  ;;  %v5483_v18 = vshrl.u32 %v6884_v58, 16  ;;  %v5486_v27 = vshll.u32 %v6884_v58, 16 }
 0x30c   : > { %v4939_v47 = vpop.permute.xlu1 %4938  ;;  %v4756_v10 = vpop.permute.xlu0 %4755  ;;  %v5707_v43 = vshrl.u32 %v6907_v7, 16  ;;  %v5710_v26 = vshll.u32 %v6907_v7, 16  ;;  %v5289_v9 = vrot.slane %v5287_v60, 4  ;;  %v5292_v48 = vrot.slane %v5290_v20, 5  ;;  %v4799_v19 = vld [vmem:[%s7649_s9 + $0xb0] sm:$0xf0] }
 0x30d   : > { %v4327_v29 = vld [vmem:[#allocation3 + $0x18] sm:$0xff]  ;;  %4962 = vst.msk [vmem:[#allocation3] sm:$0xff] %vm1271_vm14, %v4939_v47  ;;  %4761 = vrot.lane.b32.xlu1 %v4741_v52, %s7283_s10  ;;  %v5715_v32 = vshrl.u32 %v6908_v11, 16  ;;  %v5718_v28 = vshll.u32 %v6908_v11, 16  ;;  %v5297_v41 = vrot.slane %v5295_v4, 4  ;;  %v5300_v50 = vrot.slane %v5298_v54, 5 }
 0x30e   : > { %4778 = vst.msk [vmem:[#allocation3 + $0x8] sm:$0xff] %vm1125_vm12, %v4756_v10  ;;  %7110 = vmatmul.mubr.msk.bf16.gmra.mrb[12].mxu0 %vm2001_vm7, %v4327_v29  ;;  %4306 = vrot.lane.b32.xlu0 %v9101_v0, %s7290_s23  ;;  %v5494_v42 = vrot.slane %v5492_v2, 3  ;;  %v5497_v40 = vrot.slane %v5495_v39, 4  ;;  %v5502_v0 = vrot.slane %v5500_v22, 3  ;;  %v5505_v21 = vrot.slane %v5503_v36, 4 }
 0x30f   : > { %4732 = vst.msk [vmem:[#allocation3 + $0x18] sm:$0xff] %vm1076_vm11, %v4652_v62  ;;  %v5477_v5 = vrot.slane %v5475_v37, 3  ;;  %v5480_v45 = vrot.slane %v5478_v16, 4  ;;  %v5485_v51 = vrot.slane %v5483_v18, 3  ;;  %v5488_v59 = vrot.slane %v5486_v27, 4  ;;  %v6854_v16 = vld [vmem:[%s7649_s9 + $0x158] sm:$0xff] }
 0x310   : > { %v3937_v34 = vpop.permute.xlu1 %3936  ;;  %v3851_v12 = vpop.permute.xlu0 %3850  ;;  %v5709_v25 = vrot.slane %v5707_v43, 4  ;;  %v5712_v63 = vrot.slane %v5710_v26, 5  ;;  %v4886_v52 = vsel %vm4801_vm10, %v4877_v1, %v4885_v53  ;;  %v5087_v60 = vsel %vm4584_vm15, %v5078_v23, %v5086_v46  ;;  %v6909_v4 = vld [vmem:[%s7649_s9 + $0x230] sm:$0xf0]  ;;  %v4797_v7 = vld [vmem:[%s7649_s9 + $0x98] sm:$0xf0] }
 0x311   : > { %3956 = vst.msk [vmem:[#allocation3 + $0x20] sm:$0xff] %vm1420_vm0, %v3937_v34  ;;  %4763 = vrot.lane.b32.xlu1 %v4742_v14, %s7283_s10  ;;  %v5717_v20 = vrot.slane %v5715_v32, 4  ;;  %v5720_v15 = vrot.slane %v5718_v28, 5  ;;  %v5310_v62 = vor.u32 %v9207_v17, %v9197_v57  ;;  %v5318_v35 = vor.u32 %v9218_v38, %v9216_v56  ;;  %v4800_v17 = vld [vmem:[%s7649_s9 + $0xb8] sm:$0x1f] }
 0x312   : > { %3869 = vst.msk [vmem:[#allocation3 + $0x28] sm:$0xff] %vm1271_vm14, %v3851_v12  ;;  %5780 = vrot.lane.b32.xlu0 %v9126_v31, %s7290_s23  ;;  %v6910_v31 = vld [vmem:[%s7649_s9 + $0x238] sm:$0x1f]  ;;  %v5293_v55 = vor.u32 %v5292_v48, %v5289_v9  ;;  %v5301_v61 = vor.u32 %v5300_v50, %v5297_v41  ;;  %v5070_v1 = vsel %vm4584_vm15, %v5061_v44, %v5069_v30  ;;  %v5724_v56 = vshrl.u32 %v6909_v4, 16  ;;  %v9271_v39 = vld [vmem:[%s7649_s9 + $0xa0] sm:$0x1f] }
 0x313   : > { %v5498_v53 = vor.u32 %v5497_v40, %v5494_v42  ;;  %v5506_v57 = vor.u32 %v5505_v21, %v5502_v0  ;;  %v5481_v23 = vor.u32 %v5480_v45, %v5477_v5  ;;  %v5489_v46 = vor.u32 %v5488_v59, %v5485_v51  ;;  %v6853_v48 = vld [vmem:[%s7649_s9 + $0x140] sm:$0xff] }
 0x314   : > { %v5123_v6 = vpop.permute.xlu1 %5122  ;;  %v4941_v8 = vpop.permute.xlu0 %4940  ;;  %v5727_v38 = vshll.u32 %v6909_v4, 16  ;;  %v5732_v58 = vshrl.u32 %v6910_v31, 16  ;;  %v5713_v47 = vor.u32 %v5712_v63, %v5709_v25  ;;  %v5721_v10 = vor.u32 %v5720_v15, %v5717_v20  ;;  %v9306_v5 = vld [vmem:[%s7649_s9 + $0x180] sm:$0xf8] }
 0x315   : > { %5146 = vst.msk [vmem:[#allocation3] sm:$0xff] %vm1420_vm0, %v5123_v6  ;;  %4948 = vrot.lane.b32.xlu1 %v9181_v49, %s7284_s11  ;;  %v5735_v49 = vshll.u32 %v6910_v31, 16  ;;  %v4922_v29 = vshrl.u32 %v4799_v19, 16  ;;  %v9265_v44 = vsel %vm4801_vm10, %v5310_v62, %v5318_v35  ;;  %v9268_v30 = vsel %vm4801_vm10, %v5293_v55, %v5301_v61 }
 0x316   : > { %4963 = vst.msk [vmem:[#allocation3 + $0x8] sm:$0xff] %vm1271_vm14, %v4941_v8  ;;  %4946 = vrot.lane.b32.xlu0 %v4886_v52, %s7284_s11  ;;  %v4925_v54 = vshll.u32 %v4799_v19, 16  ;;  %v4930_v2 = vshrl.u32 %v4800_v17, 16  ;;  %v9277_v11 = vsel %vm4584_vm15, %v5498_v53, %v5506_v57  ;;  %v4933_v22 = vshll.u32 %v4800_v17, 16  ;;  %v6848_v19 = vld [vmem:[%s7649_s9 + $0x188] sm:$0xf] }
 0x317   : > { %v4905_v36 = vshrl.u32 %v4797_v7, 16  ;;  %v4908_v37 = vshll.u32 %v4797_v7, 16  ;;  %v9282_v14 = vsel %vm4584_vm15, %v5481_v23, %v5489_v46  ;;  %v9284_v18 = vrot.slane %v5724_v56, 4 }
 0x318   : > { %v3985_v24 = vpop.permute.xlu1 %3984  ;;  %v3939_v13 = vpop.permute.xlu0 %3938  ;;  %v9286_v27 = vrot.slane %v5727_v38, 5  ;;  %v9288_v43 = vrot.slane %v5732_v58, 4  ;;  %v9292_v32 = vsel %vm4801_vm10, %v5713_v47, %v5721_v10  ;;  %v9294_v28 = vrot.slane %v5735_v49, 5  ;;  %v6845_v10 = vld [vmem:[%s7649_s9 + $0x168] sm:$0xf8] }
 0x319   : > { %4004 = vst.msk [vmem:[#allocation3 + $0x20] sm:$0xff] %vm1469_vm2, %v3985_v24  ;;  %5132 = vrot.lane.b32.xlu1 %v5087_v60, %s7285_s12  ;;  %v9296_v34 = vrot.slane %v4922_v29, 4  ;;  %v4913_v12 = vshrl.u32 %v9271_v39, 16  ;;  %v9301_v0 = vrot.slane %v4925_v54, 5  ;;  %v9303_v21 = vrot.slane %v4930_v2, 4 }
 0x31a   : > { %3957 = vst.msk [vmem:[#allocation3 + $0x28] sm:$0xff] %vm1420_vm0, %v3939_v13  ;;  %5130 = vrot.lane.b32.xlu0 %v5070_v1, %s7285_s12  ;;  %v9311_v59 = vrot.slane %v4933_v22, 5  ;;  %v9313_v25 = vrot.slane %v4905_v36, 4  ;;  %v9315_v63 = vrot.slane %v4908_v37, 5  ;;  %v4916_v52 = vshll.u32 %v9271_v39, 16 }
 0x31b   : > { %v7067_v26 = vpop.f32.mrb[4].mxu0  ;;  %v9323_v61 = vrot.slane %v4913_v12, 4  ;;  %v5106_v1 = vshrl.u32 %v9306_v5, 16  ;;  %v5109_v56 = vshll.u32 %v9306_v5, 16  ;;  %v5114_v24 = vshrl.u32 %v6848_v19, 16 }
 0x31c   : > { %v7075_v9 = vpop.f32.mrb[4].mxu1  ;;  %v5171_v41 = vpop.permute.xlu1 %5170  ;;  %v2089_v42 = vadd.f32 %v7067_v26, %v8936_v3  ;;  %v9337_v29 = vrot.slane %v4916_v52, 5  ;;  %v5117_v13 = vshll.u32 %v6848_v19, 16  ;;  %v6846_v26 = vld [vmem:[%s7649_s9 + $0x170] sm:$0xf] }
 0x31d   : > { %v5125_v50 = vpop.permute.xlu0 %5124  ;;  %v2121_v40 = vadd.f32 %v7075_v9, %v8936_v3  ;;  %5194 = vst.msk [vmem:[#allocation3] sm:$0xff] %vm1469_vm2, %v5171_v41  ;;  %v2080_v45 = vpop.f32.mrb[5].mxu0  ;;  %5180 = vrot.lane.b32.xlu1 %v6854_v16, %s7286_s14  ;;  %v9339_v16 = vrot.slane %v5106_v1, 3  ;;  %v5089_v9 = vshrl.u32 %v6845_v10, 16  ;;  %v5116_v5 = vrot.slane %v5114_v24, 3 }
 0x31e   : > { %5147 = vst.msk [vmem:[#allocation3 + $0x8] sm:$0xff] %vm1420_vm0, %v5125_v50  ;;  %v2112_v51 = vpop.f32.mrb[5].mxu1  ;;  %v2133_v60 = vmax.f32 %v2089_v42, 0.0  ;;  %v2081_v15 = vadd.f32 %v8936_v3, %v2080_v45  ;;  %5178 = vrot.lane.b32.xlu0 %v6853_v48, %s7286_s14  ;;  %v7068_v31 = vpop.f32.mrb[6].mxu0  ;;  %v6871_v50 = vld [vmem:[%s7649_s9 + $0x188] sm:$0xf0] }
 0x31f   : > { %v2141_v20 = vmax.f32 %v2121_v40, 0.0  ;;  %v2113_v4 = vadd.f32 %v8936_v3, %v2112_v51  ;;  %v7076_v6 = vpop.f32.mrb[6].mxu1  ;;  %v2092_v8 = vadd.f32 %v7068_v31, %v8936_v3  ;;  %v2083_v35 = vpop.f32.mrb[7].mxu0  ;;  %v6896_v42 = vld [vmem:[%s7649_s9 + $0x230] sm:$0xff]  ;;  %v5111_v40 = vrot.slane %v5109_v56, 4 }
 0x320   : > { %v2124_v62 = vadd.f32 %v7076_v6, %v8936_v3  ;;  %v2115_v55 = vpop.f32.mrb[7].mxu1  ;;  %v2131_v57 = vmax.f32 %v2081_v15, 0.0  ;;  %v4073_v17 = vpop.permute.xlu1 %4072  ;;  %v2084_v7 = vadd.f32 %v8936_v3, %v2083_v35  ;;  %v2149_v49 = vmin.f32 %v2133_v60, 6.0  ;;  %v6872_v6 = vld [vmem:[%s7649_s9 + $0x190] sm:$0x1f] }
 0x321   : > { %v2157_v53 = vmin.f32 %v2141_v20, 6.0  ;;  %v2139_v23 = vmax.f32 %v2113_v4, 0.0  ;;  %v3987_v46 = vpop.permute.xlu0 %3986  ;;  %v2134_v38 = vmax.f32 %v2092_v8, 0.0  ;;  %v2116_v47 = vadd.f32 %v8936_v3, %v2115_v55  ;;  %4092 = vst.msk [vmem:[#allocation3 + $0x20] sm:$0xff] %vm1614_vm3, %v4073_v17  ;;  %5364 = vrot.lane.b32.xlu1 %v9265_v44, %s7287_s15  ;;  %v6869_v35 = vld [vmem:[%s7649_s9 + $0x170] sm:$0xf0] }
 0x322   : > { %v2142_v58 = vmax.f32 %v2124_v62, 0.0  ;;  %4005 = vst.msk [vmem:[#allocation3 + $0x28] sm:$0xff] %vm1469_vm2, %v3987_v46  ;;  %5362 = vrot.lane.b32.xlu0 %v9268_v30, %s7287_s15  ;;  %v2132_v3 = vmax.f32 %v2084_v7, 0.0  ;;  %v2147_v22 = vmin.f32 %v2131_v57, 6.0  ;;  %v5119_v45 = vrot.slane %v5117_v13, 4  ;;  %v4743_v55 = vld [vmem:[%s7649_s9 + $0x98] sm:$0xff] }
 0x323   : > { %v2150_v54 = vmin.f32 %v2134_v38, 6.0  ;;  %v2140_v39 = vmax.f32 %v2116_v47, 0.0  ;;  %v2155_v36 = vmin.f32 %v2139_v23, 6.0  ;;  %v5092_v51 = vshll.u32 %v6845_v10, 16  ;;  %v6870_v46 = vld [vmem:[%s7649_s9 + $0x178] sm:$0x1f] }
 0x324   : > { %v2158_v2 = vmin.f32 %v2142_v58, 6.0  ;;  %v5355_v37 = vpop.permute.xlu1 %5354  ;;  %v2148_v12 = vmin.f32 %v2132_v3, 6.0  ;;  %v5097_v20 = vshrl.u32 %v6846_v26, 16  ;;  %v5100_v15 = vshll.u32 %v6846_v26, 16  ;;  %v4744_v56 = vld [vmem:[%s7649_s9 + $0xb0] sm:$0xff] }
 0x325   : > { %v5173_v44 = vpop.permute.xlu0 %5172  ;;  %v2162_v48 = vpack.c.bf16 %v2150_v54, %v2149_v49  ;;  %v2156_v41 = vmin.f32 %v2140_v39, 6.0  ;;  %5378 = vst.msk [vmem:[#allocation3] sm:$0xff] %vm1614_vm3, %v5355_v37  ;;  %5552 = vrot.lane.b32.xlu1 %v9277_v11, %s7288_s16  ;;  %v5738_v31 = vor.u32 %v9294_v28, %v9288_v43  ;;  %v5338_v8 = vshrl.u32 %v6871_v50, 16  ;;  %v4576_v10 = vld [vmem:[%s7649_s9 + $0x60] sm:$0xf8] }
 0x326   : > { %v2166_v30 = vpack.c.bf16 %v2158_v2, %v2157_v53  ;;  %5195 = vst.msk [vmem:[#allocation3 + $0x8] sm:$0xff] %vm1469_vm2, %v5173_v44  ;;  %5550 = vrot.lane.b32.xlu0 %v9282_v14, %s7288_s16  ;;  %v2161_v52 = vpack.c.bf16 %v2148_v12, %v2147_v22  ;;  %v5730_v14 = vor.u32 %v9286_v27, %v9284_v18  ;;  %v5341_v62 = vshll.u32 %v6871_v50, 16  ;;  %v4577_v49 = vld [vmem:[%s7649_s9 + $0x68] sm:$0xf]  ;;  %v6889_v54 = vld [vmem:[%s7649_s9 + $0x258] sm:$0xf8] }
 0x327   : > { %2170 = vst.msk [vmem:[#allocation4 + $0x18] sm:$0xff] %vm1076_vm11, %v2162_v48  ;;  %v2165_v60 = vpack.c.bf16 %v2156_v41, %v2155_v36  ;;  %v4928_v18 = vor.u32 %v9301_v0, %v9296_v34  ;;  %v4936_v27 = vor.u32 %v9311_v59, %v9303_v21  ;;  %v4911_v43 = vor.u32 %v9315_v63, %v9313_v25  ;;  %v6890_v2 = vld [vmem:[%s7649_s9 + $0x260] sm:$0xf]  ;;  %v6888_v26 = vld [vmem:[%s7649_s9 + $0x248] sm:$0xf] }
 0x328   : > { %2174 = vst.msk [vmem:[#allocation4 + $0x38] sm:$0xff] %vm1076_vm11, %v2166_v30  ;;  %v4165_v4 = vpop.permute.xlu1 %4164  ;;  %2169 = vst.msk [vmem:[#allocation4 + $0x10] sm:$0xff] %vm1076_vm11, %v2161_v52  ;;  %v4919_v28 = vor.u32 %v9337_v29, %v9323_v61  ;;  %v5112_v19 = vor.u32 %v5111_v40, %v9339_v16  ;;  %v5120_v1 = vor.u32 %v5119_v45, %v5116_v5  ;;  %v9375_v53 = vrot.slane %v5089_v9, 3  ;;  %v6887_v16 = vld [vmem:[%s7649_s9 + $0x240] sm:$0xf8] }
 0x329   : > { %v4075_v11 = vpop.permute.xlu0 %4074  ;;  %2173 = vst.msk [vmem:[#allocation4 + $0x30] sm:$0xff] %vm1076_vm11, %v2165_v60  ;;  %5600 = vrot.lane.b32.xlu1 %v6896_v42, %s7289_s20  ;;  %v9377_v34 = vrot.slane %v5092_v51, 4  ;;  %v9379_v0 = vrot.slane %v5097_v20, 3  ;;  %v9381_v21 = vrot.slane %v5100_v15, 4  ;;  %v5346_v59 = vshrl.u32 %v6872_v6, 16 }
 0x32a   : > { %4184 = vst.msk [vmem:[#allocation3 + $0x20] sm:$0xff] %vm1763_vm4, %v4165_v4  ;;  %5598 = vrot.lane.b32.xlu0 %v9141_v33, %s7289_s20  ;;  %v5349_v25 = vshll.u32 %v6872_v6, 16  ;;  %v9383_v33 = vrot.slane %v5338_v8, 4  ;;  %v9385_v57 = vrot.slane %v5341_v62, 5  ;;  %v5321_v23 = vshrl.u32 %v6869_v35, 16 }
 0x32b   : > { %4093 = vst.msk [vmem:[#allocation3 + $0x28] sm:$0xff] %vm1614_vm3, %v4075_v11  ;;  %v5739_v17 = vsel %vm4801_vm10, %v5730_v14, %v5738_v31  ;;  %v4937_v38 = vsel %vm4801_vm10, %v4928_v18, %v4936_v27  ;;  %v4920_v58 = vsel %vm4801_vm10, %v4911_v43, %v4919_v28  ;;  %v5095_v7 = vor.u32 %v9377_v34, %v9375_v53  ;;  %v4579_v53 = vld [vmem:[%s7649_s9 + $0x80] sm:$0xf] }
 0x32c   : > { %v5543_v63 = vpop.permute.xlu1 %5542  ;;  %v5324_v47 = vshll.u32 %v6869_v35, 16  ;;  %v5121_v29 = vsel %vm4584_vm15, %v5112_v19, %v5120_v1  ;;  %v5103_v24 = vor.u32 %v9381_v21, %v9379_v0  ;;  %v5348_v13 = vrot.slane %v5346_v59, 4  ;;  %v4578_v1 = vld [vmem:[%s7649_s9 + $0x78] sm:$0xf8] }
 0x32d   : > { %v5357_v61 = vpop.permute.xlu0 %5356  ;;  %5566 = vst.msk [vmem:[#allocation3] sm:$0xff] %vm1763_vm4, %v5543_v63  ;;  %4765 = vrot.lane.b32.xlu1 %v4743_v55, %s7283_s10  ;;  %v5344_v22 = vor.u32 %v9385_v57, %v9383_v33  ;;  %v9408_v36 = vrot.slane %v5321_v23, 4  ;;  %v5329_v37 = vshrl.u32 %v6870_v46, 16  ;;  %v5332_v44 = vshll.u32 %v6870_v46, 16  ;;  %v6914_v33 = vld [vmem:[%s7649_s9 + $0x268] sm:$0x1f] }
 0x32e   : > { %5379 = vst.msk [vmem:[#allocation3 + $0x8] sm:$0xff] %vm1614_vm3, %v5357_v61  ;;  %5782 = vrot.lane.b32.xlu0 %v9292_v32, %s7290_s23  ;;  %v5351_v32 = vrot.slane %v5349_v25, 5  ;;  %v4654_v9 = vshrl.u32 %v4576_v10, 16  ;;  %v4657_v48 = vshll.u32 %v4576_v10, 16  ;;  %v4662_v30 = vshrl.u32 %v4577_v49, 16 }
 0x32f   : > { %v4665_v12 = vshll.u32 %v4577_v49, 16  ;;  %v5526_v41 = vshrl.u32 %v6889_v54, 16  ;;  %v5529_v50 = vshll.u32 %v6889_v54, 16  ;;  %v5534_v42 = vshrl.u32 %v6890_v2, 16  ;;  %v6913_v61 = vld [vmem:[%s7649_s9 + $0x260] sm:$0xf0] }
 0x330   : > { %v4213_v3 = vpop.permute.xlu1 %4212  ;;  %v5537_v40 = vshll.u32 %v6890_v2, 16  ;;  %v5352_v5 = vor.u32 %v5351_v32, %v5348_v13  ;;  %v9416_v45 = vrot.slane %v5324_v47, 5  ;;  %v5509_v51 = vshrl.u32 %v6887_v16, 16 }
 0x331   : > { %v4167_v39 = vpop.permute.xlu0 %4166  ;;  %4232 = vst.msk [vmem:[#allocation3 + $0x20] sm:$0xff] %vm1812_vm5, %v4213_v3  ;;  %4767 = vrot.lane.b32.xlu1 %v4744_v56, %s7283_s10  ;;  %v5512_v52 = vshll.u32 %v6887_v16, 16  ;;  %v9418_v15 = vrot.slane %v5329_v37, 4  ;;  %v9420_v4 = vrot.slane %v5332_v44, 5  ;;  %v5517_v11 = vshrl.u32 %v6888_v26, 16 }
 0x332   : > { %4185 = vst.msk [vmem:[#allocation3 + $0x28] sm:$0xff] %vm1763_vm4, %v4167_v39  ;;  %5784 = vrot.lane.b32.xlu0 %v5739_v17, %s7290_s23  ;;  %v5520_v14 = vshll.u32 %v6888_v26, 16  ;;  %v4656_v31 = vrot.slane %v4654_v9, 3  ;;  %v4659_v6 = vrot.slane %v4657_v48, 4  ;;  %v4664_v8 = vrot.slane %v4662_v30, 3 }
 0x333   : > { %v4667_v62 = vrot.slane %v4665_v12, 4  ;;  %v9426_v18 = vrot.slane %v5526_v41, 3  ;;  %v9428_v27 = vrot.slane %v5529_v50, 4  ;;  %v5536_v43 = vrot.slane %v5534_v42, 3  ;;  %v6911_v17 = vld [vmem:[%s7649_s9 + $0x248] sm:$0xf0] }
 0x334   : > { %v5591_v60 = vpop.permute.xlu1 %5590  ;;  %v5539_v28 = vrot.slane %v5537_v40, 4  ;;  %v5104_v35 = vsel %vm4584_vm15, %v5095_v7, %v5103_v24  ;;  %v5511_v55 = vrot.slane %v5509_v51, 3  ;;  %v5514_v19 = vrot.slane %v5512_v52, 4  ;;  %v6855_v7 = vld [vmem:[%s7649_s9 + $0x170] sm:$0xff] }
 0x335   : > { %v5545_v20 = vpop.permute.xlu0 %5544  ;;  %5614 = vst.msk [vmem:[#allocation3] sm:$0xff] %vm1812_vm5, %v5591_v60  ;;  %4952 = vrot.lane.b32.xlu1 %v4937_v38, %s7284_s11  ;;  %v5519_v21 = vrot.slane %v5517_v11, 3  ;;  %v5522_v59 = vrot.slane %v5520_v14, 4  ;;  %v5353_v25 = vsel %vm4801_vm10, %v5344_v22, %v5352_v5  ;;  %v5327_v63 = vor.u32 %v9416_v45, %v9408_v36  ;;  %v6912_v39 = vld [vmem:[%s7649_s9 + $0x250] sm:$0x1f]  ;;  %v7241_v22 = vld [vmem:[%s7649_s9 + $0x188] sm:$0xff] }
 0x336   : > { %5567 = vst.msk [vmem:[#allocation3 + $0x8] sm:$0xff] %vm1763_vm4, %v5545_v20  ;;  %4950 = vrot.lane.b32.xlu0 %v4920_v58, %s7284_s11  ;;  %v4660_v57 = vor.u32 %v4659_v6, %v4656_v31  ;;  %v4668_v23 = vor.u32 %v4667_v62, %v4664_v8  ;;  %v4671_v46 = vshrl.u32 %v4578_v1, 16  ;;  %v4674_v56 = vshll.u32 %v4578_v1, 16  ;;  %v9456_v36 = vld [vmem:[%s9836_s4 + $0x1] ss:$0 sm:$0xff] }
 0x337   : > { %v4679_v38 = vshrl.u32 %v4579_v53, 16  ;;  %v4682_v58 = vshll.u32 %v4579_v53, 16  ;;  %v5335_v47 = vor.u32 %v9420_v4, %v9418_v15  ;;  %v5532_v10 = vor.u32 %v9428_v27, %v9426_v18 }
 0x338   : > { %v4301_v34 = vpop.permute.xlu1 %4300  ;;  %v5540_v49 = vor.u32 %v5539_v28, %v5536_v43  ;;  %v5523_v32 = vor.u32 %v5522_v59, %v5519_v21  ;;  %v5758_v54 = vshrl.u32 %v6913_v61, 16  ;;  %v5761_v2 = vshll.u32 %v6913_v61, 16  ;;  %v6898_v61 = vld [vmem:[%s7649_s9 + $0x260] sm:$0xff] }
 0x339   : > { %v4215_v0 = vpop.permute.xlu0 %4214  ;;  %4320 = vst.msk [vmem:[#allocation3 + $0x20] sm:$0xff] %vm1957_vm6, %v4301_v34  ;;  %5136 = vrot.lane.b32.xlu1 %v5121_v29, %s7285_s12  ;;  %v5515_v29 = vor.u32 %v5514_v19, %v5511_v55  ;;  %v5766_v3 = vshrl.u32 %v6914_v33, 16  ;;  %v5769_v37 = vshll.u32 %v6914_v33, 16  ;;  %v5741_v44 = vshrl.u32 %v6911_v17, 16 }
 0x33a   : > { %4233 = vst.msk [vmem:[#allocation3 + $0x28] sm:$0xff] %vm1812_vm5, %v4215_v0  ;;  %5134 = vrot.lane.b32.xlu0 %v5104_v35, %s7285_s12  ;;  %v5744_v16 = vshll.u32 %v6911_v17, 16  ;;  %v4669_v26 = vsel %vm4584_vm15, %v4660_v57, %v4668_v23  ;;  %v4673_v9 = vrot.slane %v4671_v46, 3  ;;  %v4676_v48 = vrot.slane %v4674_v56, 4  ;;  %v6897_v56 = vld [vmem:[%s7649_s9 + $0x248] sm:$0xff] }
 0x33b   : > { %v4681_v30 = vrot.slane %v4679_v38, 3  ;;  %v4684_v12 = vrot.slane %v4682_v58, 4  ;;  %v5336_v50 = vsel %vm4801_vm10, %v5327_v63, %v5335_v47  ;;  %v5749_v42 = vshrl.u32 %v6912_v39, 16 }
 0x33c   : > { %v5775_v24 = vpop.permute.xlu1 %5774  ;;  %v5752_v40 = vshll.u32 %v6912_v39, 16  ;;  %v5541_v60 = vsel %vm4584_vm15, %v5532_v10, %v5540_v49  ;;  %v5524_v20 = vsel %vm4584_vm15, %v5515_v29, %v5523_v32  ;;  %v5760_v15 = vrot.slane %v5758_v54, 4 }
 0x33d   : > { %v5593_v13 = vpop.permute.xlu0 %5592  ;;  %5798 = vst.msk [vmem:[#allocation3] sm:$0xff] %vm1957_vm6, %v5775_v24  ;;  %5184 = vrot.lane.b32.xlu1 %v7241_v22, %s7286_s14  ;;  %v5763_v11 = vrot.slane %v5761_v2, 5  ;;  %v5768_v14 = vrot.slane %v5766_v3, 4  ;;  %v5771_v31 = vrot.slane %v5769_v37, 5  ;;  %v5743_v6 = vrot.slane %v5741_v44, 4 }
 0x33e   : > { %5615 = vst.msk [vmem:[#allocation3 + $0x8] sm:$0xff] %vm1812_vm5, %v5593_v13  ;;  %5182 = vrot.lane.b32.xlu0 %v6855_v7, %s7286_s14  ;;  %v5746_v18 = vrot.slane %v5744_v16, 5  ;;  %v4677_v27 = vor.u32 %v4676_v48, %v4673_v9  ;;  %v4685_v43 = vor.u32 %v4684_v12, %v4681_v30  ;;  %v5751_v19 = vrot.slane %v5749_v42, 4 }
 0x33f   : > { %v5754_v1 = vrot.slane %v5752_v40, 5  ;;  %v5764_v33 = vor.u32 %v5763_v11, %v5760_v15  ;;  %v5772_v57 = vor.u32 %v5771_v31, %v5768_v14 }
 0x340   : > { %v7085_v41 = vpop.f32.mrb[8].mxu1  ;;  %v4303_v5 = vpop.permute.xlu1 %4302  ;;  %v4328_v52 = vld [vmem:[#allocation3 + $0x20] sm:$0xff]  ;;  %v4686_v23 = vsel %vm4584_vm15, %v4677_v27, %v4685_v43  ;;  %v5747_v38 = vor.u32 %v5746_v18, %v5743_v6 }
 0x341   : > { %v3764_v45 = vpop.permute.xlu0 %3763  ;;  %v3524_v51 = vadd.f32 %v7085_v41, %v9456_v36  ;;  %4321 = vst.msk [vmem:[#allocation3 + $0x28] sm:$0xff] %vm1957_vm6, %v4303_v5  ;;  %v3515_v4 = vpop.f32.mrb[9].mxu1  ;;  %5368 = vrot.lane.b32.xlu1 %v5353_v25, %s7287_s15  ;;  %7113 = vmatprep.mubr.msk.bf16.mxu0 %vm2001_vm7, %v4328_v52  ;;  %v5755_v58 = vor.u32 %v5754_v1, %v5751_v19  ;;  %v4580_v1 = vld [vmem:[%s7649_s9 + $0x90] sm:$0xf8] }
 0x342   : > { %3781 = vst.msk [vmem:[#allocation3 + $0x30] sm:$0xff] %vm1125_vm12, %v3764_v45  ;;  %v3516_v8 = vadd.f32 %v9456_v36, %v3515_v4  ;;  %5366 = vrot.lane.b32.xlu0 %v5336_v50, %s7287_s15  ;;  %v7086_v62 = vpop.f32.mrb[10].mxu1  ;;  %v5773_v32 = vsel %vm4801_vm10, %v5764_v33, %v5772_v57 }
 0x343   : > { %4733 = vst.msk [vmem:[#allocation3 + $0x20] sm:$0xff] %vm1076_vm11, %v4669_v26  ;;  %v3580_v28 = vmax.f32 %v3524_v51, 0.0  ;;  %v3527_v35 = vadd.f32 %v7086_v62, %v9456_v36  ;;  %v3518_v55 = vpop.f32.mrb[11].mxu1  ;;  %v5756_v54 = vsel %vm4801_vm10, %v5747_v38, %v5755_v58  ;;  %v4583_v38 = vld [vmem:[%s7649_s9 + $0xb0] sm:$0xf] }
 0x344   : > { %v3578_v53 = vmax.f32 %v3516_v8, 0.0  ;;  %v3519_v34 = vadd.f32 %v9456_v36, %v3518_v55  ;;  %v5777_v0 = vpop.permute.xlu1 %5776  ;;  %v5806_v59 = vld [vmem:[#allocation3] sm:$0xff] }
 0x345   : > { %v4758_v21 = vpop.permute.xlu0 %4757  ;;  %v3581_v25 = vmax.f32 %v3527_v35, 0.0  ;;  %5799 = vst.msk [vmem:[#allocation3 + $0x8] sm:$0xff] %vm1957_vm6, %v5777_v0  ;;  %5556 = vrot.lane.b32.xlu1 %v5541_v60, %s7288_s16  ;;  %7127 = vmatprep.mubr.msk.bf16.mxu1 %vm2001_vm7, %v5806_v59  ;;  %v3596_v17 = vmin.f32 %v3580_v28, 6.0  ;;  %v4691_v59 = vshll.u32 %v4580_v1, 16 }
 0x346   : > { %4779 = vst.msk [vmem:[#allocation3 + $0x10] sm:$0xff] %vm1125_vm12, %v4758_v21  ;;  %v3579_v63 = vmax.f32 %v3519_v34, 0.0  ;;  %5554 = vrot.lane.b32.xlu0 %v5524_v20, %s7288_s16  ;;  %v3594_v7 = vmin.f32 %v3578_v53, 6.0  ;;  %v4581_v53 = vld [vmem:[%s7649_s9 + $0x98] sm:$0xf]  ;;  %v4688_v21 = vshrl.u32 %v4580_v1, 16 }
 0x347   : > { %v3597_v46 = vmin.f32 %v3581_v25, 6.0  ;;  %v4696_v25 = vshrl.u32 %v4581_v53, 16  ;;  %v9568_v1 = vld [vmem:[%s9836_s4 + $0x2] ss:$0 sm:$0xff] }
 0x348   : > { %v3595_v47 = vmin.f32 %v3579_v63, 6.0  ;;  %v3853_v10 = vpop.permute.xlu1 %3852  ;;  %v4329_v29 = vld [vmem:[#allocation3 + $0x28] sm:$0xff]  ;;  %v4699_v63 = vshll.u32 %v4581_v53, 16  ;;  %v4690_v57 = vrot.slane %v4688_v21, 3 }
 0x349   : > { %v3766_v49 = vpop.permute.xlu0 %3765  ;;  %v3611_v24 = vpack.c.bf16 %v3597_v46, %v3596_v17  ;;  %3870 = vst.msk [vmem:[#allocation3 + $0x30] sm:$0xff] %vm1271_vm14, %v3853_v10  ;;  %7114 = vmatmul.mubr.msk.bf16.gmra.mrb[16].mxu0 %vm2001_vm7, %v4329_v29  ;;  %5604 = vrot.lane.b32.xlu1 %v6898_v61, %s7289_s20  ;;  %v4698_v17 = vrot.slane %v4696_v25, 3 }
 0x34a   : > { %3782 = vst.msk [vmem:[#allocation3 + $0x38] sm:$0xff] %vm1125_vm12, %v3766_v49  ;;  %v3610_v13 = vpack.c.bf16 %v3595_v47, %v3594_v7  ;;  %5602 = vrot.lane.b32.xlu0 %v6897_v56, %s7289_s20  ;;  %v4701_v46 = vrot.slane %v4699_v63, 4  ;;  %v4582_v56 = vld [vmem:[%s7649_s9 + $0xa8] sm:$0xf8] }
 0x34b   : > { %4734 = vst.msk [vmem:[#allocation3 + $0x28] sm:$0xff] %vm1076_vm11, %v4686_v23  ;;  %v4693_v23 = vrot.slane %v4691_v59, 4  ;;  %v4705_v49 = vshrl.u32 %v4582_v56, 16  ;;  %v4708_v29 = vshll.u32 %v4582_v56, 16 }
 0x34c   : > { %v4943_v2 = vpop.permute.xlu1 %4942  ;;  %v5807_v39 = vld [vmem:[#allocation3 + $0x8] sm:$0xff]  ;;  %v4702_v10 = vor.u32 %v4701_v46, %v4698_v17 }
 0x34d   : > { %v4760_v3 = vpop.permute.xlu0 %4759  ;;  %4964 = vst.msk [vmem:[#allocation3 + $0x10] sm:$0xff] %vm1271_vm14, %v4943_v2  ;;  %7128 = vmatmul.mubr.msk.bf16.vlgmr.msra.gmra.mrb[24].mxu1 %vm2001_vm7, %v5807_v39  ;;  %5788 = vrot.lane.b32.xlu1 %v5773_v32, %s7290_s23  ;;  %v4694_v47 = vor.u32 %v4693_v23, %v4690_v57  ;;  %v4710_v39 = vrot.slane %v4708_v29, 4 }
 0x34e   : > { %4780 = vst.msk [vmem:[#allocation3 + $0x18] sm:$0xff] %vm1125_vm12, %v4760_v3  ;;  %5786 = vrot.lane.b32.xlu0 %v5756_v54, %s7290_s23  ;;  %v4707_v3 = vrot.slane %v4705_v49, 3 }
 0x34f   : > { %v4703_v2 = vsel %vm4584_vm15, %v4694_v47, %v4702_v10 }
 0x350   : > { %v3941_v22 = vpop.permute.xlu1 %3940 }
 0x351   : > { %v3855_v37 = vpop.permute.xlu0 %3854  ;;  %3958 = vst.msk [vmem:[#allocation3 + $0x30] sm:$0xff] %vm1420_vm0, %v3941_v22  ;;  %3628 = vrot.lane.b32.xlu1 %v3611_v24, %s7283_s10  ;;  %v4713_v24 = vshrl.u32 %v4583_v38, 16 }
 0x352   : > { %3871 = vst.msk [vmem:[#allocation3 + $0x38] sm:$0xff] %vm1271_vm14, %v3855_v37  ;;  %3626 = vrot.lane.b32.xlu0 %v3610_v13, %s7283_s10  ;;  %v4716_v13 = vshll.u32 %v4583_v38, 16 }
 0x353   : > { %v4715_v22 = vrot.slane %v4713_v24, 3 }
 0x354   : > { %v5127_v44 = vpop.permute.xlu1 %5126  ;;  %v4718_v37 = vrot.slane %v4716_v13, 4 }
 0x355   : > { %v4945_v16 = vpop.permute.xlu0 %4944  ;;  %5148 = vst.msk [vmem:[#allocation3 + $0x10] sm:$0xff] %vm1420_vm0, %v5127_v44 }
 0x356   : > { %4965 = vst.msk [vmem:[#allocation3 + $0x18] sm:$0xff] %vm1271_vm14, %v4945_v16 }
 0x358   : > { %v3989_v26 = vpop.permute.xlu1 %3988 }
 0x359   : > { %v3943_v9 = vpop.permute.xlu0 %3942  ;;  %4006 = vst.msk [vmem:[#allocation3 + $0x30] sm:$0xff] %vm1469_vm2, %v3989_v26 }
 0x35a   : > { %3959 = vst.msk [vmem:[#allocation3 + $0x38] sm:$0xff] %vm1420_vm0, %v3943_v9  ;;  %v4711_v9 = vor.u32 %v4710_v39, %v4707_v3 }
 0x35c   : > { %v5175_v48 = vpop.permute.xlu1 %5174 }
 0x35d   : > { %v5129_v30 = vpop.permute.xlu0 %5128  ;;  %5196 = vst.msk [vmem:[#allocation3 + $0x10] sm:$0xff] %vm1469_vm2, %v5175_v48  ;;  %v4719_v48 = vor.u32 %v4718_v37, %v4715_v22 }
 0x35e   : > { %5149 = vst.msk [vmem:[#allocation3 + $0x18] sm:$0xff] %vm1420_vm0, %v5129_v30 }
 0x360   : > { %v7089_v12 = vpop.f32.mrb[12].mxu1  ;;  %v4077_v41 = vpop.permute.xlu1 %4076 }
 0x361   : > { %v3991_v50 = vpop.permute.xlu0 %3990  ;;  %v3540_v42 = vadd.f32 %v7089_v12, %v9456_v36  ;;  %4094 = vst.msk [vmem:[#allocation3 + $0x30] sm:$0xff] %vm1614_vm3, %v4077_v41  ;;  %v3531_v40 = vpop.f32.mrb[13].mxu1 }
 0x362   : > { %4007 = vst.msk [vmem:[#allocation3 + $0x38] sm:$0xff] %vm1469_vm2, %v3991_v50  ;;  %v3532_v5 = vadd.f32 %v9456_v36, %v3531_v40  ;;  %v7090_v45 = vpop.f32.mrb[14].mxu1  ;;  %v4720_v50 = vsel %vm4584_vm15, %v4711_v9, %v4719_v48 }
 0x363   : > { %v3584_v51 = vmax.f32 %v3540_v42, 0.0  ;;  %v3543_v52 = vadd.f32 %v7090_v45, %v9456_v36  ;;  %v3534_v60 = vpop.f32.mrb[15].mxu1 }
 0x364   : > { %v3582_v20 = vmax.f32 %v3532_v5, 0.0  ;;  %v3535_v15 = vadd.f32 %v9456_v36, %v3534_v60  ;;  %v5359_v4 = vpop.permute.xlu1 %5358 }
 0x365   : > { %v5177_v11 = vpop.permute.xlu0 %5176  ;;  %v3585_v14 = vmax.f32 %v3543_v52, 0.0  ;;  %5380 = vst.msk [vmem:[#allocation3 + $0x10] sm:$0xff] %vm1614_vm3, %v5359_v4  ;;  %v9512_v6 = vmin.f32 %v3584_v51, 6.0 }
 0x366   : > { %5197 = vst.msk [vmem:[#allocation3 + $0x18] sm:$0xff] %vm1469_vm2, %v5177_v11  ;;  %v3583_v31 = vmax.f32 %v3535_v15, 0.0  ;;  %v9516_v62 = vmin.f32 %v3582_v20, 6.0 }
 0x367   : > { %v9514_v8 = vmin.f32 %v3585_v14, 6.0 }
 0x368   : > { %v9518_v18 = vmin.f32 %v3583_v31, 6.0  ;;  %v4169_v27 = vpop.permute.xlu1 %4168 }
 0x369   : > { %v4079_v43 = vpop.permute.xlu0 %4078  ;;  %v3613_v28 = vpack.c.bf16 %v9514_v8, %v9512_v6  ;;  %4186 = vst.msk [vmem:[#allocation3 + $0x30] sm:$0xff] %vm1763_vm4, %v4169_v27 }
 0x36a   : > { %4095 = vst.msk [vmem:[#allocation3 + $0x38] sm:$0xff] %vm1614_vm3, %v4079_v43  ;;  %v3612_v35 = vpack.c.bf16 %v9518_v18, %v9516_v62 }
 0x36c   : > { %v5547_v55 = vpop.permute.xlu1 %5546 }
 0x36d   : > { %v5361_v19 = vpop.permute.xlu0 %5360  ;;  %5568 = vst.msk [vmem:[#allocation3 + $0x10] sm:$0xff] %vm1763_vm4, %v5547_v55 }
 0x36e   : > { %5381 = vst.msk [vmem:[#allocation3 + $0x18] sm:$0xff] %vm1614_vm3, %v5361_v19 }
 0x370   : > { %v4217_v34 = vpop.permute.xlu1 %4216 }
 0x371   : > { %v4171_v0 = vpop.permute.xlu0 %4170  ;;  %4234 = vst.msk [vmem:[#allocation3 + $0x30] sm:$0xff] %vm1812_vm5, %v4217_v34 }
 0x372   : > { %4187 = vst.msk [vmem:[#allocation3 + $0x38] sm:$0xff] %vm1763_vm4, %v4171_v0 }
 0x374   : > { %v5595_v61 = vpop.permute.xlu1 %5594 }
 0x375   : > { %v5549_v33 = vpop.permute.xlu0 %5548  ;;  %5616 = vst.msk [vmem:[#allocation3 + $0x10] sm:$0xff] %vm1812_vm5, %v5595_v61 }
 0x376   : > { %5569 = vst.msk [vmem:[#allocation3 + $0x18] sm:$0xff] %vm1763_vm4, %v5549_v33 }
 0x378   : > { %v4305_v58 = vpop.permute.xlu1 %4304 }
 0x379   : > { %v4219_v7 = vpop.permute.xlu0 %4218  ;;  %4322 = vst.msk [vmem:[#allocation3 + $0x30] sm:$0xff] %vm1957_vm6, %v4305_v58 }
 0x37a   : > { %4235 = vst.msk [vmem:[#allocation3 + $0x38] sm:$0xff] %vm1812_vm5, %v4219_v7 }
 0x37c   : > { %v5779_v32 = vpop.permute.xlu1 %5778 }
 0x37d   : > { %v5597_v54 = vpop.permute.xlu0 %5596  ;;  %5800 = vst.msk [vmem:[#allocation3 + $0x10] sm:$0xff] %vm1957_vm6, %v5779_v32 }
 0x37e   : > { %5617 = vst.msk [vmem:[#allocation3 + $0x18] sm:$0xff] %vm1812_vm5, %v5597_v54 }
 0x380   : > { %v4762_v44 = vpop.permute.xlu1 %4761  ;;  %v4330_v26 = vld [vmem:[#allocation3 + $0x30] sm:$0xff] }
 0x381   : > { %v4307_v16 = vpop.permute.xlu0 %4306  ;;  %4781 = vst.msk [vmem:[#allocation3 + $0x20] sm:$0xff] %vm1125_vm12, %v4762_v44  ;;  %7117 = vmatprep.mubr.msk.bf16.mxu0 %vm2001_vm7, %v4330_v26 }
 0x382   : > { %4323 = vst.msk [vmem:[#allocation3 + $0x38] sm:$0xff] %vm1957_vm6, %v4307_v16 }
 0x383   : > { %4735 = vst.msk [vmem:[#allocation3 + $0x30] sm:$0xff] %vm1076_vm11, %v4703_v2 }
 0x384   : > { %v4764_v30 = vpop.permute.xlu1 %4763  ;;  %v5808_v41 = vld [vmem:[#allocation3 + $0x10] sm:$0xff] }
 0x385   : > { %v5781_v12 = vpop.permute.xlu0 %5780  ;;  %4782 = vst.msk [vmem:[#allocation3 + $0x28] sm:$0xff] %vm1125_vm12, %v4764_v30  ;;  %7131 = vmatprep.mubr.msk.bf16.mxu1 %vm2001_vm7, %v5808_v41 }
 0x386   : > { %5801 = vst.msk [vmem:[#allocation3 + $0x18] sm:$0xff] %vm1957_vm6, %v5781_v12 }
 0x388   : > { %v4949_v42 = vpop.permute.xlu1 %4948 }
 0x389   : > { %v4947_v40 = vpop.permute.xlu0 %4946  ;;  %v4331_v5 = vld [vmem:[#allocation3 + $0x38] sm:$0xff]  ;;  %4967 = vst.msk [vmem:[#allocation3 + $0x28] sm:$0xff] %vm1271_vm14, %v4949_v42 }
 0x38a   : > { %4966 = vst.msk [vmem:[#allocation3 + $0x20] sm:$0xff] %vm1271_vm14, %v4947_v40  ;;  %7118 = vmatmul.mubr.msk.bf16.gmra.mrb[20].mxu0 %vm2001_vm7, %v4331_v5 }
 0x38b   : > { %4736 = vst.msk [vmem:[#allocation3 + $0x38] sm:$0xff] %vm1076_vm11, %v4720_v50  ;;  %vm6088_vm11 = vcmask 130048  }
 0x38c   : > { %v5133_v45 = vpop.permute.xlu1 %5132 }
 0x38d   : > { %v5131_v51 = vpop.permute.xlu0 %5130  ;;  %v5809_v52 = vld [vmem:[#allocation3 + $0x18] sm:$0xff]  ;;  %5151 = vst.msk [vmem:[#allocation3 + $0x28] sm:$0xff] %vm1420_vm0, %v5133_v45 }
 0x38e   : > { %5150 = vst.msk [vmem:[#allocation3 + $0x20] sm:$0xff] %vm1420_vm0, %v5131_v51  ;;  %7132 = vmatmul.mubr.msk.bf16.gmra.mrb[28].mxu1 %vm2001_vm7, %v5809_v52 }
 0x390   : > { %v5181_v60 = vpop.permute.xlu1 %5180 }
 0x391   : > { %v5179_v20 = vpop.permute.xlu0 %5178  ;;  %5199 = vst.msk [vmem:[#allocation3 + $0x28] sm:$0xff] %vm1469_vm2, %v5181_v60 }
 0x392   : > { %5198 = vst.msk [vmem:[#allocation3 + $0x20] sm:$0xff] %vm1469_vm2, %v5179_v20 }
 0x394   : > { %v5365_v15 = vpop.permute.xlu1 %5364 }
 0x395   : > { %v5363_v4 = vpop.permute.xlu0 %5362  ;;  %5383 = vst.msk [vmem:[#allocation3 + $0x28] sm:$0xff] %vm1614_vm3, %v5365_v15 }
 0x396   : > { %5382 = vst.msk [vmem:[#allocation3 + $0x20] sm:$0xff] %vm1614_vm3, %v5363_v4 }
 0x398   : > { %v5553_v11 = vpop.permute.xlu1 %5552 }
 0x399   : > { %v5551_v14 = vpop.permute.xlu0 %5550  ;;  %5571 = vst.msk [vmem:[#allocation3 + $0x28] sm:$0xff] %vm1763_vm4, %v5553_v11 }
 0x39a   : > { %5570 = vst.msk [vmem:[#allocation3 + $0x20] sm:$0xff] %vm1763_vm4, %v5551_v14 }
 0x39b   : > { %v7093_v31 = vpop.f32.mrb[16].mxu1 }
 0x39c   : > { %v5601_v27 = vpop.permute.xlu1 %5600  ;;  %v3556_v55 = vadd.f32 %v7093_v31, %v9456_v36  ;;  %v3547_v19 = vpop.f32.mrb[17].mxu1 }
 0x39d   : > { %v5599_v43 = vpop.permute.xlu0 %5598  ;;  %5619 = vst.msk [vmem:[#allocation3 + $0x28] sm:$0xff] %vm1812_vm5, %v5601_v27  ;;  %v3548_v34 = vadd.f32 %v9456_v36, %v3547_v19  ;;  %v7094_v0 = vpop.f32.mrb[18].mxu1 }
 0x39e   : > { %5618 = vst.msk [vmem:[#allocation3 + $0x20] sm:$0xff] %vm1812_vm5, %v5599_v43  ;;  %v3588_v53 = vmax.f32 %v3556_v55, 0.0  ;;  %v3559_v21 = vadd.f32 %v7094_v0, %v9456_v36  ;;  %v3550_v59 = vpop.f32.mrb[19].mxu1 }
 0x39f   : > { %v7107_v25 = vpop.f32.mrb[8].mxu0  ;;  %v3586_v63 = vmax.f32 %v3548_v34, 0.0  ;;  %v3551_v61 = vadd.f32 %v9456_v36, %v3550_v59 }
 0x3a0   : > { %v4766_v33 = vpop.permute.xlu1 %4765  ;;  %v4431_v23 = vadd.f32 %v7107_v25, %v9568_v1  ;;  %v9574_v17 = vmin.f32 %v3588_v53, 6.0  ;;  %v3589_v46 = vmax.f32 %v3559_v21, 0.0  ;;  %v4422_v56 = vpop.f32.mrb[9].mxu0 }
 0x3a1   : > { %v5783_v57 = vpop.permute.xlu0 %5782  ;;  %4783 = vst.msk [vmem:[#allocation3 + $0x30] sm:$0xff] %vm1125_vm12, %v4766_v33  ;;  %v3587_v38 = vmax.f32 %v3551_v61, 0.0  ;;  %v4423_v7 = vadd.f32 %v9568_v1, %v4422_v56  ;;  %v7108_v47 = vpop.f32.mrb[10].mxu0  ;;  %v9582_v24 = vmin.f32 %v3586_v63, 6.0 }
 0x3a2   : > { %5802 = vst.msk [vmem:[#allocation3 + $0x20] sm:$0xff] %vm1957_vm6, %v5783_v57  ;;  %v4487_v58 = vmax.f32 %v4431_v23, 0.0  ;;  %v9579_v10 = vmin.f32 %v3589_v46, 6.0  ;;  %v4434_v49 = vadd.f32 %v7108_v47, %v9568_v1  ;;  %v4425_v29 = vpop.f32.mrb[11].mxu0 }
 0x3a3   : > { %v9584_v13 = vmin.f32 %v3587_v38, 6.0  ;;  %v4485_v32 = vmax.f32 %v4423_v7, 0.0  ;;  %v4426_v54 = vadd.f32 %v9568_v1, %v4425_v29 }
 0x3a4   : > { %v4768_v2 = vpop.permute.xlu1 %4767  ;;  %v3615_v39 = vpack.c.bf16 %v9579_v10, %v9574_v17  ;;  %v4503_v22 = vmin.f32 %v4487_v58, 6.0  ;;  %v4488_v37 = vmax.f32 %v4434_v49, 0.0 }
 0x3a5   : > { %v5785_v3 = vpop.permute.xlu0 %5784  ;;  %4784 = vst.msk [vmem:[#allocation3 + $0x38] sm:$0xff] %vm1125_vm12, %v4768_v2  ;;  %v3614_v44 = vpack.c.bf16 %v9584_v13, %v9582_v24  ;;  %v4486_v16 = vmax.f32 %v4426_v54, 0.0  ;;  %v4501_v9 = vmin.f32 %v4485_v32, 6.0 }
 0x3a6   : > { %5803 = vst.msk [vmem:[#allocation3 + $0x28] sm:$0xff] %vm1957_vm6, %v5785_v3  ;;  %v4504_v26 = vmin.f32 %v4488_v37, 6.0 }
 0x3a7   : > { %v4502_v48 = vmin.f32 %v4486_v16, 6.0 }
 0x3a8   : > { %v4953_v30 = vpop.permute.xlu1 %4952  ;;  %v4518_v50 = vpack.c.bf16 %v4504_v26, %v4503_v22 }
 0x3a9   : > { %v4951_v12 = vpop.permute.xlu0 %4950  ;;  %v5810_v41 = vld [vmem:[#allocation3 + $0x20] sm:$0xff]  ;;  %4969 = vst.msk [vmem:[#allocation3 + $0x38] sm:$0xff] %vm1271_vm14, %v4953_v30  ;;  %v4517_v42 = vpack.c.bf16 %v4502_v48, %v4501_v9 }
 0x3aa   : > { %4968 = vst.msk [vmem:[#allocation3 + $0x30] sm:$0xff] %vm1271_vm14, %v4951_v12  ;;  %7135 = vmatprep.mubr.msk.bf16.mxu1 %vm2001_vm7, %v5810_v41  ;;  %4535 = vrot.lane.b32.xlu1 %v4518_v50, %s7284_s11 }
 0x3ab   : > { %4533 = vrot.lane.b32.xlu0 %v4517_v42, %s7284_s11 }
 0x3ac   : > { %v5137_v40 = vpop.permute.xlu1 %5136 }
 0x3ad   : > { %v5135_v5 = vpop.permute.xlu0 %5134  ;;  %v5811_v45 = vld [vmem:[#allocation3 + $0x28] sm:$0xff]  ;;  %5153 = vst.msk [vmem:[#allocation3 + $0x38] sm:$0xff] %vm1420_vm0, %v5137_v40 }
 0x3ae   : > { %5152 = vst.msk [vmem:[#allocation3 + $0x30] sm:$0xff] %vm1420_vm0, %v5135_v5  ;;  %7136 = vmatmul.mubr.msk.bf16.gmra.mrb[32].mxu1 %vm2001_vm7, %v5811_v45 }
 0x3b0   : > { %v5185_v51 = vpop.permute.xlu1 %5184 }
 0x3b1   : > { %v5183_v52 = vpop.permute.xlu0 %5182  ;;  %5201 = vst.msk [vmem:[#allocation3 + $0x38] sm:$0xff] %vm1469_vm2, %v5185_v51 }
 0x3b2   : > { %5200 = vst.msk [vmem:[#allocation3 + $0x30] sm:$0xff] %vm1469_vm2, %v5183_v52 }
 0x3b4   : > { %v5369_v60 = vpop.permute.xlu1 %5368 }
 0x3b5   : > { %v5367_v20 = vpop.permute.xlu0 %5366  ;;  %5385 = vst.msk [vmem:[#allocation3 + $0x38] sm:$0xff] %vm1614_vm3, %v5369_v60 }
 0x3b6   : > { %5384 = vst.msk [vmem:[#allocation3 + $0x30] sm:$0xff] %vm1614_vm3, %v5367_v20 }
 0x3b8   : > { %v5557_v15 = vpop.permute.xlu1 %5556 }
 0x3b9   : > { %v5555_v4 = vpop.permute.xlu0 %5554  ;;  %5573 = vst.msk [vmem:[#allocation3 + $0x38] sm:$0xff] %vm1763_vm4, %v5557_v15 }
 0x3ba   : > { %5572 = vst.msk [vmem:[#allocation3 + $0x30] sm:$0xff] %vm1763_vm4, %v5555_v4 }
 0x3bc   : > { %v5605_v11 = vpop.permute.xlu1 %5604 }
 0x3bd   : > { %v5603_v14 = vpop.permute.xlu0 %5602  ;;  %5621 = vst.msk [vmem:[#allocation3 + $0x38] sm:$0xff] %vm1812_vm5, %v5605_v11  ;;  %v9641_v11 = vld [vmem:[%s9836_s4 + $0x3] ss:$0 sm:$0xff] }
 0x3be   : > { %5620 = vst.msk [vmem:[#allocation3 + $0x30] sm:$0xff] %vm1812_vm5, %v5603_v14 }
 0x3c0   : > { %v5789_v31 = vpop.permute.xlu1 %5788 }
 0x3c1   : > { %v5787_v27 = vpop.permute.xlu0 %5786  ;;  %5805 = vst.msk [vmem:[#allocation3 + $0x38] sm:$0xff] %vm1957_vm6, %v5789_v31 }
 0x3c2   : > { %5804 = vst.msk [vmem:[#allocation3 + $0x30] sm:$0xff] %vm1957_vm6, %v5787_v27 }
 0x3c4   : > { %v3629_v43 = vpop.permute.xlu1 %3628 }
 0x3c5   : > { %v3627_v55 = vpop.permute.xlu0 %3626  ;;  %3651 = vst.msk [vmem:[#allocation4 + $0x8] sm:$0xff] %vm1125_vm12, %v3629_v43 }
 0x3c6   : > { %3650 = vst.msk [vmem:[#allocation4] sm:$0xff] %vm1125_vm12, %v3627_v55 }
 0x3c8   : > { %v5813_v53 = vld [vmem:[#allocation3 + $0x38] sm:$0xff] }
 0x3c9   : > { %v5812_v19 = vld [vmem:[#allocation3 + $0x30] sm:$0xff] }
 0x3ca   : > { %7139 = vmatprep.mubr.msk.bf16.mxu1 %vm2001_vm7, %v5812_v19 }
 0x3cb   : > { %7140 = vmatmul.mubr.msk.bf16.gmra.mrb[36].mxu1 %vm2001_vm7, %v5813_v53 }
 0x3dd   : > { %v7097_v34 = vpop.f32.mrb[20].mxu1 }
 0x3de   : > { %v3572_v0 = vadd.f32 %v7097_v34, %v9456_v36  ;;  %v3563_v21 = vpop.f32.mrb[21].mxu1 }
 0x3df   : > { %v3564_v59 = vadd.f32 %v9456_v36, %v3563_v21  ;;  %v7098_v25 = vpop.f32.mrb[22].mxu1 }
 0x3e0   : > { %v3592_v63 = vmax.f32 %v3572_v0, 0.0  ;;  %v3575_v61 = vadd.f32 %v7098_v25, %v9456_v36  ;;  %v3566_v33 = vpop.f32.mrb[23].mxu1 }
 0x3e1   : > { %v3590_v57 = vmax.f32 %v3564_v59, 0.0  ;;  %v3567_v23 = vadd.f32 %v9456_v36, %v3566_v33  ;;  %v7111_v46 = vpop.f32.mrb[12].mxu0 }
 0x3e2   : > { %v3593_v56 = vmax.f32 %v3575_v61, 0.0  ;;  %v4447_v38 = vadd.f32 %v7111_v46, %v9568_v1  ;;  %v4438_v58 = vpop.f32.mrb[13].mxu0  ;;  %v9621_v29 = vmin.f32 %v3592_v63, 6.0  ;;  %v7235_v46 = vld [vmem:[%s9837_s5] sm:$0xff]  }
 0x3e3   : > { %v3591_v7 = vmax.f32 %v3567_v23, 0.0  ;;  %v4439_v47 = vadd.f32 %v9568_v1, %v4438_v58  ;;  %v7112_v49 = vpop.f32.mrb[14].mxu0  ;;  %v9626_v22 = vmin.f32 %v3590_v57, 6.0  ;;  %7143 = vmatprep.subr.bf16.mxu0 %v7235_v46 }
 0x3e4   : > { %v9623_v32 = vmin.f32 %v3593_v56, 6.0  ;;  %v4491_v54 = vmax.f32 %v4447_v38, 0.0  ;;  %v4450_v2 = vadd.f32 %v7112_v49, %v9568_v1  ;;  %v4441_v3 = vpop.f32.mrb[15].mxu0  ;;  %7144 = vmatpush3.bf16.msra.mxu0 %v7235_v46 }
 0x3e5   : > { %v9628_v36 = vmin.f32 %v3591_v7, 6.0  ;;  %v4489_v37 = vmax.f32 %v4439_v47, 0.0  ;;  %v4442_v16 = vadd.f32 %v9568_v1, %v4441_v3 }
 0x3e6   : > { %v3617_v26 = vpack.c.bf16 %v9623_v32, %v9621_v29  ;;  %v4492_v9 = vmax.f32 %v4450_v2, 0.0  ;;  %v4507_v12 = vmin.f32 %v4491_v54, 6.0 }
 0x3e7   : > { %v3616_v48 = vpack.c.bf16 %v9628_v36, %v9626_v22  ;;  %v4490_v30 = vmax.f32 %v4442_v16, 0.0  ;;  %v4505_v50 = vmin.f32 %v4489_v37, 6.0 }
 0x3e8   : > { %v4508_v41 = vmin.f32 %v4492_v9, 6.0 }
 0x3e9   : > { %v4506_v42 = vmin.f32 %v4490_v30, 6.0 }
 0x3ea   : > { %v4520_v40 = vpack.c.bf16 %v4508_v41, %v4507_v12 }
 0x3eb   : > { %v4519_v5 = vpack.c.bf16 %v4506_v42, %v4505_v50 }
 0x41c   : > { %v7115_v45 = vpop.f32.mrb[16].mxu0  ;;  %v4536_v52 = vpop.permute.xlu1 %4535 }
 0x41d   : > { %v4463_v51 = vadd.f32 %v7115_v45, %v9568_v1  ;;  %v4454_v60 = vpop.f32.mrb[17].mxu0  ;;  %4558 = vst.msk [vmem:[#allocation4 + $0x8] sm:$0xff] %vm1271_vm14, %v4536_v52  ;;  %v4534_v4 = vpop.permute.xlu0 %4533 }
 0x41e   : > { %v4455_v20 = vadd.f32 %v9568_v1, %v4454_v60  ;;  %v7116_v15 = vpop.f32.mrb[18].mxu0  ;;  %4557 = vst.msk [vmem:[#allocation4] sm:$0xff] %vm1271_vm14, %v4534_v4 }
 0x41f   : > { %v4495_v14 = vmax.f32 %v4463_v51, 0.0  ;;  %v4466_v31 = vadd.f32 %v7116_v15, %v9568_v1  ;;  %v4457_v27 = vpop.f32.mrb[19].mxu0 }
 0x420   : > { %v4493_v43 = vmax.f32 %v4455_v20, 0.0  ;;  %v4458_v55 = vadd.f32 %v9568_v1, %v4457_v27  ;;  %v7129_v19 = vpop.f32.mrb[24].mxu1 }
 0x421   : > { %v9646_v53 = vmin.f32 %v4495_v14, 6.0  ;;  %v4496_v34 = vmax.f32 %v4466_v31, 0.0  ;;  %v5913_v0 = vadd.f32 %v7129_v19, %v9641_v11  ;;  %v5904_v21 = vpop.f32.mrb[25].mxu1 }
 0x422   : > { %v4494_v59 = vmax.f32 %v4458_v55, 0.0  ;;  %v5905_v25 = vadd.f32 %v9641_v11, %v5904_v21  ;;  %v7130_v63 = vpop.f32.mrb[26].mxu1  ;;  %v9656_v56 = vmin.f32 %v4493_v43, 6.0 }
 0x423   : > { %v9650_v61 = vmin.f32 %v4496_v34, 6.0  ;;  %v5969_v33 = vmax.f32 %v5913_v0, 0.0  ;;  %v5916_v57 = vadd.f32 %v7130_v63, %v9641_v11  ;;  %v5907_v23 = vpop.f32.mrb[27].mxu1 }
 0x424   : > { %v4510_v38 = vmin.f32 %v4494_v59, 6.0  ;;  %v5967_v58 = vmax.f32 %v5905_v25, 0.0  ;;  %v5908_v7 = vadd.f32 %v9641_v11, %v5907_v23 }
 0x425   : > { %v4522_v47 = vpack.c.bf16 %v9650_v61, %v9646_v53  ;;  %v5985_v49 = vmin.f32 %v5969_v33, 6.0  ;;  %v5970_v54 = vmax.f32 %v5916_v57, 0.0 }
 0x426   : > { %v4521_v2 = vpack.c.bf16 %v4510_v38, %v9656_v56  ;;  %v5968_v3 = vmax.f32 %v5908_v7, 0.0  ;;  %v5983_v16 = vmin.f32 %v5967_v58, 6.0 }
 0x427   : > { %v5986_v37 = vmin.f32 %v5970_v54, 6.0 }
 0x428   : > { %v5984_v9 = vmin.f32 %v5968_v3, 6.0 }
 0x429   : > { %v6000_v30 = vpack.c.bf16 %v5986_v37, %v5985_v49 }
 0x42a   : > { %v5999_v12 = vpack.c.bf16 %v5984_v9, %v5983_v16 }
 0x42b   : > { %6017 = vrot.lane.b32.xlu1 %v6000_v30, %s7285_s12 }
 0x42c   : > { %6015 = vrot.lane.b32.xlu0 %v5999_v12, %s7285_s12 }
 0x42f   : > { %3632 = vrot.lane.b32.xlu1 %v3613_v28, %s7283_s10 }
 0x430   : > { %3630 = vrot.lane.b32.xlu0 %v3612_v35, %s7283_s10 }
 0x433   : > { %4539 = vrot.lane.b32.xlu1 %v4520_v40, %s7284_s11 }
 0x434   : > { %4537 = vrot.lane.b32.xlu0 %v4519_v5, %s7284_s11 }
 0x45d   : > { %v7119_v41 = vpop.f32.mrb[20].mxu0 }
 0x45e   : > { %v4479_v50 = vadd.f32 %v7119_v41, %v9568_v1  ;;  %v4470_v42 = vpop.f32.mrb[21].mxu0 }
 0x45f   : > { %v4471_v45 = vadd.f32 %v9568_v1, %v4470_v42  ;;  %v7120_v51 = vpop.f32.mrb[22].mxu0 }
 0x460   : > { %v4499_v52 = vmax.f32 %v4479_v50, 0.0  ;;  %v4482_v6 = vadd.f32 %v7120_v51, %v9568_v1  ;;  %v4473_v8 = vpop.f32.mrb[23].mxu0 }
 0x461   : > { %v4497_v28 = vmax.f32 %v4471_v45, 0.0  ;;  %v4474_v60 = vadd.f32 %v9568_v1, %v4473_v8  ;;  %v7133_v62 = vpop.f32.mrb[28].mxu1 }
 0x462   : > { %v4500_v18 = vmax.f32 %v4482_v6, 0.0  ;;  %v5929_v35 = vadd.f32 %v7133_v62, %v9641_v11  ;;  %v5920_v40 = vpop.f32.mrb[29].mxu1  ;;  %v4515_v4 = vmin.f32 %v4499_v52, 6.0 }
 0x463   : > { %v4498_v5 = vmax.f32 %v4474_v60, 0.0  ;;  %v5921_v20 = vadd.f32 %v9641_v11, %v5920_v40  ;;  %v7134_v15 = vpop.f32.mrb[30].mxu1  ;;  %v4513_v55 = vmin.f32 %v4497_v28, 6.0 }
 0x464   : > { %v4516_v14 = vmin.f32 %v4500_v18, 6.0  ;;  %v5973_v31 = vmax.f32 %v5929_v35, 0.0  ;;  %v5932_v27 = vadd.f32 %v7134_v15, %v9641_v11  ;;  %v5923_v43 = vpop.f32.mrb[31].mxu1 }
 0x465   : > { %v4514_v19 = vmin.f32 %v4498_v5, 6.0  ;;  %v5971_v53 = vmax.f32 %v5921_v20, 0.0  ;;  %v5924_v1 = vadd.f32 %v9641_v11, %v5923_v43 }
 0x466   : > { %v4524_v34 = vpack.c.bf16 %v4516_v14, %v4515_v4  ;;  %v5974_v0 = vmax.f32 %v5932_v27, 0.0  ;;  %v5989_v25 = vmin.f32 %v5973_v31, 6.0 }
 0x467   : > { %v4523_v21 = vpack.c.bf16 %v4514_v19, %v4513_v55  ;;  %v5972_v59 = vmax.f32 %v5924_v1, 0.0  ;;  %v5987_v61 = vmin.f32 %v5971_v53, 6.0 }
 0x468   : > { %v5990_v63 = vmin.f32 %v5974_v0, 6.0 }
 0x469   : > { %v5988_v33 = vmin.f32 %v5972_v59, 6.0 }
 0x46a   : > { %v6002_v57 = vpack.c.bf16 %v5990_v63, %v5989_v25 }
 0x46b   : > { %v6001_v23 = vpack.c.bf16 %v5988_v33, %v5987_v61 }
 0x46c   : > { %6021 = vrot.lane.b32.xlu1 %v6002_v57, %s7285_s12 }
 0x46d   : > { %6019 = vrot.lane.b32.xlu0 %v6001_v23, %s7285_s12 }
 0x470   : > { %3636 = vrot.lane.b32.xlu1 %v3615_v39, %s7283_s10 }
 0x471   : > { %3634 = vrot.lane.b32.xlu0 %v3614_v44, %s7283_s10 }
 0x474   : > { %4543 = vrot.lane.b32.xlu1 %v4522_v47, %s7284_s11 }
 0x475   : > { %4541 = vrot.lane.b32.xlu0 %v4521_v2, %s7284_s11 }
 0x481   : > { %v7137_v46 = vpop.f32.mrb[32].mxu1 }
 0x482   : > { %v5945_v56 = vadd.f32 %v7137_v46, %v9641_v11  ;;  %v5936_v38 = vpop.f32.mrb[33].mxu1  ;;  %v9751_v46 = vld [vmem:[%s9838_s6] ss:$0 sm:$0xff] }
 0x483   : > { %v5937_v58 = vadd.f32 %v9641_v11, %v5936_v38  ;;  %v7138_v7 = vpop.f32.mrb[34].mxu1 }
 0x484   : > { %v5977_v49 = vmax.f32 %v5945_v56, 0.0  ;;  %v5948_v17 = vadd.f32 %v7138_v7, %v9641_v11  ;;  %v5939_v10 = vpop.f32.mrb[35].mxu1 }
 0x485   : > { %v5975_v39 = vmax.f32 %v5937_v58, 0.0  ;;  %v5940_v54 = vadd.f32 %v9641_v11, %v5939_v10 }
 0x486   : > { %v5978_v24 = vmax.f32 %v5948_v17, 0.0  ;;  %v5993_v44 = vmin.f32 %v5977_v49, 6.0 }
 0x487   : > { %v5976_v13 = vmax.f32 %v5940_v54, 0.0  ;;  %v5991_v3 = vmin.f32 %v5975_v39, 6.0 }
 0x488   : > { %v5994_v47 = vmin.f32 %v5978_v24, 6.0 }
 0x489   : > { %v5992_v2 = vmin.f32 %v5976_v13, 6.0 }
 0x48a   : > { %v6004_v37 = vpack.c.bf16 %v5994_v47, %v5993_v44 }
 0x48b   : > { %v6003_v16 = vpack.c.bf16 %v5992_v2, %v5991_v3 }
 0x48c   : > { %6025 = vrot.lane.b32.xlu1 %v6004_v37, %s7285_s12 }
 0x48d   : > { %6023 = vrot.lane.b32.xlu0 %v6003_v16, %s7285_s12 }
 0x490   : > { %3640 = vrot.lane.b32.xlu1 %v3617_v26, %s7283_s10 }
 0x491   : > { %3638 = vrot.lane.b32.xlu0 %v3616_v48, %s7283_s10  ;;  %s6933_s10 = sshll.u32 %s7264_s24, 7 }
 0x494   : > { %4547 = vrot.lane.b32.xlu1 %v4524_v34, %s7284_s11 }
 0x495   : > { %4545 = vrot.lane.b32.xlu0 %v4523_v21, %s7284_s11  ;;  %s9746_s11 = scalar_lea.vmem %s7367_s13, %s6933_s10 }
 0x496   : > { %v6061_v56 = vld [vmem:[%s9746_s11 + $0x10] sm:$0xff]  ;;  %v6059_v7 = vld [vmem:[%s9746_s11] sm:$0xff]  ;;  %v6062_v10 = vld [vmem:[%s9746_s11 + $0x18] sm:$0xff] }
 0x497   : > { %v6060_v13 = vld [vmem:[%s9746_s11 + $0x8] sm:$0xff]  ;;  %v6065_v16 = vld [vmem:[%s9746_s11 + $0x30] sm:$0xff] }
 0x49d   : > { %v6018_v30 = vpop.permute.xlu1 %6017 }
 0x49e   : > { %v7141_v9 = vpop.f32.mrb[36].mxu1  ;;  %6040 = vst.msk [vmem:[#allocation4 + $0x8] sm:$0xff] %vm1420_vm0, %v6018_v30  ;;  %v6016_v50 = vpop.permute.xlu0 %6015 }
 0x49f   : > { %v5961_v12 = vadd.f32 %v7141_v9, %v9641_v11  ;;  %v5952_v41 = vpop.f32.mrb[37].mxu1  ;;  %6039 = vst.msk [vmem:[#allocation4] sm:$0xff] %vm1420_vm0, %v6016_v50 }
 0x4a0   : > { %v5953_v29 = vadd.f32 %v9641_v11, %v5952_v41  ;;  %v7142_v32 = vpop.f32.mrb[38].mxu1 }
 0x4a1   : > { %v5981_v26 = vmax.f32 %v5961_v12, 0.0  ;;  %v5964_v22 = vadd.f32 %v7142_v32, %v9641_v11  ;;  %v5955_v36 = vpop.f32.mrb[39].mxu1  ;;  %v3633_v45 = vpop.permute.xlu1 %3632  ;;  %v6063_v12 = vld [vmem:[%s9746_s11 + $0x20] sm:$0xff] }
 0x4a2   : > { %v5979_v48 = vmax.f32 %v5953_v29, 0.0  ;;  %v5956_v42 = vadd.f32 %v9641_v11, %v5955_v36  ;;  %3653 = vst.msk [vmem:[#allocation4 + $0x18] sm:$0xff] %vm1125_vm12, %v3633_v45  ;;  %v3631_v52 = vpop.permute.xlu0 %3630  ;;  %v6066_v29 = vld [vmem:[%s9746_s11 + $0x38] sm:$0xff]  ;;  %v6064_v36 = vld [vmem:[%s9746_s11 + $0x28] sm:$0xff] }
 0x4a3   : > { %v5982_v51 = vmax.f32 %v5964_v22, 0.0  ;;  %3652 = vst.msk [vmem:[#allocation4 + $0x10] sm:$0xff] %vm1125_vm12, %v3631_v52  ;;  %v5997_v8 = vmin.f32 %v5981_v26, 6.0 }
 0x4a4   : > { %v5980_v6 = vmax.f32 %v5956_v42, 0.0  ;;  %v5995_v60 = vmin.f32 %v5979_v48, 6.0 }
 0x4a5   : > { %v5998_v28 = vmin.f32 %v5982_v51, 6.0  ;;  %v4540_v18 = vpop.permute.xlu1 %4539  ;;  %v6048_v20 = vld [vmem:[#allocation4 + $0x8] sm:$0xff] }
 0x4a6   : > { %v5996_v62 = vmin.f32 %v5980_v6, 6.0  ;;  %4560 = vst.msk [vmem:[#allocation4 + $0x18] sm:$0xff] %vm1271_vm14, %v4540_v18  ;;  %v4538_v40 = vpop.permute.xlu0 %4537  ;;  %v6047_v5 = vld [vmem:[#allocation4] sm:$0xff] }
 0x4a7   : > { %v6006_v35 = vpack.c.bf16 %v5998_v28, %v5997_v8  ;;  %4559 = vst.msk [vmem:[#allocation4 + $0x10] sm:$0xff] %vm1271_vm14, %v4538_v40  ;;  %7145 = vmatprep.mubr.msk.bf16.mxu0 %vm6088_vm11, %v6047_v5  ;;  %v6069_v6 = vld [vmem:[%s9746_s11 + $0x50] sm:$0xff] }
 0x4a8   : > { %v6005_v11 = vpack.c.bf16 %v5996_v62, %v5995_v60  ;;  %7146 = vmatmul.mubr.msk.bf16.vlgmr.msra.gmra.mrb[24].mxu0 %vm6088_vm11, %v6048_v20  ;;  %v6067_v60 = vld [vmem:[%s9746_s11 + $0x40] sm:$0xff]  ;;  %v6068_v20 = vld [vmem:[%s9746_s11 + $0x48] sm:$0xff] }
 0x4a9   : > { %6029 = vrot.lane.b32.xlu1 %v6006_v35, %s7285_s12  ;;  %v6070_v35 = vld [vmem:[%s9746_s11 + $0x58] sm:$0xff] }
 0x4aa   : > { %6027 = vrot.lane.b32.xlu0 %v6005_v11, %s7285_s12 }
 0x4de   : > { %v6022_v15 = vpop.permute.xlu1 %6021 }
 0x4df   : > { %6042 = vst.msk [vmem:[#allocation4 + $0x18] sm:$0xff] %vm1420_vm0, %v6022_v15  ;;  %v6020_v4 = vpop.permute.xlu0 %6019 }
 0x4e0   : > { %6041 = vst.msk [vmem:[#allocation4 + $0x10] sm:$0xff] %vm1420_vm0, %v6020_v4 }
 0x4e2   : > { %v3637_v14 = vpop.permute.xlu1 %3636 }
 0x4e3   : > { %3655 = vst.msk [vmem:[#allocation4 + $0x28] sm:$0xff] %vm1125_vm12, %v3637_v14  ;;  %v3635_v31 = vpop.permute.xlu0 %3634 }
 0x4e4   : > { %3654 = vst.msk [vmem:[#allocation4 + $0x20] sm:$0xff] %vm1125_vm12, %v3635_v31 }
 0x4e6   : > { %v4544_v27 = vpop.permute.xlu1 %4543  ;;  %v6050_v19 = vld [vmem:[#allocation4 + $0x18] sm:$0xff] }
 0x4e7   : > { %4562 = vst.msk [vmem:[#allocation4 + $0x28] sm:$0xff] %vm1271_vm14, %v4544_v27  ;;  %v4542_v43 = vpop.permute.xlu0 %4541  ;;  %v6049_v55 = vld [vmem:[#allocation4 + $0x10] sm:$0xff] }
 0x4e8   : > { %4561 = vst.msk [vmem:[#allocation4 + $0x20] sm:$0xff] %vm1271_vm14, %v4542_v43  ;;  %7149 = vmatprep.mubr.msk.bf16.mxu0 %vm6088_vm11, %v6049_v55  ;;  %v6073_v43 = vld [vmem:[%s9746_s11 + $0x70] sm:$0xff] }
 0x4e9   : > { %7150 = vmatmul.mubr.msk.bf16.gmra.mrb[28].mxu0 %vm6088_vm11, %v6050_v19 }
 0x4fe   : > { %v6026_v53 = vpop.permute.xlu1 %6025 }
 0x4ff   : > { %6044 = vst.msk [vmem:[#allocation4 + $0x28] sm:$0xff] %vm1420_vm0, %v6026_v53  ;;  %v6024_v1 = vpop.permute.xlu0 %6023  ;;  %v6071_v53 = vld [vmem:[%s9746_s11 + $0x60] sm:$0xff] }
 0x500   : > { %6043 = vst.msk [vmem:[#allocation4 + $0x20] sm:$0xff] %vm1420_vm0, %v6024_v1 }
 0x502   : > { %v3641_v34 = vpop.permute.xlu1 %3640 }
 0x503   : > { %3657 = vst.msk [vmem:[#allocation4 + $0x38] sm:$0xff] %vm1125_vm12, %v3641_v34  ;;  %v3639_v0 = vpop.permute.xlu0 %3638 }
 0x504   : > { %3656 = vst.msk [vmem:[#allocation4 + $0x30] sm:$0xff] %vm1125_vm12, %v3639_v0  ;;  %vm6226_vm12 = vcmask 64512   ;;  %v6074_v0 = vld [vmem:[%s9746_s11 + $0x78] sm:$0xff] }
 0x506   : > { %v4548_v21 = vpop.permute.xlu1 %4547  ;;  %v6052_v63 = vld [vmem:[#allocation4 + $0x28] sm:$0xff] }
 0x507   : > { %4564 = vst.msk [vmem:[#allocation4 + $0x38] sm:$0xff] %vm1271_vm14, %v4548_v21  ;;  %v4546_v59 = vpop.permute.xlu0 %4545  ;;  %v6051_v25 = vld [vmem:[#allocation4 + $0x20] sm:$0xff] }
 0x508   : > { %4563 = vst.msk [vmem:[#allocation4 + $0x30] sm:$0xff] %vm1271_vm14, %v4546_v59  ;;  %7153 = vmatprep.mubr.msk.bf16.mxu0 %vm6088_vm11, %v6051_v25 }
 0x509   : > { %7154 = vmatmul.mubr.msk.bf16.gmra.mrb[32].mxu0 %vm6088_vm11, %v6052_v63  ;;  %v6072_v63 = vld [vmem:[%s9746_s11 + $0x68] sm:$0xff] }
 0x51b   : > { %v6030_v61 = vpop.permute.xlu1 %6029 }
 0x51c   : > { %6046 = vst.msk [vmem:[#allocation4 + $0x38] sm:$0xff] %vm1420_vm0, %v6030_v61  ;;  %v6028_v33 = vpop.permute.xlu0 %6027 }
 0x51d   : > { %6045 = vst.msk [vmem:[#allocation4 + $0x30] sm:$0xff] %vm1420_vm0, %v6028_v33 }
 0x523   : > { %v6054_v23 = vld [vmem:[#allocation4 + $0x38] sm:$0xff] }
 0x524   : > { %v6053_v57 = vld [vmem:[#allocation4 + $0x30] sm:$0xff] }
 0x525   : > { %7157 = vmatprep.mubr.msk.bf16.mxu0 %vm6088_vm11, %v6053_v57 }
 0x526   : > { %7158 = vmatmul.mubr.msk.bf16.gmra.mrb[36].mxu0 %vm6088_vm11, %v6054_v23 }
 0x57b   : > { %v7147_v38 = vpop.f32.mrb[24].mxu0 }
 0x57c   : > { %v6156_v58 = vadd.f32 %v7147_v38, %v9751_v46  ;;  %v6147_v49 = vpop.f32.mrb[25].mxu0 }
 0x57d   : > { %v6148_v17 = vadd.f32 %v9751_v46, %v6147_v49  ;;  %v7148_v39 = vpop.f32.mrb[26].mxu0 }
 0x57e   : > { %v6212_v54 = vadd.f32 %v6156_v58, %v6061_v56  ;;  %v6159_v24 = vadd.f32 %v7148_v39, %v9751_v46  ;;  %v6150_v44 = vpop.f32.mrb[27].mxu0 }
 0x57f   : > { %v6210_v47 = vadd.f32 %v6148_v17, %v6059_v7  ;;  %v6151_v3 = vadd.f32 %v9751_v46, %v6150_v44 }
 0x580   : > { %6229 = vst.msk [vmem:[%s7372_s18 + $0x10] sm:$0xff] %vm6226_vm12, %v6212_v54  ;;  %v6213_v2 = vadd.f32 %v6159_v24, %v6062_v10 }
 0x581   : > { %6227 = vst.msk [vmem:[%s7372_s18] sm:$0xff] %vm6226_vm12, %v6210_v47  ;;  %v6211_v37 = vadd.f32 %v6151_v3, %v6060_v13 }
 0x582   : > { %6230 = vst.msk [vmem:[%s7372_s18 + $0x18] sm:$0xff] %vm6226_vm12, %v6213_v2 }
 0x583   : > { %6228 = vst.msk [vmem:[%s7372_s18 + $0x8] sm:$0xff] %vm6226_vm12, %v6211_v37 }
 0x5bc   : > { %v7151_v9 = vpop.f32.mrb[28].mxu0 }
 0x5bd   : > { %v6172_v30 = vadd.f32 %v7151_v9, %v9751_v46  ;;  %v6163_v41 = vpop.f32.mrb[29].mxu0 }
 0x5be   : > { %v6164_v50 = vadd.f32 %v9751_v46, %v6163_v41  ;;  %v7152_v32 = vpop.f32.mrb[30].mxu0 }
 0x5bf   : > { %v6216_v26 = vadd.f32 %v6172_v30, %v6065_v16  ;;  %v6175_v22 = vadd.f32 %v7152_v32, %v9751_v46  ;;  %v6166_v48 = vpop.f32.mrb[31].mxu0 }
 0x5c0   : > { %v6214_v42 = vadd.f32 %v6164_v50, %v6063_v12  ;;  %v6167_v45 = vadd.f32 %v9751_v46, %v6166_v48 }
 0x5c1   : > { %6233 = vst.msk [vmem:[%s7372_s18 + $0x30] sm:$0xff] %vm6226_vm12, %v6216_v26  ;;  %v6217_v51 = vadd.f32 %v6175_v22, %v6066_v29 }
 0x5c2   : > { %6231 = vst.msk [vmem:[%s7372_s18 + $0x20] sm:$0xff] %vm6226_vm12, %v6214_v42  ;;  %v6215_v52 = vadd.f32 %v6167_v45, %v6064_v36 }
 0x5c3   : > { %6234 = vst.msk [vmem:[%s7372_s18 + $0x38] sm:$0xff] %vm6226_vm12, %v6217_v51 }
 0x5c4   : > { %6232 = vst.msk [vmem:[%s7372_s18 + $0x28] sm:$0xff] %vm6226_vm12, %v6215_v52 }
 0x5dc   : > { %v7155_v8 = vpop.f32.mrb[32].mxu0 }
 0x5dd   : > { %v6188_v28 = vadd.f32 %v7155_v8, %v9751_v46  ;;  %v6179_v62 = vpop.f32.mrb[33].mxu0 }
 0x5de   : > { %v6180_v18 = vadd.f32 %v9751_v46, %v6179_v62  ;;  %v7156_v40 = vpop.f32.mrb[34].mxu0 }
 0x5df   : > { %v6220_v5 = vadd.f32 %v6188_v28, %v6069_v6  ;;  %v6191_v11 = vadd.f32 %v7156_v40, %v9751_v46  ;;  %v6182_v15 = vpop.f32.mrb[35].mxu0 }
 0x5e0   : > { %v6218_v4 = vadd.f32 %v6180_v18, %v6067_v60  ;;  %v6183_v14 = vadd.f32 %v9751_v46, %v6182_v15 }
 0x5e1   : > { %6237 = vst.msk [vmem:[%s7372_s18 + $0x50] sm:$0xff] %vm6226_vm12, %v6220_v5  ;;  %v6221_v31 = vadd.f32 %v6191_v11, %v6070_v35 }
 0x5e2   : > { %6235 = vst.msk [vmem:[%s7372_s18 + $0x40] sm:$0xff] %vm6226_vm12, %v6218_v4  ;;  %v6219_v27 = vadd.f32 %v6183_v14, %v6068_v20 }
 0x5e3   : > { %6238 = vst.msk [vmem:[%s7372_s18 + $0x58] sm:$0xff] %vm6226_vm12, %v6221_v31 }
 0x5e4   : > { %6236 = vst.msk [vmem:[%s7372_s18 + $0x48] sm:$0xff] %vm6226_vm12, %v6219_v27 }
 0x5f9   : > { %v7159_v55 = vpop.f32.mrb[36].mxu0 }
 0x5fa   : > { %v6204_v19 = vadd.f32 %v7159_v55, %v9751_v46  ;;  %v6195_v1 = vpop.f32.mrb[37].mxu0 }
 0x5fb   : > { %v6196_v34 = vadd.f32 %v9751_v46, %v6195_v1  ;;  %v7160_v21 = vpop.f32.mrb[38].mxu0 }
 0x5fc   : > { %v6224_v59 = vadd.f32 %v6204_v19, %v6073_v43  ;;  %v6207_v25 = vadd.f32 %v7160_v21, %v9751_v46  ;;  %v6198_v61 = vpop.f32.mrb[39].mxu0 }
 0x5fd   : > { %v6222_v33 = vadd.f32 %v6196_v34, %v6071_v53  ;;  %v6199_v57 = vadd.f32 %v9751_v46, %v6198_v61 }
 0x5fe   : > { %6241 = vst.msk [vmem:[%s7372_s18 + $0x70] sm:$0xff] %vm6226_vm12, %v6224_v59  ;;  %v6225_v23 = vadd.f32 %v6207_v25, %v6074_v0 }
 0x5ff   : > { %6239 = vst.msk [vmem:[%s7372_s18 + $0x60] sm:$0xff] %vm6226_vm12, %v6222_v33  ;;  %v6223_v56 = vadd.f32 %v6199_v57, %v6072_v63 }
 0x600   : > { %6242 = vst.msk [vmem:[%s7372_s18 + $0x78] sm:$0xff] %vm6226_vm12, %v6225_v23 }
 0x601   : > { %6240 = vst.msk [vmem:[%s7372_s18 + $0x68] sm:$0xff] %vm6226_vm12, %v6223_v56 }
 0x602 PF: > { %s17_s28 = sadd.s32 1, %s7280_s28   ;;  %s9844_s24 = smov %s7272_s26 }
 0x603   : > { %p14_p8 = scmp.ge.s32.totalorder %s17_s28, 6   ;;  %s9845_s25 = smov %s7276_s27 }
 0x604   : > { %s9846_s26 = smov %s9849_s29  ;;  %s9847_s27 = smov %s9853_s30 }
 0x605   :  { %16 = sbr.rel (!%p14_p8) target bundleno = 3 (0x3), region = 102 }

</bundles_post_ra>
